<compile_context>
chip_gen: v6e
topology: v6e:2x2x1
jax: 0.10.0
libtpu: 0.0.40
codegen_flags: <defaults>
</compile_context>

<pallas_src>
import functools

import numpy as np

import jax
import jax.numpy as jnp
from jax import lax
from jax.experimental import pallas as pl
from jax.experimental.pallas import tpu as pltpu


# ----------------------------------------------------------------------------
# Fused kernel: conv1..4 -> buggy view scramble -> LSTM1 -> LSTM2 -> FC
# ----------------------------------------------------------------------------
def _cnnlstm_kernel(x_ref, mask_ref, selT_ref,
                    w1_ref, b1_ref, w2_ref, b2_ref, w3_ref, b3_ref,
                    w4_ref, b4_ref,
                    l1ih_ref, l1hh_ref, l1b_ref,
                    l2ih_ref, l2hh_ref, l2b_ref,
                    wfc_ref, bfc_ref, h0_ref, c0_ref,
                    out_ref, hT_ref, cT_ref,
                    y1_scr,
                    *, B, L, K, PAD, NF, H, G, sel_rows):
    f32 = jnp.float32
    BL = B * L
    T = L

    mask = mask_ref[...]                      # (K, BL, NF) 0/1 per-tap validity

    # ---- conv1..conv4 + ReLU: ONE wide matmul per layer --------------------
    # conv(x)[r, :] = sum_k (x @ W_k)[r + k - PAD, :]  ("same" padding, within
    # a batch segment).  Compute P = x @ [W_0|...|W_{K-1}] once, then shift the
    # k-th 64-lane slice with an XLU sublane roll, mask and accumulate.
    def conv_relu(x, w_ref, b_ref):
        p = jnp.dot(x, w_ref[...], preferred_element_type=f32)     # (BL, K*NF)
        acc = jnp.zeros((BL, NF), f32)
        for k in range(K):
            pk = p[:, k * NF:(k + 1) * NF]
            s = (PAD - k) % BL
            if s:
                pk = pltpu.roll(pk, shift=s, axis=0)
            acc = acc + pk * mask[k]
        return jnp.maximum(acc + b_ref[...], 0.0)

    a = conv_relu(x_ref[...], w1_ref, b1_ref)
    a = conv_relu(a, w2_ref, b2_ref)
    a = conv_relu(a, w3_ref, b3_ref)
    a = conv_relu(a, w4_ref, b4_ref)                                # (BL, NF)

    # ---- buggy `.view(L, -1, nf)` scramble + hoisted LSTM1 projection ------
    # x_seq row q = t*B + j, lane f equals conv[b*L + f%L, (q%L)*G + f//L] with
    # b = q//L, G = NF//L.  Per batch block:
    #   gates_x1 = sum_g (selT_g . conv_b^T) @ W1ih[g*L:(g+1)*L]  + b1
    # so x_seq is never materialized -- selection + transpose run on the MXU.
    dn_bt = (((1,), (1,)), ((), ()))                                # A @ B^T
    selTs = [selT_ref[g] for g in range(G)]
    w1ih = l1ih_ref[...]
    b1 = l1b_ref[...]
    gx1_blocks = []
    for b in range(B):
        conv_b = a[b * L:(b + 1) * L, :]                            # (L, NF)
        acc = jnp.zeros((L, 4 * H), f32)
        for g in range(G):
            t_g = lax.dot_general(selTs[g], conv_b, dn_bt,
                                  preferred_element_type=f32)       # (L, L)
            acc = acc + jnp.dot(t_g, w1ih[g * L:(g + 1) * L, :],
                                preferred_element_type=f32)
        gx1_blocks.append(acc + b1)                                 # (L, 4H)

    # ---- LSTM cell: gate columns pre-ordered [i | f | o | g] ----------------
    def cell(gx, h, c, whh):
        gates = gx + jnp.dot(h, whh, preferred_element_type=f32)    # (B, 4H)
        sig = jax.nn.sigmoid(gates[:, :3 * H])
        i_g = sig[:, 0:H]
        f_g = sig[:, H:2 * H]
        o_g = sig[:, 2 * H:3 * H]
        g_g = jnp.tanh(gates[:, 3 * H:])
        c_new = f_g * c + i_g * g_g
        h_new = o_g * jnp.tanh(c_new)
        return h_new, c_new

    # ---- LSTM1: fully unrolled, only the recurrent matmul per step ----------
    whh1 = l1hh_ref[...]
    h, c = h0_ref[...], c0_ref[...]
    for t in range(T):
        blk, off = divmod(t * B, L)
        h, c = cell(gx1_blocks[blk][off:off + B, :], h, c, whh1)
        y1_scr[t * B:(t + 1) * B, :] = h        # dense (T*B,H) VMEM scratch

    # ---- LSTM2: hoisted input projection from the y1 scratch ----------------
    gx2 = (jnp.dot(y1_scr[...], l2ih_ref[...], preferred_element_type=f32)
           + l2b_ref[...])                                          # (T*B, 4H)

    whh2 = l2hh_ref[...]
    wfc = wfc_ref[...]
    bfc = bfc_ref[...]
    # LSTM2 is seeded with LSTM1's final (h, c): the reference forward re-uses
    # `hidden` between the two nn.LSTM calls.
    for t in range(T):
        h, c = cell(gx2[t * B:(t + 1) * B, :], h, c, whh2)
        for b_out, (t_sel, j_sel) in enumerate(sel_rows):
            if t_sel == t:
                # flat row b_out*L + (L-1) of the buggy .view(-1, n_hidden)
                # TODO(synk): nn.Dropout(p=0.5) is identity at inference; no
                # stochastic mask applied.
                out_ref[b_out:b_out + 1, :] = (
                    jnp.dot(h[j_sel:j_sel + 1, :], wfc,
                            preferred_element_type=f32) + bfc)
    hT_ref[...] = h
    cT_ref[...] = c


# ----------------------------------------------------------------------------
# Forward pass wrapper (single pallas_call)
# ----------------------------------------------------------------------------
def cnnlstm_forward(prep, x_ncl, h0, c0, *, filter_size=5, pad=2):
    """x_ncl: (B, 10, L) PyTorch NCL layout; h0/c0: (1, B, n_hidden)."""
    B, c_in, L = x_ncl.shape
    NF = prep["conv1_b"].shape[1]
    H = prep["lstm1_whh"].shape[0]
    n_classes = prep["fc_b"].shape[1]
    assert NF % L == 0, "view-scramble needs n_filters % L == 0"
    assert L % B == 0, "per-step gate slicing needs L % B == 0"
    G = NF // L
    # flat rows of the (L*B, H) LSTM2 output picked by the final buggy .view()
    sel_rows = tuple(divmod(b_out * L + (L - 1), B) for b_out in range(B))

    # NCL -> channels-last rows (row r = b*L + l); tiny one-off input transpose.
    x_rows = jnp.transpose(x_ncl, (0, 2, 1)).reshape(B * L, c_in)

    kernel = functools.partial(_cnnlstm_kernel, B=B, L=L, K=filter_size,
                               PAD=pad, NF=NF, H=H, G=G, sel_rows=sel_rows)
    out, h2, c2 = pl.pallas_call(
        kernel,
        out_shape=(jax.ShapeDtypeStruct((B, n_classes), jnp.float32),
                   jax.ShapeDtypeStruct((B, H), jnp.float32),
                   jax.ShapeDtypeStruct((B, H), jnp.float32)),
        scratch_shapes=[pltpu.VMEM((B * L, H), jnp.float32)],   # LSTM1 outputs
    )(x_rows, prep["mask"], prep["selT"],
      prep["conv1_w"], prep["conv1_b"], prep["conv2_w"], prep["conv2_b"],
      prep["conv3_w"], prep["conv3_b"], prep["conv4_w"], prep["conv4_b"],
      prep["lstm1_wih"], prep["lstm1_whh"], prep["lstm1_b"],
      prep["lstm2_wih"], prep["lstm2_whh"], prep["lstm2_b"],
      prep["fc_w"], prep["fc_b"], h0[0], c0[0])
    return out, (h2[None, ...], c2[None, ...])


# ----------------------------------------------------------------------------
# One-time parameter preparation (hoisted out of the forward pass)
# ----------------------------------------------------------------------------
def prepare_params(params, *, B, L, K=5, pad=2):
    nf = int(params["conv1_w"].shape[0])
    H = int(params["lstm1_w_hh"].shape[1])
    BL = B * L
    assert nf % L == 0, "view-scramble selection matrices need n_filters % L == 0"
    G = nf // L

    prep = {}
    # Conv1d weights (Cout, Cin, K) -> taps concatenated along OUTPUT columns:
    # (Cin, K*Cout); tap k lives in columns [k*Cout, (k+1)*Cout).
    for i in range(1, 5):
        w = np.asarray(params[f"conv{i}_w"], np.float32)
        cout, cin, k = w.shape
        prep[f"conv{i}_w"] = jnp.asarray(
            np.transpose(w, (1, 2, 0)).reshape(cin, k * cout))
        prep[f"conv{i}_b"] = jnp.asarray(
            np.asarray(params[f"conv{i}_b"], np.float32).reshape(1, -1))

    # Per-tap row-validity mask ("same" padding + batch-segment boundaries);
    # identical for every conv layer.
    m = np.zeros((K, BL, nf), np.float32)
    r = np.arange(BL)
    for k in range(K):
        rp = r + k - pad
        valid = (rp >= 0) & (rp < BL) & (rp // L == r // L)
        m[k, valid, :] = 1.0
    prep["mask"] = jnp.asarray(m)

    # 0/1 selection matrices for the buggy `.view(L, -1, nf)` scramble:
    # selT[g, q, c] = 1 iff c == q*G + g.
    selT = np.zeros((G, L, nf), np.float32)
    q = np.arange(L)
    for g in range(G):
        selT[g, q, q * G + g] = 1.0
    prep["selT"] = jnp.asarray(selT)

    # LSTM: transpose to (In,4H)/(H,4H), fuse the two biases and reorder the
    # gate blocks i,f,g,o -> i,f,o,g (one contiguous sigmoid, one tanh).
    perm = np.concatenate([np.arange(0, 2 * H), np.arange(3 * H, 4 * H),
                           np.arange(2 * H, 3 * H)])
    for i in (1, 2):
        wih = np.asarray(params[f"lstm{i}_w_ih"], np.float32).T[:, perm]
        whh = np.asarray(params[f"lstm{i}_w_hh"], np.float32).T[:, perm]
        bias = (np.asarray(params[f"lstm{i}_b_ih"], np.float32)
                + np.asarray(params[f"lstm{i}_b_hh"], np.float32))[perm]
        prep[f"lstm{i}_wih"] = jnp.asarray(wih)
        prep[f"lstm{i}_whh"] = jnp.asarray(whh)
        prep[f"lstm{i}_b"] = jnp.asarray(bias.reshape(1, -1))

    prep["fc_w"] = jnp.asarray(np.asarray(params["fc_w"], np.float32).T)
    prep["fc_b"] = jnp.asarray(
        np.asarray(params["fc_b"], np.float32).reshape(1, -1))
    return prep


# ----------------------------------------------------------------------------
# Deterministic parameter init (PyTorch-style uniform fan-in bounds)
# ----------------------------------------------------------------------------
def init_params(key, n_in=10, n_filters=64, n_hidden=64, n_classes=3, K=5):
    keys = jax.random.split(key, 32)
    ki = iter(keys)

    def unif(k, shape, bound):
        return jax.random.uniform(k, shape, jnp.float32, -bound, bound)

    params = {}
    conv_ins = [n_in, n_filters, n_filters, n_filters]
    for idx, cin in enumerate(conv_ins, start=1):
        bound = 1.0 / (cin * K) ** 0.5
        params[f"conv{idx}_w"] = unif(next(ki), (n_filters, cin, K), bound)
        params[f"conv{idx}_b"] = unif(next(ki), (n_filters,), bound)
    for idx, lin in enumerate([n_filters, n_hidden], start=1):
        bound = 1.0 / n_hidden ** 0.5
        params[f"lstm{idx}_w_ih"] = unif(next(ki), (4 * n_hidden, lin), bound)
        params[f"lstm{idx}_w_hh"] = unif(next(ki), (4 * n_hidden, n_hidden), bound)
        params[f"lstm{idx}_b_ih"] = unif(next(ki), (4 * n_hidden,), bound)
        params[f"lstm{idx}_b_hh"] = unif(next(ki), (4 * n_hidden,), bound)
    bound = 1.0 / n_hidden ** 0.5
    params["fc_w"] = unif(next(ki), (n_classes, n_hidden), bound)
    params["fc_b"] = unif(next(ki), (n_classes,), bound)
    return params


if __name__ == "__main__":
    key = jax.random.PRNGKey(0)
    kp, kx = jax.random.split(key)

    B, C_IN, L = 2, 10, 16          # batch, conv1 input channels (fixed), seq len
    N_FILTERS, N_HIDDEN, N_CLASSES = 64, 64, 3

    params = init_params(kp, n_in=C_IN, n_filters=N_FILTERS,
                         n_hidden=N_HIDDEN, n_classes=N_CLASSES)
    prep = prepare_params(params, B=B, L=L, K=5, pad=2)

    x = jax.random.normal(kx, (B, C_IN, L), dtype=jnp.float32)
    h0 = jnp.zeros((1, B, N_HIDDEN), jnp.float32)    # init_hidden(): zeros
    c0 = jnp.zeros((1, B, N_HIDDEN), jnp.float32)

    fwd = jax.jit(cnnlstm_forward)
    out, hidden = fwd(prep, x, h0, c0)
    jax.block_until_ready(out)
    jax.block_until_ready(hidden)

    assert out.shape == (B, N_CLASSES)
    assert hidden[0].shape == (1, B, N_HIDDEN)
    assert hidden[1].shape == (1, B, N_HIDDEN)
    print("KERNEL_OK")
</pallas_src>

<mosaic_0001>
module attributes {stable_mosaic.version = 11 : i64} {
  func.func @_cnnlstm_kernel(%arg0: memref<32x10xf32, #tpu.memory_space<vmem>>, %arg1: memref<5x32x64xf32, #tpu.memory_space<vmem>>, %arg2: memref<4x16x64xf32, #tpu.memory_space<vmem>>, %arg3: memref<10x320xf32, #tpu.memory_space<vmem>>, %arg4: memref<1x64xf32, #tpu.memory_space<vmem>>, %arg5: memref<64x320xf32, #tpu.memory_space<vmem>>, %arg6: memref<1x64xf32, #tpu.memory_space<vmem>>, %arg7: memref<64x320xf32, #tpu.memory_space<vmem>>, %arg8: memref<1x64xf32, #tpu.memory_space<vmem>>, %arg9: memref<64x320xf32, #tpu.memory_space<vmem>>, %arg10: memref<1x64xf32, #tpu.memory_space<vmem>>, %arg11: memref<64x256xf32, #tpu.memory_space<vmem>>, %arg12: memref<64x256xf32, #tpu.memory_space<vmem>>, %arg13: memref<1x256xf32, #tpu.memory_space<vmem>>, %arg14: memref<64x256xf32, #tpu.memory_space<vmem>>, %arg15: memref<64x256xf32, #tpu.memory_space<vmem>>, %arg16: memref<1x256xf32, #tpu.memory_space<vmem>>, %arg17: memref<64x3xf32, #tpu.memory_space<vmem>>, %arg18: memref<1x3xf32, #tpu.memory_space<vmem>>, %arg19: memref<2x64xf32, #tpu.memory_space<vmem>>, %arg20: memref<2x64xf32, #tpu.memory_space<vmem>>, %arg21: memref<2x3xf32, #tpu.memory_space<vmem>>, %arg22: memref<2x64xf32, #tpu.memory_space<vmem>>, %arg23: memref<2x64xf32, #tpu.memory_space<vmem>>, %arg24: memref<32x64xf32, #tpu.memory_space<vmem>>) attributes {dimension_semantics = [], scalar_prefetch = 0 : i64, scratch_operands = 1 : i64, tpu.core_type = #tpu.core_type<tc>} {
    %c0 = arith.constant 0 : index
    %c0_0 = arith.constant 0 : index
    %c0_1 = arith.constant 0 : index
    %0 = vector.load %arg1[%c0, %c0_0, %c0_1] : memref<5x32x64xf32, #tpu.memory_space<vmem>>, vector<5x32x64xf32>
    %c0_2 = arith.constant 0 : index
    %c0_3 = arith.constant 0 : index
    %1 = vector.load %arg0[%c0_2, %c0_3] : memref<32x10xf32, #tpu.memory_space<vmem>>, vector<32x10xf32>
    %c0_4 = arith.constant 0 : index
    %c0_5 = arith.constant 0 : index
    %2 = vector.load %arg3[%c0_4, %c0_5] : memref<10x320xf32, #tpu.memory_space<vmem>>, vector<10x320xf32>
    %cst = arith.constant dense<0.000000e+00> : vector<32x320xf32>
    %3 = tpu.matmul %1, %2, %cst {dimension_numbers = #tpu.dot_dimension_numbers<[1], [0], [0], [1], [0, 0, 1, 1], [], []>} : vector<32x10xf32>, vector<10x320xf32>, vector<32x320xf32> -> vector<32x320xf32>
    %cst_6 = arith.constant 0.000000e+00 : f32
    %4 = vector.broadcast %cst_6 : f32 to vector<32x64xf32>
    %5 = vector.extract_strided_slice %3 {offsets = [0, 0], sizes = [32, 64], strides = [1, 1]} : vector<32x320xf32> to vector<32x64xf32>
    %c2_i32 = arith.constant 2 : i32
    %6 = tpu.dynamic_rotate %5 by %c2_i32 dim 0 : vector<32x64xf32>, i32 -> vector<32x64xf32>
    %7 = vector.extract_strided_slice %0 {offsets = [0, 0, 0], sizes = [1, 32, 64], strides = [1, 1, 1]} : vector<5x32x64xf32> to vector<1x32x64xf32>
    %8 = vector.shape_cast %7 : vector<1x32x64xf32> to vector<32x64xf32>
    %9 = arith.mulf %6, %8 : vector<32x64xf32>
    %10 = arith.addf %4, %9 : vector<32x64xf32>
    %11 = vector.extract_strided_slice %3 {offsets = [0, 64], sizes = [32, 64], strides = [1, 1]} : vector<32x320xf32> to vector<32x64xf32>
    %c1_i32 = arith.constant 1 : i32
    %12 = tpu.dynamic_rotate %11 by %c1_i32 dim 0 : vector<32x64xf32>, i32 -> vector<32x64xf32>
    %13 = vector.extract_strided_slice %0 {offsets = [1, 0, 0], sizes = [1, 32, 64], strides = [1, 1, 1]} : vector<5x32x64xf32> to vector<1x32x64xf32>
    %14 = vector.shape_cast %13 : vector<1x32x64xf32> to vector<32x64xf32>
    %15 = arith.mulf %12, %14 : vector<32x64xf32>
    %16 = arith.addf %10, %15 : vector<32x64xf32>
    %17 = vector.extract_strided_slice %3 {offsets = [0, 128], sizes = [32, 64], strides = [1, 1]} : vector<32x320xf32> to vector<32x64xf32>
    %18 = vector.extract_strided_slice %0 {offsets = [2, 0, 0], sizes = [1, 32, 64], strides = [1, 1, 1]} : vector<5x32x64xf32> to vector<1x32x64xf32>
    %19 = vector.shape_cast %18 : vector<1x32x64xf32> to vector<32x64xf32>
    %20 = arith.mulf %17, %19 : vector<32x64xf32>
    %21 = arith.addf %16, %20 : vector<32x64xf32>
    %22 = vector.extract_strided_slice %3 {offsets = [0, 192], sizes = [32, 64], strides = [1, 1]} : vector<32x320xf32> to vector<32x64xf32>
    %c31_i32 = arith.constant 31 : i32
    %23 = tpu.dynamic_rotate %22 by %c31_i32 dim 0 : vector<32x64xf32>, i32 -> vector<32x64xf32>
    %24 = vector.extract_strided_slice %0 {offsets = [3, 0, 0], sizes = [1, 32, 64], strides = [1, 1, 1]} : vector<5x32x64xf32> to vector<1x32x64xf32>
    %25 = vector.shape_cast %24 : vector<1x32x64xf32> to vector<32x64xf32>
    %26 = arith.mulf %23, %25 : vector<32x64xf32>
    %27 = arith.addf %21, %26 : vector<32x64xf32>
    %28 = vector.extract_strided_slice %3 {offsets = [0, 256], sizes = [32, 64], strides = [1, 1]} : vector<32x320xf32> to vector<32x64xf32>
    %c30_i32 = arith.constant 30 : i32
    %29 = tpu.dynamic_rotate %28 by %c30_i32 dim 0 : vector<32x64xf32>, i32 -> vector<32x64xf32>
    %30 = vector.extract_strided_slice %0 {offsets = [4, 0, 0], sizes = [1, 32, 64], strides = [1, 1, 1]} : vector<5x32x64xf32> to vector<1x32x64xf32>
    %31 = vector.shape_cast %30 : vector<1x32x64xf32> to vector<32x64xf32>
    %32 = arith.mulf %29, %31 : vector<32x64xf32>
    %33 = arith.addf %27, %32 : vector<32x64xf32>
    %c0_7 = arith.constant 0 : index
    %c0_8 = arith.constant 0 : index
    %34 = vector.load %arg4[%c0_7, %c0_8] : memref<1x64xf32, #tpu.memory_space<vmem>>, vector<1x64xf32>
    %35 = vector.broadcast %34 : vector<1x64xf32> to vector<32x64xf32>
    %36 = arith.addf %33, %35 : vector<32x64xf32>
    %cst_9 = arith.constant 0.000000e+00 : f32
    %37 = vector.broadcast %cst_9 : f32 to vector<32x64xf32>
    %38 = arith.maximumf %36, %37 : vector<32x64xf32>
    %c0_10 = arith.constant 0 : index
    %c0_11 = arith.constant 0 : index
    %39 = vector.load %arg5[%c0_10, %c0_11] : memref<64x320xf32, #tpu.memory_space<vmem>>, vector<64x320xf32>
    %cst_12 = arith.constant dense<0.000000e+00> : vector<32x320xf32>
    %40 = tpu.matmul %38, %39, %cst_12 {dimension_numbers = #tpu.dot_dimension_numbers<[1], [0], [0], [1], [0, 0, 1, 1], [], []>} : vector<32x64xf32>, vector<64x320xf32>, vector<32x320xf32> -> vector<32x320xf32>
    %cst_13 = arith.constant 0.000000e+00 : f32
    %41 = vector.broadcast %cst_13 : f32 to vector<32x64xf32>
    %42 = vector.extract_strided_slice %40 {offsets = [0, 0], sizes = [32, 64], strides = [1, 1]} : vector<32x320xf32> to vector<32x64xf32>
    %c2_i32_14 = arith.constant 2 : i32
    %43 = tpu.dynamic_rotate %42 by %c2_i32_14 dim 0 : vector<32x64xf32>, i32 -> vector<32x64xf32>
    %44 = vector.extract_strided_slice %0 {offsets = [0, 0, 0], sizes = [1, 32, 64], strides = [1, 1, 1]} : vector<5x32x64xf32> to vector<1x32x64xf32>
    %45 = vector.shape_cast %44 : vector<1x32x64xf32> to vector<32x64xf32>
    %46 = arith.mulf %43, %45 : vector<32x64xf32>
    %47 = arith.addf %41, %46 : vector<32x64xf32>
    %48 = vector.extract_strided_slice %40 {offsets = [0, 64], sizes = [32, 64], strides = [1, 1]} : vector<32x320xf32> to vector<32x64xf32>
    %c1_i32_15 = arith.constant 1 : i32
    %49 = tpu.dynamic_rotate %48 by %c1_i32_15 dim 0 : vector<32x64xf32>, i32 -> vector<32x64xf32>
    %50 = vector.extract_strided_slice %0 {offsets = [1, 0, 0], sizes = [1, 32, 64], strides = [1, 1, 1]} : vector<5x32x64xf32> to vector<1x32x64xf32>
    %51 = vector.shape_cast %50 : vector<1x32x64xf32> to vector<32x64xf32>
    %52 = arith.mulf %49, %51 : vector<32x64xf32>
    %53 = arith.addf %47, %52 : vector<32x64xf32>
    %54 = vector.extract_strided_slice %40 {offsets = [0, 128], sizes = [32, 64], strides = [1, 1]} : vector<32x320xf32> to vector<32x64xf32>
    %55 = vector.extract_strided_slice %0 {offsets = [2, 0, 0], sizes = [1, 32, 64], strides = [1, 1, 1]} : vector<5x32x64xf32> to vector<1x32x64xf32>
    %56 = vector.shape_cast %55 : vector<1x32x64xf32> to vector<32x64xf32>
    %57 = arith.mulf %54, %56 : vector<32x64xf32>
    %58 = arith.addf %53, %57 : vector<32x64xf32>
    %59 = vector.extract_strided_slice %40 {offsets = [0, 192], sizes = [32, 64], strides = [1, 1]} : vector<32x320xf32> to vector<32x64xf32>
    %c31_i32_16 = arith.constant 31 : i32
    %60 = tpu.dynamic_rotate %59 by %c31_i32_16 dim 0 : vector<32x64xf32>, i32 -> vector<32x64xf32>
    %61 = vector.extract_strided_slice %0 {offsets = [3, 0, 0], sizes = [1, 32, 64], strides = [1, 1, 1]} : vector<5x32x64xf32> to vector<1x32x64xf32>
    %62 = vector.shape_cast %61 : vector<1x32x64xf32> to vector<32x64xf32>
    %63 = arith.mulf %60, %62 : vector<32x64xf32>
    %64 = arith.addf %58, %63 : vector<32x64xf32>
    %65 = vector.extract_strided_slice %40 {offsets = [0, 256], sizes = [32, 64], strides = [1, 1]} : vector<32x320xf32> to vector<32x64xf32>
    %c30_i32_17 = arith.constant 30 : i32
    %66 = tpu.dynamic_rotate %65 by %c30_i32_17 dim 0 : vector<32x64xf32>, i32 -> vector<32x64xf32>
    %67 = vector.extract_strided_slice %0 {offsets = [4, 0, 0], sizes = [1, 32, 64], strides = [1, 1, 1]} : vector<5x32x64xf32> to vector<1x32x64xf32>
    %68 = vector.shape_cast %67 : vector<1x32x64xf32> to vector<32x64xf32>
    %69 = arith.mulf %66, %68 : vector<32x64xf32>
    %70 = arith.addf %64, %69 : vector<32x64xf32>
    %c0_18 = arith.constant 0 : index
    %c0_19 = arith.constant 0 : index
    %71 = vector.load %arg6[%c0_18, %c0_19] : memref<1x64xf32, #tpu.memory_space<vmem>>, vector<1x64xf32>
    %72 = vector.broadcast %71 : vector<1x64xf32> to vector<32x64xf32>
    %73 = arith.addf %70, %72 : vector<32x64xf32>
    %cst_20 = arith.constant 0.000000e+00 : f32
    %74 = vector.broadcast %cst_20 : f32 to vector<32x64xf32>
    %75 = arith.maximumf %73, %74 : vector<32x64xf32>
    %c0_21 = arith.constant 0 : index
    %c0_22 = arith.constant 0 : index
    %76 = vector.load %arg7[%c0_21, %c0_22] : memref<64x320xf32, #tpu.memory_space<vmem>>, vector<64x320xf32>
    %cst_23 = arith.constant dense<0.000000e+00> : vector<32x320xf32>
    %77 = tpu.matmul %75, %76, %cst_23 {dimension_numbers = #tpu.dot_dimension_numbers<[1], [0], [0], [1], [0, 0, 1, 1], [], []>} : vector<32x64xf32>, vector<64x320xf32>, vector<32x320xf32> -> vector<32x320xf32>
    %cst_24 = arith.constant 0.000000e+00 : f32
    %78 = vector.broadcast %cst_24 : f32 to vector<32x64xf32>
    %79 = vector.extract_strided_slice %77 {offsets = [0, 0], sizes = [32, 64], strides = [1, 1]} : vector<32x320xf32> to vector<32x64xf32>
    %c2_i32_25 = arith.constant 2 : i32
    %80 = tpu.dynamic_rotate %79 by %c2_i32_25 dim 0 : vector<32x64xf32>, i32 -> vector<32x64xf32>
    %81 = vector.extract_strided_slice %0 {offsets = [0, 0, 0], sizes = [1, 32, 64], strides = [1, 1, 1]} : vector<5x32x64xf32> to vector<1x32x64xf32>
    %82 = vector.shape_cast %81 : vector<1x32x64xf32> to vector<32x64xf32>
    %83 = arith.mulf %80, %82 : vector<32x64xf32>
    %84 = arith.addf %78, %83 : vector<32x64xf32>
    %85 = vector.extract_strided_slice %77 {offsets = [0, 64], sizes = [32, 64], strides = [1, 1]} : vector<32x320xf32> to vector<32x64xf32>
    %c1_i32_26 = arith.constant 1 : i32
    %86 = tpu.dynamic_rotate %85 by %c1_i32_26 dim 0 : vector<32x64xf32>, i32 -> vector<32x64xf32>
    %87 = vector.extract_strided_slice %0 {offsets = [1, 0, 0], sizes = [1, 32, 64], strides = [1, 1, 1]} : vector<5x32x64xf32> to vector<1x32x64xf32>
    %88 = vector.shape_cast %87 : vector<1x32x64xf32> to vector<32x64xf32>
    %89 = arith.mulf %86, %88 : vector<32x64xf32>
    %90 = arith.addf %84, %89 : vector<32x64xf32>
    %91 = vector.extract_strided_slice %77 {offsets = [0, 128], sizes = [32, 64], strides = [1, 1]} : vector<32x320xf32> to vector<32x64xf32>
    %92 = vector.extract_strided_slice %0 {offsets = [2, 0, 0], sizes = [1, 32, 64], strides = [1, 1, 1]} : vector<5x32x64xf32> to vector<1x32x64xf32>
    %93 = vector.shape_cast %92 : vector<1x32x64xf32> to vector<32x64xf32>
    %94 = arith.mulf %91, %93 : vector<32x64xf32>
    %95 = arith.addf %90, %94 : vector<32x64xf32>
    %96 = vector.extract_strided_slice %77 {offsets = [0, 192], sizes = [32, 64], strides = [1, 1]} : vector<32x320xf32> to vector<32x64xf32>
    %c31_i32_27 = arith.constant 31 : i32
    %97 = tpu.dynamic_rotate %96 by %c31_i32_27 dim 0 : vector<32x64xf32>, i32 -> vector<32x64xf32>
    %98 = vector.extract_strided_slice %0 {offsets = [3, 0, 0], sizes = [1, 32, 64], strides = [1, 1, 1]} : vector<5x32x64xf32> to vector<1x32x64xf32>
    %99 = vector.shape_cast %98 : vector<1x32x64xf32> to vector<32x64xf32>
    %100 = arith.mulf %97, %99 : vector<32x64xf32>
    %101 = arith.addf %95, %100 : vector<32x64xf32>
    %102 = vector.extract_strided_slice %77 {offsets = [0, 256], sizes = [32, 64], strides = [1, 1]} : vector<32x320xf32> to vector<32x64xf32>
    %c30_i32_28 = arith.constant 30 : i32
    %103 = tpu.dynamic_rotate %102 by %c30_i32_28 dim 0 : vector<32x64xf32>, i32 -> vector<32x64xf32>
    %104 = vector.extract_strided_slice %0 {offsets = [4, 0, 0], sizes = [1, 32, 64], strides = [1, 1, 1]} : vector<5x32x64xf32> to vector<1x32x64xf32>
    %105 = vector.shape_cast %104 : vector<1x32x64xf32> to vector<32x64xf32>
    %106 = arith.mulf %103, %105 : vector<32x64xf32>
    %107 = arith.addf %101, %106 : vector<32x64xf32>
    %c0_29 = arith.constant 0 : index
    %c0_30 = arith.constant 0 : index
    %108 = vector.load %arg8[%c0_29, %c0_30] : memref<1x64xf32, #tpu.memory_space<vmem>>, vector<1x64xf32>
    %109 = vector.broadcast %108 : vector<1x64xf32> to vector<32x64xf32>
    %110 = arith.addf %107, %109 : vector<32x64xf32>
    %cst_31 = arith.constant 0.000000e+00 : f32
    %111 = vector.broadcast %cst_31 : f32 to vector<32x64xf32>
    %112 = arith.maximumf %110, %111 : vector<32x64xf32>
    %c0_32 = arith.constant 0 : index
    %c0_33 = arith.constant 0 : index
    %113 = vector.load %arg9[%c0_32, %c0_33] : memref<64x320xf32, #tpu.memory_space<vmem>>, vector<64x320xf32>
    %cst_34 = arith.constant dense<0.000000e+00> : vector<32x320xf32>
    %114 = tpu.matmul %112, %113, %cst_34 {dimension_numbers = #tpu.dot_dimension_numbers<[1], [0], [0], [1], [0, 0, 1, 1], [], []>} : vector<32x64xf32>, vector<64x320xf32>, vector<32x320xf32> -> vector<32x320xf32>
    %cst_35 = arith.constant 0.000000e+00 : f32
    %115 = vector.broadcast %cst_35 : f32 to vector<32x64xf32>
    %116 = vector.extract_strided_slice %114 {offsets = [0, 0], sizes = [32, 64], strides = [1, 1]} : vector<32x320xf32> to vector<32x64xf32>
    %c2_i32_36 = arith.constant 2 : i32
    %117 = tpu.dynamic_rotate %116 by %c2_i32_36 dim 0 : vector<32x64xf32>, i32 -> vector<32x64xf32>
    %118 = vector.extract_strided_slice %0 {offsets = [0, 0, 0], sizes = [1, 32, 64], strides = [1, 1, 1]} : vector<5x32x64xf32> to vector<1x32x64xf32>
    %119 = vector.shape_cast %118 : vector<1x32x64xf32> to vector<32x64xf32>
    %120 = arith.mulf %117, %119 : vector<32x64xf32>
    %121 = arith.addf %115, %120 : vector<32x64xf32>
    %122 = vector.extract_strided_slice %114 {offsets = [0, 64], sizes = [32, 64], strides = [1, 1]} : vector<32x320xf32> to vector<32x64xf32>
    %c1_i32_37 = arith.constant 1 : i32
    %123 = tpu.dynamic_rotate %122 by %c1_i32_37 dim 0 : vector<32x64xf32>, i32 -> vector<32x64xf32>
    %124 = vector.extract_strided_slice %0 {offsets = [1, 0, 0], sizes = [1, 32, 64], strides = [1, 1, 1]} : vector<5x32x64xf32> to vector<1x32x64xf32>
    %125 = vector.shape_cast %124 : vector<1x32x64xf32> to vector<32x64xf32>
    %126 = arith.mulf %123, %125 : vector<32x64xf32>
    %127 = arith.addf %121, %126 : vector<32x64xf32>
    %128 = vector.extract_strided_slice %114 {offsets = [0, 128], sizes = [32, 64], strides = [1, 1]} : vector<32x320xf32> to vector<32x64xf32>
    %129 = vector.extract_strided_slice %0 {offsets = [2, 0, 0], sizes = [1, 32, 64], strides = [1, 1, 1]} : vector<5x32x64xf32> to vector<1x32x64xf32>
    %130 = vector.shape_cast %129 : vector<1x32x64xf32> to vector<32x64xf32>
    %131 = arith.mulf %128, %130 : vector<32x64xf32>
    %132 = arith.addf %127, %131 : vector<32x64xf32>
    %133 = vector.extract_strided_slice %114 {offsets = [0, 192], sizes = [32, 64], strides = [1, 1]} : vector<32x320xf32> to vector<32x64xf32>
    %c31_i32_38 = arith.constant 31 : i32
    %134 = tpu.dynamic_rotate %133 by %c31_i32_38 dim 0 : vector<32x64xf32>, i32 -> vector<32x64xf32>
    %135 = vector.extract_strided_slice %0 {offsets = [3, 0, 0], sizes = [1, 32, 64], strides = [1, 1, 1]} : vector<5x32x64xf32> to vector<1x32x64xf32>
    %136 = vector.shape_cast %135 : vector<1x32x64xf32> to vector<32x64xf32>
    %137 = arith.mulf %134, %136 : vector<32x64xf32>
    %138 = arith.addf %132, %137 : vector<32x64xf32>
    %139 = vector.extract_strided_slice %114 {offsets = [0, 256], sizes = [32, 64], strides = [1, 1]} : vector<32x320xf32> to vector<32x64xf32>
    %c30_i32_39 = arith.constant 30 : i32
    %140 = tpu.dynamic_rotate %139 by %c30_i32_39 dim 0 : vector<32x64xf32>, i32 -> vector<32x64xf32>
    %141 = vector.extract_strided_slice %0 {offsets = [4, 0, 0], sizes = [1, 32, 64], strides = [1, 1, 1]} : vector<5x32x64xf32> to vector<1x32x64xf32>
    %142 = vector.shape_cast %141 : vector<1x32x64xf32> to vector<32x64xf32>
    %143 = arith.mulf %140, %142 : vector<32x64xf32>
    %144 = arith.addf %138, %143 : vector<32x64xf32>
    %c0_40 = arith.constant 0 : index
    %c0_41 = arith.constant 0 : index
    %145 = vector.load %arg10[%c0_40, %c0_41] : memref<1x64xf32, #tpu.memory_space<vmem>>, vector<1x64xf32>
    %146 = vector.broadcast %145 : vector<1x64xf32> to vector<32x64xf32>
    %147 = arith.addf %144, %146 : vector<32x64xf32>
    %cst_42 = arith.constant 0.000000e+00 : f32
    %148 = vector.broadcast %cst_42 : f32 to vector<32x64xf32>
    %149 = arith.maximumf %147, %148 : vector<32x64xf32>
    %c0_43 = arith.constant 0 : index
    %c0_44 = arith.constant 0 : index
    %c0_45 = arith.constant 0 : index
    %150 = vector.load %arg2[%c0_43, %c0_44, %c0_45] : memref<4x16x64xf32, #tpu.memory_space<vmem>>, vector<1x16x64xf32>
    %151 = vector.shape_cast %150 : vector<1x16x64xf32> to vector<16x64xf32>
    %c1 = arith.constant 1 : index
    %c0_46 = arith.constant 0 : index
    %c0_47 = arith.constant 0 : index
    %152 = vector.load %arg2[%c1, %c0_46, %c0_47] : memref<4x16x64xf32, #tpu.memory_space<vmem>>, vector<1x16x64xf32>
    %153 = vector.shape_cast %152 : vector<1x16x64xf32> to vector<16x64xf32>
    %c2 = arith.constant 2 : index
    %c0_48 = arith.constant 0 : index
    %c0_49 = arith.constant 0 : index
    %154 = vector.load %arg2[%c2, %c0_48, %c0_49] : memref<4x16x64xf32, #tpu.memory_space<vmem>>, vector<1x16x64xf32>
    %155 = vector.shape_cast %154 : vector<1x16x64xf32> to vector<16x64xf32>
    %c3 = arith.constant 3 : index
    %c0_50 = arith.constant 0 : index
    %c0_51 = arith.constant 0 : index
    %156 = vector.load %arg2[%c3, %c0_50, %c0_51] : memref<4x16x64xf32, #tpu.memory_space<vmem>>, vector<1x16x64xf32>
    %157 = vector.shape_cast %156 : vector<1x16x64xf32> to vector<16x64xf32>
    %c0_52 = arith.constant 0 : index
    %c0_53 = arith.constant 0 : index
    %158 = vector.load %arg11[%c0_52, %c0_53] : memref<64x256xf32, #tpu.memory_space<vmem>>, vector<64x256xf32>
    %c0_54 = arith.constant 0 : index
    %c0_55 = arith.constant 0 : index
    %159 = vector.load %arg13[%c0_54, %c0_55] : memref<1x256xf32, #tpu.memory_space<vmem>>, vector<1x256xf32>
    %160 = vector.extract_strided_slice %149 {offsets = [0, 0], sizes = [16, 64], strides = [1, 1]} : vector<32x64xf32> to vector<16x64xf32>
    %cst_56 = arith.constant 0.000000e+00 : f32
    %161 = vector.broadcast %cst_56 : f32 to vector<16x256xf32>
    %cst_57 = arith.constant dense<0.000000e+00> : vector<16x16xf32>
    %162 = tpu.matmul %151, %160, %cst_57 {dimension_numbers = #tpu.dot_dimension_numbers<[1], [1], [0], [0], [0, 0, 1, 0], [], []>} : vector<16x64xf32>, vector<16x64xf32>, vector<16x16xf32> -> vector<16x16xf32>
    %163 = vector.extract_strided_slice %158 {offsets = [0, 0], sizes = [16, 256], strides = [1, 1]} : vector<64x256xf32> to vector<16x256xf32>
    %cst_58 = arith.constant dense<0.000000e+00> : vector<16x256xf32>
    %164 = tpu.matmul %162, %163, %cst_58 {dimension_numbers = #tpu.dot_dimension_numbers<[1], [0], [0], [1], [0, 0, 1, 1], [], []>} : vector<16x16xf32>, vector<16x256xf32>, vector<16x256xf32> -> vector<16x256xf32>
    %165 = arith.addf %161, %164 : vector<16x256xf32>
    %cst_59 = arith.constant dense<0.000000e+00> : vector<16x16xf32>
    %166 = tpu.matmul %153, %160, %cst_59 {dimension_numbers = #tpu.dot_dimension_numbers<[1], [1], [0], [0], [0, 0, 1, 0], [], []>} : vector<16x64xf32>, vector<16x64xf32>, vector<16x16xf32> -> vector<16x16xf32>
    %167 = vector.extract_strided_slice %158 {offsets = [16, 0], sizes = [16, 256], strides = [1, 1]} : vector<64x256xf32> to vector<16x256xf32>
    %cst_60 = arith.constant dense<0.000000e+00> : vector<16x256xf32>
    %168 = tpu.matmul %166, %167, %cst_60 {dimension_numbers = #tpu.dot_dimension_numbers<[1], [0], [0], [1], [0, 0, 1, 1], [], []>} : vector<16x16xf32>, vector<16x256xf32>, vector<16x256xf32> -> vector<16x256xf32>
    %169 = arith.addf %165, %168 : vector<16x256xf32>
    %cst_61 = arith.constant dense<0.000000e+00> : vector<16x16xf32>
    %170 = tpu.matmul %155, %160, %cst_61 {dimension_numbers = #tpu.dot_dimension_numbers<[1], [1], [0], [0], [0, 0, 1, 0], [], []>} : vector<16x64xf32>, vector<16x64xf32>, vector<16x16xf32> -> vector<16x16xf32>
    %171 = vector.extract_strided_slice %158 {offsets = [32, 0], sizes = [16, 256], strides = [1, 1]} : vector<64x256xf32> to vector<16x256xf32>
    %cst_62 = arith.constant dense<0.000000e+00> : vector<16x256xf32>
    %172 = tpu.matmul %170, %171, %cst_62 {dimension_numbers = #tpu.dot_dimension_numbers<[1], [0], [0], [1], [0, 0, 1, 1], [], []>} : vector<16x16xf32>, vector<16x256xf32>, vector<16x256xf32> -> vector<16x256xf32>
    %173 = arith.addf %169, %172 : vector<16x256xf32>
    %cst_63 = arith.constant dense<0.000000e+00> : vector<16x16xf32>
    %174 = tpu.matmul %157, %160, %cst_63 {dimension_numbers = #tpu.dot_dimension_numbers<[1], [1], [0], [0], [0, 0, 1, 0], [], []>} : vector<16x64xf32>, vector<16x64xf32>, vector<16x16xf32> -> vector<16x16xf32>
    %175 = vector.extract_strided_slice %158 {offsets = [48, 0], sizes = [16, 256], strides = [1, 1]} : vector<64x256xf32> to vector<16x256xf32>
    %cst_64 = arith.constant dense<0.000000e+00> : vector<16x256xf32>
    %176 = tpu.matmul %174, %175, %cst_64 {dimension_numbers = #tpu.dot_dimension_numbers<[1], [0], [0], [1], [0, 0, 1, 1], [], []>} : vector<16x16xf32>, vector<16x256xf32>, vector<16x256xf32> -> vector<16x256xf32>
    %177 = arith.addf %173, %176 : vector<16x256xf32>
    %178 = vector.broadcast %159 : vector<1x256xf32> to vector<16x256xf32>
    %179 = arith.addf %177, %178 : vector<16x256xf32>
    %180 = vector.extract_strided_slice %149 {offsets = [16, 0], sizes = [16, 64], strides = [1, 1]} : vector<32x64xf32> to vector<16x64xf32>
    %cst_65 = arith.constant 0.000000e+00 : f32
    %181 = vector.broadcast %cst_65 : f32 to vector<16x256xf32>
    %cst_66 = arith.constant dense<0.000000e+00> : vector<16x16xf32>
    %182 = tpu.matmul %151, %180, %cst_66 {dimension_numbers = #tpu.dot_dimension_numbers<[1], [1], [0], [0], [0, 0, 1, 0], [], []>} : vector<16x64xf32>, vector<16x64xf32>, vector<16x16xf32> -> vector<16x16xf32>
    %183 = vector.extract_strided_slice %158 {offsets = [0, 0], sizes = [16, 256], strides = [1, 1]} : vector<64x256xf32> to vector<16x256xf32>
    %cst_67 = arith.constant dense<0.000000e+00> : vector<16x256xf32>
    %184 = tpu.matmul %182, %183, %cst_67 {dimension_numbers = #tpu.dot_dimension_numbers<[1], [0], [0], [1], [0, 0, 1, 1], [], []>} : vector<16x16xf32>, vector<16x256xf32>, vector<16x256xf32> -> vector<16x256xf32>
    %185 = arith.addf %181, %184 : vector<16x256xf32>
    %cst_68 = arith.constant dense<0.000000e+00> : vector<16x16xf32>
    %186 = tpu.matmul %153, %180, %cst_68 {dimension_numbers = #tpu.dot_dimension_numbers<[1], [1], [0], [0], [0, 0, 1, 0], [], []>} : vector<16x64xf32>, vector<16x64xf32>, vector<16x16xf32> -> vector<16x16xf32>
    %187 = vector.extract_strided_slice %158 {offsets = [16, 0], sizes = [16, 256], strides = [1, 1]} : vector<64x256xf32> to vector<16x256xf32>
    %cst_69 = arith.constant dense<0.000000e+00> : vector<16x256xf32>
    %188 = tpu.matmul %186, %187, %cst_69 {dimension_numbers = #tpu.dot_dimension_numbers<[1], [0], [0], [1], [0, 0, 1, 1], [], []>} : vector<16x16xf32>, vector<16x256xf32>, vector<16x256xf32> -> vector<16x256xf32>
    %189 = arith.addf %185, %188 : vector<16x256xf32>
    %cst_70 = arith.constant dense<0.000000e+00> : vector<16x16xf32>
    %190 = tpu.matmul %155, %180, %cst_70 {dimension_numbers = #tpu.dot_dimension_numbers<[1], [1], [0], [0], [0, 0, 1, 0], [], []>} : vector<16x64xf32>, vector<16x64xf32>, vector<16x16xf32> -> vector<16x16xf32>
    %191 = vector.extract_strided_slice %158 {offsets = [32, 0], sizes = [16, 256], strides = [1, 1]} : vector<64x256xf32> to vector<16x256xf32>
    %cst_71 = arith.constant dense<0.000000e+00> : vector<16x256xf32>
    %192 = tpu.matmul %190, %191, %cst_71 {dimension_numbers = #tpu.dot_dimension_numbers<[1], [0], [0], [1], [0, 0, 1, 1], [], []>} : vector<16x16xf32>, vector<16x256xf32>, vector<16x256xf32> -> vector<16x256xf32>
    %193 = arith.addf %189, %192 : vector<16x256xf32>
    %cst_72 = arith.constant dense<0.000000e+00> : vector<16x16xf32>
    %194 = tpu.matmul %157, %180, %cst_72 {dimension_numbers = #tpu.dot_dimension_numbers<[1], [1], [0], [0], [0, 0, 1, 0], [], []>} : vector<16x64xf32>, vector<16x64xf32>, vector<16x16xf32> -> vector<16x16xf32>
    %195 = vector.extract_strided_slice %158 {offsets = [48, 0], sizes = [16, 256], strides = [1, 1]} : vector<64x256xf32> to vector<16x256xf32>
    %cst_73 = arith.constant dense<0.000000e+00> : vector<16x256xf32>
    %196 = tpu.matmul %194, %195, %cst_73 {dimension_numbers = #tpu.dot_dimension_numbers<[1], [0], [0], [1], [0, 0, 1, 1], [], []>} : vector<16x16xf32>, vector<16x256xf32>, vector<16x256xf32> -> vector<16x256xf32>
    %197 = arith.addf %193, %196 : vector<16x256xf32>
    %198 = vector.broadcast %159 : vector<1x256xf32> to vector<16x256xf32>
    %199 = arith.addf %197, %198 : vector<16x256xf32>
    %c0_74 = arith.constant 0 : index
    %c0_75 = arith.constant 0 : index
    %200 = vector.load %arg12[%c0_74, %c0_75] : memref<64x256xf32, #tpu.memory_space<vmem>>, vector<64x256xf32>
    %c0_76 = arith.constant 0 : index
    %c0_77 = arith.constant 0 : index
    %201 = vector.load %arg19[%c0_76, %c0_77] : memref<2x64xf32, #tpu.memory_space<vmem>>, vector<2x64xf32>
    %c0_78 = arith.constant 0 : index
    %c0_79 = arith.constant 0 : index
    %202 = vector.load %arg20[%c0_78, %c0_79] : memref<2x64xf32, #tpu.memory_space<vmem>>, vector<2x64xf32>
    %203 = vector.extract_strided_slice %179 {offsets = [0, 0], sizes = [2, 256], strides = [1, 1]} : vector<16x256xf32> to vector<2x256xf32>
    %cst_80 = arith.constant dense<0.000000e+00> : vector<2x256xf32>
    %204 = tpu.matmul %201, %200, %cst_80 {dimension_numbers = #tpu.dot_dimension_numbers<[1], [0], [0], [1], [0, 0, 1, 1], [], []>} : vector<2x64xf32>, vector<64x256xf32>, vector<2x256xf32> -> vector<2x256xf32>
    %205 = arith.addf %203, %204 : vector<2x256xf32>
    %206 = vector.extract_strided_slice %205 {offsets = [0, 0], sizes = [2, 192], strides = [1, 1]} : vector<2x256xf32> to vector<2x192xf32>
    %207 = arith.negf %206 : vector<2x192xf32>
    %208 = math.exp %207 : vector<2x192xf32>
    %cst_81 = arith.constant 1.000000e+00 : f32
    %209 = vector.broadcast %cst_81 : f32 to vector<2x192xf32>
    %210 = arith.addf %209, %208 : vector<2x192xf32>
    %211 = arith.divf %209, %210 : vector<2x192xf32>
    %212 = vector.extract_strided_slice %211 {offsets = [0, 0], sizes = [2, 64], strides = [1, 1]} : vector<2x192xf32> to vector<2x64xf32>
    %213 = vector.extract_strided_slice %211 {offsets = [0, 64], sizes = [2, 64], strides = [1, 1]} : vector<2x192xf32> to vector<2x64xf32>
    %214 = vector.extract_strided_slice %211 {offsets = [0, 128], sizes = [2, 64], strides = [1, 1]} : vector<2x192xf32> to vector<2x64xf32>
    %215 = vector.extract_strided_slice %205 {offsets = [0, 192], sizes = [2, 64], strides = [1, 1]} : vector<2x256xf32> to vector<2x64xf32>
    %216 = math.tanh %215 : vector<2x64xf32>
    %217 = arith.mulf %213, %202 : vector<2x64xf32>
    %218 = arith.mulf %212, %216 : vector<2x64xf32>
    %219 = arith.addf %217, %218 : vector<2x64xf32>
    %220 = math.tanh %219 : vector<2x64xf32>
    %221 = arith.mulf %214, %220 : vector<2x64xf32>
    %c0_82 = arith.constant 0 : index
    %c0_83 = arith.constant 0 : index
    %222 = vector.load %arg24[%c0_82, %c0_83] : memref<32x64xf32, #tpu.memory_space<vmem>>, vector<2x64xf32>
    tpu.vector_store %arg24[%c0_82, %c0_83], %221 {strides = array<i32>} : memref<32x64xf32, #tpu.memory_space<vmem>>, vector<2x64xf32>,
    %223 = vector.extract_strided_slice %179 {offsets = [2, 0], sizes = [2, 256], strides = [1, 1]} : vector<16x256xf32> to vector<2x256xf32>
    %cst_84 = arith.constant dense<0.000000e+00> : vector<2x256xf32>
    %224 = tpu.matmul %221, %200, %cst_84 {dimension_numbers = #tpu.dot_dimension_numbers<[1], [0], [0], [1], [0, 0, 1, 1], [], []>} : vector<2x64xf32>, vector<64x256xf32>, vector<2x256xf32> -> vector<2x256xf32>
    %225 = arith.addf %223, %224 : vector<2x256xf32>
    %226 = vector.extract_strided_slice %225 {offsets = [0, 0], sizes = [2, 192], strides = [1, 1]} : vector<2x256xf32> to vector<2x192xf32>
    %227 = arith.negf %226 : vector<2x192xf32>
    %228 = math.exp %227 : vector<2x192xf32>
    %cst_85 = arith.constant 1.000000e+00 : f32
    %229 = vector.broadcast %cst_85 : f32 to vector<2x192xf32>
    %230 = arith.addf %229, %228 : vector<2x192xf32>
    %231 = arith.divf %229, %230 : vector<2x192xf32>
    %232 = vector.extract_strided_slice %231 {offsets = [0, 0], sizes = [2, 64], strides = [1, 1]} : vector<2x192xf32> to vector<2x64xf32>
    %233 = vector.extract_strided_slice %231 {offsets = [0, 64], sizes = [2, 64], strides = [1, 1]} : vector<2x192xf32> to vector<2x64xf32>
    %234 = vector.extract_strided_slice %231 {offsets = [0, 128], sizes = [2, 64], strides = [1, 1]} : vector<2x192xf32> to vector<2x64xf32>
    %235 = vector.extract_strided_slice %225 {offsets = [0, 192], sizes = [2, 64], strides = [1, 1]} : vector<2x256xf32> to vector<2x64xf32>
    %236 = math.tanh %235 : vector<2x64xf32>
    %237 = arith.mulf %233, %219 : vector<2x64xf32>
    %238 = arith.mulf %232, %236 : vector<2x64xf32>
    %239 = arith.addf %237, %238 : vector<2x64xf32>
    %240 = math.tanh %239 : vector<2x64xf32>
    %241 = arith.mulf %234, %240 : vector<2x64xf32>
    %c2_86 = arith.constant 2 : index
    %c0_87 = arith.constant 0 : index
    %242 = vector.load %arg24[%c2_86, %c0_87] : memref<32x64xf32, #tpu.memory_space<vmem>>, vector<2x64xf32>
    tpu.vector_store %arg24[%c2_86, %c0_87], %241 {strides = array<i32>} : memref<32x64xf32, #tpu.memory_space<vmem>>, vector<2x64xf32>,
    %243 = vector.extract_strided_slice %179 {offsets = [4, 0], sizes = [2, 256], strides = [1, 1]} : vector<16x256xf32> to vector<2x256xf32>
    %cst_88 = arith.constant dense<0.000000e+00> : vector<2x256xf32>
    %244 = tpu.matmul %241, %200, %cst_88 {dimension_numbers = #tpu.dot_dimension_numbers<[1], [0], [0], [1], [0, 0, 1, 1], [], []>} : vector<2x64xf32>, vector<64x256xf32>, vector<2x256xf32> -> vector<2x256xf32>
    %245 = arith.addf %243, %244 : vector<2x256xf32>
    %246 = vector.extract_strided_slice %245 {offsets = [0, 0], sizes = [2, 192], strides = [1, 1]} : vector<2x256xf32> to vector<2x192xf32>
    %247 = arith.negf %246 : vector<2x192xf32>
    %248 = math.exp %247 : vector<2x192xf32>
    %cst_89 = arith.constant 1.000000e+00 : f32
    %249 = vector.broadcast %cst_89 : f32 to vector<2x192xf32>
    %250 = arith.addf %249, %248 : vector<2x192xf32>
    %251 = arith.divf %249, %250 : vector<2x192xf32>
    %252 = vector.extract_strided_slice %251 {offsets = [0, 0], sizes = [2, 64], strides = [1, 1]} : vector<2x192xf32> to vector<2x64xf32>
    %253 = vector.extract_strided_slice %251 {offsets = [0, 64], sizes = [2, 64], strides = [1, 1]} : vector<2x192xf32> to vector<2x64xf32>
    %254 = vector.extract_strided_slice %251 {offsets = [0, 128], sizes = [2, 64], strides = [1, 1]} : vector<2x192xf32> to vector<2x64xf32>
    %255 = vector.extract_strided_slice %245 {offsets = [0, 192], sizes = [2, 64], strides = [1, 1]} : vector<2x256xf32> to vector<2x64xf32>
    %256 = math.tanh %255 : vector<2x64xf32>
    %257 = arith.mulf %253, %239 : vector<2x64xf32>
    %258 = arith.mulf %252, %256 : vector<2x64xf32>
    %259 = arith.addf %257, %258 : vector<2x64xf32>
    %260 = math.tanh %259 : vector<2x64xf32>
    %261 = arith.mulf %254, %260 : vector<2x64xf32>
    %c4 = arith.constant 4 : index
    %c0_90 = arith.constant 0 : index
    %262 = vector.load %arg24[%c4, %c0_90] : memref<32x64xf32, #tpu.memory_space<vmem>>, vector<2x64xf32>
    tpu.vector_store %arg24[%c4, %c0_90], %261 {strides = array<i32>} : memref<32x64xf32, #tpu.memory_space<vmem>>, vector<2x64xf32>,
    %263 = vector.extract_strided_slice %179 {offsets = [6, 0], sizes = [2, 256], strides = [1, 1]} : vector<16x256xf32> to vector<2x256xf32>
    %cst_91 = arith.constant dense<0.000000e+00> : vector<2x256xf32>
    %264 = tpu.matmul %261, %200, %cst_91 {dimension_numbers = #tpu.dot_dimension_numbers<[1], [0], [0], [1], [0, 0, 1, 1], [], []>} : vector<2x64xf32>, vector<64x256xf32>, vector<2x256xf32> -> vector<2x256xf32>
    %265 = arith.addf %263, %264 : vector<2x256xf32>
    %266 = vector.extract_strided_slice %265 {offsets = [0, 0], sizes = [2, 192], strides = [1, 1]} : vector<2x256xf32> to vector<2x192xf32>
    %267 = arith.negf %266 : vector<2x192xf32>
    %268 = math.exp %267 : vector<2x192xf32>
    %cst_92 = arith.constant 1.000000e+00 : f32
    %269 = vector.broadcast %cst_92 : f32 to vector<2x192xf32>
    %270 = arith.addf %269, %268 : vector<2x192xf32>
    %271 = arith.divf %269, %270 : vector<2x192xf32>
    %272 = vector.extract_strided_slice %271 {offsets = [0, 0], sizes = [2, 64], strides = [1, 1]} : vector<2x192xf32> to vector<2x64xf32>
    %273 = vector.extract_strided_slice %271 {offsets = [0, 64], sizes = [2, 64], strides = [1, 1]} : vector<2x192xf32> to vector<2x64xf32>
    %274 = vector.extract_strided_slice %271 {offsets = [0, 128], sizes = [2, 64], strides = [1, 1]} : vector<2x192xf32> to vector<2x64xf32>
    %275 = vector.extract_strided_slice %265 {offsets = [0, 192], sizes = [2, 64], strides = [1, 1]} : vector<2x256xf32> to vector<2x64xf32>
    %276 = math.tanh %275 : vector<2x64xf32>
    %277 = arith.mulf %273, %259 : vector<2x64xf32>
    %278 = arith.mulf %272, %276 : vector<2x64xf32>
    %279 = arith.addf %277, %278 : vector<2x64xf32>
    %280 = math.tanh %279 : vector<2x64xf32>
    %281 = arith.mulf %274, %280 : vector<2x64xf32>
    %c6 = arith.constant 6 : index
    %c0_93 = arith.constant 0 : index
    %282 = vector.load %arg24[%c6, %c0_93] : memref<32x64xf32, #tpu.memory_space<vmem>>, vector<2x64xf32>
    tpu.vector_store %arg24[%c6, %c0_93], %281 {strides = array<i32>} : memref<32x64xf32, #tpu.memory_space<vmem>>, vector<2x64xf32>,
    %283 = vector.extract_strided_slice %179 {offsets = [8, 0], sizes = [2, 256], strides = [1, 1]} : vector<16x256xf32> to vector<2x256xf32>
    %cst_94 = arith.constant dense<0.000000e+00> : vector<2x256xf32>
    %284 = tpu.matmul %281, %200, %cst_94 {dimension_numbers = #tpu.dot_dimension_numbers<[1], [0], [0], [1], [0, 0, 1, 1], [], []>} : vector<2x64xf32>, vector<64x256xf32>, vector<2x256xf32> -> vector<2x256xf32>
    %285 = arith.addf %283, %284 : vector<2x256xf32>
    %286 = vector.extract_strided_slice %285 {offsets = [0, 0], sizes = [2, 192], strides = [1, 1]} : vector<2x256xf32> to vector<2x192xf32>
    %287 = arith.negf %286 : vector<2x192xf32>
    %288 = math.exp %287 : vector<2x192xf32>
    %cst_95 = arith.constant 1.000000e+00 : f32
    %289 = vector.broadcast %cst_95 : f32 to vector<2x192xf32>
    %290 = arith.addf %289, %288 : vector<2x192xf32>
    %291 = arith.divf %289, %290 : vector<2x192xf32>
    %292 = vector.extract_strided_slice %291 {offsets = [0, 0], sizes = [2, 64], strides = [1, 1]} : vector<2x192xf32> to vector<2x64xf32>
    %293 = vector.extract_strided_slice %291 {offsets = [0, 64], sizes = [2, 64], strides = [1, 1]} : vector<2x192xf32> to vector<2x64xf32>
    %294 = vector.extract_strided_slice %291 {offsets = [0, 128], sizes = [2, 64], strides = [1, 1]} : vector<2x192xf32> to vector<2x64xf32>
    %295 = vector.extract_strided_slice %285 {offsets = [0, 192], sizes = [2, 64], strides = [1, 1]} : vector<2x256xf32> to vector<2x64xf32>
    %296 = math.tanh %295 : vector<2x64xf32>
    %297 = arith.mulf %293, %279 : vector<2x64xf32>
    %298 = arith.mulf %292, %296 : vector<2x64xf32>
    %299 = arith.addf %297, %298 : vector<2x64xf32>
    %300 = math.tanh %299 : vector<2x64xf32>
    %301 = arith.mulf %294, %300 : vector<2x64xf32>
    %c8 = arith.constant 8 : index
    %c0_96 = arith.constant 0 : index
    %302 = vector.load %arg24[%c8, %c0_96] : memref<32x64xf32, #tpu.memory_space<vmem>>, vector<2x64xf32>
    tpu.vector_store %arg24[%c8, %c0_96], %301 {strides = array<i32>} : memref<32x64xf32, #tpu.memory_space<vmem>>, vector<2x64xf32>,
    %303 = vector.extract_strided_slice %179 {offsets = [10, 0], sizes = [2, 256], strides = [1, 1]} : vector<16x256xf32> to vector<2x256xf32>
    %cst_97 = arith.constant dense<0.000000e+00> : vector<2x256xf32>
    %304 = tpu.matmul %301, %200, %cst_97 {dimension_numbers = #tpu.dot_dimension_numbers<[1], [0], [0], [1], [0, 0, 1, 1], [], []>} : vector<2x64xf32>, vector<64x256xf32>, vector<2x256xf32> -> vector<2x256xf32>
    %305 = arith.addf %303, %304 : vector<2x256xf32>
    %306 = vector.extract_strided_slice %305 {offsets = [0, 0], sizes = [2, 192], strides = [1, 1]} : vector<2x256xf32> to vector<2x192xf32>
    %307 = arith.negf %306 : vector<2x192xf32>
    %308 = math.exp %307 : vector<2x192xf32>
    %cst_98 = arith.constant 1.000000e+00 : f32
    %309 = vector.broadcast %cst_98 : f32 to vector<2x192xf32>
    %310 = arith.addf %309, %308 : vector<2x192xf32>
    %311 = arith.divf %309, %310 : vector<2x192xf32>
    %312 = vector.extract_strided_slice %311 {offsets = [0, 0], sizes = [2, 64], strides = [1, 1]} : vector<2x192xf32> to vector<2x64xf32>
    %313 = vector.extract_strided_slice %311 {offsets = [0, 64], sizes = [2, 64], strides = [1, 1]} : vector<2x192xf32> to vector<2x64xf32>
    %314 = vector.extract_strided_slice %311 {offsets = [0, 128], sizes = [2, 64], strides = [1, 1]} : vector<2x192xf32> to vector<2x64xf32>
    %315 = vector.extract_strided_slice %305 {offsets = [0, 192], sizes = [2, 64], strides = [1, 1]} : vector<2x256xf32> to vector<2x64xf32>
    %316 = math.tanh %315 : vector<2x64xf32>
    %317 = arith.mulf %313, %299 : vector<2x64xf32>
    %318 = arith.mulf %312, %316 : vector<2x64xf32>
    %319 = arith.addf %317, %318 : vector<2x64xf32>
    %320 = math.tanh %319 : vector<2x64xf32>
    %321 = arith.mulf %314, %320 : vector<2x64xf32>
    %c10 = arith.constant 10 : index
    %c0_99 = arith.constant 0 : index
    %322 = vector.load %arg24[%c10, %c0_99] : memref<32x64xf32, #tpu.memory_space<vmem>>, vector<2x64xf32>
    tpu.vector_store %arg24[%c10, %c0_99], %321 {strides = array<i32>} : memref<32x64xf32, #tpu.memory_space<vmem>>, vector<2x64xf32>,
    %323 = vector.extract_strided_slice %179 {offsets = [12, 0], sizes = [2, 256], strides = [1, 1]} : vector<16x256xf32> to vector<2x256xf32>
    %cst_100 = arith.constant dense<0.000000e+00> : vector<2x256xf32>
    %324 = tpu.matmul %321, %200, %cst_100 {dimension_numbers = #tpu.dot_dimension_numbers<[1], [0], [0], [1], [0, 0, 1, 1], [], []>} : vector<2x64xf32>, vector<64x256xf32>, vector<2x256xf32> -> vector<2x256xf32>
    %325 = arith.addf %323, %324 : vector<2x256xf32>
    %326 = vector.extract_strided_slice %325 {offsets = [0, 0], sizes = [2, 192], strides = [1, 1]} : vector<2x256xf32> to vector<2x192xf32>
    %327 = arith.negf %326 : vector<2x192xf32>
    %328 = math.exp %327 : vector<2x192xf32>
    %cst_101 = arith.constant 1.000000e+00 : f32
    %329 = vector.broadcast %cst_101 : f32 to vector<2x192xf32>
    %330 = arith.addf %329, %328 : vector<2x192xf32>
    %331 = arith.divf %329, %330 : vector<2x192xf32>
    %332 = vector.extract_strided_slice %331 {offsets = [0, 0], sizes = [2, 64], strides = [1, 1]} : vector<2x192xf32> to vector<2x64xf32>
    %333 = vector.extract_strided_slice %331 {offsets = [0, 64], sizes = [2, 64], strides = [1, 1]} : vector<2x192xf32> to vector<2x64xf32>
    %334 = vector.extract_strided_slice %331 {offsets = [0, 128], sizes = [2, 64], strides = [1, 1]} : vector<2x192xf32> to vector<2x64xf32>
    %335 = vector.extract_strided_slice %325 {offsets = [0, 192], sizes = [2, 64], strides = [1, 1]} : vector<2x256xf32> to vector<2x64xf32>
    %336 = math.tanh %335 : vector<2x64xf32>
    %337 = arith.mulf %333, %319 : vector<2x64xf32>
    %338 = arith.mulf %332, %336 : vector<2x64xf32>
    %339 = arith.addf %337, %338 : vector<2x64xf32>
    %340 = math.tanh %339 : vector<2x64xf32>
    %341 = arith.mulf %334, %340 : vector<2x64xf32>
    %c12 = arith.constant 12 : index
    %c0_102 = arith.constant 0 : index
    %342 = vector.load %arg24[%c12, %c0_102] : memref<32x64xf32, #tpu.memory_space<vmem>>, vector<2x64xf32>
    tpu.vector_store %arg24[%c12, %c0_102], %341 {strides = array<i32>} : memref<32x64xf32, #tpu.memory_space<vmem>>, vector<2x64xf32>,
    %343 = vector.extract_strided_slice %179 {offsets = [14, 0], sizes = [2, 256], strides = [1, 1]} : vector<16x256xf32> to vector<2x256xf32>
    %cst_103 = arith.constant dense<0.000000e+00> : vector<2x256xf32>
    %344 = tpu.matmul %341, %200, %cst_103 {dimension_numbers = #tpu.dot_dimension_numbers<[1], [0], [0], [1], [0, 0, 1, 1], [], []>} : vector<2x64xf32>, vector<64x256xf32>, vector<2x256xf32> -> vector<2x256xf32>
    %345 = arith.addf %343, %344 : vector<2x256xf32>
    %346 = vector.extract_strided_slice %345 {offsets = [0, 0], sizes = [2, 192], strides = [1, 1]} : vector<2x256xf32> to vector<2x192xf32>
    %347 = arith.negf %346 : vector<2x192xf32>
    %348 = math.exp %347 : vector<2x192xf32>
    %cst_104 = arith.constant 1.000000e+00 : f32
    %349 = vector.broadcast %cst_104 : f32 to vector<2x192xf32>
    %350 = arith.addf %349, %348 : vector<2x192xf32>
    %351 = arith.divf %349, %350 : vector<2x192xf32>
    %352 = vector.extract_strided_slice %351 {offsets = [0, 0], sizes = [2, 64], strides = [1, 1]} : vector<2x192xf32> to vector<2x64xf32>
    %353 = vector.extract_strided_slice %351 {offsets = [0, 64], sizes = [2, 64], strides = [1, 1]} : vector<2x192xf32> to vector<2x64xf32>
    %354 = vector.extract_strided_slice %351 {offsets = [0, 128], sizes = [2, 64], strides = [1, 1]} : vector<2x192xf32> to vector<2x64xf32>
    %355 = vector.extract_strided_slice %345 {offsets = [0, 192], sizes = [2, 64], strides = [1, 1]} : vector<2x256xf32> to vector<2x64xf32>
    %356 = math.tanh %355 : vector<2x64xf32>
    %357 = arith.mulf %353, %339 : vector<2x64xf32>
    %358 = arith.mulf %352, %356 : vector<2x64xf32>
    %359 = arith.addf %357, %358 : vector<2x64xf32>
    %360 = math.tanh %359 : vector<2x64xf32>
    %361 = arith.mulf %354, %360 : vector<2x64xf32>
    %c14 = arith.constant 14 : index
    %c0_105 = arith.constant 0 : index
    %362 = vector.load %arg24[%c14, %c0_105] : memref<32x64xf32, #tpu.memory_space<vmem>>, vector<2x64xf32>
    tpu.vector_store %arg24[%c14, %c0_105], %361 {strides = array<i32>} : memref<32x64xf32, #tpu.memory_space<vmem>>, vector<2x64xf32>,
    %363 = vector.extract_strided_slice %199 {offsets = [0, 0], sizes = [2, 256], strides = [1, 1]} : vector<16x256xf32> to vector<2x256xf32>
    %cst_106 = arith.constant dense<0.000000e+00> : vector<2x256xf32>
    %364 = tpu.matmul %361, %200, %cst_106 {dimension_numbers = #tpu.dot_dimension_numbers<[1], [0], [0], [1], [0, 0, 1, 1], [], []>} : vector<2x64xf32>, vector<64x256xf32>, vector<2x256xf32> -> vector<2x256xf32>
    %365 = arith.addf %363, %364 : vector<2x256xf32>
    %366 = vector.extract_strided_slice %365 {offsets = [0, 0], sizes = [2, 192], strides = [1, 1]} : vector<2x256xf32> to vector<2x192xf32>
    %367 = arith.negf %366 : vector<2x192xf32>
    %368 = math.exp %367 : vector<2x192xf32>
    %cst_107 = arith.constant 1.000000e+00 : f32
    %369 = vector.broadcast %cst_107 : f32 to vector<2x192xf32>
    %370 = arith.addf %369, %368 : vector<2x192xf32>
    %371 = arith.divf %369, %370 : vector<2x192xf32>
    %372 = vector.extract_strided_slice %371 {offsets = [0, 0], sizes = [2, 64], strides = [1, 1]} : vector<2x192xf32> to vector<2x64xf32>
    %373 = vector.extract_strided_slice %371 {offsets = [0, 64], sizes = [2, 64], strides = [1, 1]} : vector<2x192xf32> to vector<2x64xf32>
    %374 = vector.extract_strided_slice %371 {offsets = [0, 128], sizes = [2, 64], strides = [1, 1]} : vector<2x192xf32> to vector<2x64xf32>
    %375 = vector.extract_strided_slice %365 {offsets = [0, 192], sizes = [2, 64], strides = [1, 1]} : vector<2x256xf32> to vector<2x64xf32>
    %376 = math.tanh %375 : vector<2x64xf32>
    %377 = arith.mulf %373, %359 : vector<2x64xf32>
    %378 = arith.mulf %372, %376 : vector<2x64xf32>
    %379 = arith.addf %377, %378 : vector<2x64xf32>
    %380 = math.tanh %379 : vector<2x64xf32>
    %381 = arith.mulf %374, %380 : vector<2x64xf32>
    %c16 = arith.constant 16 : index
    %c0_108 = arith.constant 0 : index
    %382 = vector.load %arg24[%c16, %c0_108] : memref<32x64xf32, #tpu.memory_space<vmem>>, vector<2x64xf32>
    tpu.vector_store %arg24[%c16, %c0_108], %381 {strides = array<i32>} : memref<32x64xf32, #tpu.memory_space<vmem>>, vector<2x64xf32>,
    %383 = vector.extract_strided_slice %199 {offsets = [2, 0], sizes = [2, 256], strides = [1, 1]} : vector<16x256xf32> to vector<2x256xf32>
    %cst_109 = arith.constant dense<0.000000e+00> : vector<2x256xf32>
    %384 = tpu.matmul %381, %200, %cst_109 {dimension_numbers = #tpu.dot_dimension_numbers<[1], [0], [0], [1], [0, 0, 1, 1], [], []>} : vector<2x64xf32>, vector<64x256xf32>, vector<2x256xf32> -> vector<2x256xf32>
    %385 = arith.addf %383, %384 : vector<2x256xf32>
    %386 = vector.extract_strided_slice %385 {offsets = [0, 0], sizes = [2, 192], strides = [1, 1]} : vector<2x256xf32> to vector<2x192xf32>
    %387 = arith.negf %386 : vector<2x192xf32>
    %388 = math.exp %387 : vector<2x192xf32>
    %cst_110 = arith.constant 1.000000e+00 : f32
    %389 = vector.broadcast %cst_110 : f32 to vector<2x192xf32>
    %390 = arith.addf %389, %388 : vector<2x192xf32>
    %391 = arith.divf %389, %390 : vector<2x192xf32>
    %392 = vector.extract_strided_slice %391 {offsets = [0, 0], sizes = [2, 64], strides = [1, 1]} : vector<2x192xf32> to vector<2x64xf32>
    %393 = vector.extract_strided_slice %391 {offsets = [0, 64], sizes = [2, 64], strides = [1, 1]} : vector<2x192xf32> to vector<2x64xf32>
    %394 = vector.extract_strided_slice %391 {offsets = [0, 128], sizes = [2, 64], strides = [1, 1]} : vector<2x192xf32> to vector<2x64xf32>
    %395 = vector.extract_strided_slice %385 {offsets = [0, 192], sizes = [2, 64], strides = [1, 1]} : vector<2x256xf32> to vector<2x64xf32>
    %396 = math.tanh %395 : vector<2x64xf32>
    %397 = arith.mulf %393, %379 : vector<2x64xf32>
    %398 = arith.mulf %392, %396 : vector<2x64xf32>
    %399 = arith.addf %397, %398 : vector<2x64xf32>
    %400 = math.tanh %399 : vector<2x64xf32>
    %401 = arith.mulf %394, %400 : vector<2x64xf32>
    %c18 = arith.constant 18 : index
    %c0_111 = arith.constant 0 : index
    %402 = vector.load %arg24[%c18, %c0_111] : memref<32x64xf32, #tpu.memory_space<vmem>>, vector<2x64xf32>
    tpu.vector_store %arg24[%c18, %c0_111], %401 {strides = array<i32>} : memref<32x64xf32, #tpu.memory_space<vmem>>, vector<2x64xf32>,
    %403 = vector.extract_strided_slice %199 {offsets = [4, 0], sizes = [2, 256], strides = [1, 1]} : vector<16x256xf32> to vector<2x256xf32>
    %cst_112 = arith.constant dense<0.000000e+00> : vector<2x256xf32>
    %404 = tpu.matmul %401, %200, %cst_112 {dimension_numbers = #tpu.dot_dimension_numbers<[1], [0], [0], [1], [0, 0, 1, 1], [], []>} : vector<2x64xf32>, vector<64x256xf32>, vector<2x256xf32> -> vector<2x256xf32>
    %405 = arith.addf %403, %404 : vector<2x256xf32>
    %406 = vector.extract_strided_slice %405 {offsets = [0, 0], sizes = [2, 192], strides = [1, 1]} : vector<2x256xf32> to vector<2x192xf32>
    %407 = arith.negf %406 : vector<2x192xf32>
    %408 = math.exp %407 : vector<2x192xf32>
    %cst_113 = arith.constant 1.000000e+00 : f32
    %409 = vector.broadcast %cst_113 : f32 to vector<2x192xf32>
    %410 = arith.addf %409, %408 : vector<2x192xf32>
    %411 = arith.divf %409, %410 : vector<2x192xf32>
    %412 = vector.extract_strided_slice %411 {offsets = [0, 0], sizes = [2, 64], strides = [1, 1]} : vector<2x192xf32> to vector<2x64xf32>
    %413 = vector.extract_strided_slice %411 {offsets = [0, 64], sizes = [2, 64], strides = [1, 1]} : vector<2x192xf32> to vector<2x64xf32>
    %414 = vector.extract_strided_slice %411 {offsets = [0, 128], sizes = [2, 64], strides = [1, 1]} : vector<2x192xf32> to vector<2x64xf32>
    %415 = vector.extract_strided_slice %405 {offsets = [0, 192], sizes = [2, 64], strides = [1, 1]} : vector<2x256xf32> to vector<2x64xf32>
    %416 = math.tanh %415 : vector<2x64xf32>
    %417 = arith.mulf %413, %399 : vector<2x64xf32>
    %418 = arith.mulf %412, %416 : vector<2x64xf32>
    %419 = arith.addf %417, %418 : vector<2x64xf32>
    %420 = math.tanh %419 : vector<2x64xf32>
    %421 = arith.mulf %414, %420 : vector<2x64xf32>
    %c20 = arith.constant 20 : index
    %c0_114 = arith.constant 0 : index
    %422 = vector.load %arg24[%c20, %c0_114] : memref<32x64xf32, #tpu.memory_space<vmem>>, vector<2x64xf32>
    tpu.vector_store %arg24[%c20, %c0_114], %421 {strides = array<i32>} : memref<32x64xf32, #tpu.memory_space<vmem>>, vector<2x64xf32>,
    %423 = vector.extract_strided_slice %199 {offsets = [6, 0], sizes = [2, 256], strides = [1, 1]} : vector<16x256xf32> to vector<2x256xf32>
    %cst_115 = arith.constant dense<0.000000e+00> : vector<2x256xf32>
    %424 = tpu.matmul %421, %200, %cst_115 {dimension_numbers = #tpu.dot_dimension_numbers<[1], [0], [0], [1], [0, 0, 1, 1], [], []>} : vector<2x64xf32>, vector<64x256xf32>, vector<2x256xf32> -> vector<2x256xf32>
    %425 = arith.addf %423, %424 : vector<2x256xf32>
    %426 = vector.extract_strided_slice %425 {offsets = [0, 0], sizes = [2, 192], strides = [1, 1]} : vector<2x256xf32> to vector<2x192xf32>
    %427 = arith.negf %426 : vector<2x192xf32>
    %428 = math.exp %427 : vector<2x192xf32>
    %cst_116 = arith.constant 1.000000e+00 : f32
    %429 = vector.broadcast %cst_116 : f32 to vector<2x192xf32>
    %430 = arith.addf %429, %428 : vector<2x192xf32>
    %431 = arith.divf %429, %430 : vector<2x192xf32>
    %432 = vector.extract_strided_slice %431 {offsets = [0, 0], sizes = [2, 64], strides = [1, 1]} : vector<2x192xf32> to vector<2x64xf32>
    %433 = vector.extract_strided_slice %431 {offsets = [0, 64], sizes = [2, 64], strides = [1, 1]} : vector<2x192xf32> to vector<2x64xf32>
    %434 = vector.extract_strided_slice %431 {offsets = [0, 128], sizes = [2, 64], strides = [1, 1]} : vector<2x192xf32> to vector<2x64xf32>
    %435 = vector.extract_strided_slice %425 {offsets = [0, 192], sizes = [2, 64], strides = [1, 1]} : vector<2x256xf32> to vector<2x64xf32>
    %436 = math.tanh %435 : vector<2x64xf32>
    %437 = arith.mulf %433, %419 : vector<2x64xf32>
    %438 = arith.mulf %432, %436 : vector<2x64xf32>
    %439 = arith.addf %437, %438 : vector<2x64xf32>
    %440 = math.tanh %439 : vector<2x64xf32>
    %441 = arith.mulf %434, %440 : vector<2x64xf32>
    %c22 = arith.constant 22 : index
    %c0_117 = arith.constant 0 : index
    %442 = vector.load %arg24[%c22, %c0_117] : memref<32x64xf32, #tpu.memory_space<vmem>>, vector<2x64xf32>
    tpu.vector_store %arg24[%c22, %c0_117], %441 {strides = array<i32>} : memref<32x64xf32, #tpu.memory_space<vmem>>, vector<2x64xf32>,
    %443 = vector.extract_strided_slice %199 {offsets = [8, 0], sizes = [2, 256], strides = [1, 1]} : vector<16x256xf32> to vector<2x256xf32>
    %cst_118 = arith.constant dense<0.000000e+00> : vector<2x256xf32>
    %444 = tpu.matmul %441, %200, %cst_118 {dimension_numbers = #tpu.dot_dimension_numbers<[1], [0], [0], [1], [0, 0, 1, 1], [], []>} : vector<2x64xf32>, vector<64x256xf32>, vector<2x256xf32> -> vector<2x256xf32>
    %445 = arith.addf %443, %444 : vector<2x256xf32>
    %446 = vector.extract_strided_slice %445 {offsets = [0, 0], sizes = [2, 192], strides = [1, 1]} : vector<2x256xf32> to vector<2x192xf32>
    %447 = arith.negf %446 : vector<2x192xf32>
    %448 = math.exp %447 : vector<2x192xf32>
    %cst_119 = arith.constant 1.000000e+00 : f32
    %449 = vector.broadcast %cst_119 : f32 to vector<2x192xf32>
    %450 = arith.addf %449, %448 : vector<2x192xf32>
    %451 = arith.divf %449, %450 : vector<2x192xf32>
    %452 = vector.extract_strided_slice %451 {offsets = [0, 0], sizes = [2, 64], strides = [1, 1]} : vector<2x192xf32> to vector<2x64xf32>
    %453 = vector.extract_strided_slice %451 {offsets = [0, 64], sizes = [2, 64], strides = [1, 1]} : vector<2x192xf32> to vector<2x64xf32>
    %454 = vector.extract_strided_slice %451 {offsets = [0, 128], sizes = [2, 64], strides = [1, 1]} : vector<2x192xf32> to vector<2x64xf32>
    %455 = vector.extract_strided_slice %445 {offsets = [0, 192], sizes = [2, 64], strides = [1, 1]} : vector<2x256xf32> to vector<2x64xf32>
    %456 = math.tanh %455 : vector<2x64xf32>
    %457 = arith.mulf %453, %439 : vector<2x64xf32>
    %458 = arith.mulf %452, %456 : vector<2x64xf32>
    %459 = arith.addf %457, %458 : vector<2x64xf32>
    %460 = math.tanh %459 : vector<2x64xf32>
    %461 = arith.mulf %454, %460 : vector<2x64xf32>
    %c24 = arith.constant 24 : index
    %c0_120 = arith.constant 0 : index
    %462 = vector.load %arg24[%c24, %c0_120] : memref<32x64xf32, #tpu.memory_space<vmem>>, vector<2x64xf32>
    tpu.vector_store %arg24[%c24, %c0_120], %461 {strides = array<i32>} : memref<32x64xf32, #tpu.memory_space<vmem>>, vector<2x64xf32>,
    %463 = vector.extract_strided_slice %199 {offsets = [10, 0], sizes = [2, 256], strides = [1, 1]} : vector<16x256xf32> to vector<2x256xf32>
    %cst_121 = arith.constant dense<0.000000e+00> : vector<2x256xf32>
    %464 = tpu.matmul %461, %200, %cst_121 {dimension_numbers = #tpu.dot_dimension_numbers<[1], [0], [0], [1], [0, 0, 1, 1], [], []>} : vector<2x64xf32>, vector<64x256xf32>, vector<2x256xf32> -> vector<2x256xf32>
    %465 = arith.addf %463, %464 : vector<2x256xf32>
    %466 = vector.extract_strided_slice %465 {offsets = [0, 0], sizes = [2, 192], strides = [1, 1]} : vector<2x256xf32> to vector<2x192xf32>
    %467 = arith.negf %466 : vector<2x192xf32>
    %468 = math.exp %467 : vector<2x192xf32>
    %cst_122 = arith.constant 1.000000e+00 : f32
    %469 = vector.broadcast %cst_122 : f32 to vector<2x192xf32>
    %470 = arith.addf %469, %468 : vector<2x192xf32>
    %471 = arith.divf %469, %470 : vector<2x192xf32>
    %472 = vector.extract_strided_slice %471 {offsets = [0, 0], sizes = [2, 64], strides = [1, 1]} : vector<2x192xf32> to vector<2x64xf32>
    %473 = vector.extract_strided_slice %471 {offsets = [0, 64], sizes = [2, 64], strides = [1, 1]} : vector<2x192xf32> to vector<2x64xf32>
    %474 = vector.extract_strided_slice %471 {offsets = [0, 128], sizes = [2, 64], strides = [1, 1]} : vector<2x192xf32> to vector<2x64xf32>
    %475 = vector.extract_strided_slice %465 {offsets = [0, 192], sizes = [2, 64], strides = [1, 1]} : vector<2x256xf32> to vector<2x64xf32>
    %476 = math.tanh %475 : vector<2x64xf32>
    %477 = arith.mulf %473, %459 : vector<2x64xf32>
    %478 = arith.mulf %472, %476 : vector<2x64xf32>
    %479 = arith.addf %477, %478 : vector<2x64xf32>
    %480 = math.tanh %479 : vector<2x64xf32>
    %481 = arith.mulf %474, %480 : vector<2x64xf32>
    %c26 = arith.constant 26 : index
    %c0_123 = arith.constant 0 : index
    %482 = vector.load %arg24[%c26, %c0_123] : memref<32x64xf32, #tpu.memory_space<vmem>>, vector<2x64xf32>
    tpu.vector_store %arg24[%c26, %c0_123], %481 {strides = array<i32>} : memref<32x64xf32, #tpu.memory_space<vmem>>, vector<2x64xf32>,
    %483 = vector.extract_strided_slice %199 {offsets = [12, 0], sizes = [2, 256], strides = [1, 1]} : vector<16x256xf32> to vector<2x256xf32>
    %cst_124 = arith.constant dense<0.000000e+00> : vector<2x256xf32>
    %484 = tpu.matmul %481, %200, %cst_124 {dimension_numbers = #tpu.dot_dimension_numbers<[1], [0], [0], [1], [0, 0, 1, 1], [], []>} : vector<2x64xf32>, vector<64x256xf32>, vector<2x256xf32> -> vector<2x256xf32>
    %485 = arith.addf %483, %484 : vector<2x256xf32>
    %486 = vector.extract_strided_slice %485 {offsets = [0, 0], sizes = [2, 192], strides = [1, 1]} : vector<2x256xf32> to vector<2x192xf32>
    %487 = arith.negf %486 : vector<2x192xf32>
    %488 = math.exp %487 : vector<2x192xf32>
    %cst_125 = arith.constant 1.000000e+00 : f32
    %489 = vector.broadcast %cst_125 : f32 to vector<2x192xf32>
    %490 = arith.addf %489, %488 : vector<2x192xf32>
    %491 = arith.divf %489, %490 : vector<2x192xf32>
    %492 = vector.extract_strided_slice %491 {offsets = [0, 0], sizes = [2, 64], strides = [1, 1]} : vector<2x192xf32> to vector<2x64xf32>
    %493 = vector.extract_strided_slice %491 {offsets = [0, 64], sizes = [2, 64], strides = [1, 1]} : vector<2x192xf32> to vector<2x64xf32>
    %494 = vector.extract_strided_slice %491 {offsets = [0, 128], sizes = [2, 64], strides = [1, 1]} : vector<2x192xf32> to vector<2x64xf32>
    %495 = vector.extract_strided_slice %485 {offsets = [0, 192], sizes = [2, 64], strides = [1, 1]} : vector<2x256xf32> to vector<2x64xf32>
    %496 = math.tanh %495 : vector<2x64xf32>
    %497 = arith.mulf %493, %479 : vector<2x64xf32>
    %498 = arith.mulf %492, %496 : vector<2x64xf32>
    %499 = arith.addf %497, %498 : vector<2x64xf32>
    %500 = math.tanh %499 : vector<2x64xf32>
    %501 = arith.mulf %494, %500 : vector<2x64xf32>
    %c28 = arith.constant 28 : index
    %c0_126 = arith.constant 0 : index
    %502 = vector.load %arg24[%c28, %c0_126] : memref<32x64xf32, #tpu.memory_space<vmem>>, vector<2x64xf32>
    tpu.vector_store %arg24[%c28, %c0_126], %501 {strides = array<i32>} : memref<32x64xf32, #tpu.memory_space<vmem>>, vector<2x64xf32>,
    %503 = vector.extract_strided_slice %199 {offsets = [14, 0], sizes = [2, 256], strides = [1, 1]} : vector<16x256xf32> to vector<2x256xf32>
    %cst_127 = arith.constant dense<0.000000e+00> : vector<2x256xf32>
    %504 = tpu.matmul %501, %200, %cst_127 {dimension_numbers = #tpu.dot_dimension_numbers<[1], [0], [0], [1], [0, 0, 1, 1], [], []>} : vector<2x64xf32>, vector<64x256xf32>, vector<2x256xf32> -> vector<2x256xf32>
    %505 = arith.addf %503, %504 : vector<2x256xf32>
    %506 = vector.extract_strided_slice %505 {offsets = [0, 0], sizes = [2, 192], strides = [1, 1]} : vector<2x256xf32> to vector<2x192xf32>
    %507 = arith.negf %506 : vector<2x192xf32>
    %508 = math.exp %507 : vector<2x192xf32>
    %cst_128 = arith.constant 1.000000e+00 : f32
    %509 = vector.broadcast %cst_128 : f32 to vector<2x192xf32>
    %510 = arith.addf %509, %508 : vector<2x192xf32>
    %511 = arith.divf %509, %510 : vector<2x192xf32>
    %512 = vector.extract_strided_slice %511 {offsets = [0, 0], sizes = [2, 64], strides = [1, 1]} : vector<2x192xf32> to vector<2x64xf32>
    %513 = vector.extract_strided_slice %511 {offsets = [0, 64], sizes = [2, 64], strides = [1, 1]} : vector<2x192xf32> to vector<2x64xf32>
    %514 = vector.extract_strided_slice %511 {offsets = [0, 128], sizes = [2, 64], strides = [1, 1]} : vector<2x192xf32> to vector<2x64xf32>
    %515 = vector.extract_strided_slice %505 {offsets = [0, 192], sizes = [2, 64], strides = [1, 1]} : vector<2x256xf32> to vector<2x64xf32>
    %516 = math.tanh %515 : vector<2x64xf32>
    %517 = arith.mulf %513, %499 : vector<2x64xf32>
    %518 = arith.mulf %512, %516 : vector<2x64xf32>
    %519 = arith.addf %517, %518 : vector<2x64xf32>
    %520 = math.tanh %519 : vector<2x64xf32>
    %521 = arith.mulf %514, %520 : vector<2x64xf32>
    %c30 = arith.constant 30 : index
    %c0_129 = arith.constant 0 : index
    %522 = vector.load %arg24[%c30, %c0_129] : memref<32x64xf32, #tpu.memory_space<vmem>>, vector<2x64xf32>
    tpu.vector_store %arg24[%c30, %c0_129], %521 {strides = array<i32>} : memref<32x64xf32, #tpu.memory_space<vmem>>, vector<2x64xf32>,
    %c0_130 = arith.constant 0 : index
    %c0_131 = arith.constant 0 : index
    %523 = vector.load %arg24[%c0_130, %c0_131] : memref<32x64xf32, #tpu.memory_space<vmem>>, vector<32x64xf32>
    %c0_132 = arith.constant 0 : index
    %c0_133 = arith.constant 0 : index
    %524 = vector.load %arg14[%c0_132, %c0_133] : memref<64x256xf32, #tpu.memory_space<vmem>>, vector<64x256xf32>
    %cst_134 = arith.constant dense<0.000000e+00> : vector<32x256xf32>
    %525 = tpu.matmul %523, %524, %cst_134 {dimension_numbers = #tpu.dot_dimension_numbers<[1], [0], [0], [1], [0, 0, 1, 1], [], []>} : vector<32x64xf32>, vector<64x256xf32>, vector<32x256xf32> -> vector<32x256xf32>
    %c0_135 = arith.constant 0 : index
    %c0_136 = arith.constant 0 : index
    %526 = vector.load %arg16[%c0_135, %c0_136] : memref<1x256xf32, #tpu.memory_space<vmem>>, vector<1x256xf32>
    %527 = vector.broadcast %526 : vector<1x256xf32> to vector<32x256xf32>
    %528 = arith.addf %525, %527 : vector<32x256xf32>
    %c0_137 = arith.constant 0 : index
    %c0_138 = arith.constant 0 : index
    %529 = vector.load %arg15[%c0_137, %c0_138] : memref<64x256xf32, #tpu.memory_space<vmem>>, vector<64x256xf32>
    %c0_139 = arith.constant 0 : index
    %c0_140 = arith.constant 0 : index
    %530 = vector.load %arg17[%c0_139, %c0_140] : memref<64x3xf32, #tpu.memory_space<vmem>>, vector<64x3xf32>
    %c0_141 = arith.constant 0 : index
    %c0_142 = arith.constant 0 : index
    %531 = vector.load %arg18[%c0_141, %c0_142] : memref<1x3xf32, #tpu.memory_space<vmem>>, vector<1x3xf32>
    %532 = vector.extract_strided_slice %528 {offsets = [0, 0], sizes = [2, 256], strides = [1, 1]} : vector<32x256xf32> to vector<2x256xf32>
    %cst_143 = arith.constant dense<0.000000e+00> : vector<2x256xf32>
    %533 = tpu.matmul %521, %529, %cst_143 {dimension_numbers = #tpu.dot_dimension_numbers<[1], [0], [0], [1], [0, 0, 1, 1], [], []>} : vector<2x64xf32>, vector<64x256xf32>, vector<2x256xf32> -> vector<2x256xf32>
    %534 = arith.addf %532, %533 : vector<2x256xf32>
    %535 = vector.extract_strided_slice %534 {offsets = [0, 0], sizes = [2, 192], strides = [1, 1]} : vector<2x256xf32> to vector<2x192xf32>
    %536 = arith.negf %535 : vector<2x192xf32>
    %537 = math.exp %536 : vector<2x192xf32>
    %cst_144 = arith.constant 1.000000e+00 : f32
    %538 = vector.broadcast %cst_144 : f32 to vector<2x192xf32>
    %539 = arith.addf %538, %537 : vector<2x192xf32>
    %540 = arith.divf %538, %539 : vector<2x192xf32>
    %541 = vector.extract_strided_slice %540 {offsets = [0, 0], sizes = [2, 64], strides = [1, 1]} : vector<2x192xf32> to vector<2x64xf32>
    %542 = vector.extract_strided_slice %540 {offsets = [0, 64], sizes = [2, 64], strides = [1, 1]} : vector<2x192xf32> to vector<2x64xf32>
    %543 = vector.extract_strided_slice %540 {offsets = [0, 128], sizes = [2, 64], strides = [1, 1]} : vector<2x192xf32> to vector<2x64xf32>
    %544 = vector.extract_strided_slice %534 {offsets = [0, 192], sizes = [2, 64], strides = [1, 1]} : vector<2x256xf32> to vector<2x64xf32>
    %545 = math.tanh %544 : vector<2x64xf32>
    %546 = arith.mulf %542, %519 : vector<2x64xf32>
    %547 = arith.mulf %541, %545 : vector<2x64xf32>
    %548 = arith.addf %546, %547 : vector<2x64xf32>
    %549 = math.tanh %548 : vector<2x64xf32>
    %550 = arith.mulf %543, %549 : vector<2x64xf32>
    %551 = vector.extract_strided_slice %528 {offsets = [2, 0], sizes = [2, 256], strides = [1, 1]} : vector<32x256xf32> to vector<2x256xf32>
    %cst_145 = arith.constant dense<0.000000e+00> : vector<2x256xf32>
    %552 = tpu.matmul %550, %529, %cst_145 {dimension_numbers = #tpu.dot_dimension_numbers<[1], [0], [0], [1], [0, 0, 1, 1], [], []>} : vector<2x64xf32>, vector<64x256xf32>, vector<2x256xf32> -> vector<2x256xf32>
    %553 = arith.addf %551, %552 : vector<2x256xf32>
    %554 = vector.extract_strided_slice %553 {offsets = [0, 0], sizes = [2, 192], strides = [1, 1]} : vector<2x256xf32> to vector<2x192xf32>
    %555 = arith.negf %554 : vector<2x192xf32>
    %556 = math.exp %555 : vector<2x192xf32>
    %cst_146 = arith.constant 1.000000e+00 : f32
    %557 = vector.broadcast %cst_146 : f32 to vector<2x192xf32>
    %558 = arith.addf %557, %556 : vector<2x192xf32>
    %559 = arith.divf %557, %558 : vector<2x192xf32>
    %560 = vector.extract_strided_slice %559 {offsets = [0, 0], sizes = [2, 64], strides = [1, 1]} : vector<2x192xf32> to vector<2x64xf32>
    %561 = vector.extract_strided_slice %559 {offsets = [0, 64], sizes = [2, 64], strides = [1, 1]} : vector<2x192xf32> to vector<2x64xf32>
    %562 = vector.extract_strided_slice %559 {offsets = [0, 128], sizes = [2, 64], strides = [1, 1]} : vector<2x192xf32> to vector<2x64xf32>
    %563 = vector.extract_strided_slice %553 {offsets = [0, 192], sizes = [2, 64], strides = [1, 1]} : vector<2x256xf32> to vector<2x64xf32>
    %564 = math.tanh %563 : vector<2x64xf32>
    %565 = arith.mulf %561, %548 : vector<2x64xf32>
    %566 = arith.mulf %560, %564 : vector<2x64xf32>
    %567 = arith.addf %565, %566 : vector<2x64xf32>
    %568 = math.tanh %567 : vector<2x64xf32>
    %569 = arith.mulf %562, %568 : vector<2x64xf32>
    %570 = vector.extract_strided_slice %528 {offsets = [4, 0], sizes = [2, 256], strides = [1, 1]} : vector<32x256xf32> to vector<2x256xf32>
    %cst_147 = arith.constant dense<0.000000e+00> : vector<2x256xf32>
    %571 = tpu.matmul %569, %529, %cst_147 {dimension_numbers = #tpu.dot_dimension_numbers<[1], [0], [0], [1], [0, 0, 1, 1], [], []>} : vector<2x64xf32>, vector<64x256xf32>, vector<2x256xf32> -> vector<2x256xf32>
    %572 = arith.addf %570, %571 : vector<2x256xf32>
    %573 = vector.extract_strided_slice %572 {offsets = [0, 0], sizes = [2, 192], strides = [1, 1]} : vector<2x256xf32> to vector<2x192xf32>
    %574 = arith.negf %573 : vector<2x192xf32>
    %575 = math.exp %574 : vector<2x192xf32>
    %cst_148 = arith.constant 1.000000e+00 : f32
    %576 = vector.broadcast %cst_148 : f32 to vector<2x192xf32>
    %577 = arith.addf %576, %575 : vector<2x192xf32>
    %578 = arith.divf %576, %577 : vector<2x192xf32>
    %579 = vector.extract_strided_slice %578 {offsets = [0, 0], sizes = [2, 64], strides = [1, 1]} : vector<2x192xf32> to vector<2x64xf32>
    %580 = vector.extract_strided_slice %578 {offsets = [0, 64], sizes = [2, 64], strides = [1, 1]} : vector<2x192xf32> to vector<2x64xf32>
    %581 = vector.extract_strided_slice %578 {offsets = [0, 128], sizes = [2, 64], strides = [1, 1]} : vector<2x192xf32> to vector<2x64xf32>
    %582 = vector.extract_strided_slice %572 {offsets = [0, 192], sizes = [2, 64], strides = [1, 1]} : vector<2x256xf32> to vector<2x64xf32>
    %583 = math.tanh %582 : vector<2x64xf32>
    %584 = arith.mulf %580, %567 : vector<2x64xf32>
    %585 = arith.mulf %579, %583 : vector<2x64xf32>
    %586 = arith.addf %584, %585 : vector<2x64xf32>
    %587 = math.tanh %586 : vector<2x64xf32>
    %588 = arith.mulf %581, %587 : vector<2x64xf32>
    %589 = vector.extract_strided_slice %528 {offsets = [6, 0], sizes = [2, 256], strides = [1, 1]} : vector<32x256xf32> to vector<2x256xf32>
    %cst_149 = arith.constant dense<0.000000e+00> : vector<2x256xf32>
    %590 = tpu.matmul %588, %529, %cst_149 {dimension_numbers = #tpu.dot_dimension_numbers<[1], [0], [0], [1], [0, 0, 1, 1], [], []>} : vector<2x64xf32>, vector<64x256xf32>, vector<2x256xf32> -> vector<2x256xf32>
    %591 = arith.addf %589, %590 : vector<2x256xf32>
    %592 = vector.extract_strided_slice %591 {offsets = [0, 0], sizes = [2, 192], strides = [1, 1]} : vector<2x256xf32> to vector<2x192xf32>
    %593 = arith.negf %592 : vector<2x192xf32>
    %594 = math.exp %593 : vector<2x192xf32>
    %cst_150 = arith.constant 1.000000e+00 : f32
    %595 = vector.broadcast %cst_150 : f32 to vector<2x192xf32>
    %596 = arith.addf %595, %594 : vector<2x192xf32>
    %597 = arith.divf %595, %596 : vector<2x192xf32>
    %598 = vector.extract_strided_slice %597 {offsets = [0, 0], sizes = [2, 64], strides = [1, 1]} : vector<2x192xf32> to vector<2x64xf32>
    %599 = vector.extract_strided_slice %597 {offsets = [0, 64], sizes = [2, 64], strides = [1, 1]} : vector<2x192xf32> to vector<2x64xf32>
    %600 = vector.extract_strided_slice %597 {offsets = [0, 128], sizes = [2, 64], strides = [1, 1]} : vector<2x192xf32> to vector<2x64xf32>
    %601 = vector.extract_strided_slice %591 {offsets = [0, 192], sizes = [2, 64], strides = [1, 1]} : vector<2x256xf32> to vector<2x64xf32>
    %602 = math.tanh %601 : vector<2x64xf32>
    %603 = arith.mulf %599, %586 : vector<2x64xf32>
    %604 = arith.mulf %598, %602 : vector<2x64xf32>
    %605 = arith.addf %603, %604 : vector<2x64xf32>
    %606 = math.tanh %605 : vector<2x64xf32>
    %607 = arith.mulf %600, %606 : vector<2x64xf32>
    %608 = vector.extract_strided_slice %528 {offsets = [8, 0], sizes = [2, 256], strides = [1, 1]} : vector<32x256xf32> to vector<2x256xf32>
    %cst_151 = arith.constant dense<0.000000e+00> : vector<2x256xf32>
    %609 = tpu.matmul %607, %529, %cst_151 {dimension_numbers = #tpu.dot_dimension_numbers<[1], [0], [0], [1], [0, 0, 1, 1], [], []>} : vector<2x64xf32>, vector<64x256xf32>, vector<2x256xf32> -> vector<2x256xf32>
    %610 = arith.addf %608, %609 : vector<2x256xf32>
    %611 = vector.extract_strided_slice %610 {offsets = [0, 0], sizes = [2, 192], strides = [1, 1]} : vector<2x256xf32> to vector<2x192xf32>
    %612 = arith.negf %611 : vector<2x192xf32>
    %613 = math.exp %612 : vector<2x192xf32>
    %cst_152 = arith.constant 1.000000e+00 : f32
    %614 = vector.broadcast %cst_152 : f32 to vector<2x192xf32>
    %615 = arith.addf %614, %613 : vector<2x192xf32>
    %616 = arith.divf %614, %615 : vector<2x192xf32>
    %617 = vector.extract_strided_slice %616 {offsets = [0, 0], sizes = [2, 64], strides = [1, 1]} : vector<2x192xf32> to vector<2x64xf32>
    %618 = vector.extract_strided_slice %616 {offsets = [0, 64], sizes = [2, 64], strides = [1, 1]} : vector<2x192xf32> to vector<2x64xf32>
    %619 = vector.extract_strided_slice %616 {offsets = [0, 128], sizes = [2, 64], strides = [1, 1]} : vector<2x192xf32> to vector<2x64xf32>
    %620 = vector.extract_strided_slice %610 {offsets = [0, 192], sizes = [2, 64], strides = [1, 1]} : vector<2x256xf32> to vector<2x64xf32>
    %621 = math.tanh %620 : vector<2x64xf32>
    %622 = arith.mulf %618, %605 : vector<2x64xf32>
    %623 = arith.mulf %617, %621 : vector<2x64xf32>
    %624 = arith.addf %622, %623 : vector<2x64xf32>
    %625 = math.tanh %624 : vector<2x64xf32>
    %626 = arith.mulf %619, %625 : vector<2x64xf32>
    %627 = vector.extract_strided_slice %528 {offsets = [10, 0], sizes = [2, 256], strides = [1, 1]} : vector<32x256xf32> to vector<2x256xf32>
    %cst_153 = arith.constant dense<0.000000e+00> : vector<2x256xf32>
    %628 = tpu.matmul %626, %529, %cst_153 {dimension_numbers = #tpu.dot_dimension_numbers<[1], [0], [0], [1], [0, 0, 1, 1], [], []>} : vector<2x64xf32>, vector<64x256xf32>, vector<2x256xf32> -> vector<2x256xf32>
    %629 = arith.addf %627, %628 : vector<2x256xf32>
    %630 = vector.extract_strided_slice %629 {offsets = [0, 0], sizes = [2, 192], strides = [1, 1]} : vector<2x256xf32> to vector<2x192xf32>
    %631 = arith.negf %630 : vector<2x192xf32>
    %632 = math.exp %631 : vector<2x192xf32>
    %cst_154 = arith.constant 1.000000e+00 : f32
    %633 = vector.broadcast %cst_154 : f32 to vector<2x192xf32>
    %634 = arith.addf %633, %632 : vector<2x192xf32>
    %635 = arith.divf %633, %634 : vector<2x192xf32>
    %636 = vector.extract_strided_slice %635 {offsets = [0, 0], sizes = [2, 64], strides = [1, 1]} : vector<2x192xf32> to vector<2x64xf32>
    %637 = vector.extract_strided_slice %635 {offsets = [0, 64], sizes = [2, 64], strides = [1, 1]} : vector<2x192xf32> to vector<2x64xf32>
    %638 = vector.extract_strided_slice %635 {offsets = [0, 128], sizes = [2, 64], strides = [1, 1]} : vector<2x192xf32> to vector<2x64xf32>
    %639 = vector.extract_strided_slice %629 {offsets = [0, 192], sizes = [2, 64], strides = [1, 1]} : vector<2x256xf32> to vector<2x64xf32>
    %640 = math.tanh %639 : vector<2x64xf32>
    %641 = arith.mulf %637, %624 : vector<2x64xf32>
    %642 = arith.mulf %636, %640 : vector<2x64xf32>
    %643 = arith.addf %641, %642 : vector<2x64xf32>
    %644 = math.tanh %643 : vector<2x64xf32>
    %645 = arith.mulf %638, %644 : vector<2x64xf32>
    %646 = vector.extract_strided_slice %528 {offsets = [12, 0], sizes = [2, 256], strides = [1, 1]} : vector<32x256xf32> to vector<2x256xf32>
    %cst_155 = arith.constant dense<0.000000e+00> : vector<2x256xf32>
    %647 = tpu.matmul %645, %529, %cst_155 {dimension_numbers = #tpu.dot_dimension_numbers<[1], [0], [0], [1], [0, 0, 1, 1], [], []>} : vector<2x64xf32>, vector<64x256xf32>, vector<2x256xf32> -> vector<2x256xf32>
    %648 = arith.addf %646, %647 : vector<2x256xf32>
    %649 = vector.extract_strided_slice %648 {offsets = [0, 0], sizes = [2, 192], strides = [1, 1]} : vector<2x256xf32> to vector<2x192xf32>
    %650 = arith.negf %649 : vector<2x192xf32>
    %651 = math.exp %650 : vector<2x192xf32>
    %cst_156 = arith.constant 1.000000e+00 : f32
    %652 = vector.broadcast %cst_156 : f32 to vector<2x192xf32>
    %653 = arith.addf %652, %651 : vector<2x192xf32>
    %654 = arith.divf %652, %653 : vector<2x192xf32>
    %655 = vector.extract_strided_slice %654 {offsets = [0, 0], sizes = [2, 64], strides = [1, 1]} : vector<2x192xf32> to vector<2x64xf32>
    %656 = vector.extract_strided_slice %654 {offsets = [0, 64], sizes = [2, 64], strides = [1, 1]} : vector<2x192xf32> to vector<2x64xf32>
    %657 = vector.extract_strided_slice %654 {offsets = [0, 128], sizes = [2, 64], strides = [1, 1]} : vector<2x192xf32> to vector<2x64xf32>
    %658 = vector.extract_strided_slice %648 {offsets = [0, 192], sizes = [2, 64], strides = [1, 1]} : vector<2x256xf32> to vector<2x64xf32>
    %659 = math.tanh %658 : vector<2x64xf32>
    %660 = arith.mulf %656, %643 : vector<2x64xf32>
    %661 = arith.mulf %655, %659 : vector<2x64xf32>
    %662 = arith.addf %660, %661 : vector<2x64xf32>
    %663 = math.tanh %662 : vector<2x64xf32>
    %664 = arith.mulf %657, %663 : vector<2x64xf32>
    %665 = vector.extract_strided_slice %528 {offsets = [14, 0], sizes = [2, 256], strides = [1, 1]} : vector<32x256xf32> to vector<2x256xf32>
    %cst_157 = arith.constant dense<0.000000e+00> : vector<2x256xf32>
    %666 = tpu.matmul %664, %529, %cst_157 {dimension_numbers = #tpu.dot_dimension_numbers<[1], [0], [0], [1], [0, 0, 1, 1], [], []>} : vector<2x64xf32>, vector<64x256xf32>, vector<2x256xf32> -> vector<2x256xf32>
    %667 = arith.addf %665, %666 : vector<2x256xf32>
    %668 = vector.extract_strided_slice %667 {offsets = [0, 0], sizes = [2, 192], strides = [1, 1]} : vector<2x256xf32> to vector<2x192xf32>
    %669 = arith.negf %668 : vector<2x192xf32>
    %670 = math.exp %669 : vector<2x192xf32>
    %cst_158 = arith.constant 1.000000e+00 : f32
    %671 = vector.broadcast %cst_158 : f32 to vector<2x192xf32>
    %672 = arith.addf %671, %670 : vector<2x192xf32>
    %673 = arith.divf %671, %672 : vector<2x192xf32>
    %674 = vector.extract_strided_slice %673 {offsets = [0, 0], sizes = [2, 64], strides = [1, 1]} : vector<2x192xf32> to vector<2x64xf32>
    %675 = vector.extract_strided_slice %673 {offsets = [0, 64], sizes = [2, 64], strides = [1, 1]} : vector<2x192xf32> to vector<2x64xf32>
    %676 = vector.extract_strided_slice %673 {offsets = [0, 128], sizes = [2, 64], strides = [1, 1]} : vector<2x192xf32> to vector<2x64xf32>
    %677 = vector.extract_strided_slice %667 {offsets = [0, 192], sizes = [2, 64], strides = [1, 1]} : vector<2x256xf32> to vector<2x64xf32>
    %678 = math.tanh %677 : vector<2x64xf32>
    %679 = arith.mulf %675, %662 : vector<2x64xf32>
    %680 = arith.mulf %674, %678 : vector<2x64xf32>
    %681 = arith.addf %679, %680 : vector<2x64xf32>
    %682 = math.tanh %681 : vector<2x64xf32>
    %683 = arith.mulf %676, %682 : vector<2x64xf32>
    %684 = vector.extract_strided_slice %683 {offsets = [1, 0], sizes = [1, 64], strides = [1, 1]} : vector<2x64xf32> to vector<1x64xf32>
    %cst_159 = arith.constant dense<0.000000e+00> : vector<1x3xf32>
    %685 = tpu.matmul %684, %530, %cst_159 {dimension_numbers = #tpu.dot_dimension_numbers<[1], [0], [0], [1], [0, 0, 1, 1], [], []>} : vector<1x64xf32>, vector<64x3xf32>, vector<1x3xf32> -> vector<1x3xf32>
    %686 = arith.addf %685, %531 : vector<1x3xf32>
    %c0_160 = arith.constant 0 : index
    %c0_161 = arith.constant 0 : index
    %687 = vector.load %arg21[%c0_160, %c0_161] : memref<2x3xf32, #tpu.memory_space<vmem>>, vector<1x3xf32>
    tpu.vector_store %arg21[%c0_160, %c0_161], %686 {strides = array<i32>} : memref<2x3xf32, #tpu.memory_space<vmem>>, vector<1x3xf32>,
    %688 = vector.extract_strided_slice %528 {offsets = [16, 0], sizes = [2, 256], strides = [1, 1]} : vector<32x256xf32> to vector<2x256xf32>
    %cst_162 = arith.constant dense<0.000000e+00> : vector<2x256xf32>
    %689 = tpu.matmul %683, %529, %cst_162 {dimension_numbers = #tpu.dot_dimension_numbers<[1], [0], [0], [1], [0, 0, 1, 1], [], []>} : vector<2x64xf32>, vector<64x256xf32>, vector<2x256xf32> -> vector<2x256xf32>
    %690 = arith.addf %688, %689 : vector<2x256xf32>
    %691 = vector.extract_strided_slice %690 {offsets = [0, 0], sizes = [2, 192], strides = [1, 1]} : vector<2x256xf32> to vector<2x192xf32>
    %692 = arith.negf %691 : vector<2x192xf32>
    %693 = math.exp %692 : vector<2x192xf32>
    %cst_163 = arith.constant 1.000000e+00 : f32
    %694 = vector.broadcast %cst_163 : f32 to vector<2x192xf32>
    %695 = arith.addf %694, %693 : vector<2x192xf32>
    %696 = arith.divf %694, %695 : vector<2x192xf32>
    %697 = vector.extract_strided_slice %696 {offsets = [0, 0], sizes = [2, 64], strides = [1, 1]} : vector<2x192xf32> to vector<2x64xf32>
    %698 = vector.extract_strided_slice %696 {offsets = [0, 64], sizes = [2, 64], strides = [1, 1]} : vector<2x192xf32> to vector<2x64xf32>
    %699 = vector.extract_strided_slice %696 {offsets = [0, 128], sizes = [2, 64], strides = [1, 1]} : vector<2x192xf32> to vector<2x64xf32>
    %700 = vector.extract_strided_slice %690 {offsets = [0, 192], sizes = [2, 64], strides = [1, 1]} : vector<2x256xf32> to vector<2x64xf32>
    %701 = math.tanh %700 : vector<2x64xf32>
    %702 = arith.mulf %698, %681 : vector<2x64xf32>
    %703 = arith.mulf %697, %701 : vector<2x64xf32>
    %704 = arith.addf %702, %703 : vector<2x64xf32>
    %705 = math.tanh %704 : vector<2x64xf32>
    %706 = arith.mulf %699, %705 : vector<2x64xf32>
    %707 = vector.extract_strided_slice %528 {offsets = [18, 0], sizes = [2, 256], strides = [1, 1]} : vector<32x256xf32> to vector<2x256xf32>
    %cst_164 = arith.constant dense<0.000000e+00> : vector<2x256xf32>
    %708 = tpu.matmul %706, %529, %cst_164 {dimension_numbers = #tpu.dot_dimension_numbers<[1], [0], [0], [1], [0, 0, 1, 1], [], []>} : vector<2x64xf32>, vector<64x256xf32>, vector<2x256xf32> -> vector<2x256xf32>
    %709 = arith.addf %707, %708 : vector<2x256xf32>
    %710 = vector.extract_strided_slice %709 {offsets = [0, 0], sizes = [2, 192], strides = [1, 1]} : vector<2x256xf32> to vector<2x192xf32>
    %711 = arith.negf %710 : vector<2x192xf32>
    %712 = math.exp %711 : vector<2x192xf32>
    %cst_165 = arith.constant 1.000000e+00 : f32
    %713 = vector.broadcast %cst_165 : f32 to vector<2x192xf32>
    %714 = arith.addf %713, %712 : vector<2x192xf32>
    %715 = arith.divf %713, %714 : vector<2x192xf32>
    %716 = vector.extract_strided_slice %715 {offsets = [0, 0], sizes = [2, 64], strides = [1, 1]} : vector<2x192xf32> to vector<2x64xf32>
    %717 = vector.extract_strided_slice %715 {offsets = [0, 64], sizes = [2, 64], strides = [1, 1]} : vector<2x192xf32> to vector<2x64xf32>
    %718 = vector.extract_strided_slice %715 {offsets = [0, 128], sizes = [2, 64], strides = [1, 1]} : vector<2x192xf32> to vector<2x64xf32>
    %719 = vector.extract_strided_slice %709 {offsets = [0, 192], sizes = [2, 64], strides = [1, 1]} : vector<2x256xf32> to vector<2x64xf32>
    %720 = math.tanh %719 : vector<2x64xf32>
    %721 = arith.mulf %717, %704 : vector<2x64xf32>
    %722 = arith.mulf %716, %720 : vector<2x64xf32>
    %723 = arith.addf %721, %722 : vector<2x64xf32>
    %724 = math.tanh %723 : vector<2x64xf32>
    %725 = arith.mulf %718, %724 : vector<2x64xf32>
    %726 = vector.extract_strided_slice %528 {offsets = [20, 0], sizes = [2, 256], strides = [1, 1]} : vector<32x256xf32> to vector<2x256xf32>
    %cst_166 = arith.constant dense<0.000000e+00> : vector<2x256xf32>
    %727 = tpu.matmul %725, %529, %cst_166 {dimension_numbers = #tpu.dot_dimension_numbers<[1], [0], [0], [1], [0, 0, 1, 1], [], []>} : vector<2x64xf32>, vector<64x256xf32>, vector<2x256xf32> -> vector<2x256xf32>
    %728 = arith.addf %726, %727 : vector<2x256xf32>
    %729 = vector.extract_strided_slice %728 {offsets = [0, 0], sizes = [2, 192], strides = [1, 1]} : vector<2x256xf32> to vector<2x192xf32>
    %730 = arith.negf %729 : vector<2x192xf32>
    %731 = math.exp %730 : vector<2x192xf32>
    %cst_167 = arith.constant 1.000000e+00 : f32
    %732 = vector.broadcast %cst_167 : f32 to vector<2x192xf32>
    %733 = arith.addf %732, %731 : vector<2x192xf32>
    %734 = arith.divf %732, %733 : vector<2x192xf32>
    %735 = vector.extract_strided_slice %734 {offsets = [0, 0], sizes = [2, 64], strides = [1, 1]} : vector<2x192xf32> to vector<2x64xf32>
    %736 = vector.extract_strided_slice %734 {offsets = [0, 64], sizes = [2, 64], strides = [1, 1]} : vector<2x192xf32> to vector<2x64xf32>
    %737 = vector.extract_strided_slice %734 {offsets = [0, 128], sizes = [2, 64], strides = [1, 1]} : vector<2x192xf32> to vector<2x64xf32>
    %738 = vector.extract_strided_slice %728 {offsets = [0, 192], sizes = [2, 64], strides = [1, 1]} : vector<2x256xf32> to vector<2x64xf32>
    %739 = math.tanh %738 : vector<2x64xf32>
    %740 = arith.mulf %736, %723 : vector<2x64xf32>
    %741 = arith.mulf %735, %739 : vector<2x64xf32>
    %742 = arith.addf %740, %741 : vector<2x64xf32>
    %743 = math.tanh %742 : vector<2x64xf32>
    %744 = arith.mulf %737, %743 : vector<2x64xf32>
    %745 = vector.extract_strided_slice %528 {offsets = [22, 0], sizes = [2, 256], strides = [1, 1]} : vector<32x256xf32> to vector<2x256xf32>
    %cst_168 = arith.constant dense<0.000000e+00> : vector<2x256xf32>
    %746 = tpu.matmul %744, %529, %cst_168 {dimension_numbers = #tpu.dot_dimension_numbers<[1], [0], [0], [1], [0, 0, 1, 1], [], []>} : vector<2x64xf32>, vector<64x256xf32>, vector<2x256xf32> -> vector<2x256xf32>
    %747 = arith.addf %745, %746 : vector<2x256xf32>
    %748 = vector.extract_strided_slice %747 {offsets = [0, 0], sizes = [2, 192], strides = [1, 1]} : vector<2x256xf32> to vector<2x192xf32>
    %749 = arith.negf %748 : vector<2x192xf32>
    %750 = math.exp %749 : vector<2x192xf32>
    %cst_169 = arith.constant 1.000000e+00 : f32
    %751 = vector.broadcast %cst_169 : f32 to vector<2x192xf32>
    %752 = arith.addf %751, %750 : vector<2x192xf32>
    %753 = arith.divf %751, %752 : vector<2x192xf32>
    %754 = vector.extract_strided_slice %753 {offsets = [0, 0], sizes = [2, 64], strides = [1, 1]} : vector<2x192xf32> to vector<2x64xf32>
    %755 = vector.extract_strided_slice %753 {offsets = [0, 64], sizes = [2, 64], strides = [1, 1]} : vector<2x192xf32> to vector<2x64xf32>
    %756 = vector.extract_strided_slice %753 {offsets = [0, 128], sizes = [2, 64], strides = [1, 1]} : vector<2x192xf32> to vector<2x64xf32>
    %757 = vector.extract_strided_slice %747 {offsets = [0, 192], sizes = [2, 64], strides = [1, 1]} : vector<2x256xf32> to vector<2x64xf32>
    %758 = math.tanh %757 : vector<2x64xf32>
    %759 = arith.mulf %755, %742 : vector<2x64xf32>
    %760 = arith.mulf %754, %758 : vector<2x64xf32>
    %761 = arith.addf %759, %760 : vector<2x64xf32>
    %762 = math.tanh %761 : vector<2x64xf32>
    %763 = arith.mulf %756, %762 : vector<2x64xf32>
    %764 = vector.extract_strided_slice %528 {offsets = [24, 0], sizes = [2, 256], strides = [1, 1]} : vector<32x256xf32> to vector<2x256xf32>
    %cst_170 = arith.constant dense<0.000000e+00> : vector<2x256xf32>
    %765 = tpu.matmul %763, %529, %cst_170 {dimension_numbers = #tpu.dot_dimension_numbers<[1], [0], [0], [1], [0, 0, 1, 1], [], []>} : vector<2x64xf32>, vector<64x256xf32>, vector<2x256xf32> -> vector<2x256xf32>
    %766 = arith.addf %764, %765 : vector<2x256xf32>
    %767 = vector.extract_strided_slice %766 {offsets = [0, 0], sizes = [2, 192], strides = [1, 1]} : vector<2x256xf32> to vector<2x192xf32>
    %768 = arith.negf %767 : vector<2x192xf32>
    %769 = math.exp %768 : vector<2x192xf32>
    %cst_171 = arith.constant 1.000000e+00 : f32
    %770 = vector.broadcast %cst_171 : f32 to vector<2x192xf32>
    %771 = arith.addf %770, %769 : vector<2x192xf32>
    %772 = arith.divf %770, %771 : vector<2x192xf32>
    %773 = vector.extract_strided_slice %772 {offsets = [0, 0], sizes = [2, 64], strides = [1, 1]} : vector<2x192xf32> to vector<2x64xf32>
    %774 = vector.extract_strided_slice %772 {offsets = [0, 64], sizes = [2, 64], strides = [1, 1]} : vector<2x192xf32> to vector<2x64xf32>
    %775 = vector.extract_strided_slice %772 {offsets = [0, 128], sizes = [2, 64], strides = [1, 1]} : vector<2x192xf32> to vector<2x64xf32>
    %776 = vector.extract_strided_slice %766 {offsets = [0, 192], sizes = [2, 64], strides = [1, 1]} : vector<2x256xf32> to vector<2x64xf32>
    %777 = math.tanh %776 : vector<2x64xf32>
    %778 = arith.mulf %774, %761 : vector<2x64xf32>
    %779 = arith.mulf %773, %777 : vector<2x64xf32>
    %780 = arith.addf %778, %779 : vector<2x64xf32>
    %781 = math.tanh %780 : vector<2x64xf32>
    %782 = arith.mulf %775, %781 : vector<2x64xf32>
    %783 = vector.extract_strided_slice %528 {offsets = [26, 0], sizes = [2, 256], strides = [1, 1]} : vector<32x256xf32> to vector<2x256xf32>
    %cst_172 = arith.constant dense<0.000000e+00> : vector<2x256xf32>
    %784 = tpu.matmul %782, %529, %cst_172 {dimension_numbers = #tpu.dot_dimension_numbers<[1], [0], [0], [1], [0, 0, 1, 1], [], []>} : vector<2x64xf32>, vector<64x256xf32>, vector<2x256xf32> -> vector<2x256xf32>
    %785 = arith.addf %783, %784 : vector<2x256xf32>
    %786 = vector.extract_strided_slice %785 {offsets = [0, 0], sizes = [2, 192], strides = [1, 1]} : vector<2x256xf32> to vector<2x192xf32>
    %787 = arith.negf %786 : vector<2x192xf32>
    %788 = math.exp %787 : vector<2x192xf32>
    %cst_173 = arith.constant 1.000000e+00 : f32
    %789 = vector.broadcast %cst_173 : f32 to vector<2x192xf32>
    %790 = arith.addf %789, %788 : vector<2x192xf32>
    %791 = arith.divf %789, %790 : vector<2x192xf32>
    %792 = vector.extract_strided_slice %791 {offsets = [0, 0], sizes = [2, 64], strides = [1, 1]} : vector<2x192xf32> to vector<2x64xf32>
    %793 = vector.extract_strided_slice %791 {offsets = [0, 64], sizes = [2, 64], strides = [1, 1]} : vector<2x192xf32> to vector<2x64xf32>
    %794 = vector.extract_strided_slice %791 {offsets = [0, 128], sizes = [2, 64], strides = [1, 1]} : vector<2x192xf32> to vector<2x64xf32>
    %795 = vector.extract_strided_slice %785 {offsets = [0, 192], sizes = [2, 64], strides = [1, 1]} : vector<2x256xf32> to vector<2x64xf32>
    %796 = math.tanh %795 : vector<2x64xf32>
    %797 = arith.mulf %793, %780 : vector<2x64xf32>
    %798 = arith.mulf %792, %796 : vector<2x64xf32>
    %799 = arith.addf %797, %798 : vector<2x64xf32>
    %800 = math.tanh %799 : vector<2x64xf32>
    %801 = arith.mulf %794, %800 : vector<2x64xf32>
    %802 = vector.extract_strided_slice %528 {offsets = [28, 0], sizes = [2, 256], strides = [1, 1]} : vector<32x256xf32> to vector<2x256xf32>
    %cst_174 = arith.constant dense<0.000000e+00> : vector<2x256xf32>
    %803 = tpu.matmul %801, %529, %cst_174 {dimension_numbers = #tpu.dot_dimension_numbers<[1], [0], [0], [1], [0, 0, 1, 1], [], []>} : vector<2x64xf32>, vector<64x256xf32>, vector<2x256xf32> -> vector<2x256xf32>
    %804 = arith.addf %802, %803 : vector<2x256xf32>
    %805 = vector.extract_strided_slice %804 {offsets = [0, 0], sizes = [2, 192], strides = [1, 1]} : vector<2x256xf32> to vector<2x192xf32>
    %806 = arith.negf %805 : vector<2x192xf32>
    %807 = math.exp %806 : vector<2x192xf32>
    %cst_175 = arith.constant 1.000000e+00 : f32
    %808 = vector.broadcast %cst_175 : f32 to vector<2x192xf32>
    %809 = arith.addf %808, %807 : vector<2x192xf32>
    %810 = arith.divf %808, %809 : vector<2x192xf32>
    %811 = vector.extract_strided_slice %810 {offsets = [0, 0], sizes = [2, 64], strides = [1, 1]} : vector<2x192xf32> to vector<2x64xf32>
    %812 = vector.extract_strided_slice %810 {offsets = [0, 64], sizes = [2, 64], strides = [1, 1]} : vector<2x192xf32> to vector<2x64xf32>
    %813 = vector.extract_strided_slice %810 {offsets = [0, 128], sizes = [2, 64], strides = [1, 1]} : vector<2x192xf32> to vector<2x64xf32>
    %814 = vector.extract_strided_slice %804 {offsets = [0, 192], sizes = [2, 64], strides = [1, 1]} : vector<2x256xf32> to vector<2x64xf32>
    %815 = math.tanh %814 : vector<2x64xf32>
    %816 = arith.mulf %812, %799 : vector<2x64xf32>
    %817 = arith.mulf %811, %815 : vector<2x64xf32>
    %818 = arith.addf %816, %817 : vector<2x64xf32>
    %819 = math.tanh %818 : vector<2x64xf32>
    %820 = arith.mulf %813, %819 : vector<2x64xf32>
    %821 = vector.extract_strided_slice %528 {offsets = [30, 0], sizes = [2, 256], strides = [1, 1]} : vector<32x256xf32> to vector<2x256xf32>
    %cst_176 = arith.constant dense<0.000000e+00> : vector<2x256xf32>
    %822 = tpu.matmul %820, %529, %cst_176 {dimension_numbers = #tpu.dot_dimension_numbers<[1], [0], [0], [1], [0, 0, 1, 1], [], []>} : vector<2x64xf32>, vector<64x256xf32>, vector<2x256xf32> -> vector<2x256xf32>
    %823 = arith.addf %821, %822 : vector<2x256xf32>
    %824 = vector.extract_strided_slice %823 {offsets = [0, 0], sizes = [2, 192], strides = [1, 1]} : vector<2x256xf32> to vector<2x192xf32>
    %825 = arith.negf %824 : vector<2x192xf32>
    %826 = math.exp %825 : vector<2x192xf32>
    %cst_177 = arith.constant 1.000000e+00 : f32
    %827 = vector.broadcast %cst_177 : f32 to vector<2x192xf32>
    %828 = arith.addf %827, %826 : vector<2x192xf32>
    %829 = arith.divf %827, %828 : vector<2x192xf32>
    %830 = vector.extract_strided_slice %829 {offsets = [0, 0], sizes = [2, 64], strides = [1, 1]} : vector<2x192xf32> to vector<2x64xf32>
    %831 = vector.extract_strided_slice %829 {offsets = [0, 64], sizes = [2, 64], strides = [1, 1]} : vector<2x192xf32> to vector<2x64xf32>
    %832 = vector.extract_strided_slice %829 {offsets = [0, 128], sizes = [2, 64], strides = [1, 1]} : vector<2x192xf32> to vector<2x64xf32>
    %833 = vector.extract_strided_slice %823 {offsets = [0, 192], sizes = [2, 64], strides = [1, 1]} : vector<2x256xf32> to vector<2x64xf32>
    %834 = math.tanh %833 : vector<2x64xf32>
    %835 = arith.mulf %831, %818 : vector<2x64xf32>
    %836 = arith.mulf %830, %834 : vector<2x64xf32>
    %837 = arith.addf %835, %836 : vector<2x64xf32>
    %838 = math.tanh %837 : vector<2x64xf32>
    %839 = arith.mulf %832, %838 : vector<2x64xf32>
    %840 = vector.extract_strided_slice %839 {offsets = [1, 0], sizes = [1, 64], strides = [1, 1]} : vector<2x64xf32> to vector<1x64xf32>
    %cst_178 = arith.constant dense<0.000000e+00> : vector<1x3xf32>
    %841 = tpu.matmul %840, %530, %cst_178 {dimension_numbers = #tpu.dot_dimension_numbers<[1], [0], [0], [1], [0, 0, 1, 1], [], []>} : vector<1x64xf32>, vector<64x3xf32>, vector<1x3xf32> -> vector<1x3xf32>
    %842 = arith.addf %841, %531 : vector<1x3xf32>
    %c1_179 = arith.constant 1 : index
    %c0_180 = arith.constant 0 : index
    %843 = vector.load %arg21[%c1_179, %c0_180] : memref<2x3xf32, #tpu.memory_space<vmem>>, vector<1x3xf32>
    tpu.vector_store %arg21[%c1_179, %c0_180], %842 {strides = array<i32>} : memref<2x3xf32, #tpu.memory_space<vmem>>, vector<1x3xf32>,
    %c0_181 = arith.constant 0 : index
    %c0_182 = arith.constant 0 : index
    %844 = vector.load %arg22[%c0_181, %c0_182] : memref<2x64xf32, #tpu.memory_space<vmem>>, vector<2x64xf32>
    tpu.vector_store %arg22[%c0_181, %c0_182], %839 {strides = array<i32>} : memref<2x64xf32, #tpu.memory_space<vmem>>, vector<2x64xf32>,
    %c0_183 = arith.constant 0 : index
    %c0_184 = arith.constant 0 : index
    %845 = vector.load %arg23[%c0_183, %c0_184] : memref<2x64xf32, #tpu.memory_space<vmem>>, vector<2x64xf32>
    tpu.vector_store %arg23[%c0_183, %c0_184], %837 {strides = array<i32>} : memref<2x64xf32, #tpu.memory_space<vmem>>, vector<2x64xf32>,
    return
  }
}

</mosaic_0001>

<bundles_post_ra>
// kernel: cnnlstm_forward.1
= control target key start
LH: loop header
LB: loop body
LE: loop exit
PB: predicated region body
PF: predicated region fallthrough
CT: control target
= control target key end

     0   :  { %s10185_s0 = inlined_call_operand.vmem [shape: f32[32,10], index: 0, kind: input, shape index: {}]   ;;  %s10186_s1 = inlined_call_operand.hbm [shape: f32[5,32,64], index: 1, kind: input, shape index: {}]   ;;  %s10187_s2 = inlined_call_operand.hbm [shape: f32[4,16,64], index: 2, kind: input, shape index: {}]   ;;  %s10188_s3 = inlined_call_operand.hbm [shape: f32[10,320], index: 3, kind: input, shape index: {}]   ;;  %s10189_s4 = inlined_call_operand.vmem [shape: f32[1,64], index: 4, kind: input, shape index: {}]   ;;  %s10190_s5 = inlined_call_operand.hbm [shape: f32[64,320], index: 5, kind: input, shape index: {}]   ;;  %s10191_s6 = inlined_call_operand.vmem [shape: f32[1,64], index: 6, kind: input, shape index: {}]   ;;  %s10192_s7 = inlined_call_operand.hbm [shape: f32[64,320], index: 7, kind: input, shape index: {}]   ;;  %s10193_s8 = inlined_call_operand.vmem [shape: f32[1,64], index: 8, kind: input, shape index: {}]   ;;  %s10194_s9 = inlined_call_operand.hbm [shape: f32[64,320], index: 9, kind: input, shape index: {}]   ;;  %s10195_s10 = inlined_call_operand.vmem [shape: f32[1,64], index: 10, kind: input, shape index: {}]   ;;  %s10196_s11 = inlined_call_operand.vmem [shape: f32[64,256], index: 11, kind: input, shape index: {}]   ;;  %s10197_s12 = inlined_call_operand.hbm [shape: f32[64,256], index: 12, kind: input, shape index: {}]   ;;  %s10198_s13 = inlined_call_operand.vmem [shape: f32[1,256], index: 13, kind: input, shape index: {}]   ;;  %s10199_s14 = inlined_call_operand.hbm [shape: f32[64,256], index: 14, kind: input, shape index: {}]   ;;  %s10200_s15 = inlined_call_operand.hbm [shape: f32[64,256], index: 15, kind: input, shape index: {}]   ;;  %s10201_s16 = inlined_call_operand.vmem [shape: f32[1,256], index: 16, kind: input, shape index: {}]   ;;  %s10202_s17 = inlined_call_operand.vmem [shape: f32[64,3], index: 17, kind: input, shape index: {}]   ;;  %s10203_s18 = inlined_call_operand.hbm [shape: f32[1,3], index: 18, kind: input, shape index: {}]   ;;  %s10204_s19 = inlined_call_operand.vmem [shape: f32[2,64], index: 19, kind: input, shape index: {}]   ;;  %s10205_s20 = inlined_call_operand.vmem [shape: f32[2,64], index: 20, kind: input, shape index: {}]   ;;  %s10206_s21 = inlined_call_operand.hbm [shape: f32[2,3], index: 21, kind: output, shape index: {0}]   ;;  %s10207_s22 = inlined_call_operand.hbm [shape: f32[2,64], index: 22, kind: output, shape index: {1}]   ;;  %s10208_s23 = inlined_call_operand.hbm [shape: f32[2,64], index: 23, kind: output, shape index: {2}]  }
   0x1   :  { %10212 = sst [smem:[#allocation32_spill]] %s10185_s0 }
   0x2   :  { %10213 = sst [smem:[#allocation33_spill]] %s10186_s1 }
   0x3   :  { %10214 = sst [smem:[#allocation34_spill]] %s10187_s2 }
   0x4   :  { %10215 = sst [smem:[#allocation35_spill]] %s10188_s3 }
   0x5   :  { %10216 = sst [smem:[#allocation36_spill]] %s10189_s4 }
   0x6   :  { %10217 = sst [smem:[#allocation37_spill]] %s10190_s5 }
   0x7   :  { %10218 = sst [smem:[#allocation38_spill]] %s10191_s6 }
   0x8   :  { %10219 = sst [smem:[#allocation39_spill]] %s10192_s7 }
   0x9   :  { %29 = vsyncpa [#allocation4], 0 }
   0xa   :  { %30 = vsyncpa [#allocation7], 0 }
   0xb   :  { %31 = vsyncpa [#allocation10], 0 }
   0xc   :  { %32 = vsyncpa [#allocation13], 0 }
   0xd   :  { %33 = vsyncpa [#allocation16], 0 }
   0xe   :  { %34 = vsyncpa [#allocation19], 0 }
   0xf   :  { %35 = vsyncpa [#allocation5], 0 }
  0x10   :  { %36 = vsyncpa [#allocation22], 0  ;;  %s8136_s4 = smov [#allocation6]  }
  0x11   :  { %s56_s30 = sshll.u32 %s8136_s4, 4  ;;  %s57_s30 = int_to_ptr.vmem [resolvable:$true] %s56_s30 }
  0x12   :  { %s7868_s24 = scalar_lea.vmem %s57_s30, 1024  ;;  %p7873_p1 = scmp.lt.s32.totalorder %s57_s30, %s57_s30 }
  0x13   :  { %p7869_p0 = scmp.ne.s32.totalorder %s57_s30, %s7868_s24  ;;  %p7874_p2 = scmp.lt.s32.totalorder %s7868_s24, %s7868_s24 }
  0x15   :  { %p7875_p3 = por %p7874_p2, %p7873_p1 }
  0x17   :  { %p7876_p4 = pnand %p7875_p3, %p7869_p0 }
  0x19   :  { %7879 = shalt.err (!%p7876_p4)
}
  0x1a   :  { %s8137_s25 = smov 128   ;;  %s8138_s5 = smov 8  }
  0x1b   :  { %s10220_s2 = sld [smem:[#allocation34_spill]]  ;;  %s8139_s6 = smov [#allocation9]  }
  0x1c   :  { %s82_s27 = sshll.u32 %s8139_s6, 4  ;;  %s8140_s7 = smov [#allocation12]   ;;  %s83_s27 = int_to_ptr.vmem [resolvable:$true] %s82_s27 }
  0x1d   :  { %s110_s28 = sshll.u32 %s8140_s7, 4  ;;  %s7888_s29 = scalar_lea.vmem %s83_s27, 3072  ;;  %s111_s28 = int_to_ptr.vmem [resolvable:$true] %s110_s28 }
  0x1e   :  { %p7889_p5 = scmp.ne.s32.totalorder %s83_s27, %s7888_s29  ;;  %p7893_p6 = scmp.lt.s32.totalorder %s83_s27, %s83_s27 }
  0x1f   :  { %p7894_p7 = scmp.lt.s32.totalorder %s7888_s29, %s7888_s29 }
  0x21   :  { %62 = dma.hbm_to_vmem [thread:$0]  %s10220_s2, 1024, %s57_s30, [#allocation7], %s8137_s25, %s8137_s25, %s8138_s5  }
  0x22   :  { %p7895_p8 = por %p7894_p7, %p7893_p6 }
  0x24   :  { %p7896_p9 = pnand %p7895_p8, %p7889_p5 }
  0x26   :  { %7899 = shalt.err (!%p7896_p9)
}
  0x27   :  { %s8141_s3 = smov 384   ;;  %s8142_s0 = smov 24  }
  0x28   :  { %s10221_s30 = sld [smem:[#allocation37_spill]]  ;;  %s7908_s1 = scalar_lea.vmem %s111_s28, 3072 }
  0x29   :  { %p7909_p10 = scmp.ne.s32.totalorder %s111_s28, %s7908_s1  ;;  %p7913_p11 = scmp.lt.s32.totalorder %s111_s28, %s111_s28 }
  0x2a   :  { %p7914_p12 = scmp.lt.s32.totalorder %s7908_s1, %s7908_s1 }
  0x2c   :  { %p7915_p13 = por %p7914_p12, %p7913_p11 }
  0x2e   :  { %88 = dma.hbm_to_vmem [thread:$0]  %s10221_s30, 3072, %s83_s27, [#allocation10], %s8141_s3, %s8141_s3, %s8142_s0  }
  0x2f   :  { %p7916_p0 = pnand %p7915_p13, %p7909_p10 }
  0x31   :  { %7919 = shalt.err (!%p7916_p0)
}
  0x32   :  { %116 = dma.hbm_to_vmem [thread:$0]  %s10194_s9, 3072, %s111_s28, [#allocation13], %s8141_s3, %s8141_s3, %s8142_s0  }
  0x33   :  { %s8143_s6 = smov [#allocation15]   ;;  %s8144_s29 = smov [#allocation3]  }
  0x34   :  { %s140_s7 = sshll.u32 %s8143_s6, 4  ;;  %s44_s27 = sshll.u32 %s8144_s29, 4  ;;  %s141_s7 = int_to_ptr.vmem [resolvable:$true] %s140_s7  ;;  %s45_s27 = int_to_ptr.vmem [resolvable:$true] %s44_s27 }
  0x35   :  { %s7928_s4 = scalar_lea.vmem %s141_s7, 2048  ;;  %p7933_p2 = scmp.lt.s32.totalorder %s141_s7, %s141_s7 }
  0x36   :  { %p7929_p1 = scmp.ne.s32.totalorder %s141_s7, %s7928_s4  ;;  %p7934_p3 = scmp.lt.s32.totalorder %s7928_s4, %s7928_s4 }
  0x38   :  { %p7935_p4 = por %p7934_p3, %p7933_p2 }
  0x3a   :  { %p7936_p5 = pnand %p7935_p4, %p7929_p1 }
  0x3c   :  { %7939 = shalt.err (!%p7936_p5)
}
  0x3d   :  { %s10210_s24 = smov 256   ;;  %s8146_s30 = smov 16  }
  0x3e   :  { %146 = dma.hbm_to_vmem [thread:$0]  %s10199_s14, 2048, %s141_s7, [#allocation16], %s10210_s24, %s10210_s24, %s8146_s30  }
  0x3f   :  { %s7948_s9 = scalar_lea.vmem %s45_s27, 2560  ;;  %p7953_p7 = scmp.lt.s32.totalorder %s45_s27, %s45_s27 }
  0x40   :  { %p7949_p6 = scmp.ne.s32.totalorder %s45_s27, %s7948_s9  ;;  %p7954_p8 = scmp.lt.s32.totalorder %s7948_s9, %s7948_s9 }
  0x42   :  { %p7955_p9 = por %p7954_p8, %p7953_p7 }
  0x44   :  { %p7956_p10 = pnand %p7955_p9, %p7949_p6 }
  0x46   :  { %7959 = shalt.err (!%p7956_p10)
}
  0x47   :  { %s10222_s6 = sld [smem:[#allocation33_spill]]  ;;  %s8147_s29 = smov [#allocation8]  }
  0x48   :  { %s68_s4 = sshll.u32 %s8147_s29, 4  ;;  %s8148_s1 = smov [#allocation11]   ;;  %s69_s4 = int_to_ptr.vmem [resolvable:$true] %s68_s4 }
  0x49   :  { %s96_s14 = sshll.u32 %s8148_s1, 4  ;;  %s7968_s7 = scalar_lea.vmem %s69_s4, 768  ;;  %s97_s14 = int_to_ptr.vmem [resolvable:$true] %s96_s14 }
  0x4a   :  { %p7969_p11 = scmp.ne.s32.totalorder %s69_s4, %s7968_s7  ;;  %p7973_p12 = scmp.lt.s32.totalorder %s69_s4, %s69_s4 }
  0x4b   :  { %p7974_p13 = scmp.lt.s32.totalorder %s7968_s7, %s7968_s7 }
  0x4d   :  { %50 = dma.hbm_to_vmem [thread:$0]  %s10222_s6, 2560, %s45_s27, [#allocation4], %s8137_s25, %s8137_s25, %s8138_s5  }
  0x4e   :  { %p7975_p0 = por %p7974_p13, %p7973_p12 }
  0x50   :  { %p7976_p1 = pnand %p7975_p0, %p7969_p11 }
  0x52   :  { %7979 = shalt.err (!%p7976_p1)
}
  0x53   :  { %s10223_s24 = sld [smem:[#allocation35_spill]]  ;;  %s7988_s25 = scalar_lea.vmem %s97_s14, 3072 }
  0x54   :  { %p7989_p2 = scmp.ne.s32.totalorder %s97_s14, %s7988_s25  ;;  %p7993_p3 = scmp.lt.s32.totalorder %s97_s14, %s97_s14 }
  0x55   :  { %p7994_p4 = scmp.lt.s32.totalorder %s7988_s25, %s7988_s25 }
  0x57   :  { %p7995_p5 = por %p7994_p4, %p7993_p3 }
  0x59   :  { %74 = dma.hbm_to_vmem [thread:$0]  %s10223_s24, 768, %s69_s4, [#allocation7], %s8141_s3, %s8141_s3, %s8142_s0  }
  0x5a   :  { %p7996_p6 = pnand %p7995_p5, %p7989_p2 }
  0x5c   :  { %7999 = shalt.err (!%p7996_p6)
}
  0x5d   :  { %s10224_s28 = sld [smem:[#allocation39_spill]]  ;;  %s8149_s2 = smov [#allocation14]  }
  0x5e   :  { %s126_s6 = sshll.u32 %s8149_s2, 4  ;;  %s8150_s29 = smov [#allocation17]   ;;  %s127_s6 = int_to_ptr.vmem [resolvable:$true] %s126_s6 }
  0x5f   :  { %s152_s24 = sshll.u32 %s8150_s29, 4  ;;  %s8008_s4 = scalar_lea.vmem %s127_s6, 2048  ;;  %s153_s24 = int_to_ptr.vmem [resolvable:$true] %s152_s24 }
  0x60   :  { %p8009_p7 = scmp.ne.s32.totalorder %s127_s6, %s8008_s4  ;;  %p8013_p8 = scmp.lt.s32.totalorder %s127_s6, %s127_s6 }
  0x61   :  { %p8014_p9 = scmp.lt.s32.totalorder %s8008_s4, %s8008_s4 }
  0x63   :  { %102 = dma.hbm_to_vmem [thread:$0]  %s10224_s28, 3072, %s97_s14, [#allocation10], %s8141_s3, %s8141_s3, %s8142_s0  }
  0x64   :  { %p8015_p10 = por %p8014_p9, %p8013_p8 }
  0x66   :  { %p8016_p11 = pnand %p8015_p10, %p8009_p7 }
  0x68   :  { %8019 = shalt.err (!%p8016_p11)
}
  0x69   :  { %s10225_s1 = smov 256   ;;  %s8028_s3 = scalar_lea.vmem %s153_s24, 2048 }
  0x6a   :  { %132 = dma.hbm_to_vmem [thread:$0]  %s10197_s12, 2048, %s127_s6, [#allocation13], %s10225_s1, %s10225_s1, %s8146_s30  }
  0x6b   :  { %p8029_p12 = scmp.ne.s32.totalorder %s153_s24, %s8028_s3  ;;  %p8033_p13 = scmp.lt.s32.totalorder %s153_s24, %s153_s24 }
  0x6c   :  { %p8034_p0 = scmp.lt.s32.totalorder %s8028_s3, %s8028_s3 }
  0x6e   :  { %p8035_p1 = por %p8034_p0, %p8033_p13 }
  0x70   :  { %p8036_p2 = pnand %p8035_p1, %p8029_p12 }
  0x72   :  { %8039 = shalt.err (!%p8036_p2)
}
  0x73   :  { %158 = dma.hbm_to_vmem [thread:$0]  %s10200_s15, 2048, %s153_s24, [#allocation16], %s10225_s1, %s10225_s1, %s8146_s30  }
  0x74   :  { %s8151_s9 = smov [#allocation18]  }
  0x75   :  { %s169_s25 = sshll.u32 %s8151_s9, 4  ;;  %s170_s25 = int_to_ptr.vmem [resolvable:$true] %s169_s25 }
  0x76   :  { %s8048_s5 = scalar_lea.vmem %s170_s25, 16  ;;  %s8052_s12 = scalar_lea.vmem %s170_s25, 32 }
  0x77   :  { %p8049_p3 = scmp.ne.s32.totalorder %s170_s25, %s8048_s5  ;;  %p8053_p4 = scmp.lt.s32.totalorder %s170_s25, %s170_s25 }
  0x78   :  { %p8054_p5 = scmp.lt.s32.totalorder %s8052_s12, %s8048_s5 }
  0x7a   :  { %p8055_p6 = por %p8054_p5, %p8053_p4 }
  0x7c   :  { %p8056_p7 = pnand %p8055_p6, %p8049_p3 }
  0x7e   :  { %8059 = shalt.err (!%p8056_p7)
}
  0x7f   :  { %172 = dma.hbm_to_vmem [thread:$0]  %s10203_s18, 16, %s170_s25, [#allocation19]  }
  0x80   :  { %8120 = dma.done.wait [#allocation4], 2560  }
  0x81   :  { %8121 = vsyncadd [#allocation4], 4294964736 }
  0x82   :  { %8122 = dma.done.wait [#allocation7], 1792  }
  0x83   :  { %8123 = vsyncadd [#allocation7], 4294965504 }
  0x84   :  { %8124 = dma.done.wait [#allocation10], 6144  }
  0x85   :  { %8125 = vsyncadd [#allocation10], 4294961152 }
  0x86   :  { %8126 = dma.done.wait [#allocation13], 5120  }
  0x87   :  { %8127 = vsyncadd [#allocation13], 4294962176 }
  0x88   :  { %8128 = dma.done.wait [#allocation16], 4096  }
  0x89   :  { %8129 = vsyncadd [#allocation16], 4294963200 }
  0x8a   :  { %8130 = dma.done.wait [#allocation19], 16  }
  0x8b   :  { %8131 = vsyncadd [#allocation19], 4294967280  ;;  %v8152_v0 = vmov 0.0   ;;  %vm250_vm0 = vcmask 1041408   ;;  %v235_v1 = vld [vmem:[#allocation8 + $0x20] sm:$0x3]  ;;  %v438_v11 = vlaneseq }
  0x8c   :  { %324 = vmatprep.mubr.f32.mxu0 %v8152_v0  ;;  %v234_v2 = vld [vmem:[#allocation8 + $0x18] sm:$0x3]  ;;  %v232_v3 = vld [vmem:[#allocation8 + $0x8] sm:$0xff]  ;;  %6966 = vmatprep.subr.msk.mxu0 %vm250_vm0, %v235_v1  ;;  %v231_v4 = vld [vmem:[#allocation8] sm:$0xff]  ;;  %s10226_s30 = sld [smem:[#allocation32_spill]]  ;;  %vm237_vm1 = vcmask 80896  }
  0x8d   :  { %6967 = vmatpush1.msk.msra.mxu0 %vm250_vm0, %v234_v2  ;;  %v236_v6 = vld [vmem:[#allocation8 + $0x28] sm:$0x3]  ;;  %v233_v7 = vld [vmem:[#allocation8 + $0x10] sm:$0xff]  ;;  %v8362_v13 = vshrl.u32 %v438_v11, 7  ;;  %v581_v14 = vld [vmem:[#allocation9 + $0xb0] sm:$0xff]  ;;  %s8153_s7 = smov 64  }
  0x8e   :  { %290 = vmatprep.subr.mxu0 %v232_v3  ;;  %7247 = vmatprep.subr.msk.mxu1 %vm250_vm0, %v236_v6  ;;  %v580_v15 = vld [vmem:[#allocation9 + $0xa8] sm:$0xff]  ;;  %v578_v17 = vld [vmem:[#allocation9 + $0x98] sm:$0xff]  ;;  %v577_v18 = vld [vmem:[#allocation9 + $0x90] sm:$0xff]  ;;  %s10227_s0 = sld [smem:[#allocation36_spill]]  ;;  %vm583_vm6 = vcmask 523264   ;;  %vm1743_vm7 = vcmask 130048  }
  0x8f   :  { %291 = vmatpush1.msra.mxu0 %v231_v4  ;;  %7248 = vmatpush3.msk.msra.mxu1 %vm250_vm0, %v236_v6  ;;  %vm440_vm2 = vcmp.lt.s32.totalorder %v8362_v13, 2  ;;  %v575_v20 = vld [vmem:[#allocation9 + $0x80] sm:$0xff]  ;;  %v582_v21 = vld [vmem:[#allocation9 + $0xb8] sm:$0xff]  ;;  %v572_v26 = vld [vmem:[#allocation9 + $0x68] sm:$0xff]  ;;  %vm473_vm3 = vcmp.lt.s32.totalorder %v8362_v13, 1  ;;  %vm531_vm4 = vcmp.lt.s32.totalorder %v8362_v13, 6 }
  0x90   :  { %7249 = vmatprep.subr.mxu1 %v233_v7  ;;  %612 = vmatprep.subr.mxu0 %v581_v14  ;;  %v574_v24 = vld [vmem:[#allocation9 + $0x78] sm:$0xff]  ;;  %v579_v28 = vld [vmem:[#allocation9 + $0xa0] sm:$0xff]  ;;  %v569_v31 = vld [vmem:[#allocation9 + $0x50] sm:$0xff]  ;;  %vm514_vm5 = vcmp.lt.s32.totalorder %v8362_v13, 7  ;;  %s10228_s25 = sld [smem:[#allocation38_spill]]  ;;  %vm3039_vm8 = vcmask 517120  }
  0x91   :  { %7250 = vmatpush3.msra.mxu1 %v233_v7  ;;  %v571_v29 = vld [vmem:[#allocation9 + $0x60] sm:$0xff]  ;;  %v576_v32 = vld [vmem:[#allocation9 + $0x88] sm:$0xff]  ;;  %v566_v36 = vld [vmem:[#allocation9 + $0x38] sm:$0xff]  ;;  %vm3156_vm9 = vcmask 519170   ;;  %vm3274_vm10 = vcmask 521220   ;;  %vm3392_vm11 = vcmask 523270  }
  0x92   :  { %v227_v5 = vld [vmem:[%s10226_s30] sm:$0xff]  ;;  %v228_v8 = vld [vmem:[%s10226_s30 + $0x8] sm:$0xff]  ;;  %v229_v9 = vld [vmem:[%s10226_s30 + $0x10] sm:$0xff]  ;;  %7257 = vmatprep.subr.mxu1 %v582_v21  ;;  %vm8154_vm12 = vmmov 0   ;;  %vm5923_vm13 = vcmask 16384  }
  0x93   :  { %7251 = vmatprep.mubr.msk.f32.mxu1 %vm237_vm1, %v227_v5  ;;  %6968 = vmatmul.mubr.msk.f32.vlgmr.msra.gmra.mxu0 %vm237_vm1, %v227_v5  ;;  %v230_v10 = vld [vmem:[%s10226_s30 + $0x18] sm:$0xff]  ;;  %v573_v38 = vld [vmem:[#allocation9 + $0x70] sm:$0xff]  ;;  %v563_v41 = vld [vmem:[#allocation9 + $0x20] sm:$0xff] }
  0x94   :  { %330 = vmatprep.mubr.f32.mxu0 %v8152_v0  ;;  %7252 = vmatmul.mubr.msk.f32.vlgmr.msra.gmra.mxu1 %vm237_vm1, %v228_v8  ;;  %v568_v34 = vld [vmem:[#allocation9 + $0x48] sm:$0xff]  ;;  %v565_v39 = vld [vmem:[#allocation9 + $0x30] sm:$0xff]  ;;  %v570_v43 = vld [vmem:[#allocation9 + $0x58] sm:$0xff] }
  0x95   :  { %7254 = vmatprep.mubr.msk.f32.mxu1 %vm237_vm1, %v229_v9  ;;  %613 = vmatpush1.msra.mxu0 %v580_v15  ;;  %v562_v44 = vld [vmem:[#allocation9 + $0x18] sm:$0xff]  ;;  %v560_v48 = vld [vmem:[#allocation9 + $0x8] sm:$0xff]  ;;  %v567_v49 = vld [vmem:[#allocation9 + $0x40] sm:$0xff] }
  0x96   :  { %614 = vmatprep.subr.mxu0 %v578_v17  ;;  %7258 = vmatpush3.msra.mxu1 %v582_v21  ;;  %v559_v50 = vld [vmem:[#allocation9] sm:$0xff]  ;;  %v564_v51 = vld [vmem:[#allocation9 + $0x28] sm:$0xff]  ;;  %v561_v52 = vld [vmem:[#allocation9 + $0x10] sm:$0xff] }
  0x97   :  { %6969 = vmatmul.mubr.msk.f32.gmra.mxu0 %vm237_vm1, %v228_v8  ;;  %7259 = vmatprep.subr.mxu1 %v579_v28  ;;  %v8410_v58 = vld [vmem:[#allocation3 + $0x8] sm:$0xff]  ;;  %v8414_v62 = vld [vmem:[#allocation3 + $0x40] sm:$0xff]  ;;  %v8428_v8 = vld [vmem:[#allocation3 + $0x10] sm:$0xff] }
  0x98   :  { %336 = vmatprep.mubr.f32.mxu0 %v8152_v0  ;;  %7255 = vmatmul.mubr.msk.f32.gmra.mxu1 %vm237_vm1, %v230_v10  ;;  %v8412_v60 = vld [vmem:[#allocation3 + $0x28] sm:$0xff]  ;;  %v8438_v15 = vld [vmem:[#allocation3] sm:$0xff] }
  0x99   :  { %615 = vmatpush1.msra.mxu0 %v577_v18  ;;  %7260 = vmatpush3.msra.mxu1 %v579_v28  ;;  %v8416_v63 = vld [vmem:[#allocation3 + $0x48] sm:$0xff] }
  0x9a   :  { %616 = vmatprep.subr.mxu0 %v575_v20  ;;  %7261 = vmatprep.subr.mxu1 %v576_v32 }
  0x9b   :  { %6970 = vmatmul.mubr.msk.f32.gmra.mxu0 %vm237_vm1, %v229_v9  ;;  %7262 = vmatpush3.msra.mxu1 %v576_v32  ;;  %v8430_v9 = vld [vmem:[#allocation3 + $0x50] sm:$0xff] }
  0x9c   :  { %342 = vmatprep.mubr.f32.mxu0 %v8152_v0  ;;  %617 = vmatpush1.msra.mxu0 %v574_v24 }
  0x9d   :  { %618 = vmatprep.subr.mxu0 %v572_v26  ;;  %7263 = vmatprep.subr.mxu1 %v573_v38 }
  0x9e   :  { %619 = vmatpush1.msra.mxu0 %v571_v29  ;;  %7264 = vmatpush3.msra.mxu1 %v573_v38 }
  0x9f   :  { %6971 = vmatmul.mubr.msk.f32.gmra.mxu0 %vm237_vm1, %v230_v10  ;;  %620 = vmatprep.subr.mxu0 %v569_v31  ;;  %v8432_v10 = vld [vmem:[#allocation3 + $0x30] sm:$0xff]  ;;  %v8460_v31 = vld [vmem:[#allocation3 + $0x58] sm:$0xff] }
  0xa0   :  { %660 = vmatprep.mubr.f32.mxu0 %v8152_v0  ;;  %621 = vmatpush1.msra.mxu0 %v568_v34 }
  0xa1   :  { %622 = vmatprep.subr.mxu0 %v566_v36  ;;  %7265 = vmatprep.subr.mxu1 %v570_v43 }
  0xa2   :  { %623 = vmatpush1.msra.mxu0 %v565_v39  ;;  %7266 = vmatpush3.msra.mxu1 %v570_v43  ;;  %v8472_v43 = vld [vmem:[#allocation3 + $0x60] sm:$0xff] }
  0xa3   :  { %624 = vmatprep.subr.mxu0 %v563_v41  ;;  %7267 = vmatprep.subr.mxu1 %v567_v49 }
  0xa4   :  { %625 = vmatpush1.msra.mxu0 %v562_v44  ;;  %7268 = vmatpush3.msra.mxu1 %v567_v49 }
  0xa5   :  { %626 = vmatprep.subr.mxu0 %v560_v48  ;;  %7269 = vmatprep.subr.mxu1 %v564_v51  ;;  %v8476_v48 = vld [vmem:[#allocation3 + $0x80] sm:$0xff] }
  0xa6   :  { %627 = vmatpush1.msra.mxu0 %v559_v50  ;;  %7270 = vmatpush3.msra.mxu1 %v564_v51  ;;  %v8478_v51 = vld [vmem:[#allocation3 + $0x78] sm:$0xff] }
  0xa7   :  { %7271 = vmatprep.subr.mxu1 %v561_v52 }
  0xa8   :  { %7272 = vmatpush3.msra.mxu1 %v561_v52 }
 0x153   :  { %v8360_v12 = vpop.f32.mrf.mxu0 }
 0x154   :  { %457 = vrot.lane.b32.xlu0 %v8360_v12, %s8153_s7  ;;  %v434_v22 = vrot.slane %v8360_v12, 6  ;;  %v8405_v54 = vpop.f32.mrf.mxu1 }
 0x155   :  { %v8366_v16 = vpop.f32.mrf.mxu0  ;;  %v528_v2 = vrot.slane %v8405_v54, 2 }
 0x156   :  { %498 = vrot.lane.b32.xlu1 %v8366_v16, %s8153_s7  ;;  %v8408_v57 = vpop.f32.mrf.mxu1  ;;  %v486_v12 = vmul.f32 %v8366_v16, %v8414_v62  ;;  %v8450_v16 = vld [vmem:[#allocation3 + $0x38] sm:$0xff] }
 0x157   :  { %v332_v19 = vpop.f32.mrf.mxu0  ;;  %v527_v3 = vrot.slane %v8408_v57, 2 }
 0x158   :  { %v435_v23 = vrot.slane %v332_v19, 6  ;;  %v8426_v7 = vpop.f32.mrf.mxu1 }
 0x159   :  { %v8372_v25 = vpop.f32.mrf.mxu0  ;;  %v534_v21 = vsel %vm531_vm4, %v527_v3, %v528_v2  ;;  %v530_v41 = vrot.slane %v8426_v7, 2 }
 0x15a   :  { %v8376_v27 = vsel %vm440_vm2, %v434_v22, %v435_v23  ;;  %459 = vrot.lane.b32.xlu1 %v332_v19, %s8153_s7  ;;  %v487_v14 = vmul.f32 %v8372_v25, %v8416_v63  ;;  %v8440_v19 = vld [vmem:[#allocation3 + $0x18] sm:$0xff]  ;;  %v425_v28 = vpop.f32.mrf.mxu1 }
 0x15b   :  { %v338_v30 = vpop.f32.mrf.mxu0  ;;  %v446_v4 = vmul.f32 %v8376_v27, %v8410_v58 }
 0x15c   :  { %v436_v33 = vrot.slane %v338_v30, 6 }
 0x15d   :  { %v8379_v35 = vpop.f32.mrf.mxu0 }
 0x15e   :  { %v8383_v37 = vsel %vm440_vm2, %v435_v23, %v436_v33  ;;  %461 = vrot.lane.b32.xlu1 %v338_v30, %s8153_s7 }
 0x15f   :  { %v344_v40 = vpop.f32.mrf.mxu0  ;;  %v447_v24 = vmul.f32 %v8383_v37, %v8428_v8 }
 0x160   :  { %v437_v42 = vrot.slane %v344_v40, 6  ;;  %463 = vrot.lane.b32.xlu0 %v344_v40, %s8153_s7 }
 0x161   :  { %v8387_v45 = vpop.f32.mrf.mxu0 }
 0x162   :  { %v8391_v46 = vsel %vm440_vm2, %v436_v33, %v437_v42  ;;  %v8395_v47 = vsel %vm440_vm2, %v437_v42, %v434_v22  ;;  %504 = vrot.lane.b32.xlu1 %v8387_v45, %s8153_s7  ;;  %v8448_v22 = vld [vmem:[#allocation3 + $0x20] sm:$0xff]  ;;  %v529_v42 = vrot.slane %v425_v28, 2 }
 0x163   :  { %v445_v30 = vmul.f32 %v8395_v47, %v8438_v15  ;;  %v489_v47 = vmul.f32 %v8387_v45, %v8460_v31  ;;  %v536_v45 = vmul.f32 %v534_v21, %v8476_v48 }
 0x164   :  { %500 = vrot.lane.b32.xlu0 %v8372_v25, %s8153_s7  ;;  %v488_v25 = vmul.f32 %v8379_v35, %v8430_v9 }
 0x168   :  { %502 = vrot.lane.b32.xlu0 %v8379_v35, %s8153_s7  ;;  %v448_v35 = vmul.f32 %v8391_v46, %v8440_v19 }
 0x1c6   :  { %v458_v55 = vpop.permute.xlu0 %457 }
 0x1c7   :  { %v469_v59 = vrot.slane %v458_v55, 7 }
 0x1c8   :  { %v8403_v53 = vpop.permute.xlu1 %498 }
 0x1c9   :  { %v510_v40 = vrot.slane %v8403_v53, 1 }
 0x1cc   :  { %v460_v56 = vpop.permute.xlu1 %459 }
 0x1cd   :  { %v470_v61 = vrot.slane %v460_v56, 7 }
 0x1cf   :  { %v476_v1 = vsel %vm473_vm3, %v469_v59, %v470_v61 }
 0x1d0   :  { %v479_v5 = vmul.f32 %v476_v1, %v8412_v60  ;;  %v462_v6 = vpop.permute.xlu1 %461  ;;  %v8488_v1 = vld [vmem:[#allocation3 + $0x70] sm:$0xff] }
 0x1d1   :  { %v471_v11 = vrot.slane %v462_v6, 7  ;;  %v535_v6 = vsel %vm531_vm4, %v530_v41, %v527_v3 }
 0x1d2   :  { %v483_v17 = vadd.f32 %v479_v5, %v446_v4  ;;  %v464_v18 = vpop.permute.xlu0 %463  ;;  %v8490_v5 = vld [vmem:[#allocation3 + $0x98] sm:$0xff] }
 0x1d3   :  { %v475_v20 = vsel %vm473_vm3, %v470_v61, %v471_v11  ;;  %v472_v23 = vrot.slane %v464_v18, 7  ;;  %v8486_v61 = vld [vmem:[#allocation3 + $0x68] sm:$0xff]  ;;  %v532_v18 = vsel %vm531_vm4, %v529_v42, %v530_v41 }
 0x1d4   :  { %v480_v26 = vmul.f32 %v475_v20, %v8432_v10  ;;  %v505_v27 = vpop.permute.xlu1 %504  ;;  %v491_v29 = vadd.f32 %v487_v14, %v483_v17  ;;  %v8501_v17 = vld [vmem:[#allocation3 + $0x90] sm:$0xff]  ;;  %v6977_v20 = vld [vmem:[%s10227_s0] ss:$0 sm:$0xff] }
 0x1d5   :  { %v474_v32 = vsel %vm473_vm3, %v471_v11, %v472_v23  ;;  %v477_v33 = vsel %vm473_vm3, %v472_v23, %v469_v59  ;;  %v513_v34 = vrot.slane %v505_v27, 1  ;;  %v8495_v11 = vld [vmem:[#allocation3 + $0x88] sm:$0xff]  ;;  %v538_v27 = vmul.f32 %v532_v18, %v8501_v17  ;;  %v903_v18 = vld [vmem:[#allocation11 + $0x70] sm:$0xff] }
 0x1d6   :  { %v484_v36 = vadd.f32 %v480_v26, %v447_v24  ;;  %v478_v37 = vmul.f32 %v477_v33, %v8448_v22  ;;  %v481_v38 = vmul.f32 %v474_v32, %v8450_v16  ;;  %v501_v39 = vpop.permute.xlu0 %500 }
 0x1d7   :  { %v511_v44 = vrot.slane %v501_v39, 1  ;;  %v518_v52 = vsel %vm514_vm5, %v513_v34, %v510_v40 }
 0x1d8   :  { %v482_v46 = vadd.f32 %v478_v37, %v445_v30  ;;  %v485_v49 = vadd.f32 %v481_v38, %v448_v35  ;;  %v492_v50 = vadd.f32 %v488_v25, %v484_v36  ;;  %v522_v7 = vmul.f32 %v518_v52, %v8478_v51  ;;  %v907_v52 = vld [vmem:[#allocation11 + $0x90] sm:$0xff] }
 0x1d9   :  { %v517_v53 = vsel %vm514_vm5, %v510_v40, %v511_v44  ;;  %v539_v25 = vmul.f32 %v535_v6, %v8490_v5 }
 0x1da   :  { %v493_v55 = vadd.f32 %v489_v47, %v485_v49  ;;  %v490_v56 = vadd.f32 %v486_v12, %v482_v46  ;;  %v519_v57 = vmul.f32 %v517_v53, %v8472_v43  ;;  %v503_v59 = vpop.permute.xlu0 %502  ;;  %v533_v12 = vsel %vm531_vm4, %v528_v2, %v529_v42  ;;  %v910_v47 = vld [vmem:[#allocation11 + $0xa8] sm:$0xff]  ;;  %v912_v46 = vld [vmem:[#allocation11 + $0xb8] sm:$0xff]  ;;  %v909_v53 = vld [vmem:[#allocation11 + $0xa0] sm:$0xff] }
 0x1db   :  { %v512_v4 = vrot.slane %v503_v59, 1  ;;  %v537_v26 = vmul.f32 %v533_v12, %v8495_v11  ;;  %7279 = vmatprep.subr.mxu1 %v912_v46 }
 0x1dc   :  { %v523_v14 = vadd.f32 %v519_v57, %v490_v56  ;;  %v526_v54 = vadd.f32 %v522_v7, %v493_v55  ;;  %v905_v56 = vld [vmem:[#allocation11 + $0x80] sm:$0xff]  ;;  %v902_v7 = vld [vmem:[#allocation11 + $0x68] sm:$0xff] }
 0x1dd   :  { %v515_v3 = vsel %vm514_vm5, %v512_v4, %v513_v34  ;;  %v516_v21 = vsel %vm514_vm5, %v511_v44, %v512_v4  ;;  %v911_v44 = vld [vmem:[#allocation11 + $0xb0] sm:$0xff]  ;;  %v906_v4 = vld [vmem:[#allocation11 + $0x88] sm:$0xff] }
 0x1de   :  { %v540_v23 = vadd.f32 %v536_v45, %v523_v14  ;;  %v520_v2 = vmul.f32 %v516_v21, %v8486_v61  ;;  %v521_v24 = vmul.f32 %v515_v3, %v8488_v1  ;;  %v543_v36 = vadd.f32 %v539_v25, %v526_v54  ;;  %941 = vmatprep.subr.mxu0 %v911_v44  ;;  %v904_v45 = vld [vmem:[#allocation11 + $0x78] sm:$0xff]  ;;  %v901_v14 = vld [vmem:[#allocation11 + $0x60] sm:$0xff]  ;;  %v899_v3 = vld [vmem:[#allocation11 + $0x50] sm:$0xff] }
 0x1df   :  { %v898_v54 = vld [vmem:[#allocation11 + $0x48] sm:$0xff] }
 0x1e0   :  { %v551_v28 = vadd.f32 %v6977_v20, %v540_v23  ;;  %v524_v30 = vadd.f32 %v520_v2, %v491_v29  ;;  %v525_v32 = vadd.f32 %v521_v24, %v492_v50  ;;  %v554_v41 = vadd.f32 %v6977_v20, %v543_v36  ;;  %v908_v50 = vld [vmem:[#allocation11 + $0x98] sm:$0xff] }
 0x1e1   :  { %v900_v23 = vld [vmem:[#allocation11 + $0x58] sm:$0xff] }
 0x1e2   :  { %v555_v33 = vmax.f32 %v551_v28, 0.0  ;;  %v541_v34 = vadd.f32 %v537_v26, %v524_v30  ;;  %v542_v35 = vadd.f32 %v538_v27, %v525_v32  ;;  %v558_v29 = vmax.f32 %v554_v41, 0.0  ;;  %v896_v24 = vld [vmem:[#allocation11 + $0x38] sm:$0xff]  ;;  %v895_v27 = vld [vmem:[#allocation11 + $0x30] sm:$0xff]  ;;  %v897_v28 = vld [vmem:[#allocation11 + $0x40] sm:$0xff] }
 0x1e3   :  { %v893_v32 = vld [vmem:[#allocation11 + $0x20] sm:$0xff] }
 0x1e4   :  { %6978 = vmatmul.mubr.msk.f32.vlgmr.msra.gmra.mxu0 %vm583_vm6, %v555_v33  ;;  %7273 = vmatprep.mubr.msk.f32.mxu1 %vm583_vm6, %v555_v33  ;;  %v552_v37 = vadd.f32 %v6977_v20, %v541_v34  ;;  %v553_v38 = vadd.f32 %v6977_v20, %v542_v35  ;;  %v892_v33 = vld [vmem:[#allocation11 + $0x18] sm:$0xff]  ;;  %v894_v34 = vld [vmem:[#allocation11 + $0x28] sm:$0xff] }
 0x1e5   :  { %666 = vmatprep.mubr.f32.mxu0 %v8152_v0  ;;  %942 = vmatpush1.msra.mxu0 %v910_v47 }
 0x1e6   :  { %v556_v39 = vmax.f32 %v552_v37, 0.0  ;;  %v557_v40 = vmax.f32 %v553_v38, 0.0  ;;  %943 = vmatprep.subr.mxu0 %v908_v50  ;;  %v890_v37 = vld [vmem:[#allocation11 + $0x8] sm:$0xff]  ;;  %v889_v38 = vld [vmem:[#allocation11] sm:$0xff] }
 0x1e7   :  { %944 = vmatpush1.msra.mxu0 %v907_v52 }
 0x1e8   :  { %6979 = vmatmul.mubr.msk.f32.gmra.mxu0 %vm583_vm6, %v556_v39  ;;  %7274 = vmatmul.mubr.msk.f32.vlgmr.msra.gmra.mxu1 %vm583_vm6, %v556_v39  ;;  %v891_v39 = vld [vmem:[#allocation11 + $0x10] sm:$0xff] }
 0x1e9   :  { %7276 = vmatprep.mubr.msk.f32.mxu1 %vm583_vm6, %v557_v40  ;;  %672 = vmatprep.mubr.f32.mxu0 %v8152_v0 }
 0x1ea   :  { %7280 = vmatpush3.msra.mxu1 %v912_v46  ;;  %945 = vmatprep.subr.mxu0 %v905_v56 }
 0x1eb   :  { %7281 = vmatprep.subr.mxu1 %v909_v53  ;;  %946 = vmatpush1.msra.mxu0 %v904_v45 }
 0x1ec   :  { %6980 = vmatmul.mubr.msk.f32.gmra.mxu0 %vm583_vm6, %v557_v40  ;;  %7277 = vmatmul.mubr.msk.f32.gmra.mxu1 %vm583_vm6, %v558_v29 }
 0x1ed   :  { %678 = vmatprep.mubr.f32.mxu0 %v8152_v0  ;;  %7282 = vmatpush3.msra.mxu1 %v909_v53 }
 0x1ee   :  { %7283 = vmatprep.subr.mxu1 %v906_v4  ;;  %947 = vmatprep.subr.mxu0 %v902_v7 }
 0x1ef   :  { %7284 = vmatpush3.msra.mxu1 %v906_v4  ;;  %948 = vmatpush1.msra.mxu0 %v901_v14 }
 0x1f0   :  { %6981 = vmatmul.mubr.msk.f32.gmra.mxu0 %vm583_vm6, %v558_v29  ;;  %7285 = vmatprep.subr.mxu1 %v903_v18 }
 0x1f1   :  { %989 = vmatprep.mubr.f32.mxu0 %v8152_v0  ;;  %949 = vmatprep.subr.mxu0 %v899_v3 }
 0x1f2   :  { %7286 = vmatpush3.msra.mxu1 %v903_v18  ;;  %950 = vmatpush1.msra.mxu0 %v898_v54 }
 0x1f3   :  { %7287 = vmatprep.subr.mxu1 %v900_v23  ;;  %951 = vmatprep.subr.mxu0 %v896_v24 }
 0x1f4   :  { %7288 = vmatpush3.msra.mxu1 %v900_v23  ;;  %952 = vmatpush1.msra.mxu0 %v895_v27 }
 0x1f5   :  { %7289 = vmatprep.subr.mxu1 %v897_v28  ;;  %953 = vmatprep.subr.mxu0 %v893_v32 }
 0x1f6   :  { %7290 = vmatpush3.msra.mxu1 %v897_v28  ;;  %954 = vmatpush1.msra.mxu0 %v892_v33 }
 0x1f7   :  { %7291 = vmatprep.subr.mxu1 %v894_v34  ;;  %955 = vmatprep.subr.mxu0 %v890_v37 }
 0x1f8   :  { %7292 = vmatpush3.msra.mxu1 %v894_v34  ;;  %956 = vmatpush1.msra.mxu0 %v889_v38 }
 0x1f9   :  { %7293 = vmatprep.subr.mxu1 %v891_v39 }
 0x1fa   :  { %7294 = vmatpush3.msra.mxu1 %v891_v39 }
 0x2a4   :  { %v8529_v42 = vpop.f32.mrf.mxu0 }
 0x2a5   :  { %790 = vrot.lane.b32.xlu0 %v8529_v42, %s8153_s7  ;;  %v770_v57 = vrot.slane %v8529_v42, 6 }
 0x2a6   :  { %v8533_v49 = vpop.f32.mrf.mxu0 }
 0x2a7   :  { %v818_v33 = vmul.f32 %v8533_v49, %v8414_v62 }
 0x2a8   :  { %v668_v55 = vpop.f32.mrf.mxu0  ;;  %v7275_v41 = vpop.f32.mrf.mxu1 }
 0x2a9   :  { %v771_v59 = vrot.slane %v668_v55, 6  ;;  %792 = vrot.lane.b32.xlu0 %v668_v55, %s8153_s7  ;;  %v859_v54 = vrot.slane %v7275_v41, 2 }
 0x2aa   :  { %v8537_v6 = vpop.f32.mrf.mxu0  ;;  %v751_v42 = vpop.f32.mrf.mxu1 }
 0x2ab   :  { %v776_v12 = vsel %vm440_vm2, %v770_v57, %v771_v59  ;;  %v858_v23 = vrot.slane %v751_v42, 2 }
 0x2ac   :  { %v674_v20 = vpop.f32.mrf.mxu0  ;;  %v7278_v47 = vpop.f32.mrf.mxu1  ;;  %v779_v53 = vmul.f32 %v776_v12, %v8410_v58 }
 0x2ad   :  { %v772_v21 = vrot.slane %v674_v20, 6  ;;  %832 = vrot.lane.b32.xlu0 %v8537_v6, %s8153_s7  ;;  %v864_v38 = vsel %vm531_vm4, %v858_v23, %v859_v54 }
 0x2ae   :  { %v8543_v2 = vpop.f32.mrf.mxu0 }
 0x2af   :  { %v8547_v25 = vsel %vm440_vm2, %v771_v59, %v772_v21  ;;  %v819_v59 = vmul.f32 %v8537_v6, %v8416_v63 }
 0x2b0   :  { %v680_v26 = vpop.f32.mrf.mxu0 }
 0x2b1   :  { %v773_v30 = vrot.slane %v680_v26, 6  ;;  %834 = vrot.lane.b32.xlu0 %v8543_v2, %s8153_s7  ;;  %796 = vrot.lane.b32.xlu1 %v680_v26, %s8153_s7 }
 0x2b2   :  { %v682_v40 = vpop.f32.mrf.mxu0 }
 0x2b3   :  { %v8554_v35 = vsel %vm440_vm2, %v772_v21, %v773_v30  ;;  %v777_v36 = vsel %vm440_vm2, %v773_v30, %v770_v57  ;;  %v761_v57 = vpop.f32.mrf.mxu1 }
 0x2b4   :  { %v860_v4 = vrot.slane %v761_v57, 2  ;;  %v778_v6 = vmul.f32 %v777_v36, %v8438_v15 }
 0x2b5   :  { %830 = vrot.lane.b32.xlu1 %v8533_v49, %s8153_s7  ;;  %v6986_v49 = vld [vmem:[%s10228_s25] ss:$0 sm:$0xff] }
 0x2b6   :  { %v863_v26 = vsel %vm531_vm4, %v859_v54, %v860_v4  ;;  %v820_v54 = vmul.f32 %v8543_v2, %v8430_v9 }
 0x2b7   :  { %v867_v39 = vmul.f32 %v863_v26, %v8495_v11 }
 0x2b9   :  { %794 = vrot.lane.b32.xlu1 %v674_v20, %s8153_s7 }
 0x2bd   :  { %836 = vrot.lane.b32.xlu1 %v682_v40, %s8153_s7 }
 0x317   :  { %v791_v29 = vpop.permute.xlu0 %790 }
 0x318   :  { %v802_v46 = vrot.slane %v791_v29, 7 }
 0x31b   :  { %v793_v44 = vpop.permute.xlu0 %792 }
 0x31c   :  { %v803_v50 = vrot.slane %v793_v44, 7 }
 0x31e   :  { %v808_v52 = vsel %vm473_vm3, %v802_v46, %v803_v50 }
 0x31f   :  { %v811_v55 = vmul.f32 %v808_v52, %v8412_v60  ;;  %v833_v56 = vpop.permute.xlu0 %832  ;;  %v866_v52 = vmul.f32 %v864_v38, %v8476_v48 }
 0x320   :  { %v843_v20 = vrot.slane %v833_v56, 1  ;;  %v861_v56 = vrot.slane %v7278_v47, 2 }
 0x321   :  { %v815_v45 = vadd.f32 %v811_v55, %v779_v53  ;;  %v780_v55 = vmul.f32 %v8547_v25, %v8428_v8 }
 0x323   :  { %v823_v7 = vadd.f32 %v819_v59, %v815_v45  ;;  %v835_v14 = vpop.permute.xlu0 %834  ;;  %v797_v18 = vpop.permute.xlu1 %796  ;;  %v781_v45 = vmul.f32 %v8554_v35, %v8440_v19  ;;  %v862_v35 = vsel %vm531_vm4, %v860_v4, %v861_v56 }
 0x324   :  { %v844_v3 = vrot.slane %v835_v14, 1  ;;  %v805_v21 = vrot.slane %v797_v18, 7 }
 0x326   :  { %v847_v12 = vsel %vm514_vm5, %v843_v20, %v844_v3  ;;  %v809_v24 = vsel %vm473_vm3, %v805_v21, %v802_v46 }
 0x327   :  { %v851_v27 = vmul.f32 %v847_v12, %v8486_v61  ;;  %v810_v28 = vmul.f32 %v809_v24, %v8448_v22  ;;  %v831_v30 = vpop.permute.xlu1 %830  ;;  %v821_v12 = vmul.f32 %v682_v40, %v8460_v31 }
 0x328   :  { %v842_v32 = vrot.slane %v831_v30, 1 }
 0x329   :  { %v855_v34 = vadd.f32 %v851_v27, %v823_v7  ;;  %v814_v37 = vadd.f32 %v810_v28, %v778_v6 }
 0x32a   :  { %v848_v41 = vsel %vm514_vm5, %v842_v32, %v843_v20 }
 0x32b   :  { %v822_v36 = vadd.f32 %v818_v33, %v814_v37  ;;  %v850_v29 = vmul.f32 %v848_v41, %v8472_v43  ;;  %v795_v42 = vpop.permute.xlu1 %794  ;;  %v871_v44 = vadd.f32 %v867_v39, %v855_v34  ;;  %v868_v37 = vmul.f32 %v862_v35, %v8501_v17  ;;  %v1227_v35 = vld [vmem:[#allocation12 + $0x48] sm:$0xff] }
 0x32c   :  { %v804_v46 = vrot.slane %v795_v42, 7 }
 0x32d   :  { %v854_v53 = vadd.f32 %v850_v29, %v822_v36  ;;  %v882_v25 = vadd.f32 %v6986_v49, %v871_v44  ;;  %v1240_v44 = vld [vmem:[#allocation12 + $0xb0] sm:$0xff] }
 0x32e   :  { %v806_v57 = vsel %vm473_vm3, %v804_v46, %v805_v21  ;;  %v807_v59 = vsel %vm473_vm3, %v803_v50, %v804_v46  ;;  %v865_v50 = vsel %vm531_vm4, %v861_v56, %v858_v23  ;;  %1270 = vmatprep.subr.mxu0 %v1240_v44  ;;  %v1236_v56 = vld [vmem:[#allocation12 + $0x90] sm:$0xff] }
 0x32f   :  { %v870_v7 = vadd.f32 %v866_v52, %v854_v53  ;;  %v812_v14 = vmul.f32 %v807_v59, %v8432_v10  ;;  %v813_v18 = vmul.f32 %v806_v57, %v8450_v16  ;;  %v837_v20 = vpop.permute.xlu1 %836  ;;  %v886_v33 = vmax.f32 %v882_v25, 0.0  ;;  %v1239_v52 = vld [vmem:[#allocation12 + $0xa8] sm:$0xff]  ;;  %v1237_v53 = vld [vmem:[#allocation12 + $0x98] sm:$0xff]  ;;  %v1238_v57 = vld [vmem:[#allocation12 + $0xa0] sm:$0xff] }
 0x330   :  { %v845_v47 = vrot.slane %v837_v20, 1  ;;  %v869_v4 = vmul.f32 %v865_v50, %v8490_v5  ;;  %v1235_v20 = vld [vmem:[#allocation12 + $0x88] sm:$0xff] }
 0x331   :  { %v881_v21 = vadd.f32 %v6986_v49, %v870_v7  ;;  %v816_v24 = vadd.f32 %v812_v14, %v780_v55  ;;  %v817_v26 = vadd.f32 %v813_v18, %v781_v45  ;;  %v1234_v7 = vld [vmem:[#allocation12 + $0x80] sm:$0xff]  ;;  %v1233_v18 = vld [vmem:[#allocation12 + $0x78] sm:$0xff]  ;;  %v1231_v25 = vld [vmem:[#allocation12 + $0x68] sm:$0xff] }
 0x332   :  { %v846_v6 = vsel %vm514_vm5, %v844_v3, %v845_v47  ;;  %v849_v27 = vsel %vm514_vm5, %v845_v47, %v842_v32 }
 0x333   :  { %v885_v2 = vmax.f32 %v881_v21, 0.0  ;;  %v824_v28 = vadd.f32 %v820_v54, %v816_v24  ;;  %v825_v30 = vadd.f32 %v821_v12, %v817_v26  ;;  %v852_v40 = vmul.f32 %v846_v6, %v8488_v1  ;;  %v1230_v12 = vld [vmem:[#allocation12 + $0x60] sm:$0xff]  ;;  %v1232_v21 = vld [vmem:[#allocation12 + $0x70] sm:$0xff]  ;;  %v1229_v6 = vld [vmem:[#allocation12 + $0x58] sm:$0xff] }
 0x334   :  { %v853_v34 = vmul.f32 %v849_v27, %v8478_v51  ;;  %v1228_v26 = vld [vmem:[#allocation12 + $0x50] sm:$0xff] }
 0x335   :  { %v856_v23 = vadd.f32 %v852_v40, %v824_v28  ;;  %6987 = vmatmul.mubr.msk.f32.vlgmr.msra.gmra.mxu0 %vm583_vm6, %v885_v2  ;;  %7295 = vmatprep.mubr.msk.f32.mxu1 %vm583_vm6, %v885_v2  ;;  %v1225_v2 = vld [vmem:[#allocation12 + $0x38] sm:$0xff] }
 0x336   :  { %v857_v3 = vadd.f32 %v853_v34, %v825_v30  ;;  %7296 = vmatmul.mubr.msk.f32.vlgmr.msra.gmra.mxu1 %vm583_vm6, %v886_v33  ;;  %995 = vmatprep.mubr.f32.mxu0 %v8152_v0  ;;  %v1224_v30 = vld [vmem:[#allocation12 + $0x30] sm:$0xff]  ;;  %v1222_v34 = vld [vmem:[#allocation12 + $0x20] sm:$0xff] }
 0x337   :  { %v872_v32 = vadd.f32 %v868_v37, %v856_v23  ;;  %1271 = vmatpush1.msra.mxu0 %v1239_v52 }
 0x338   :  { %v873_v38 = vadd.f32 %v869_v4, %v857_v3  ;;  %1272 = vmatprep.subr.mxu0 %v1237_v53  ;;  %v1221_v4 = vld [vmem:[#allocation12 + $0x18] sm:$0xff]  ;;  %v1223_v3 = vld [vmem:[#allocation12 + $0x28] sm:$0xff] }
 0x339   :  { %6988 = vmatmul.mubr.msk.f32.gmra.mxu0 %vm583_vm6, %v886_v33  ;;  %v883_v39 = vadd.f32 %v6986_v49, %v872_v32  ;;  %v1226_v33 = vld [vmem:[#allocation12 + $0x40] sm:$0xff]  ;;  %v1219_v32 = vld [vmem:[#allocation12 + $0x8] sm:$0xff] }
 0x33a   :  { %1001 = vmatprep.mubr.f32.mxu0 %v8152_v0  ;;  %v884_v41 = vadd.f32 %v6986_v49, %v873_v38  ;;  %v1241_v49 = vld [vmem:[#allocation12 + $0xb8] sm:$0xff]  ;;  %1273 = vmatpush1.msra.mxu0 %v1236_v56  ;;  %v1218_v38 = vld [vmem:[#allocation12] sm:$0xff] }
 0x33b   :  { %v887_v36 = vmax.f32 %v883_v39, 0.0  ;;  %7301 = vmatprep.subr.mxu1 %v1241_v49  ;;  %1274 = vmatprep.subr.mxu0 %v1234_v7  ;;  %v1220_v39 = vld [vmem:[#allocation12 + $0x10] sm:$0xff] }
 0x33c   :  { %v888_v29 = vmax.f32 %v884_v41, 0.0  ;;  %7302 = vmatpush3.msra.mxu1 %v1241_v49  ;;  %1275 = vmatpush1.msra.mxu0 %v1233_v18 }
 0x33d   :  { %6989 = vmatmul.mubr.msk.f32.gmra.mxu0 %vm583_vm6, %v887_v36  ;;  %7298 = vmatprep.mubr.msk.f32.mxu1 %vm583_vm6, %v887_v36 }
 0x33e   :  { %7299 = vmatmul.mubr.msk.f32.gmra.mxu1 %vm583_vm6, %v888_v29  ;;  %1007 = vmatprep.mubr.f32.mxu0 %v8152_v0 }
 0x33f   :  { %7303 = vmatprep.subr.mxu1 %v1238_v57  ;;  %1276 = vmatprep.subr.mxu0 %v1231_v25 }
 0x340   :  { %7304 = vmatpush3.msra.mxu1 %v1238_v57  ;;  %1277 = vmatpush1.msra.mxu0 %v1230_v12 }
 0x341   :  { %6990 = vmatmul.mubr.msk.f32.gmra.mxu0 %vm583_vm6, %v888_v29  ;;  %7305 = vmatprep.subr.mxu1 %v1235_v20 }
 0x342   :  { %1318 = vmatprep.mubr.f32.mxu0 %v8152_v0  ;;  %7306 = vmatpush3.msra.mxu1 %v1235_v20 }
 0x343   :  { %7307 = vmatprep.subr.mxu1 %v1232_v21  ;;  %1278 = vmatprep.subr.mxu0 %v1228_v26 }
 0x344   :  { %7308 = vmatpush3.msra.mxu1 %v1232_v21  ;;  %1279 = vmatpush1.msra.mxu0 %v1227_v35 }
 0x345   :  { %7309 = vmatprep.subr.mxu1 %v1229_v6  ;;  %1280 = vmatprep.subr.mxu0 %v1225_v2 }
 0x346   :  { %7310 = vmatpush3.msra.mxu1 %v1229_v6  ;;  %1281 = vmatpush1.msra.mxu0 %v1224_v30 }
 0x347   :  { %7311 = vmatprep.subr.mxu1 %v1226_v33  ;;  %1282 = vmatprep.subr.mxu0 %v1222_v34 }
 0x348   :  { %7312 = vmatpush3.msra.mxu1 %v1226_v33  ;;  %1283 = vmatpush1.msra.mxu0 %v1221_v4 }
 0x349   :  { %7313 = vmatprep.subr.mxu1 %v1223_v3  ;;  %1284 = vmatprep.subr.mxu0 %v1219_v32 }
 0x34a   :  { %7314 = vmatpush3.msra.mxu1 %v1223_v3  ;;  %1285 = vmatpush1.msra.mxu0 %v1218_v38 }
 0x34b   :  { %7315 = vmatprep.subr.mxu1 %v1220_v39 }
 0x34c   :  { %7316 = vmatpush3.msra.mxu1 %v1220_v39 }
 0x3f5   :  { %v991_v42 = vpop.f32.mrf.mxu0 }
 0x3f6   :  { %1119 = vrot.lane.b32.xlu0 %v991_v42, %s8153_s7  ;;  %v1099_v59 = vrot.slane %v991_v42, 6  ;;  %v7297_v36 = vpop.f32.mrf.mxu1 }
 0x3f7   :  { %v8627_v46 = vpop.f32.mrf.mxu0  ;;  %v1188_v35 = vrot.slane %v7297_v36, 2 }
 0x3f8   :  { %v1080_v42 = vpop.f32.mrf.mxu1  ;;  %v1147_v4 = vmul.f32 %v8627_v46, %v8414_v62  ;;  %v6995_v62 = vld [vmem:[%s10193_s8] ss:$0 sm:$0xff] }
 0x3f9   :  { %v997_v55 = vpop.f32.mrf.mxu0  ;;  %v1187_v6 = vrot.slane %v1080_v42, 2 }
 0x3fa   :  { %v1100_v45 = vrot.slane %v997_v55, 6  ;;  %1121 = vrot.lane.b32.xlu0 %v997_v55, %s8153_s7 }
 0x3fb   :  { %v8630_v14 = vpop.f32.mrf.mxu0  ;;  %v1193_v38 = vsel %vm531_vm4, %v1187_v6, %v1188_v35 }
 0x3fc   :  { %v8634_v54 = vsel %vm440_vm2, %v1099_v59, %v1100_v45  ;;  %v1148_v7 = vmul.f32 %v8630_v14, %v8416_v63 }
 0x3fd   :  { %v1003_v47 = vpop.f32.mrf.mxu0  ;;  %v1108_v56 = vmul.f32 %v8634_v54, %v8410_v58 }
 0x3fe   :  { %v1101_v24 = vrot.slane %v1003_v47, 6  ;;  %1161 = vrot.lane.b32.xlu0 %v8630_v14, %s8153_s7  ;;  %v7300_v52 = vpop.f32.mrf.mxu1 }
 0x3ff   :  { %v8638_v50 = vpop.f32.mrf.mxu0 }
 0x400   :  { %v8642_v27 = vsel %vm440_vm2, %v1100_v45, %v1101_v24  ;;  %v1090_v45 = vpop.f32.mrf.mxu1 }
 0x401   :  { %v1009_v28 = vpop.f32.mrf.mxu0  ;;  %v1189_v20 = vrot.slane %v1090_v45, 2 }
 0x402   :  { %v1102_v40 = vrot.slane %v1009_v28, 6  ;;  %1163 = vrot.lane.b32.xlu0 %v8638_v50, %s8153_s7  ;;  %1125 = vrot.lane.b32.xlu1 %v1009_v28, %s8153_s7 }
 0x403   :  { %v1011_v41 = vpop.f32.mrf.mxu0  ;;  %v1192_v28 = vsel %vm531_vm4, %v1188_v35, %v1189_v20 }
 0x404   :  { %v8649_v37 = vsel %vm440_vm2, %v1101_v24, %v1102_v40  ;;  %v1106_v23 = vsel %vm440_vm2, %v1102_v40, %v1099_v59  ;;  %v1196_v39 = vmul.f32 %v1192_v28, %v8495_v11 }
 0x405   :  { %v1107_v14 = vmul.f32 %v1106_v23, %v8438_v15 }
 0x406   :  { %1159 = vrot.lane.b32.xlu1 %v8627_v46, %s8153_s7 }
 0x40a   :  { %1123 = vrot.lane.b32.xlu1 %v1003_v47, %s8153_s7 }
 0x40e   :  { %1165 = vrot.lane.b32.xlu1 %v1011_v41, %s8153_s7 }
 0x468   :  { %v1120_v29 = vpop.permute.xlu0 %1119 }
 0x469   :  { %v1131_v49 = vrot.slane %v1120_v29, 7 }
 0x46c   :  { %v1122_v44 = vpop.permute.xlu0 %1121 }
 0x46d   :  { %v1132_v53 = vrot.slane %v1122_v44, 7 }
 0x46f   :  { %v1137_v55 = vsel %vm473_vm3, %v1131_v49, %v1132_v53 }
 0x470   :  { %v1140_v57 = vmul.f32 %v1137_v55, %v8412_v60  ;;  %v1162_v59 = vpop.permute.xlu0 %1161  ;;  %v1195_v55 = vmul.f32 %v1193_v38, %v8476_v48 }
 0x471   :  { %v1172_v21 = vrot.slane %v1162_v59, 1 }
 0x472   :  { %v1144_v18 = vadd.f32 %v1140_v57, %v1108_v56  ;;  %v1109_v56 = vmul.f32 %v8642_v27, %v8428_v8  ;;  %v1190_v57 = vrot.slane %v7300_v52, 2  ;;  %v1150_v52 = vmul.f32 %v1011_v41, %v8460_v31 }
 0x474   :  { %v1152_v25 = vadd.f32 %v1148_v7, %v1144_v18  ;;  %v1164_v47 = vpop.permute.xlu0 %1163  ;;  %v1126_v12 = vpop.permute.xlu1 %1125  ;;  %v1110_v7 = vmul.f32 %v8649_v37, %v8440_v19  ;;  %v1191_v37 = vsel %vm531_vm4, %v1189_v20, %v1190_v57 }
 0x475   :  { %v1173_v24 = vrot.slane %v1164_v47, 1  ;;  %v1134_v26 = vrot.slane %v1126_v12, 7 }
 0x477   :  { %v1176_v54 = vsel %vm514_vm5, %v1172_v21, %v1173_v24  ;;  %v1138_v2 = vsel %vm473_vm3, %v1134_v26, %v1131_v49 }
 0x478   :  { %v1180_v30 = vmul.f32 %v1176_v54, %v8486_v61  ;;  %v1139_v40 = vmul.f32 %v1138_v2, %v8448_v22  ;;  %v1160_v33 = vpop.permute.xlu1 %1159 }
 0x479   :  { %v1171_v34 = vrot.slane %v1160_v33, 1 }
 0x47a   :  { %v1184_v3 = vadd.f32 %v1180_v30, %v1152_v25  ;;  %v1143_v32 = vadd.f32 %v1139_v40, %v1107_v14  ;;  %v1197_v30 = vmul.f32 %v1191_v37, %v8501_v17 }
 0x47b   :  { %v1177_v36 = vsel %vm514_vm5, %v1171_v34, %v1172_v21  ;;  %v1149_v21 = vmul.f32 %v8638_v50, %v8430_v9 }
 0x47c   :  { %v1151_v23 = vadd.f32 %v1147_v4, %v1143_v32  ;;  %v1179_v29 = vmul.f32 %v1177_v36, %v8472_v43  ;;  %v1124_v42 = vpop.permute.xlu1 %1123  ;;  %v1200_v44 = vadd.f32 %v1196_v39, %v1184_v3 }
 0x47d   :  { %v1133_v49 = vrot.slane %v1124_v42, 7 }
 0x47e   :  { %v1183_v46 = vadd.f32 %v1179_v29, %v1151_v23  ;;  %v1211_v8 = vadd.f32 %v6995_v62, %v1200_v44 }
 0x47f   :  { %v1135_v59 = vsel %vm473_vm3, %v1133_v49, %v1134_v26  ;;  %v1136_v45 = vsel %vm473_vm3, %v1132_v53, %v1133_v49  ;;  %v1194_v53 = vsel %vm531_vm4, %v1190_v57, %v1187_v6 }
 0x480   :  { %v1199_v18 = vadd.f32 %v1195_v55, %v1183_v46  ;;  %v1141_v25 = vmul.f32 %v1136_v45, %v8432_v10  ;;  %v1142_v47 = vmul.f32 %v1135_v59, %v8450_v16  ;;  %v1166_v12 = vpop.permute.xlu1 %1165  ;;  %v1215_v28 = vmax.f32 %v1211_v8, 0.0 }
 0x481   :  { %v1174_v27 = vrot.slane %v1166_v12, 1  ;;  %v1198_v20 = vmul.f32 %v1194_v53, %v8490_v5 }
 0x482   :  { %v1210_v26 = vadd.f32 %v6995_v62, %v1199_v18  ;;  %v1145_v35 = vadd.f32 %v1141_v25, %v1109_v56  ;;  %v1146_v54 = vadd.f32 %v1142_v47, %v1110_v7 }
 0x483   :  { %v1175_v10 = vsel %vm514_vm5, %v1173_v24, %v1174_v27  ;;  %v1178_v16 = vsel %vm514_vm5, %v1174_v27, %v1171_v34 }
 0x484   :  { %v1214_v9 = vmax.f32 %v1210_v26, 0.0  ;;  %v1153_v50 = vadd.f32 %v1149_v21, %v1145_v35  ;;  %v1154_v2 = vadd.f32 %v1150_v52, %v1146_v54  ;;  %v1181_v41 = vmul.f32 %v1175_v10, %v8488_v1  ;;  %v8753_v35 = vld [vmem:[#allocation6] sm:$0xff]  ;;  %v8755_v54 = vld [vmem:[#allocation6 + $0x10] sm:$0xff] }
 0x485   :  { %v1182_v14 = vmul.f32 %v1178_v16, %v8478_v51 }
 0x486   :  { %v1185_v6 = vadd.f32 %v1181_v41, %v1153_v50  ;;  %6996 = vmatmul.mubr.msk.f32.vlgmr.msra.gmra.mxu0 %vm583_vm6, %v1214_v9  ;;  %7317 = vmatprep.mubr.msk.f32.mxu1 %vm583_vm6, %v1214_v9 }
 0x487   :  { %v1186_v24 = vadd.f32 %v1182_v14, %v1154_v2  ;;  %7318 = vmatmul.mubr.msk.f32.vlgmr.msra.gmra.mxu1 %vm583_vm6, %v1215_v28  ;;  %1324 = vmatprep.mubr.f32.mxu0 %v8152_v0 }
 0x488   :  { %v1201_v40 = vadd.f32 %v1197_v30, %v1185_v6 }
 0x489   :  { %v1202_v33 = vadd.f32 %v1198_v20, %v1186_v24 }
 0x48a   :  { %6997 = vmatmul.mubr.msk.f32.gmra.mxu0 %vm583_vm6, %v1215_v28  ;;  %v1212_v34 = vadd.f32 %v6995_v62, %v1201_v40 }
 0x48b   :  { %1330 = vmatprep.mubr.f32.mxu0 %v8152_v0  ;;  %v1213_v4 = vadd.f32 %v6995_v62, %v1202_v33 }
 0x48c   :  { %v1216_v3 = vmax.f32 %v1212_v34, 0.0 }
 0x48d   :  { %v1217_v32 = vmax.f32 %v1213_v4, 0.0 }
 0x48e   :  { %6998 = vmatmul.mubr.msk.f32.gmra.mxu0 %vm583_vm6, %v1216_v3  ;;  %7320 = vmatprep.mubr.msk.f32.mxu1 %vm583_vm6, %v1216_v3 }
 0x48f   :  { %7321 = vmatmul.mubr.msk.f32.gmra.mxu1 %vm583_vm6, %v1217_v32  ;;  %1336 = vmatprep.mubr.f32.mxu0 %v8152_v0 }
 0x490   :  { %7327 = vmatprep.mubr.msk.f32.mxu1 %vm583_vm6, %v8753_v35 }
 0x492   :  { %6999 = vmatmul.mubr.msk.f32.gmra.mxu0 %vm583_vm6, %v1217_v32 }
 0x493   :  { %7334 = vmatprep.mubr.msk.f32.mxu0 %vm583_vm6, %v8755_v54 }
 0x546   :  { %v1320_v38 = vpop.f32.mrf.mxu0 }
 0x547   :  { %1448 = vrot.lane.b32.xlu0 %v1320_v38, %s8153_s7  ;;  %v8722_v36 = vpop.f32.mrf.mxu1  ;;  %v1428_v29 = vrot.slane %v1320_v38, 6 }
 0x548   :  { %v1322_v39 = vpop.f32.mrf.mxu0 }
 0x549   :  { %v1409_v49 = vpop.f32.mrf.mxu1 }
 0x54a   :  { %v1326_v23 = vpop.f32.mrf.mxu0  ;;  %v1516_v57 = vrot.slane %v1409_v49, 2 }
 0x54b   :  { %v1429_v42 = vrot.slane %v1326_v23, 6  ;;  %1450 = vrot.lane.b32.xlu1 %v1326_v23, %s8153_s7 }
 0x54c   :  { %v1328_v44 = vpop.f32.mrf.mxu0 }
 0x54d   :  { %v1434_v55 = vsel %vm440_vm2, %v1428_v29, %v1429_v42  ;;  %v1477_v28 = vmul.f32 %v1328_v44, %v8416_v63 }
 0x54e   :  { %v1332_v62 = vpop.f32.mrf.mxu0  ;;  %v1437_v50 = vmul.f32 %v1434_v55, %v8410_v58 }
 0x54f   :  { %v1430_v46 = vrot.slane %v1332_v62, 6  ;;  %1490 = vrot.lane.b32.xlu1 %v1328_v44, %s8153_s7  ;;  %v7322_v56 = vpop.f32.mrf.mxu1 }
 0x550   :  { %v1519_v59 = vrot.slane %v7322_v56, 2  ;;  %v8728_v45 = vpop.f32.mrf.mxu0 }
 0x551   :  { %v1433_v7 = vsel %vm440_vm2, %v1429_v42, %v1430_v46  ;;  %v1419_v18 = vpop.f32.mrf.mxu1 }
 0x552   :  { %v8734_v25 = vsel %vm531_vm4, %v1519_v59, %v1516_v57  ;;  %v1518_v47 = vrot.slane %v1419_v18, 2  ;;  %v1338_v12 = vpop.f32.mrf.mxu0 }
 0x553   :  { %v1431_v21 = vrot.slane %v1338_v12, 6  ;;  %1488 = vrot.lane.b32.xlu1 %v1322_v39, %s8153_s7  ;;  %1454 = vrot.lane.b32.xlu0 %v1338_v12, %s8153_s7 }
 0x554   :  { %v8740_v8 = vsel %vm531_vm4, %v1518_v47, %v1519_v59  ;;  %v8746_v26 = vpop.f32.mrf.mxu0 }
 0x555   :  { %v1432_v27 = vsel %vm440_vm2, %v1430_v46, %v1431_v21  ;;  %v1435_v52 = vsel %vm440_vm2, %v1431_v21, %v1428_v29  ;;  %v7823_v29 = vld [vmem:[#allocation3 + $0x40] sm:$0xff] }
 0x556   :  { %v1436_v4 = vmul.f32 %v1435_v52, %v8438_v15  ;;  %v1476_v42 = vmul.f32 %v7823_v29, %v1322_v39  ;;  %v1439_v52 = vmul.f32 %v1432_v27, %v8440_v19  ;;  %v1479_v19 = vmul.f32 %v8746_v26, %v8460_v31 }
 0x557   :  { %1492 = vrot.lane.b32.xlu0 %v8728_v45, %s8153_s7  ;;  %1494 = vrot.lane.b32.xlu1 %v8746_v26, %s8153_s7  ;;  %v1526_v31 = vmul.f32 %v8740_v8, %v8501_v17  ;;  %v8818_v17 = vld [vmem:[%s10196_s11 + $0x18] sm:$0xff] }
 0x55b   :  { %1452 = vrot.lane.b32.xlu0 %v1332_v62, %s8153_s7 }
 0x5b9   :  { %v1449_v53 = vpop.permute.xlu0 %1448 }
 0x5ba   :  { %v1460_v10 = vrot.slane %v1449_v53, 7  ;;  %v7004_v53 = vld [vmem:[%s10195_s10] ss:$0 sm:$0xff] }
 0x5bd   :  { %v1451_v37 = vpop.permute.xlu1 %1450 }
 0x5be   :  { %v1461_v16 = vrot.slane %v1451_v37, 7 }
 0x5c0   :  { %v1466_v9 = vsel %vm473_vm3, %v1460_v10, %v1461_v16 }
 0x5c1   :  { %v1469_v2 = vmul.f32 %v1466_v9, %v8412_v60  ;;  %v1491_v41 = vpop.permute.xlu1 %1490  ;;  %v1517_v60 = vrot.slane %v8722_v36, 2  ;;  %v7826_v9 = vld [vmem:[#allocation3 + $0x38] sm:$0xff] }
 0x5c2   :  { %v1501_v33 = vrot.slane %v1491_v41, 1 }
 0x5c3   :  { %v1473_v14 = vadd.f32 %v1469_v2, %v1437_v50  ;;  %v1522_v49 = vsel %vm531_vm4, %v1516_v57, %v1517_v60  ;;  %v1521_v15 = vsel %vm531_vm4, %v1517_v60, %v1518_v47  ;;  %v7824_v47 = vld [vmem:[#allocation3 + $0x10] sm:$0xff]  ;;  %v8843_v60 = vld [vmem:[%s10196_s11 + $0x28] sm:$0xff] }
 0x5c4   :  { %v1524_v59 = vmul.f32 %v1522_v49, %v8476_v48  ;;  %v1525_v57 = vmul.f32 %v1521_v15, %v8495_v11  ;;  %v1438_v21 = vmul.f32 %v7824_v47, %v1433_v7  ;;  %v7827_v2 = vld [vmem:[#allocation3 + $0x50] sm:$0xff]  ;;  %v8882_v15 = vld [vmem:[#allocation6 + $0x20] sm:$0xff] }
 0x5c5   :  { %v1489_v30 = vpop.permute.xlu1 %1488  ;;  %v1455_v6 = vpop.permute.xlu0 %1454  ;;  %v1481_v20 = vadd.f32 %v1477_v28, %v1473_v14  ;;  %v1478_v7 = vmul.f32 %v7827_v2, %v8728_v45  ;;  %v1527_v45 = vmul.f32 %v8734_v25, %v8490_v5  ;;  %v8813_v5 = vld [vmem:[%s10196_s11 + $0x38] sm:$0xff] }
 0x5c6   :  { %v1500_v24 = vrot.slane %v1489_v30, 1  ;;  %v1463_v40 = vrot.slane %v1455_v6, 7 }
 0x5c8   :  { %v1467_v34 = vsel %vm473_vm3, %v1463_v40, %v1460_v10  ;;  %v1506_v63 = vsel %vm514_vm5, %v1500_v24, %v1501_v33  ;;  %v7825_v10 = vld [vmem:[#allocation3 + $0x30] sm:$0xff] }
 0x5c9   :  { %v1468_v3 = vmul.f32 %v1467_v34, %v8448_v22  ;;  %v1493_v58 = vpop.permute.xlu0 %1492  ;;  %v1495_v32 = vpop.permute.xlu1 %1494  ;;  %v1508_v55 = vmul.f32 %v1506_v63, %v8472_v43  ;;  %v8848_v63 = vld [vmem:[%s10196_s11 + $0x8] sm:$0xff] }
 0x5ca   :  { %v1502_v38 = vrot.slane %v1493_v58, 1  ;;  %v1503_v23 = vrot.slane %v1495_v32, 1  ;;  %v8833_v58 = vld [vmem:[%s10196_s11 + $0x30] sm:$0xff] }
 0x5cb   :  { %v1472_v44 = vadd.f32 %v1468_v3, %v1436_v4  ;;  %v8824_v4 = vld [vmem:[#allocation6 + $0x8] sm:$0xff]  ;;  %v8826_v3 = vld [vmem:[#allocation6 + $0x18] sm:$0xff]  ;;  %v8838_v32 = vld [vmem:[%s10196_s11 + $0x10] sm:$0xff] }
 0x5cc   :  { %v1505_v22 = vsel %vm514_vm5, %v1501_v33, %v1502_v38  ;;  %v1504_v36 = vsel %vm514_vm5, %v1502_v38, %v1503_v23  ;;  %v1507_v27 = vsel %vm514_vm5, %v1503_v23, %v1500_v24  ;;  %v8857_v38 = vld [vmem:[%s10196_s11 + $0x20] sm:$0xff] }
 0x5cd   :  { %v1480_v62 = vadd.f32 %v1476_v42, %v1472_v44  ;;  %v1509_v46 = vmul.f32 %v1505_v22, %v8486_v61  ;;  %v1453_v56 = vpop.permute.xlu0 %1452  ;;  %v8862_v23 = vld [vmem:[%s10196_s11] sm:$0xff]  ;;  %v8887_v22 = vld [vmem:[%s10196_s11 + $0x58] sm:$0xff] }
 0x5ce   :  { %v1462_v39 = vrot.slane %v1453_v56, 7  ;;  %v8910_v56 = vld [vmem:[%s10196_s11 + $0x50] sm:$0xff] }
 0x5cf   :  { %v1512_v18 = vadd.f32 %v1508_v55, %v1480_v62  ;;  %v1513_v12 = vadd.f32 %v1509_v46, %v1481_v20  ;;  %v1511_v20 = vmul.f32 %v1507_v27, %v8478_v51  ;;  %v8896_v55 = vld [vmem:[%s10196_s11 + $0x78] sm:$0xff]  ;;  %v8900_v62 = vld [vmem:[#allocation6 + $0x28] sm:$0xff] }
 0x5d0   :  { %v1464_v43 = vsel %vm473_vm3, %v1462_v39, %v1463_v40  ;;  %v1465_v61 = vsel %vm473_vm3, %v1461_v16, %v1462_v39  ;;  %v1510_v16 = vmul.f32 %v1504_v36, %v8488_v1  ;;  %v8891_v36 = vld [vmem:[#allocation6 + $0x30] sm:$0xff]  ;;  %v8902_v46 = vld [vmem:[#allocation6 + $0x38] sm:$0xff] }
 0x5d1   :  { %v1528_v37 = vadd.f32 %v1524_v59, %v1512_v18  ;;  %v1529_v48 = vadd.f32 %v1525_v57, %v1513_v12  ;;  %v1470_v11 = vmul.f32 %v7825_v10, %v1465_v61  ;;  %v1471_v50 = vmul.f32 %v7826_v9, %v1464_v43  ;;  %v8915_v39 = vld [vmem:[%s10196_s11 + $0x70] sm:$0xff]  ;;  %v8923_v59 = vld [vmem:[%s10196_s11 + $0x48] sm:$0xff]  ;;  %v8937_v18 = vld [vmem:[%s10196_s11 + $0x40] sm:$0xff] }
 0x5d2   :  { %v8928_v57 = vld [vmem:[%s10196_s11 + $0x68] sm:$0xff]  ;;  %v8942_v12 = vld [vmem:[%s10196_s11 + $0x60] sm:$0xff] }
 0x5d3   :  { %v1539_v41 = vadd.f32 %v7004_v53, %v1528_v37  ;;  %v1540_v28 = vadd.f32 %v7004_v53, %v1529_v48  ;;  %v1474_v14 = vadd.f32 %v1470_v11, %v1438_v21  ;;  %v1475_v30 = vadd.f32 %v1471_v50, %v1439_v52 }
 0x5d5   :  { %v1544_v6 = vmax.f32 %v1540_v28, 0.0  ;;  %v1482_v40 = vadd.f32 %v1478_v7, %v1474_v14  ;;  %v1483_v33 = vadd.f32 %v1479_v19, %v1475_v30  ;;  %v1543_v26 = vmax.f32 %v1539_v41, 0.0 }
 0x5d7   :  { %v1514_v34 = vadd.f32 %v1510_v16, %v1482_v40  ;;  %v1515_v24 = vadd.f32 %v1511_v20, %v1483_v33  ;;  %7323 = vmatprep.subr.msk.mxu1 %vm583_vm6, %v1544_v6  ;;  %7330 = vmatprep.subr.msk.mxu0 %vm583_vm6, %v1544_v6 }
 0x5d8   :  { %7324 = vmatpush3.xpose.msk.msra.mxu1 %vm583_vm6, %v1544_v6  ;;  %7331 = vmatpush3.xpose.msk.msra.mxu0 %vm583_vm6, %v1544_v6 }
 0x5d9   :  { %v1530_v51 = vadd.f32 %v1526_v31, %v1514_v34  ;;  %v1531_v1 = vadd.f32 %v1527_v45, %v1515_v24  ;;  %7325 = vmatprep.subr.msk.mxu1 %vm583_vm6, %v1543_v26  ;;  %7332 = vmatprep.subr.msk.mxu0 %vm583_vm6, %v1543_v26 }
 0x5db   :  { %v8820_v25 = vadd.f32 %v7004_v53, %v1530_v51  ;;  %v1542_v8 = vadd.f32 %v7004_v53, %v1531_v1 }
 0x5dc   :  { %7326 = vmatpush3.xpose.msk.msra.mxu1 %vm583_vm6, %v1543_v26  ;;  %7333 = vmatpush3.xpose.msk.msra.mxu0 %vm583_vm6, %v1543_v26 }
 0x5dd   :  { %1778 = vmatprep.subr.mxu1 %v8813_v5  ;;  %1861 = vmatprep.subr.mxu0 %v8818_v17  ;;  %v8946_v47 = vmax.f32 %v1542_v8, 0.0  ;;  %v1545_v28 = vmax.f32 %v8820_v25, 0.0 }
 0x5df   :  { %7328 = vmatmul.mubr.msk.f32.vlgmr.msra.gmra.mxu1 %vm583_vm6, %v8824_v4  ;;  %7335 = vmatmul.mubr.msk.f32.vlgmr.msra.gmra.mxu0 %vm583_vm6, %v8826_v3 }
 0x5e0   :  { %1779 = vmatpush1.msra.mxu1 %v8833_v58  ;;  %1862 = vmatpush1.msra.mxu0 %v8838_v32 }
 0x5e1   :  { %1780 = vmatprep.subr.mxu1 %v8843_v60  ;;  %1863 = vmatprep.subr.mxu0 %v8848_v63 }
 0x5e2   :  { %1781 = vmatpush1.msra.mxu1 %v8857_v38  ;;  %1864 = vmatpush1.msra.mxu0 %v8862_v23 }
 0x5e3   :  { %7337 = vmatprep.subr.msk.mxu1 %vm583_vm6, %v1544_v6  ;;  %7344 = vmatprep.subr.msk.mxu0 %vm583_vm6, %v1544_v6 }
 0x5e4   :  { %1814 = vmatprep.mubr.f32.mxu1 %v8152_v0  ;;  %1897 = vmatprep.mubr.f32.mxu0 %v8152_v0 }
 0x69f   :  { %v7329_v29 = vpop.f32.mrf.mxu1  ;;  %v7336_v42 = vpop.f32.mrf.mxu0 }
 0x6a1   :  { %v1653_v44 = vpop.f32.mrf.mxu1  ;;  %v1734_v49 = vpop.f32.mrf.mxu0 }
 0x6a2   :  { %7013 = vmatmul.mubr.msk.f32.vlgmr.msra.gmra.mxu1 %vm1743_vm7, %v1734_v49  ;;  %7015 = vmatmul.mubr.msk.f32.vlgmr.msra.gmra.mxu0 %vm1743_vm7, %v1653_v44 }
 0x6a3   :  { %7338 = vmatpush3.xpose.msk.msra.mxu1 %vm583_vm6, %v1544_v6  ;;  %7345 = vmatpush3.xpose.msk.msra.mxu0 %vm583_vm6, %v1544_v6 }
 0x6a4   :  { %7339 = vmatprep.subr.msk.mxu1 %vm583_vm6, %v1543_v26  ;;  %7346 = vmatprep.subr.msk.mxu0 %vm583_vm6, %v1543_v26 }
 0x6a5   :  { %1820 = vmatprep.mubr.f32.mxu1 %v8152_v0  ;;  %1903 = vmatprep.mubr.f32.mxu0 %v8152_v0 }
 0x6a6   :  { %7014 = vmatmul.mubr.msk.f32.gmra.mxu1 %vm1743_vm7, %v7336_v42  ;;  %7016 = vmatmul.mubr.msk.f32.gmra.mxu0 %vm1743_vm7, %v7329_v29 }
 0x6a7   :  { %7340 = vmatpush3.xpose.msk.msra.mxu1 %vm583_vm6, %v1543_v26  ;;  %7347 = vmatpush3.xpose.msk.msra.mxu0 %vm583_vm6, %v1543_v26 }
 0x6a8   :  { %7341 = vmatprep.mubr.msk.f32.mxu1 %vm583_vm6, %v8882_v15  ;;  %2025 = vmatprep.subr.mxu1 %v8887_v22 }
 0x6a9   :  { %7348 = vmatprep.mubr.msk.f32.mxu0 %vm583_vm6, %v8891_v36  ;;  %2193 = vmatprep.subr.mxu0 %v8896_v55 }
 0x6aa   :  { %7342 = vmatmul.mubr.msk.f32.vlgmr.msra.gmra.mxu1 %vm583_vm6, %v8900_v62  ;;  %7349 = vmatmul.mubr.msk.f32.vlgmr.msra.gmra.mxu0 %vm583_vm6, %v8902_v46 }
 0x6ab   :  { %2026 = vmatpush1.msra.mxu1 %v8910_v56  ;;  %2194 = vmatpush1.msra.mxu0 %v8915_v39 }
 0x6ac   :  { %2027 = vmatprep.subr.mxu1 %v8923_v59  ;;  %2195 = vmatprep.subr.mxu0 %v8928_v57 }
 0x6ad   :  { %2028 = vmatpush1.msra.mxu1 %v8937_v18  ;;  %2196 = vmatpush1.msra.mxu0 %v8942_v12 }
 0x6ae   :  { %7351 = vmatprep.subr.msk.mxu1 %vm583_vm6, %v8946_v47  ;;  %7358 = vmatprep.subr.msk.mxu0 %vm583_vm6, %v8946_v47 }
 0x6af   :  { %2061 = vmatprep.mubr.f32.mxu1 %v8152_v0  ;;  %2229 = vmatprep.mubr.f32.mxu0 %v8152_v0 }
 0x762   :  { %v1816_v21 = vpop.f32.mrf.mxu1  ;;  %v1899_v52 = vpop.f32.mrf.mxu0 }
 0x763   :  { %v1900_v53 = vadd.f32 %v1899_v52, %v1816_v21  ;;  %v9077_v21 = vld [vmem:[#allocation14 + $0x38] sm:$0xff]  ;;  %v9080_v52 = vld [vmem:[#allocation14 + $0x30] sm:$0xff] }
 0x764   :  { %v1818_v43 = vpop.f32.mrf.mxu1  ;;  %v1901_v61 = vpop.f32.mrf.mxu0 }
 0x765   :  { %v1902_v37 = vadd.f32 %v1901_v61, %v1818_v43  ;;  %v9088_v43 = vld [vmem:[#allocation14 + $0x20] sm:$0xff]  ;;  %v9092_v61 = vld [vmem:[#allocation14 + $0x18] sm:$0xff] }
 0x766   :  { %v1822_v48 = vpop.f32.mrf.mxu1  ;;  %v1905_v10 = vpop.f32.mrf.mxu0 }
 0x767   :  { %v1906_v11 = vadd.f32 %v1905_v10, %v1822_v48  ;;  %v9100_v48 = vld [vmem:[#allocation14 + $0x8] sm:$0xff]  ;;  %v9104_v10 = vld [vmem:[#allocation14] sm:$0xff] }
 0x768   :  { %v1824_v9 = vpop.f32.mrf.mxu1  ;;  %v1907_v50 = vpop.f32.mrf.mxu0 }
 0x769   :  { %v1908_v2 = vadd.f32 %v1907_v50, %v1824_v9 }
 0x76a   :  { %v7343_v7 = vpop.f32.mrf.mxu1  ;;  %v7350_v19 = vpop.f32.mrf.mxu0 }
 0x76c   :  { %v1982_v27 = vpop.f32.mrf.mxu1  ;;  %v2150_v41 = vpop.f32.mrf.mxu0 }
 0x76d   :  { %7021 = vmatmul.mubr.msk.f32.vlgmr.msra.gmra.mxu1 %vm1743_vm7, %v1982_v27  ;;  %7027 = vmatmul.mubr.msk.f32.vlgmr.msra.gmra.mxu0 %vm1743_vm7, %v2150_v41 }
 0x76e   :  { %7352 = vmatpush3.xpose.msk.msra.mxu1 %vm583_vm6, %v8946_v47  ;;  %7359 = vmatpush3.xpose.msk.msra.mxu0 %vm583_vm6, %v8946_v47 }
 0x76f   :  { %7353 = vmatprep.subr.msk.mxu1 %vm583_vm6, %v1545_v28  ;;  %7360 = vmatprep.subr.msk.mxu0 %vm583_vm6, %v1545_v28 }
 0x770   :  { %2067 = vmatprep.mubr.f32.mxu1 %v8152_v0  ;;  %2235 = vmatprep.mubr.f32.mxu0 %v8152_v0 }
 0x771   :  { %7022 = vmatmul.mubr.msk.f32.gmra.mxu1 %vm1743_vm7, %v7343_v7  ;;  %7028 = vmatmul.mubr.msk.f32.gmra.mxu0 %vm1743_vm7, %v7350_v19 }
 0x772   :  { %7354 = vmatpush3.xpose.msk.msra.mxu1 %vm583_vm6, %v1545_v28  ;;  %7361 = vmatpush3.xpose.msk.msra.mxu0 %vm583_vm6, %v1545_v28 }
 0x773   :  { %7355 = vmatprep.mubr.msk.f32.mxu1 %vm583_vm6, %v8753_v35  ;;  %7362 = vmatprep.mubr.msk.f32.mxu0 %vm583_vm6, %v8755_v54 }
 0x774   :  { %2451 = vmatprep.subr.mxu1 %v8813_v5  ;;  %2534 = vmatprep.subr.mxu0 %v8818_v17 }
 0x775   :  { %7356 = vmatmul.mubr.msk.f32.vlgmr.msra.gmra.mxu1 %vm583_vm6, %v8824_v4  ;;  %7363 = vmatmul.mubr.msk.f32.vlgmr.msra.gmra.mxu0 %vm583_vm6, %v8826_v3  ;;  %v9035_v4 = vld [vmem:[#allocation14 + $0x78] sm:$0xff]  ;;  %v2928_v3 = vld [vmem:[%s10205_s20] sm:$0x3] }
 0x776   :  { %2452 = vmatpush1.msra.mxu1 %v8833_v58  ;;  %2535 = vmatpush1.msra.mxu0 %v8838_v32 }
 0x777   :  { %2453 = vmatprep.subr.mxu1 %v8843_v60  ;;  %2536 = vmatprep.subr.mxu0 %v8848_v63 }
 0x778   :  { %2454 = vmatpush1.msra.mxu1 %v8857_v38  ;;  %2537 = vmatpush1.msra.mxu0 %v8862_v23 }
 0x779   :  { %7365 = vmatprep.subr.msk.mxu1 %vm583_vm6, %v8946_v47  ;;  %7372 = vmatprep.subr.msk.mxu0 %vm583_vm6, %v8946_v47 }
 0x77a   :  { %2487 = vmatprep.mubr.f32.mxu1 %v8152_v0  ;;  %2570 = vmatprep.mubr.f32.mxu0 %v8152_v0 }
 0x77b   :  { %3019 = vrot.lane.b32.xlu1 %v2928_v3, %s8153_s7 }
 0x82d   :  { %v2063_v35 = vpop.f32.mrf.mxu1  ;;  %v2231_v54 = vpop.f32.mrf.mxu0 }
 0x82e   :  { %v2074_v14 = vadd.f32 %v2063_v35, %v1900_v53  ;;  %v9084_v53 = vld [vmem:[#allocation14 + $0x28] sm:$0xff] }
 0x82f   :  { %v2065_v30 = vpop.f32.mrf.mxu1  ;;  %v2233_v16 = vpop.f32.mrf.mxu0 }
 0x830   :  { %v8995_v6 = vadd.f32 %v2231_v54, %v2074_v14  ;;  %v2075_v20 = vadd.f32 %v2065_v30, %v1902_v37  ;;  %v9096_v37 = vld [vmem:[#allocation14 + $0x10] sm:$0xff] }
 0x831   :  { %v2069_v40 = vpop.f32.mrf.mxu1  ;;  %v2237_v33 = vpop.f32.mrf.mxu0 }
 0x832   :  { %v8997_v45 = vadd.f32 %v2233_v16, %v2075_v20  ;;  %v2076_v31 = vadd.f32 %v2069_v40, %v1906_v11  ;;  %v2927_v11 = vld [vmem:[%s10204_s19] sm:$0x3]  ;;  %v2253_v40 = vsub.s32 1, %v8362_v13 }
 0x833   :  { %v2071_v26 = vpop.f32.mrf.mxu1  ;;  %v2239_v34 = vpop.f32.mrf.mxu0 }
 0x834   :  { %v8999_v24 = vadd.f32 %v2237_v33, %v2076_v31  ;;  %v2077_v51 = vadd.f32 %v2071_v26, %v1908_v2  ;;  %v1574_v33 = vld [vmem:[%s10198_s13] sm:$0x3] }
 0x835   :  { %v7357_v1 = vpop.f32.mrf.mxu1  ;;  %v7364_v5 = vpop.f32.mrf.mxu0  ;;  %v9160_v31 = vrot.slane %v1574_v33, %v2253_v40 }
 0x836   :  { %v9001_v17 = vadd.f32 %v2239_v34, %v2077_v51 }
 0x837   :  { %v2333_v25 = vpop.f32.mrf.mxu1  ;;  %v2408_v8 = vpop.f32.mrf.mxu0  ;;  %v9164_v34 = vadd.f32 %v9160_v31, %v8997_v45 }
 0x838   :  { %7037 = vmatmul.mubr.msk.f32.vlgmr.msra.gmra.mxu1 %vm1743_vm7, %v2408_v8  ;;  %7039 = vmatmul.mubr.msk.f32.vlgmr.msra.gmra.mxu0 %vm1743_vm7, %v2333_v25  ;;  %v2249_v25 = vsub.s32 0, %v8362_v13 }
 0x839   :  { %7366 = vmatpush3.xpose.msk.msra.mxu1 %vm583_vm6, %v8946_v47  ;;  %7373 = vmatpush3.xpose.msk.msra.mxu0 %vm583_vm6, %v8946_v47  ;;  %v9073_v47 = vld [vmem:[#allocation14 + $0x40] sm:$0xff] }
 0x83a   :  { %7367 = vmatprep.subr.msk.mxu1 %vm583_vm6, %v1545_v28  ;;  %7374 = vmatprep.subr.msk.mxu0 %vm583_vm6, %v1545_v28  ;;  %v9171_v8 = vrot.slane %v1574_v33, %v2249_v25 }
 0x83b   :  { %2493 = vmatprep.mubr.f32.mxu1 %v8152_v0  ;;  %2576 = vmatprep.mubr.f32.mxu0 %v8152_v0 }
 0x83c   :  { %7038 = vmatmul.mubr.msk.f32.gmra.mxu1 %vm1743_vm7, %v7364_v5  ;;  %7040 = vmatmul.mubr.msk.f32.gmra.mxu0 %vm1743_vm7, %v7357_v1  ;;  %v9175_v3 = vadd.f32 %v9171_v8, %v8995_v6 }
 0x83d   :  { %7368 = vmatpush3.xpose.msk.msra.mxu1 %vm583_vm6, %v1545_v28  ;;  %7375 = vmatpush3.xpose.msk.msra.mxu0 %vm583_vm6, %v1545_v28 }
 0x83e   :  { %7369 = vmatprep.mubr.msk.f32.mxu1 %vm583_vm6, %v8882_v15  ;;  %7376 = vmatprep.mubr.msk.f32.mxu0 %vm583_vm6, %v8891_v36 }
 0x83f   :  { %2692 = vmatprep.subr.mxu1 %v8887_v22  ;;  %2854 = vmatprep.subr.mxu0 %v8896_v55 }
 0x840   :  { %7370 = vmatmul.mubr.msk.f32.vlgmr.msra.gmra.mxu1 %vm583_vm6, %v8900_v62  ;;  %7377 = vmatmul.mubr.msk.f32.vlgmr.msra.gmra.mxu0 %vm583_vm6, %v8902_v46  ;;  %v9051_v62 = vld [vmem:[#allocation14 + $0x70] sm:$0xff] }
 0x841   :  { %2693 = vmatpush1.msra.mxu1 %v8910_v56  ;;  %2728 = vmatprep.mubr.f32.mxu1 %v8152_v0 }
 0x842   :  { %2694 = vmatprep.subr.mxu1 %v8923_v59  ;;  %2855 = vmatpush1.msra.mxu0 %v8915_v39  ;;  %v9053_v39 = vld [vmem:[#allocation14 + $0x68] sm:$0xff]  ;;  %v9057_v59 = vld [vmem:[#allocation14 + $0x60] sm:$0xff] }
 0x843   :  { %2695 = vmatpush1.msra.mxu1 %v8937_v18  ;;  %2856 = vmatprep.subr.mxu0 %v8928_v57  ;;  %v9061_v57 = vld [vmem:[#allocation14 + $0x58] sm:$0xff]  ;;  %v9064_v18 = vld [vmem:[#allocation14 + $0x50] sm:$0xff] }
 0x844   :  { %2857 = vmatpush1.msra.mxu0 %v8942_v12  ;;  %2890 = vmatprep.mubr.f32.mxu0 %v8152_v0  ;;  %v9068_v12 = vld [vmem:[#allocation14 + $0x48] sm:$0xff] }
 0x845   :  { %2948 = vmatprep.subr.mxu1 %v9035_v4  ;;  %3060 = vmatprep.subr.mxu0 %v9035_v4 }
 0x8f8   :  { %v2489_v58 = vpop.f32.mrf.mxu1  ;;  %v2572_v32 = vpop.f32.mrf.mxu0 }
 0x8f9   :  { %v9043_v60 = vadd.f32 %v2572_v32, %v2489_v58 }
 0x8fa   :  { %v2491_v63 = vpop.f32.mrf.mxu1  ;;  %v2574_v38 = vpop.f32.mrf.mxu0 }
 0x8fb   :  { %v9045_v23 = vadd.f32 %v2574_v38, %v2491_v63 }
 0x8fc   :  { %v2495_v29 = vpop.f32.mrf.mxu1  ;;  %v2578_v42 = vpop.f32.mrf.mxu0 }
 0x8fd   :  { %v9047_v44 = vadd.f32 %v2578_v42, %v2495_v29  ;;  %v3020_v29 = vpop.permute.xlu1 %3019 }
 0x8fe   :  { %v2497_v49 = vpop.f32.mrf.mxu1  ;;  %v2580_v15 = vpop.f32.mrf.mxu0 }
 0x8ff   :  { %v9049_v22 = vadd.f32 %v2580_v15, %v2497_v49 }
 0x900   :  { %v7371_v36 = vpop.f32.mrf.mxu1  ;;  %v7378_v55 = vpop.f32.mrf.mxu0 }
 0x902   :  { %v2649_v46 = vpop.f32.mrf.mxu1  ;;  %v2811_v56 = vpop.f32.mrf.mxu0 }
 0x903   :  { %7045 = vmatmul.mubr.msk.f32.vlgmr.msra.gmra.mxu1 %vm1743_vm7, %v2649_v46  ;;  %7051 = vmatmul.mubr.msk.f32.vlgmr.msra.gmra.mxu0 %vm1743_vm7, %v2811_v56 }
 0x904   :  { %2949 = vmatpush1.msra.mxu1 %v9051_v62  ;;  %2734 = vmatprep.mubr.f32.mxu1 %v8152_v0 }
 0x905   :  { %2950 = vmatprep.subr.mxu1 %v9053_v39  ;;  %2896 = vmatprep.mubr.f32.mxu0 %v8152_v0 }
 0x906   :  { %2951 = vmatpush1.msra.mxu1 %v9057_v59  ;;  %3061 = vmatpush1.msra.mxu0 %v9051_v62 }
 0x907   :  { %2952 = vmatprep.subr.mxu1 %v9061_v57  ;;  %7046 = vmatmul.mubr.msk.f32.gmra.mxu1 %vm1743_vm7, %v7371_v36 }
 0x908   :  { %2953 = vmatpush1.msra.mxu1 %v9064_v18  ;;  %7052 = vmatmul.mubr.msk.f32.gmra.mxu0 %vm1743_vm7, %v7378_v55 }
 0x909   :  { %2954 = vmatprep.subr.mxu1 %v9068_v12  ;;  %2996 = vmatprep.mubr.f32.mxu1 %v8152_v0 }
 0x90a   :  { %2955 = vmatpush1.msra.mxu1 %v9073_v47  ;;  %3062 = vmatprep.subr.mxu0 %v9053_v39 }
 0x90b   :  { %2956 = vmatprep.subr.mxu1 %v9077_v21  ;;  %3063 = vmatpush1.msra.mxu0 %v9057_v59 }
 0x90c   :  { %2957 = vmatpush1.msra.mxu1 %v9080_v52  ;;  %3064 = vmatprep.subr.mxu0 %v9061_v57 }
 0x90d   :  { %2958 = vmatprep.subr.mxu1 %v9084_v53  ;;  %3065 = vmatpush1.msra.mxu0 %v9064_v18 }
 0x90e   :  { %2959 = vmatpush1.msra.mxu1 %v9088_v43  ;;  %3066 = vmatprep.subr.mxu0 %v9068_v12 }
 0x90f   :  { %2960 = vmatprep.subr.mxu1 %v9092_v61  ;;  %3067 = vmatpush1.msra.mxu0 %v9073_v47 }
 0x910   :  { %2961 = vmatpush1.msra.mxu1 %v9096_v37  ;;  %3068 = vmatprep.subr.mxu0 %v9077_v21 }
 0x911   :  { %2962 = vmatprep.subr.mxu1 %v9100_v48  ;;  %3069 = vmatpush1.msra.mxu0 %v9080_v52 }
 0x912   :  { %2963 = vmatpush1.msra.mxu1 %v9104_v10  ;;  %3070 = vmatprep.subr.mxu0 %v9084_v53 }
 0x913   :  { %7053 = vmatmul.mubr.msk.f32.vlgmr.msra.gmra.mxu1 %vm583_vm6, %v2927_v11  ;;  %3071 = vmatpush1.msra.mxu0 %v9088_v43 }
 0x914   :  { %3072 = vmatprep.subr.mxu0 %v9092_v61  ;;  %3108 = vmatprep.mubr.f32.mxu0 %v8152_v0 }
 0x915   :  { %3073 = vmatpush1.msra.mxu0 %v9096_v37  ;;  %3178 = vmatprep.subr.mxu1 %v9035_v4 }
 0x916   :  { %3074 = vmatprep.subr.mxu0 %v9100_v48  ;;  %3179 = vmatpush1.msra.mxu1 %v9051_v62 }
 0x917   :  { %3075 = vmatpush1.msra.mxu0 %v9104_v10  ;;  %3180 = vmatprep.subr.mxu1 %v9053_v39 }
 0x918   :  { %3181 = vmatpush1.msra.mxu1 %v9057_v59  ;;  %3226 = vmatprep.mubr.f32.mxu1 %v8152_v0 }
 0x919   :  { %3182 = vmatprep.subr.mxu1 %v9061_v57  ;;  %3296 = vmatprep.subr.mxu0 %v9035_v4 }
 0x91a   :  { %3183 = vmatpush1.msra.mxu1 %v9064_v18 }
 0x91b   :  { %3184 = vmatprep.subr.mxu1 %v9068_v12 }
 0x91c   :  { %3185 = vmatpush1.msra.mxu1 %v9073_v47 }
 0x91d   :  { %3186 = vmatprep.subr.mxu1 %v9077_v21 }
 0x91e   :  { %3187 = vmatpush1.msra.mxu1 %v9080_v52 }
 0x91f   :  { %3188 = vmatprep.subr.mxu1 %v9084_v53 }
 0x920   :  { %3189 = vmatpush1.msra.mxu1 %v9088_v43 }
 0x921   :  { %3190 = vmatprep.subr.mxu1 %v9092_v61 }
 0x922   :  { %3191 = vmatpush1.msra.mxu1 %v9096_v37 }
 0x923   :  { %3192 = vmatprep.subr.mxu1 %v9100_v48 }
 0x924   :  { %3193 = vmatpush1.msra.mxu1 %v9104_v10 }
 0x925   :  { %3414 = vmatprep.subr.mxu1 %v9035_v4 }
 0x9c3   :  { %v2730_v9 = vpop.f32.mrf.mxu1  ;;  %v2892_v50 = vpop.f32.mrf.mxu0 }
 0x9c4   :  { %v2741_v2 = vadd.f32 %v2730_v9, %v9043_v60 }
 0x9c5   :  { %v2732_v7 = vpop.f32.mrf.mxu1  ;;  %v2894_v19 = vpop.f32.mrf.mxu0 }
 0x9c6   :  { %v2742_v27 = vadd.f32 %v2732_v7, %v9045_v23  ;;  %v9144_v41 = vadd.f32 %v2892_v50, %v2741_v2 }
 0x9c7   :  { %v2736_v28 = vpop.f32.mrf.mxu1 }
 0x9c8   :  { %v2743_v35 = vadd.f32 %v2736_v28, %v9047_v44  ;;  %v9147_v54 = vadd.f32 %v2894_v19, %v2742_v27  ;;  %v2898_v14 = vpop.f32.mrf.mxu0 }
 0x9c9   :  { %v2738_v30 = vpop.f32.mrf.mxu1 }
 0x9ca   :  { %v9150_v16 = vadd.f32 %v2738_v30, %v9049_v22  ;;  %v9152_v20 = vadd.f32 %v2898_v14, %v2743_v35  ;;  %v9199_v11 = vpop.f32.mrf.mxu0 }
 0x9d3   :  { %v2998_v26 = vpop.f32.mrf.mxu1 }
 0x9d4   :  { %v3003_v45 = vadd.f32 %v2998_v26, %v9175_v3 }
 0x9d5   :  { %v3000_v51 = vpop.f32.mrf.mxu1 }
 0x9d6   :  { %v3004_v1 = vadd.f32 %v3000_v51, %v9164_v34  ;;  %v7054_v58 = vmul.f32 -1.442695, %v3003_v45 }
 0x9d8   :  { %7439 = vtanh.f32 %v3004_v1  ;;  %v7055_v6 = vmul.f32 -1.442695, %v3004_v1 }
 0x9d9   :  { %7441 = vpow2.f32 %v7054_v58 }
 0x9e5   :  { %v7440_v5 = vpop.eup %7439 }
 0x9e6   :  { %3024 = vrot.lane.b32.xlu0 %v7440_v5, %s8153_s7  ;;  %v7442_v32 = vpop.eup %7441 }
 0x9e7   :  { %v3011_v60 = vadd.f32 1.0, %v7442_v32 }
 0x9e9   :  { %7443 = vrcp.f32 %v3011_v60 }
 0x9f6   :  { %v7444_v63 = vpop.eup %7443 }
 0x9f7   :  { %v3022_v42 = vmul.f32 %v7444_v63, %v3020_v29 }
 0xa58   :  { %v3025_v38 = vpop.permute.xlu0 %3024 }
 0xa59   :  { %v3027_v23 = vmul.f32 %v7444_v63, %v3025_v38 }
 0xa5b   :  { %3029 = vrot.lane.b32.xlu0 %v3027_v23, %s8153_s7 }
 0xacd   :  { %v3030_v44 = vpop.permute.xlu0 %3029 }
 0xace   :  { %v3032_v49 = vadd.f32 %v3030_v44, %v3022_v42 }
 0xad0   :  { %7445 = vtanh.f32 %v3032_v49  ;;  %v3137_v1 = vrot.slane %v3032_v49, 6 }
 0xad1   :  { %7447 = vpow2.f32 %v7055_v6 }
 0xadd   :  { %v7446_v15 = vpop.eup %7445 }
 0xade   :  { %3035 = vrot.lane.b32.xlu1 %v7446_v15, %s8153_s7  ;;  %v7448_v22 = vpop.eup %7447 }
 0xadf   :  { %v3012_v36 = vadd.f32 1.0, %v7448_v22 }
 0xae1   :  { %7449 = vrcp.f32 %v3012_v36 }
 0xaee   :  { %v7450_v55 = vpop.eup %7449 }
 0xb50   :  { %v3036_v46 = vpop.permute.xlu1 %3035 }
 0xb51   :  { %v3038_v56 = vmul.f32 %v7450_v55, %v3036_v46 }
 0xb53   :  { %3040 = vst.msk [vmem:[#allocation2] sm:$0x3] %vm3039_vm8, %v3038_v56  ;;  %7056 = vmatmul.mubr.msk.f32.vlgmr.msra.gmra.mxu0 %vm583_vm6, %v3038_v56 }
 0xb54   :  { %3297 = vmatpush1.msra.mxu0 %v9051_v62  ;;  %3344 = vmatprep.mubr.f32.mxu0 %v8152_v0 }
 0xb55   :  { %3298 = vmatprep.subr.mxu0 %v9053_v39 }
 0xb56   :  { %3299 = vmatpush1.msra.mxu0 %v9057_v59 }
 0xb57   :  { %3300 = vmatprep.subr.mxu0 %v9061_v57 }
 0xb58   :  { %3301 = vmatpush1.msra.mxu0 %v9064_v18 }
 0xb59   :  { %3302 = vmatprep.subr.mxu0 %v9068_v12 }
 0xb5a   :  { %3303 = vmatpush1.msra.mxu0 %v9073_v47 }
 0xb5b   :  { %3304 = vmatprep.subr.mxu0 %v9077_v21 }
 0xb5c   :  { %3305 = vmatpush1.msra.mxu0 %v9080_v52 }
 0xb5d   :  { %3306 = vmatprep.subr.mxu0 %v9084_v53 }
 0xb5e   :  { %3307 = vmatpush1.msra.mxu0 %v9088_v43 }
 0xb5f   :  { %3308 = vmatprep.subr.mxu0 %v9092_v61 }
 0xb60   :  { %3309 = vmatpush1.msra.mxu0 %v9096_v37 }
 0xb61   :  { %3310 = vmatprep.subr.mxu0 %v9100_v48 }
 0xb62   :  { %3311 = vmatpush1.msra.mxu0 %v9104_v10 }
 0xb63   :  { %3524 = vmatprep.subr.mxu0 %v9035_v4 }
 0xc13   :  { %v3110_v9 = vpop.f32.mrf.mxu0 }
 0xc14   :  { %v3117_v27 = vrot.slane %v3110_v9, 6 }
 0xc15   :  { %v3112_v50 = vpop.f32.mrf.mxu0 }
 0xc16   :  { %v3118_v2 = vrot.slane %v3112_v50, 6  ;;  %v3121_v28 = vadd.f32 %v3117_v27, %v9175_v3 }
 0xc18   :  { %v3122_v7 = vadd.f32 %v3118_v2, %v9164_v34  ;;  %v7057_v35 = vmul.f32 -1.442695, %v3121_v28 }
 0xc1a   :  { %7451 = vtanh.f32 %v3122_v7  ;;  %v7058_v60 = vmul.f32 -1.442695, %v3122_v7 }
 0xc1b   :  { %7453 = vpow2.f32 %v7057_v35 }
 0xc27   :  { %v7452_v19 = vpop.eup %7451 }
 0xc28   :  { %3141 = vrot.lane.b32.xlu0 %v7452_v19, %s8153_s7  ;;  %v7454_v14 = vpop.eup %7453 }
 0xc29   :  { %v3129_v30 = vadd.f32 1.0, %v7454_v14 }
 0xc2b   :  { %7455 = vrcp.f32 %v3129_v30 }
 0xc38   :  { %v7456_v33 = vpop.eup %7455 }
 0xc39   :  { %v3139_v5 = vmul.f32 %v7456_v33, %v3137_v1 }
 0xc9a   :  { %v3142_v26 = vpop.permute.xlu0 %3141 }
 0xc9b   :  { %v3144_v51 = vmul.f32 %v7456_v33, %v3142_v26 }
 0xc9d   :  { %3146 = vrot.lane.b32.xlu1 %v3144_v51, %s8153_s7 }
 0xd0f   :  { %v3147_v45 = vpop.permute.xlu1 %3146 }
 0xd10   :  { %v3149_v58 = vadd.f32 %v3147_v45, %v3139_v5 }
 0xd12   :  { %7457 = vtanh.f32 %v3149_v58  ;;  %v3255_v27 = vrot.slane %v3149_v58, 6 }
 0xd13   :  { %7459 = vpow2.f32 %v7058_v60 }
 0xd1f   :  { %v7458_v32 = vpop.eup %7457 }
 0xd20   :  { %3152 = vrot.lane.b32.xlu0 %v7458_v32, %s8153_s7  ;;  %v7460_v63 = vpop.eup %7459 }
 0xd21   :  { %v3130_v38 = vadd.f32 1.0, %v7460_v63 }
 0xd23   :  { %7461 = vrcp.f32 %v3130_v38 }
 0xd30   :  { %v7462_v23 = vpop.eup %7461 }
 0xd92   :  { %v3153_v29 = vpop.permute.xlu0 %3152 }
 0xd93   :  { %v3155_v42 = vmul.f32 %v7462_v23, %v3153_v29 }
 0xd95   :  { %3157 = vst.msk [vmem:[#allocation2] sm:$0xc] %vm3156_vm9, %v3155_v42  ;;  %v3159_v44 = vrot.slane %v3155_v42, 2 }
 0xd97   :  { %7059 = vmatmul.mubr.msk.f32.vlgmr.msra.gmra.mxu1 %vm583_vm6, %v3159_v44 }
 0xd98   :  { %3415 = vmatpush1.msra.mxu1 %v9051_v62  ;;  %3462 = vmatprep.mubr.f32.mxu1 %v8152_v0 }
 0xd99   :  { %3416 = vmatprep.subr.mxu1 %v9053_v39 }
 0xd9a   :  { %3417 = vmatpush1.msra.mxu1 %v9057_v59 }
 0xd9b   :  { %3418 = vmatprep.subr.mxu1 %v9061_v57 }
 0xd9c   :  { %3419 = vmatpush1.msra.mxu1 %v9064_v18 }
 0xd9d   :  { %3420 = vmatprep.subr.mxu1 %v9068_v12 }
 0xd9e   :  { %3421 = vmatpush1.msra.mxu1 %v9073_v47 }
 0xd9f   :  { %3422 = vmatprep.subr.mxu1 %v9077_v21 }
 0xda0   :  { %3423 = vmatpush1.msra.mxu1 %v9080_v52 }
 0xda1   :  { %3424 = vmatprep.subr.mxu1 %v9084_v53 }
 0xda2   :  { %3425 = vmatpush1.msra.mxu1 %v9088_v43 }
 0xda3   :  { %3426 = vmatprep.subr.mxu1 %v9092_v61 }
 0xda4   :  { %3427 = vmatpush1.msra.mxu1 %v9096_v37 }
 0xda5   :  { %3428 = vmatprep.subr.mxu1 %v9100_v48 }
 0xda6   :  { %3429 = vmatpush1.msra.mxu1 %v9104_v10 }
 0xda7   :  { %3641 = vmatprep.subr.mxu1 %v9035_v4 }
 0xe57   :  { %v3228_v49 = vpop.f32.mrf.mxu1 }
 0xe58   :  { %v3235_v55 = vrot.slane %v3228_v49, 4 }
 0xe59   :  { %v3230_v15 = vpop.f32.mrf.mxu1 }
 0xe5a   :  { %v3236_v6 = vrot.slane %v3230_v15, 4  ;;  %v3239_v46 = vadd.f32 %v3235_v55, %v9175_v3 }
 0xe5c   :  { %v3240_v22 = vadd.f32 %v3236_v6, %v9164_v34  ;;  %v7060_v56 = vmul.f32 -1.442695, %v3239_v46 }
 0xe5e   :  { %7463 = vtanh.f32 %v3240_v22  ;;  %v7061_v33 = vmul.f32 -1.442695, %v3240_v22 }
 0xe5f   :  { %7465 = vpow2.f32 %v7060_v56 }
 0xe6b   :  { %v7464_v36 = vpop.eup %7463 }
 0xe6c   :  { %3259 = vrot.lane.b32.xlu1 %v7464_v36, %s8153_s7  ;;  %v7466_v9 = vpop.eup %7465 }
 0xe6d   :  { %v3247_v50 = vadd.f32 1.0, %v7466_v9 }
 0xe6f   :  { %7467 = vrcp.f32 %v3247_v50 }
 0xe7c   :  { %v7468_v2 = vpop.eup %7467 }
 0xe7d   :  { %v3257_v28 = vmul.f32 %v7468_v2, %v3255_v27 }
 0xede   :  { %v3260_v7 = vpop.permute.xlu1 %3259 }
 0xedf   :  { %v3262_v19 = vmul.f32 %v7468_v2, %v3260_v7 }
 0xee1   :  { %3264 = vrot.lane.b32.xlu0 %v3262_v19, %s8153_s7 }
 0xf53   :  { %v3265_v35 = vpop.permute.xlu0 %3264 }
 0xf54   :  { %v3267_v14 = vadd.f32 %v3265_v35, %v3257_v28 }
 0xf56   :  { %7469 = vtanh.f32 %v3267_v14  ;;  %v3373_v55 = vrot.slane %v3267_v14, 6  ;;  %v9275_v14 = vadd.f32 %v9160_v31, %v9001_v17 }
 0xf57   :  { %7471 = vpow2.f32 %v7061_v33 }
 0xf63   :  { %v7470_v30 = vpop.eup %7469 }
 0xf64   :  { %3270 = vrot.lane.b32.xlu1 %v7470_v30, %s8153_s7  ;;  %v7472_v26 = vpop.eup %7471 }
 0xf65   :  { %v3248_v51 = vadd.f32 1.0, %v7472_v26 }
 0xf67   :  { %7473 = vrcp.f32 %v3248_v51  ;;  %v9281_v51 = vadd.f32 %v9171_v8, %v8999_v24 }
 0xf74   :  { %v7474_v1 = vpop.eup %7473 }
 0xfd6   :  { %v3271_v5 = vpop.permute.xlu1 %3270 }
 0xfd7   :  { %v3273_v45 = vmul.f32 %v7474_v1, %v3271_v5 }
 0xfd9   :  { %3275 = vst.msk [vmem:[#allocation2] sm:$0x30] %vm3274_vm10, %v3273_v45  ;;  %v3277_v32 = vrot.slane %v3273_v45, 4 }
 0xfdb   :  { %7062 = vmatmul.mubr.msk.f32.vlgmr.msra.gmra.mxu0 %vm583_vm6, %v3277_v32 }
 0xfdc   :  { %3525 = vmatpush1.msra.mxu0 %v9051_v62  ;;  %3572 = vmatprep.mubr.f32.mxu0 %v8152_v0 }
 0xfdd   :  { %3526 = vmatprep.subr.mxu0 %v9053_v39 }
 0xfde   :  { %3527 = vmatpush1.msra.mxu0 %v9057_v59 }
 0xfdf   :  { %3528 = vmatprep.subr.mxu0 %v9061_v57 }
 0xfe0   :  { %3529 = vmatpush1.msra.mxu0 %v9064_v18 }
 0xfe1   :  { %3530 = vmatprep.subr.mxu0 %v9068_v12 }
 0xfe2   :  { %3531 = vmatpush1.msra.mxu0 %v9073_v47 }
 0xfe3   :  { %3532 = vmatprep.subr.mxu0 %v9077_v21 }
 0xfe4   :  { %3533 = vmatpush1.msra.mxu0 %v9080_v52 }
 0xfe5   :  { %3534 = vmatprep.subr.mxu0 %v9084_v53 }
 0xfe6   :  { %3535 = vmatpush1.msra.mxu0 %v9088_v43 }
 0xfe7   :  { %3536 = vmatprep.subr.mxu0 %v9092_v61 }
 0xfe8   :  { %3537 = vmatpush1.msra.mxu0 %v9096_v37 }
 0xfe9   :  { %3538 = vmatprep.subr.mxu0 %v9100_v48 }
 0xfea   :  { %3539 = vmatpush1.msra.mxu0 %v9104_v10 }
 0xfeb   :  { %3758 = vmatprep.subr.mxu0 %v9035_v4 }
0x109b   :  { %v3346_v58 = vpop.f32.mrf.mxu0 }
0x109c   :  { %v3353_v29 = vrot.slane %v3346_v58, 2 }
0x109d   :  { %v3348_v60 = vpop.f32.mrf.mxu0 }
0x109e   :  { %v3354_v63 = vrot.slane %v3348_v60, 2  ;;  %v3357_v42 = vadd.f32 %v3353_v29, %v9175_v3 }
0x10a0   :  { %v3358_v38 = vadd.f32 %v3354_v63, %v9164_v34  ;;  %v7063_v44 = vmul.f32 -1.442695, %v3357_v42 }
0x10a2   :  { %7475 = vtanh.f32 %v3358_v38  ;;  %v7064_v50 = vmul.f32 -1.442695, %v3358_v38 }
0x10a3   :  { %7477 = vpow2.f32 %v7063_v44 }
0x10af   :  { %v7476_v23 = vpop.eup %7475 }
0x10b0   :  { %3377 = vrot.lane.b32.xlu0 %v7476_v23, %s8153_s7  ;;  %v7478_v49 = vpop.eup %7477 }
0x10b1   :  { %v3365_v15 = vadd.f32 1.0, %v7478_v49 }
0x10b3   :  { %7479 = vrcp.f32 %v3365_v15 }
0x10c0   :  { %v7480_v6 = vpop.eup %7479 }
0x10c1   :  { %v3375_v46 = vmul.f32 %v7480_v6, %v3373_v55 }
0x1122   :  { %v3378_v22 = vpop.permute.xlu0 %3377 }
0x1123   :  { %v3380_v36 = vmul.f32 %v7480_v6, %v3378_v22 }
0x1125   :  { %3382 = vrot.lane.b32.xlu1 %v3380_v36, %s8153_s7 }
0x1197   :  { %v3383_v34 = vpop.permute.xlu1 %3382 }
0x1198   :  { %v3385_v56 = vadd.f32 %v3383_v34, %v3375_v46 }
0x119a   :  { %7481 = vtanh.f32 %v3385_v56  ;;  %v3485_v63 = vrot.slane %v3385_v56, 6 }
0x119b   :  { %7483 = vpow2.f32 %v7064_v50 }
0x11a7   :  { %v7482_v9 = vpop.eup %7481 }
0x11a8   :  { %3388 = vrot.lane.b32.xlu0 %v7482_v9, %s8153_s7  ;;  %v7484_v3 = vpop.eup %7483 }
0x11a9   :  { %v3366_v2 = vadd.f32 1.0, %v7484_v3 }
0x11ab   :  { %7485 = vrcp.f32 %v3366_v2 }
0x11b8   :  { %v7486_v7 = vpop.eup %7485 }
0x121a   :  { %v3389_v19 = vpop.permute.xlu0 %3388 }
0x121b   :  { %v3391_v27 = vmul.f32 %v7486_v7, %v3389_v19 }
0x121d   :  { %3393 = vst.msk [vmem:[#allocation2] sm:$0xc0] %vm3392_vm11, %v3391_v27  ;;  %v3395_v28 = vrot.slane %v3391_v27, 6 }
0x121f   :  { %7065 = vmatmul.mubr.msk.f32.vlgmr.msra.gmra.mxu1 %vm583_vm6, %v3395_v28 }
0x1220   :  { %3642 = vmatpush1.msra.mxu1 %v9051_v62  ;;  %3689 = vmatprep.mubr.f32.mxu1 %v8152_v0 }
0x1221   :  { %3643 = vmatprep.subr.mxu1 %v9053_v39 }
0x1222   :  { %3644 = vmatpush1.msra.mxu1 %v9057_v59 }
0x1223   :  { %3645 = vmatprep.subr.mxu1 %v9061_v57 }
0x1224   :  { %3646 = vmatpush1.msra.mxu1 %v9064_v18 }
0x1225   :  { %3647 = vmatprep.subr.mxu1 %v9068_v12 }
0x1226   :  { %3648 = vmatpush1.msra.mxu1 %v9073_v47 }
0x1227   :  { %3649 = vmatprep.subr.mxu1 %v9077_v21 }
0x1228   :  { %3650 = vmatpush1.msra.mxu1 %v9080_v52 }
0x1229   :  { %3651 = vmatprep.subr.mxu1 %v9084_v53 }
0x122a   :  { %3652 = vmatpush1.msra.mxu1 %v9088_v43 }
0x122b   :  { %3653 = vmatprep.subr.mxu1 %v9092_v61 }
0x122c   :  { %3654 = vmatpush1.msra.mxu1 %v9096_v37 }
0x122d   :  { %3655 = vmatprep.subr.mxu1 %v9100_v48 }
0x122e   :  { %3656 = vmatpush1.msra.mxu1 %v9104_v10 }
0x122f   :  { %3875 = vmatprep.subr.mxu1 %v9035_v4 }
0x12df   :  { %v3464_v35 = vpop.f32.mrf.mxu1 }
0x12e0   :  { %v3469_v1 = vadd.f32 %v3464_v35, %v9281_v51 }
0x12e1   :  { %v3466_v30 = vpop.f32.mrf.mxu1 }
0x12e2   :  { %v3470_v33 = vadd.f32 %v3466_v30, %v9275_v14  ;;  %v7066_v5 = vmul.f32 -1.442695, %v3469_v1 }
0x12e4   :  { %7487 = vtanh.f32 %v3470_v33  ;;  %v7067_v24 = vmul.f32 -1.442695, %v3470_v33 }
0x12e5   :  { %7489 = vpow2.f32 %v7066_v5 }
0x12f1   :  { %v7488_v26 = vpop.eup %7487 }
0x12f2   :  { %3489 = vrot.lane.b32.xlu1 %v7488_v26, %s8153_s7  ;;  %v7490_v45 = vpop.eup %7489 }
0x12f3   :  { %v3477_v32 = vadd.f32 1.0, %v7490_v45 }
0x12f5   :  { %7491 = vrcp.f32 %v3477_v32 }
0x1302   :  { %v7492_v17 = vpop.eup %7491 }
0x1303   :  { %v3487_v38 = vmul.f32 %v7492_v17, %v3485_v63 }
0x1364   :  { %v3490_v58 = vpop.permute.xlu1 %3489 }
0x1365   :  { %v3492_v60 = vmul.f32 %v7492_v17, %v3490_v58 }
0x1367   :  { %3494 = vrot.lane.b32.xlu0 %v3492_v60, %s8153_s7 }
0x13d9   :  { %v3495_v23 = vpop.permute.xlu0 %3494 }
0x13da   :  { %v3497_v29 = vadd.f32 %v3495_v23, %v3487_v38 }
0x13dc   :  { %7493 = vtanh.f32 %v3497_v29  ;;  %v3601_v35 = vrot.slane %v3497_v29, 6 }
0x13dd   :  { %7495 = vpow2.f32 %v7067_v24 }
0x13e9   :  { %v7494_v42 = vpop.eup %7493 }
0x13ea   :  { %3500 = vrot.lane.b32.xlu1 %v7494_v42, %s8153_s7  ;;  %v7496_v44 = vpop.eup %7495 }
0x13eb   :  { %v3478_v49 = vadd.f32 1.0, %v7496_v44 }
0x13ed   :  { %7497 = vrcp.f32 %v3478_v49 }
0x13fa   :  { %v7498_v15 = vpop.eup %7497 }
0x145c   :  { %v3501_v6 = vpop.permute.xlu1 %3500 }
0x145d   :  { %v3503_v22 = vmul.f32 %v7498_v15, %v3501_v6 }
0x145f   :  { %3504 = vst.msk [vmem:[#allocation2 + $0x8] sm:$0x3] %vm3039_vm8, %v3503_v22  ;;  %7068 = vmatmul.mubr.msk.f32.vlgmr.msra.gmra.mxu0 %vm583_vm6, %v3503_v22 }
0x1460   :  { %3759 = vmatpush1.msra.mxu0 %v9051_v62  ;;  %3806 = vmatprep.mubr.f32.mxu0 %v8152_v0 }
0x1461   :  { %3760 = vmatprep.subr.mxu0 %v9053_v39 }
0x1462   :  { %3761 = vmatpush1.msra.mxu0 %v9057_v59 }
0x1463   :  { %3762 = vmatprep.subr.mxu0 %v9061_v57 }
0x1464   :  { %3763 = vmatpush1.msra.mxu0 %v9064_v18 }
0x1465   :  { %3764 = vmatprep.subr.mxu0 %v9068_v12 }
0x1466   :  { %3765 = vmatpush1.msra.mxu0 %v9073_v47 }
0x1467   :  { %3766 = vmatprep.subr.mxu0 %v9077_v21 }
0x1468   :  { %3767 = vmatpush1.msra.mxu0 %v9080_v52 }
0x1469   :  { %3768 = vmatprep.subr.mxu0 %v9084_v53 }
0x146a   :  { %3769 = vmatpush1.msra.mxu0 %v9088_v43 }
0x146b   :  { %3770 = vmatprep.subr.mxu0 %v9092_v61 }
0x146c   :  { %3771 = vmatpush1.msra.mxu0 %v9096_v37 }
0x146d   :  { %3772 = vmatprep.subr.mxu0 %v9100_v48 }
0x146e   :  { %3773 = vmatpush1.msra.mxu0 %v9104_v10 }
0x146f   :  { %3985 = vmatprep.subr.mxu0 %v9035_v4 }
0x151f   :  { %v3574_v36 = vpop.f32.mrf.mxu0 }
0x1520   :  { %v3581_v9 = vrot.slane %v3574_v36, 6 }
0x1521   :  { %v3576_v55 = vpop.f32.mrf.mxu0 }
0x1522   :  { %v3582_v46 = vrot.slane %v3576_v55, 6  ;;  %v3585_v50 = vadd.f32 %v3581_v9, %v9281_v51 }
0x1524   :  { %v3586_v34 = vadd.f32 %v3582_v46, %v9275_v14  ;;  %v7069_v3 = vmul.f32 -1.442695, %v3585_v50 }
0x1526   :  { %7499 = vtanh.f32 %v3586_v34  ;;  %v7070_v5 = vmul.f32 -1.442695, %v3586_v34 }
0x1527   :  { %7501 = vpow2.f32 %v7069_v3 }
0x1533   :  { %v7500_v56 = vpop.eup %7499 }
0x1534   :  { %3605 = vrot.lane.b32.xlu0 %v7500_v56, %s8153_s7  ;;  %v7502_v2 = vpop.eup %7501 }
0x1535   :  { %v3593_v7 = vadd.f32 1.0, %v7502_v2 }
0x1537   :  { %7503 = vrcp.f32 %v3593_v7 }
0x1544   :  { %v7504_v19 = vpop.eup %7503 }
0x1545   :  { %v3603_v30 = vmul.f32 %v7504_v19, %v3601_v35 }
0x15a6   :  { %v3606_v27 = vpop.permute.xlu0 %3605 }
0x15a7   :  { %v3608_v28 = vmul.f32 %v7504_v19, %v3606_v27 }
0x15a9   :  { %3610 = vrot.lane.b32.xlu1 %v3608_v28, %s8153_s7 }
0x161b   :  { %v3611_v33 = vpop.permute.xlu1 %3610 }
0x161c   :  { %v3613_v26 = vadd.f32 %v3611_v33, %v3603_v30 }
0x161e   :  { %7505 = vtanh.f32 %v3613_v26  ;;  %v3718_v34 = vrot.slane %v3613_v26, 6 }
0x161f   :  { %7507 = vpow2.f32 %v7070_v5 }
0x162b   :  { %v7506_v1 = vpop.eup %7505 }
0x162c   :  { %3616 = vrot.lane.b32.xlu0 %v7506_v1, %s8153_s7  ;;  %v7508_v45 = vpop.eup %7507 }
0x162d   :  { %v3594_v32 = vadd.f32 1.0, %v7508_v45 }
0x162f   :  { %7509 = vrcp.f32 %v3594_v32 }
0x163c   :  { %v7510_v17 = vpop.eup %7509 }
0x169e   :  { %v3617_v58 = vpop.permute.xlu0 %3616 }
0x169f   :  { %v3619_v60 = vmul.f32 %v7510_v17, %v3617_v58 }
0x16a1   :  { %3620 = vst.msk [vmem:[#allocation2 + $0x8] sm:$0xc] %vm3156_vm9, %v3619_v60  ;;  %v3622_v63 = vrot.slane %v3619_v60, 2 }
0x16a3   :  { %7071 = vmatmul.mubr.msk.f32.vlgmr.msra.gmra.mxu1 %vm583_vm6, %v3622_v63 }
0x16a4   :  { %3876 = vmatpush1.msra.mxu1 %v9051_v62  ;;  %3923 = vmatprep.mubr.f32.mxu1 %v8152_v0 }
0x16a5   :  { %3877 = vmatprep.subr.mxu1 %v9053_v39 }
0x16a6   :  { %3878 = vmatpush1.msra.mxu1 %v9057_v59 }
0x16a7   :  { %3879 = vmatprep.subr.mxu1 %v9061_v57 }
0x16a8   :  { %3880 = vmatpush1.msra.mxu1 %v9064_v18 }
0x16a9   :  { %3881 = vmatprep.subr.mxu1 %v9068_v12 }
0x16aa   :  { %3882 = vmatpush1.msra.mxu1 %v9073_v47 }
0x16ab   :  { %3883 = vmatprep.subr.mxu1 %v9077_v21 }
0x16ac   :  { %3884 = vmatpush1.msra.mxu1 %v9080_v52 }
0x16ad   :  { %3885 = vmatprep.subr.mxu1 %v9084_v53 }
0x16ae   :  { %3886 = vmatpush1.msra.mxu1 %v9088_v43 }
0x16af   :  { %3887 = vmatprep.subr.mxu1 %v9092_v61 }
0x16b0   :  { %3888 = vmatpush1.msra.mxu1 %v9096_v37 }
0x16b1   :  { %3889 = vmatprep.subr.mxu1 %v9100_v48 }
0x16b2   :  { %3890 = vmatpush1.msra.mxu1 %v9104_v10 }
0x16b3   :  { %4102 = vmatprep.subr.mxu1 %v9035_v4 }
0x1763   :  { %v3691_v38 = vpop.f32.mrf.mxu1 }
0x1764   :  { %v3698_v44 = vrot.slane %v3691_v38, 4 }
0x1765   :  { %v3693_v23 = vpop.f32.mrf.mxu1 }
0x1766   :  { %v3699_v29 = vrot.slane %v3693_v23, 4  ;;  %v3702_v49 = vadd.f32 %v3698_v44, %v9281_v51 }
0x1768   :  { %v3703_v42 = vadd.f32 %v3699_v29, %v9275_v14  ;;  %v7072_v15 = vmul.f32 -1.442695, %v3702_v49 }
0x176a   :  { %7511 = vtanh.f32 %v3703_v42  ;;  %v7073_v2 = vmul.f32 -1.442695, %v3703_v42 }
0x176b   :  { %7513 = vpow2.f32 %v7072_v15 }
0x1777   :  { %v7512_v24 = vpop.eup %7511 }
0x1778   :  { %3722 = vrot.lane.b32.xlu1 %v7512_v24, %s8153_s7  ;;  %v7514_v6 = vpop.eup %7513 }
0x1779   :  { %v3710_v22 = vadd.f32 1.0, %v7514_v6 }
0x177b   :  { %7515 = vrcp.f32 %v3710_v22 }
0x1788   :  { %v7516_v36 = vpop.eup %7515 }
0x1789   :  { %v3720_v56 = vmul.f32 %v7516_v36, %v3718_v34 }
0x17ea   :  { %v3723_v55 = vpop.permute.xlu1 %3722 }
0x17eb   :  { %v3725_v46 = vmul.f32 %v7516_v36, %v3723_v55 }
0x17ed   :  { %3727 = vrot.lane.b32.xlu0 %v3725_v46, %s8153_s7 }
0x185f   :  { %v3728_v9 = vpop.permute.xlu0 %3727 }
0x1860   :  { %v3730_v50 = vadd.f32 %v3728_v9, %v3720_v56 }
0x1862   :  { %7517 = vtanh.f32 %v3730_v50  ;;  %v3835_v29 = vrot.slane %v3730_v50, 6 }
0x1863   :  { %7519 = vpow2.f32 %v7073_v2 }
0x186f   :  { %v7518_v3 = vpop.eup %7517 }
0x1870   :  { %3733 = vrot.lane.b32.xlu1 %v7518_v3, %s8153_s7  ;;  %v7520_v7 = vpop.eup %7519 }
0x1871   :  { %v3711_v19 = vadd.f32 1.0, %v7520_v7 }
0x1873   :  { %7521 = vrcp.f32 %v3711_v19  ;;  %v9397_v19 = vld [vmem:[#allocation14 + $0x70] sm:$0xff] }
0x1880   :  { %v7522_v27 = vpop.eup %7521 }
0x18e2   :  { %v3734_v28 = vpop.permute.xlu1 %3733 }
0x18e3   :  { %v3736_v35 = vmul.f32 %v7522_v27, %v3734_v28  ;;  %v9401_v27 = vld [vmem:[#allocation14 + $0x68] sm:$0xff]  ;;  %v9404_v28 = vld [vmem:[#allocation14 + $0x60] sm:$0xff] }
0x18e5   :  { %3737 = vst.msk [vmem:[#allocation2 + $0x8] sm:$0x30] %vm3274_vm10, %v3736_v35  ;;  %v3739_v30 = vrot.slane %v3736_v35, 4  ;;  %v9407_v35 = vld [vmem:[#allocation14 + $0x58] sm:$0xff] }
0x18e7   :  { %7074 = vmatmul.mubr.msk.f32.vlgmr.msra.gmra.mxu0 %vm583_vm6, %v3739_v30  ;;  %v9410_v30 = vld [vmem:[#allocation14 + $0x50] sm:$0xff] }
0x18e8   :  { %3986 = vmatpush1.msra.mxu0 %v9051_v62  ;;  %4033 = vmatprep.mubr.f32.mxu0 %v8152_v0 }
0x18e9   :  { %3987 = vmatprep.subr.mxu0 %v9053_v39 }
0x18ea   :  { %3988 = vmatpush1.msra.mxu0 %v9057_v59 }
0x18eb   :  { %3989 = vmatprep.subr.mxu0 %v9061_v57 }
0x18ec   :  { %3990 = vmatpush1.msra.mxu0 %v9064_v18 }
0x18ed   :  { %3991 = vmatprep.subr.mxu0 %v9068_v12 }
0x18ee   :  { %3992 = vmatpush1.msra.mxu0 %v9073_v47 }
0x18ef   :  { %3993 = vmatprep.subr.mxu0 %v9077_v21 }
0x18f0   :  { %3994 = vmatpush1.msra.mxu0 %v9080_v52 }
0x18f1   :  { %3995 = vmatprep.subr.mxu0 %v9084_v53 }
0x18f2   :  { %3996 = vmatpush1.msra.mxu0 %v9088_v43 }
0x18f3   :  { %3997 = vmatprep.subr.mxu0 %v9092_v61 }
0x18f4   :  { %3998 = vmatpush1.msra.mxu0 %v9096_v37 }
0x18f5   :  { %3999 = vmatprep.subr.mxu0 %v9100_v48 }
0x18f6   :  { %4000 = vmatpush1.msra.mxu0 %v9104_v10 }
0x18f7   :  { %4219 = vmatprep.subr.mxu0 %v9035_v4 }
0x19a7   :  { %v3808_v33 = vpop.f32.mrf.mxu0 }
0x19a8   :  { %v3815_v32 = vrot.slane %v3808_v33, 2  ;;  %v9413_v33 = vld [vmem:[#allocation14 + $0x48] sm:$0xff] }
0x19a9   :  { %v3810_v26 = vpop.f32.mrf.mxu0 }
0x19aa   :  { %v3816_v1 = vrot.slane %v3810_v26, 2  ;;  %v3819_v17 = vadd.f32 %v3815_v32, %v9281_v51  ;;  %v9416_v26 = vld [vmem:[#allocation14 + $0x40] sm:$0xff] }
0x19ab   :  { %v9428_v32 = vld [vmem:[#allocation14 + $0x20] sm:$0xff] }
0x19ac   :  { %v3820_v5 = vadd.f32 %v3816_v1, %v9275_v14  ;;  %v7075_v58 = vmul.f32 -1.442695, %v3819_v17  ;;  %v9419_v1 = vld [vmem:[#allocation14 + $0x38] sm:$0xff] }
0x19ad   :  { %v9431_v17 = vld [vmem:[#allocation14 + $0x18] sm:$0xff] }
0x19ae   :  { %7523 = vtanh.f32 %v3820_v5  ;;  %v7076_v49 = vmul.f32 -1.442695, %v3820_v5  ;;  %v9422_v5 = vld [vmem:[#allocation14 + $0x30] sm:$0xff] }
0x19af   :  { %7525 = vpow2.f32 %v7075_v58  ;;  %v9434_v58 = vld [vmem:[#allocation14 + $0x10] sm:$0xff] }
0x19bb   :  { %v7524_v45 = vpop.eup %7523 }
0x19bc   :  { %3839 = vrot.lane.b32.xlu0 %v7524_v45, %s8153_s7  ;;  %v7526_v60 = vpop.eup %7525  ;;  %v9425_v45 = vld [vmem:[#allocation14 + $0x28] sm:$0xff] }
0x19bd   :  { %v3827_v63 = vadd.f32 1.0, %v7526_v60  ;;  %v9437_v60 = vld [vmem:[#allocation14 + $0x8] sm:$0xff] }
0x19bf   :  { %7527 = vrcp.f32 %v3827_v63  ;;  %v9440_v63 = vld [vmem:[#allocation14] sm:$0xff] }
0x19cc   :  { %v7528_v38 = vpop.eup %7527 }
0x19cd   :  { %v3837_v42 = vmul.f32 %v7528_v38, %v3835_v29 }
0x1a2e   :  { %v3840_v23 = vpop.permute.xlu0 %3839 }
0x1a2f   :  { %v3842_v4 = vmul.f32 %v7528_v38, %v3840_v23 }
0x1a31   :  { %3844 = vrot.lane.b32.xlu1 %v3842_v4, %s8153_s7 }
0x1aa3   :  { %v3845_v14 = vpop.permute.xlu1 %3844 }
0x1aa4   :  { %v3847_v24 = vadd.f32 %v3845_v14, %v3837_v42 }
0x1aa6   :  { %7529 = vtanh.f32 %v3847_v24 }
0x1aa7   :  { %7531 = vpow2.f32 %v7076_v49 }
0x1ab3   :  { %v7530_v44 = vpop.eup %7529 }
0x1ab4   :  { %3850 = vrot.lane.b32.xlu0 %v7530_v44, %s8153_s7  ;;  %v7532_v51 = vpop.eup %7531 }
0x1ab5   :  { %v3828_v15 = vadd.f32 1.0, %v7532_v51 }
0x1ab7   :  { %7533 = vrcp.f32 %v3828_v15 }
0x1ac4   :  { %v7534_v6 = vpop.eup %7533 }
0x1b26   :  { %v3851_v22 = vpop.permute.xlu0 %3850 }
0x1b27   :  { %v3853_v36 = vmul.f32 %v7534_v6, %v3851_v22 }
0x1b29   :  { %3854 = vst.msk [vmem:[#allocation2 + $0x8] sm:$0xc0] %vm3392_vm11, %v3853_v36  ;;  %v3856_v55 = vrot.slane %v3853_v36, 6 }
0x1b2b   :  { %7077 = vmatmul.mubr.msk.f32.vlgmr.msra.gmra.mxu1 %vm583_vm6, %v3856_v55 }
0x1b2c   :  { %4103 = vmatpush1.msra.mxu1 %v9051_v62  ;;  %4150 = vmatprep.mubr.f32.mxu1 %v8152_v0  ;;  %v9376_v62 = vld [vmem:[#allocation14 + $0x78] sm:$0xff] }
0x1b2d   :  { %4104 = vmatprep.subr.mxu1 %v9053_v39 }
0x1b2e   :  { %4105 = vmatpush1.msra.mxu1 %v9057_v59  ;;  %v9381_v59 = vadd.f32 %v9147_v54, %v9160_v31 }
0x1b2f   :  { %4106 = vmatprep.subr.mxu1 %v9061_v57 }
0x1b30   :  { %4107 = vmatpush1.msra.mxu1 %v9064_v18 }
0x1b31   :  { %4108 = vmatprep.subr.mxu1 %v9068_v12 }
0x1b32   :  { %4109 = vmatpush1.msra.mxu1 %v9073_v47  ;;  %v9387_v47 = vadd.f32 %v9144_v41, %v9171_v8 }
0x1b33   :  { %4110 = vmatprep.subr.mxu1 %v9077_v21 }
0x1b34   :  { %4111 = vmatpush1.msra.mxu1 %v9080_v52 }
0x1b35   :  { %4112 = vmatprep.subr.mxu1 %v9084_v53 }
0x1b36   :  { %4113 = vmatpush1.msra.mxu1 %v9088_v43 }
0x1b37   :  { %4114 = vmatprep.subr.mxu1 %v9092_v61 }
0x1b38   :  { %4115 = vmatpush1.msra.mxu1 %v9096_v37 }
0x1b39   :  { %4116 = vmatprep.subr.mxu1 %v9100_v48 }
0x1b3a   :  { %4117 = vmatpush1.msra.mxu1 %v9104_v10  ;;  %v3946_v10 = vrot.slane %v3847_v24, 6 }
0x1b3b   :  { %4336 = vmatprep.subr.mxu1 %v9376_v62 }
0x1beb   :  { %v3925_v39 = vpop.f32.mrf.mxu1 }
0x1bec   :  { %v3930_v21 = vadd.f32 %v3925_v39, %v9387_v47 }
0x1bed   :  { %v3927_v57 = vpop.f32.mrf.mxu1 }
0x1bee   :  { %v3931_v18 = vadd.f32 %v3927_v57, %v9381_v59  ;;  %v7078_v52 = vmul.f32 -1.442695, %v3930_v21 }
0x1bf0   :  { %7535 = vtanh.f32 %v3931_v18  ;;  %v7079_v56 = vmul.f32 -1.442695, %v3931_v18 }
0x1bf1   :  { %7537 = vpow2.f32 %v7078_v52 }
0x1bfd   :  { %v7536_v12 = vpop.eup %7535 }
0x1bfe   :  { %3950 = vrot.lane.b32.xlu1 %v7536_v12, %s8153_s7  ;;  %v7538_v53 = vpop.eup %7537 }
0x1bff   :  { %v3938_v43 = vadd.f32 1.0, %v7538_v53 }
0x1c01   :  { %7539 = vrcp.f32 %v3938_v43 }
0x1c0e   :  { %v7540_v61 = vpop.eup %7539 }
0x1c0f   :  { %v3948_v54 = vmul.f32 %v7540_v61, %v3946_v10 }
0x1c70   :  { %v3951_v37 = vpop.permute.xlu1 %3950 }
0x1c71   :  { %v3953_v48 = vmul.f32 %v7540_v61, %v3951_v37 }
0x1c73   :  { %3955 = vrot.lane.b32.xlu0 %v3953_v48, %s8153_s7 }
0x1ce5   :  { %v3956_v46 = vpop.permute.xlu0 %3955 }
0x1ce6   :  { %v9391_v34 = vadd.f32 %v3956_v46, %v3948_v54 }
0x1ce8   :  { %7541 = vtanh.f32 %v9391_v34  ;;  %v4062_v36 = vrot.slane %v9391_v34, 6 }
0x1ce9   :  { %7543 = vpow2.f32 %v7079_v56 }
0x1cf5   :  { %v7542_v41 = vpop.eup %7541 }
0x1cf6   :  { %3961 = vrot.lane.b32.xlu1 %v7542_v41, %s8153_s7  ;;  %v7544_v9 = vpop.eup %7543 }
0x1cf7   :  { %v3939_v50 = vadd.f32 1.0, %v7544_v9 }
0x1cf9   :  { %7545 = vrcp.f32 %v3939_v50 }
0x1d06   :  { %v7546_v3 = vpop.eup %7545 }
0x1d68   :  { %v3962_v2 = vpop.permute.xlu1 %3961 }
0x1d69   :  { %v3964_v7 = vmul.f32 %v7546_v3, %v3962_v2 }
0x1d6b   :  { %3965 = vst.msk [vmem:[#allocation2 + $0x10] sm:$0x3] %vm3039_vm8, %v3964_v7  ;;  %7080 = vmatmul.mubr.msk.f32.vlgmr.msra.gmra.mxu0 %vm583_vm6, %v3964_v7 }
0x1d6c   :  { %4220 = vmatpush1.msra.mxu0 %v9397_v19  ;;  %4267 = vmatprep.mubr.f32.mxu0 %v8152_v0 }
0x1d6d   :  { %4221 = vmatprep.subr.mxu0 %v9401_v27 }
0x1d6e   :  { %4222 = vmatpush1.msra.mxu0 %v9404_v28 }
0x1d6f   :  { %4223 = vmatprep.subr.mxu0 %v9407_v35 }
0x1d70   :  { %4224 = vmatpush1.msra.mxu0 %v9410_v30 }
0x1d71   :  { %4225 = vmatprep.subr.mxu0 %v9413_v33 }
0x1d72   :  { %4226 = vmatpush1.msra.mxu0 %v9416_v26 }
0x1d73   :  { %4227 = vmatprep.subr.mxu0 %v9419_v1 }
0x1d74   :  { %4228 = vmatpush1.msra.mxu0 %v9422_v5 }
0x1d75   :  { %4229 = vmatprep.subr.mxu0 %v9425_v45 }
0x1d76   :  { %4230 = vmatpush1.msra.mxu0 %v9428_v32 }
0x1d77   :  { %4231 = vmatprep.subr.mxu0 %v9431_v17 }
0x1d78   :  { %4232 = vmatpush1.msra.mxu0 %v9434_v58 }
0x1d79   :  { %4233 = vmatprep.subr.mxu0 %v9437_v60 }
0x1d7a   :  { %4234 = vmatpush1.msra.mxu0 %v9440_v63 }
0x1d7b   :  { %4446 = vmatprep.subr.mxu0 %v9376_v62 }
0x1e2b   :  { %v4035_v38 = vpop.f32.mrf.mxu0 }
0x1e2c   :  { %v4042_v14 = vrot.slane %v4035_v38, 6 }
0x1e2d   :  { %v4037_v23 = vpop.f32.mrf.mxu0 }
0x1e2e   :  { %v4043_v4 = vrot.slane %v4037_v23, 6  ;;  %v4046_v24 = vadd.f32 %v4042_v14, %v9387_v47 }
0x1e30   :  { %v4047_v29 = vadd.f32 %v4043_v4, %v9381_v59  ;;  %v7081_v44 = vmul.f32 -1.442695, %v4046_v24 }
0x1e32   :  { %7547 = vtanh.f32 %v4047_v29  ;;  %v7082_v12 = vmul.f32 -1.442695, %v4047_v29 }
0x1e33   :  { %7549 = vpow2.f32 %v7081_v44 }
0x1e3f   :  { %v7548_v42 = vpop.eup %7547 }
0x1e40   :  { %4066 = vrot.lane.b32.xlu0 %v7548_v42, %s8153_s7  ;;  %v7550_v49 = vpop.eup %7549 }
0x1e41   :  { %v4054_v51 = vadd.f32 1.0, %v7550_v49 }
0x1e43   :  { %7551 = vrcp.f32 %v4054_v51 }
0x1e50   :  { %v7552_v15 = vpop.eup %7551 }
0x1e51   :  { %v4064_v55 = vmul.f32 %v7552_v15, %v4062_v36 }
0x1eb2   :  { %v4067_v6 = vpop.permute.xlu0 %4066 }
0x1eb3   :  { %v4069_v22 = vmul.f32 %v7552_v15, %v4067_v6 }
0x1eb5   :  { %4071 = vrot.lane.b32.xlu1 %v4069_v22, %s8153_s7 }
0x1f27   :  { %v4072_v39 = vpop.permute.xlu1 %4071 }
0x1f28   :  { %v4074_v57 = vadd.f32 %v4072_v39, %v4064_v55 }
0x1f2a   :  { %7553 = vtanh.f32 %v4074_v57  ;;  %v4179_v23 = vrot.slane %v4074_v57, 6 }
0x1f2b   :  { %7555 = vpow2.f32 %v7082_v12 }
0x1f37   :  { %v7554_v18 = vpop.eup %7553 }
0x1f38   :  { %4077 = vrot.lane.b32.xlu0 %v7554_v18, %s8153_s7  ;;  %v7556_v21 = vpop.eup %7555 }
0x1f39   :  { %v4055_v52 = vadd.f32 1.0, %v7556_v21 }
0x1f3b   :  { %7557 = vrcp.f32 %v4055_v52 }
0x1f48   :  { %v7558_v53 = vpop.eup %7557 }
0x1faa   :  { %v4078_v43 = vpop.permute.xlu0 %4077 }
0x1fab   :  { %v4080_v61 = vmul.f32 %v7558_v53, %v4078_v43 }
0x1fad   :  { %4081 = vst.msk [vmem:[#allocation2 + $0x10] sm:$0xc] %vm3156_vm9, %v4080_v61  ;;  %v4083_v37 = vrot.slane %v4080_v61, 2 }
0x1faf   :  { %7083 = vmatmul.mubr.msk.f32.vlgmr.msra.gmra.mxu1 %vm583_vm6, %v4083_v37 }
0x1fb0   :  { %4337 = vmatpush1.msra.mxu1 %v9397_v19  ;;  %4384 = vmatprep.mubr.f32.mxu1 %v8152_v0 }
0x1fb1   :  { %4338 = vmatprep.subr.mxu1 %v9401_v27 }
0x1fb2   :  { %4339 = vmatpush1.msra.mxu1 %v9404_v28 }
0x1fb3   :  { %4340 = vmatprep.subr.mxu1 %v9407_v35 }
0x1fb4   :  { %4341 = vmatpush1.msra.mxu1 %v9410_v30 }
0x1fb5   :  { %4342 = vmatprep.subr.mxu1 %v9413_v33 }
0x1fb6   :  { %4343 = vmatpush1.msra.mxu1 %v9416_v26 }
0x1fb7   :  { %4344 = vmatprep.subr.mxu1 %v9419_v1 }
0x1fb8   :  { %4345 = vmatpush1.msra.mxu1 %v9422_v5 }
0x1fb9   :  { %4346 = vmatprep.subr.mxu1 %v9425_v45 }
0x1fba   :  { %4347 = vmatpush1.msra.mxu1 %v9428_v32 }
0x1fbb   :  { %4348 = vmatprep.subr.mxu1 %v9431_v17 }
0x1fbc   :  { %4349 = vmatpush1.msra.mxu1 %v9434_v58 }
0x1fbd   :  { %4350 = vmatprep.subr.mxu1 %v9437_v60 }
0x1fbe   :  { %4351 = vmatpush1.msra.mxu1 %v9440_v63 }
0x1fbf   :  { %4563 = vmatprep.subr.mxu1 %v9376_v62 }
0x206f   :  { %v4152_v48 = vpop.f32.mrf.mxu1 }
0x2070   :  { %v4159_v41 = vrot.slane %v4152_v48, 4 }
0x2071   :  { %v4154_v10 = vpop.f32.mrf.mxu1 }
0x2072   :  { %v4160_v54 = vrot.slane %v4154_v10, 4  ;;  %v4163_v56 = vadd.f32 %v4159_v41, %v9387_v47 }
0x2074   :  { %v4164_v46 = vadd.f32 %v4160_v54, %v9381_v59  ;;  %v7084_v9 = vmul.f32 -1.442695, %v4163_v56 }
0x2076   :  { %7559 = vtanh.f32 %v4164_v46  ;;  %v7085_v24 = vmul.f32 -1.442695, %v4164_v46 }
0x2077   :  { %7561 = vpow2.f32 %v7084_v9 }
0x2083   :  { %v7560_v34 = vpop.eup %7559 }
0x2084   :  { %4183 = vrot.lane.b32.xlu1 %v7560_v34, %s8153_s7  ;;  %v7562_v50 = vpop.eup %7561 }
0x2085   :  { %v4171_v3 = vadd.f32 1.0, %v7562_v50 }
0x2087   :  { %7563 = vrcp.f32 %v4171_v3 }
0x2094   :  { %v7564_v2 = vpop.eup %7563 }
0x2095   :  { %v4181_v4 = vmul.f32 %v7564_v2, %v4179_v23 }
0x20f6   :  { %v4184_v7 = vpop.permute.xlu1 %4183 }
0x20f7   :  { %v4186_v38 = vmul.f32 %v7564_v2, %v4184_v7  ;;  %v2906_v2 = vadd.f32 %v9199_v11, %v9150_v16 }
0x20f9   :  { %4188 = vrot.lane.b32.xlu0 %v4186_v38, %s8153_s7  ;;  %v9519_v38 = vadd.f32 %v2906_v2, %v9160_v31  ;;  %v4786_v2 = vld [vmem:[#allocation15 + $0x28] sm:$0xff] }
0x216b   :  { %v4189_v29 = vpop.permute.xlu0 %4188 }
0x216c   :  { %v4191_v42 = vadd.f32 %v4189_v29, %v4181_v4 }
0x216e   :  { %7565 = vtanh.f32 %v4191_v42  ;;  %v4296_v48 = vrot.slane %v4191_v42, 6  ;;  %v9525_v42 = vadd.f32 %v9152_v20, %v9171_v8 }
0x216f   :  { %7567 = vpow2.f32 %v7085_v24 }
0x217b   :  { %v7566_v14 = vpop.eup %7565 }
0x217c   :  { %4194 = vrot.lane.b32.xlu1 %v7566_v14, %s8153_s7  ;;  %v7568_v44 = vpop.eup %7567 }
0x217d   :  { %v4172_v49 = vadd.f32 1.0, %v7568_v44 }
0x217f   :  { %7569 = vrcp.f32 %v4172_v49 }
0x218c   :  { %v7570_v51 = vpop.eup %7569 }
0x21ee   :  { %v4195_v15 = vpop.permute.xlu1 %4194 }
0x21ef   :  { %v4197_v6 = vmul.f32 %v7570_v51, %v4195_v15 }
0x21f1   :  { %4198 = vst.msk [vmem:[#allocation2 + $0x10] sm:$0x30] %vm3274_vm10, %v4197_v6  ;;  %v4200_v22 = vrot.slane %v4197_v6, 4 }
0x21f3   :  { %7086 = vmatmul.mubr.msk.f32.vlgmr.msra.gmra.mxu0 %vm583_vm6, %v4200_v22 }
0x21f4   :  { %4447 = vmatpush1.msra.mxu0 %v9397_v19  ;;  %4494 = vmatprep.mubr.f32.mxu0 %v8152_v0 }
0x21f5   :  { %4448 = vmatprep.subr.mxu0 %v9401_v27 }
0x21f6   :  { %4449 = vmatpush1.msra.mxu0 %v9404_v28 }
0x21f7   :  { %4450 = vmatprep.subr.mxu0 %v9407_v35 }
0x21f8   :  { %4451 = vmatpush1.msra.mxu0 %v9410_v30 }
0x21f9   :  { %4452 = vmatprep.subr.mxu0 %v9413_v33 }
0x21fa   :  { %4453 = vmatpush1.msra.mxu0 %v9416_v26 }
0x21fb   :  { %4454 = vmatprep.subr.mxu0 %v9419_v1 }
0x21fc   :  { %4455 = vmatpush1.msra.mxu0 %v9422_v5 }
0x21fd   :  { %4456 = vmatprep.subr.mxu0 %v9425_v45 }
0x21fe   :  { %4457 = vmatpush1.msra.mxu0 %v9428_v32 }
0x21ff   :  { %4458 = vmatprep.subr.mxu0 %v9431_v17 }
0x2200   :  { %4459 = vmatpush1.msra.mxu0 %v9434_v58 }
0x2201   :  { %4460 = vmatprep.subr.mxu0 %v9437_v60 }
0x2202   :  { %4461 = vmatpush1.msra.mxu0 %v9440_v63 }
0x2203   :  { %4680 = vmatprep.subr.mxu0 %v9376_v62 }
0x22b3   :  { %v4269_v36 = vpop.f32.mrf.mxu0 }
0x22b4   :  { %v4276_v12 = vrot.slane %v4269_v36, 2 }
0x22b5   :  { %v4271_v55 = vpop.f32.mrf.mxu0 }
0x22b6   :  { %v4277_v39 = vrot.slane %v4271_v55, 2  ;;  %v4280_v21 = vadd.f32 %v4276_v12, %v9387_v47 }
0x22b8   :  { %v4281_v57 = vadd.f32 %v4277_v39, %v9381_v59  ;;  %v7087_v52 = vmul.f32 -1.442695, %v4280_v21 }
0x22ba   :  { %7571 = vtanh.f32 %v4281_v57  ;;  %v7088_v34 = vmul.f32 -1.442695, %v4281_v57 }
0x22bb   :  { %7573 = vpow2.f32 %v7087_v52  ;;  %v4796_v52 = vld [vmem:[#allocation15 + $0x78] sm:$0xff] }
0x22c7   :  { %v7572_v18 = vpop.eup %7571 }
0x22c8   :  { %4300 = vrot.lane.b32.xlu0 %v7572_v18, %s8153_s7  ;;  %v7574_v53 = vpop.eup %7573 }
0x22c9   :  { %v4288_v43 = vadd.f32 1.0, %v7574_v53 }
0x22cb   :  { %7575 = vrcp.f32 %v4288_v43 }
0x22d8   :  { %v7576_v61 = vpop.eup %7575 }
0x22d9   :  { %v4298_v10 = vmul.f32 %v7576_v61, %v4296_v48 }
0x233a   :  { %v4301_v37 = vpop.permute.xlu0 %4300 }
0x233b   :  { %v4303_v62 = vmul.f32 %v7576_v61, %v4301_v37 }
0x233d   :  { %4305 = vrot.lane.b32.xlu1 %v4303_v62, %s8153_s7 }
0x23af   :  { %v4306_v59 = vpop.permute.xlu1 %4305 }
0x23b0   :  { %v4308_v54 = vadd.f32 %v4306_v59, %v4298_v10 }
0x23b2   :  { %7577 = vtanh.f32 %v4308_v54  ;;  %v4407_v51 = vrot.slane %v4308_v54, 6  ;;  %v4795_v54 = vld [vmem:[#allocation15 + $0x70] sm:$0xff] }
0x23b3   :  { %7579 = vpow2.f32 %v7088_v34  ;;  %v4793_v34 = vld [vmem:[#allocation15 + $0x60] sm:$0xff] }
0x23bf   :  { %v7578_v46 = vpop.eup %7577 }
0x23c0   :  { %4311 = vrot.lane.b32.xlu0 %v7578_v46, %s8153_s7  ;;  %v7580_v47 = vpop.eup %7579  ;;  %v4794_v46 = vld [vmem:[#allocation15 + $0x68] sm:$0xff] }
0x23c1   :  { %v4289_v41 = vadd.f32 1.0, %v7580_v47  ;;  %v4792_v47 = vld [vmem:[#allocation15 + $0x58] sm:$0xff] }
0x23c3   :  { %7581 = vrcp.f32 %v4289_v41  ;;  %v4791_v41 = vld [vmem:[#allocation15 + $0x50] sm:$0xff] }
0x23d0   :  { %v7582_v56 = vpop.eup %7581 }
0x2432   :  { %v4312_v9 = vpop.permute.xlu0 %4311 }
0x2433   :  { %v4314_v50 = vmul.f32 %v7582_v56, %v4312_v9  ;;  %v4790_v56 = vld [vmem:[#allocation15 + $0x48] sm:$0xff]  ;;  %v4789_v9 = vld [vmem:[#allocation15 + $0x40] sm:$0xff] }
0x2435   :  { %4315 = vst.msk [vmem:[#allocation2 + $0x10] sm:$0xc0] %vm3392_vm11, %v4314_v50  ;;  %v4317_v3 = vrot.slane %v4314_v50, 6  ;;  %v4788_v50 = vld [vmem:[#allocation15 + $0x38] sm:$0xff] }
0x2437   :  { %7089 = vmatmul.mubr.msk.f32.vlgmr.msra.gmra.mxu1 %vm583_vm6, %v4317_v3  ;;  %v4787_v3 = vld [vmem:[#allocation15 + $0x30] sm:$0xff] }
0x2438   :  { %4564 = vmatpush1.msra.mxu1 %v9397_v19  ;;  %4611 = vmatprep.mubr.f32.mxu1 %v8152_v0 }
0x2439   :  { %4565 = vmatprep.subr.mxu1 %v9401_v27 }
0x243a   :  { %4566 = vmatpush1.msra.mxu1 %v9404_v28 }
0x243b   :  { %4567 = vmatprep.subr.mxu1 %v9407_v35 }
0x243c   :  { %4568 = vmatpush1.msra.mxu1 %v9410_v30 }
0x243d   :  { %4569 = vmatprep.subr.mxu1 %v9413_v33 }
0x243e   :  { %4570 = vmatpush1.msra.mxu1 %v9416_v26 }
0x243f   :  { %4571 = vmatprep.subr.mxu1 %v9419_v1 }
0x2440   :  { %4572 = vmatpush1.msra.mxu1 %v9422_v5 }
0x2441   :  { %4573 = vmatprep.subr.mxu1 %v9425_v45 }
0x2442   :  { %4574 = vmatpush1.msra.mxu1 %v9428_v32 }
0x2443   :  { %4575 = vmatprep.subr.mxu1 %v9431_v17 }
0x2444   :  { %4576 = vmatpush1.msra.mxu1 %v9434_v58 }
0x2445   :  { %4577 = vmatprep.subr.mxu1 %v9437_v60 }
0x2446   :  { %4578 = vmatpush1.msra.mxu1 %v9440_v63 }
0x2447   :  { %4837 = vmatprep.subr.mxu1 %v4796_v52 }
0x24f7   :  { %v4386_v7 = vpop.f32.mrf.mxu1 }
0x24f8   :  { %v4391_v14 = vadd.f32 %v4386_v7, %v9525_v42  ;;  %v4785_v7 = vld [vmem:[#allocation15 + $0x20] sm:$0xff] }
0x24f9   :  { %v4388_v23 = vpop.f32.mrf.mxu1 }
0x24fa   :  { %v4392_v4 = vadd.f32 %v4388_v23, %v9519_v38  ;;  %v7090_v24 = vmul.f32 -1.442695, %v4391_v14  ;;  %v4784_v23 = vld [vmem:[#allocation15 + $0x18] sm:$0xff]  ;;  %v4781_v14 = vld [vmem:[#allocation15] sm:$0xff] }
0x24fc   :  { %7583 = vtanh.f32 %v4392_v4  ;;  %v7091_v20 = vmul.f32 -1.442695, %v4392_v4  ;;  %v4783_v4 = vld [vmem:[#allocation15 + $0x10] sm:$0xff] }
0x24fd   :  { %7585 = vpow2.f32 %v7090_v24  ;;  %v4777_v24 = vld [vmem:[#allocation2] sm:$0xff] }
0x2509   :  { %v7584_v29 = vpop.eup %7583 }
0x250a   :  { %4411 = vrot.lane.b32.xlu1 %v7584_v29, %s8153_s7  ;;  %v7586_v16 = vpop.eup %7585  ;;  %v4782_v29 = vld [vmem:[#allocation15 + $0x8] sm:$0xff] }
0x250b   :  { %v4399_v11 = vadd.f32 1.0, %v7586_v16  ;;  %v4778_v16 = vld [vmem:[#allocation2 + $0x8] sm:$0xff] }
0x250d   :  { %7587 = vrcp.f32 %v4399_v11  ;;  %v4779_v11 = vld [vmem:[#allocation2 + $0x10] sm:$0xff] }
0x251a   :  { %v7588_v31 = vpop.eup %7587 }
0x251b   :  { %v4409_v15 = vmul.f32 %v7588_v31, %v4407_v51 }
0x257c   :  { %v4412_v44 = vpop.permute.xlu1 %4411 }
0x257d   :  { %v4414_v49 = vmul.f32 %v7588_v31, %v4412_v44 }
0x257f   :  { %4416 = vrot.lane.b32.xlu0 %v4414_v49, %s8153_s7 }
0x25f1   :  { %v4417_v6 = vpop.permute.xlu0 %4416 }
0x25f2   :  { %v4419_v22 = vadd.f32 %v4417_v6, %v4409_v15 }
0x25f4   :  { %7589 = vtanh.f32 %v4419_v22 }
0x25f5   :  { %7591 = vpow2.f32 %v7091_v20 }
0x2601   :  { %v7590_v36 = vpop.eup %7589 }
0x2602   :  { %4422 = vrot.lane.b32.xlu1 %v7590_v36, %s8153_s7  ;;  %v7592_v8 = vpop.eup %7591 }
0x2603   :  { %v4400_v55 = vadd.f32 1.0, %v7592_v8 }
0x2605   :  { %7593 = vrcp.f32 %v4400_v55 }
0x2612   :  { %v7594_v39 = vpop.eup %7593 }
0x2674   :  { %v4423_v57 = vpop.permute.xlu1 %4422 }
0x2675   :  { %v4425_v18 = vmul.f32 %v7594_v39, %v4423_v57 }
0x2677   :  { %4426 = vst.msk [vmem:[#allocation2 + $0x18] sm:$0x3] %vm3039_vm8, %v4425_v18  ;;  %7092 = vmatmul.mubr.msk.f32.vlgmr.msra.gmra.mxu0 %vm583_vm6, %v4425_v18 }
0x2678   :  { %4681 = vmatpush1.msra.mxu0 %v9397_v19  ;;  %4728 = vmatprep.mubr.f32.mxu0 %v8152_v0 }
0x2679   :  { %4682 = vmatprep.subr.mxu0 %v9401_v27 }
0x267a   :  { %4683 = vmatpush1.msra.mxu0 %v9404_v28 }
0x267b   :  { %4684 = vmatprep.subr.mxu0 %v9407_v35 }
0x267c   :  { %4685 = vmatpush1.msra.mxu0 %v9410_v30 }
0x267d   :  { %4686 = vmatprep.subr.mxu0 %v9413_v33 }
0x267e   :  { %4687 = vmatpush1.msra.mxu0 %v9416_v26 }
0x267f   :  { %4688 = vmatprep.subr.mxu0 %v9419_v1 }
0x2680   :  { %4689 = vmatpush1.msra.mxu0 %v9422_v5 }
0x2681   :  { %4690 = vmatprep.subr.mxu0 %v9425_v45 }
0x2682   :  { %4691 = vmatpush1.msra.mxu0 %v9428_v32 }
0x2683   :  { %4692 = vmatprep.subr.mxu0 %v9431_v17 }
0x2684   :  { %4693 = vmatpush1.msra.mxu0 %v9434_v58 }
0x2685   :  { %4694 = vmatprep.subr.mxu0 %v9437_v60  ;;  %v4523_v60 = vrot.slane %v4419_v22, 6 }
0x2686   :  { %4695 = vmatpush1.msra.mxu0 %v9440_v63 }
0x2737   :  { %v4496_v19 = vpop.f32.mrf.mxu0 }
0x2738   :  { %v4503_v33 = vrot.slane %v4496_v19, 6 }
0x2739   :  { %v4498_v27 = vpop.f32.mrf.mxu0 }
0x273a   :  { %v4504_v28 = vrot.slane %v4498_v27, 6  ;;  %v4507_v26 = vadd.f32 %v4503_v33, %v9525_v42 }
0x273c   :  { %v4508_v35 = vadd.f32 %v4504_v28, %v9519_v38  ;;  %v7093_v1 = vmul.f32 -1.442695, %v4507_v26 }
0x273e   :  { %7595 = vtanh.f32 %v4508_v35  ;;  %v7094_v43 = vmul.f32 -1.442695, %v4508_v35 }
0x273f   :  { %7597 = vpow2.f32 %v7093_v1 }
0x274b   :  { %v7596_v30 = vpop.eup %7595 }
0x274c   :  { %4527 = vrot.lane.b32.xlu0 %v7596_v30, %s8153_s7  ;;  %v7598_v5 = vpop.eup %7597 }
0x274d   :  { %v4515_v45 = vadd.f32 1.0, %v7598_v5 }
0x274f   :  { %7599 = vrcp.f32 %v4515_v45 }
0x275c   :  { %v7600_v32 = vpop.eup %7599 }
0x275d   :  { %v4525_v63 = vmul.f32 %v7600_v32, %v4523_v60 }
0x27be   :  { %v4528_v17 = vpop.permute.xlu0 %4527 }
0x27bf   :  { %v4530_v58 = vmul.f32 %v7600_v32, %v4528_v17 }
0x27c1   :  { %4532 = vrot.lane.b32.xlu1 %v4530_v58, %s8153_s7 }
0x2833   :  { %v4533_v12 = vpop.permute.xlu1 %4532 }
0x2834   :  { %v9552_v21 = vadd.f32 %v4533_v12, %v4525_v63 }
0x2836   :  { %7601 = vtanh.f32 %v9552_v21  ;;  %v4640_v18 = vrot.slane %v9552_v21, 6 }
0x2837   :  { %7603 = vpow2.f32 %v7094_v43 }
0x2843   :  { %v7602_v53 = vpop.eup %7601 }
0x2844   :  { %4538 = vrot.lane.b32.xlu0 %v7602_v53, %s8153_s7  ;;  %v7604_v61 = vpop.eup %7603 }
0x2845   :  { %v4516_v37 = vadd.f32 1.0, %v7604_v61 }
0x2847   :  { %7605 = vrcp.f32 %v4516_v37 }
0x2854   :  { %v7606_v62 = vpop.eup %7605 }
0x28b6   :  { %v4539_v48 = vpop.permute.xlu0 %4538 }
0x28b7   :  { %v4541_v10 = vmul.f32 %v7606_v62, %v4539_v48 }
0x28b9   :  { %4542 = vst.msk [vmem:[#allocation2 + $0x18] sm:$0xc] %vm3156_vm9, %v4541_v10  ;;  %v4544_v59 = vrot.slane %v4541_v10, 2  ;;  %v9586_v10 = vld [vmem:[#allocation17 + $0x70] sm:$0xff] }
0x28bb   :  { %7095 = vmatmul.mubr.msk.f32.vlgmr.msra.gmra.mxu1 %vm583_vm6, %v4544_v59  ;;  %v9588_v59 = vld [vmem:[#allocation17 + $0x68] sm:$0xff] }
0x28bc   :  { %4838 = vmatpush1.msra.mxu1 %v4795_v54  ;;  %4885 = vmatprep.mubr.f32.mxu1 %v8152_v0  ;;  %v9591_v54 = vld [vmem:[#allocation17 + $0x60] sm:$0xff] }
0x28bd   :  { %4839 = vmatprep.subr.mxu1 %v4794_v46  ;;  %v9599_v46 = vld [vmem:[#allocation17 + $0x50] sm:$0xff] }
0x28be   :  { %4840 = vmatpush1.msra.mxu1 %v4793_v34  ;;  %v9603_v34 = vld [vmem:[#allocation17 + $0x48] sm:$0xff] }
0x28bf   :  { %4841 = vmatprep.subr.mxu1 %v4792_v47  ;;  %v9607_v47 = vld [vmem:[#allocation17 + $0x40] sm:$0xff] }
0x28c0   :  { %4842 = vmatpush1.msra.mxu1 %v4791_v41  ;;  %v9611_v41 = vld [vmem:[#allocation17 + $0x38] sm:$0xff] }
0x28c1   :  { %4843 = vmatprep.subr.mxu1 %v4790_v56  ;;  %v9615_v56 = vld [vmem:[#allocation17 + $0x30] sm:$0xff] }
0x28c2   :  { %4844 = vmatpush1.msra.mxu1 %v4789_v9  ;;  %v9619_v9 = vld [vmem:[#allocation17 + $0x28] sm:$0xff] }
0x28c3   :  { %4845 = vmatprep.subr.mxu1 %v4788_v50  ;;  %v9623_v50 = vld [vmem:[#allocation17 + $0x20] sm:$0xff] }
0x28c4   :  { %4846 = vmatpush1.msra.mxu1 %v4787_v3 }
0x28c5   :  { %4847 = vmatprep.subr.mxu1 %v4786_v2 }
0x28c6   :  { %4848 = vmatpush1.msra.mxu1 %v4785_v7 }
0x28c7   :  { %4849 = vmatprep.subr.mxu1 %v4784_v23 }
0x28c8   :  { %4850 = vmatpush1.msra.mxu1 %v4783_v4  ;;  %v9636_v4 = vld [vmem:[#allocation17 + $0x18] sm:$0xff] }
0x28c9   :  { %4851 = vmatprep.subr.mxu1 %v4782_v29  ;;  %v9639_v29 = vld [vmem:[#allocation17 + $0x10] sm:$0xff] }
0x28ca   :  { %4852 = vmatpush1.msra.mxu1 %v4781_v14  ;;  %v9643_v14 = vld [vmem:[#allocation17 + $0x8] sm:$0xff] }
0x28cb   :  { %7101 = vmatmul.mubr.msk.f32.vlgmr.msra.gmra.mxu1 %vm583_vm6, %v4777_v24  ;;  %v9647_v24 = vld [vmem:[#allocation17] sm:$0xff] }
0x28cc   :  { %4891 = vmatprep.mubr.f32.mxu1 %v8152_v0 }
0x28cf   :  { %7102 = vmatmul.mubr.msk.f32.gmra.mxu1 %vm583_vm6, %v4778_v16 }
0x28d0   :  { %4897 = vmatprep.mubr.f32.mxu1 %v8152_v0 }
0x28d3   :  { %7103 = vmatmul.mubr.msk.f32.gmra.mxu1 %vm583_vm6, %v4779_v11 }
0x28d4   :  { %4903 = vmatprep.mubr.f32.mxu1 %v8152_v0 }
0x297b   :  { %v4613_v31 = vpop.f32.mrf.mxu1 }
0x297c   :  { %v4620_v6 = vrot.slane %v4613_v31, 4 }
0x297d   :  { %v4615_v44 = vpop.f32.mrf.mxu1 }
0x297e   :  { %v4621_v49 = vrot.slane %v4615_v44, 4  ;;  %v4624_v22 = vadd.f32 %v4620_v6, %v9525_v42 }
0x2980   :  { %v4625_v51 = vadd.f32 %v4621_v49, %v9519_v38  ;;  %v7096_v36 = vmul.f32 -1.442695, %v4624_v22 }
0x2982   :  { %7607 = vtanh.f32 %v4625_v51  ;;  %v7097_v30 = vmul.f32 -1.442695, %v4625_v51 }
0x2983   :  { %7609 = vpow2.f32 %v7096_v36 }
0x298b   :  { %v4887_v36 = vpop.f32.mrf.mxu1 }
0x298f   :  { %v7608_v15 = vpop.eup %7607 }
0x2990   :  { %4644 = vrot.lane.b32.xlu1 %v7608_v15, %s8153_s7  ;;  %v7610_v20 = vpop.eup %7609 }
0x2991   :  { %v4632_v8 = vadd.f32 1.0, %v7610_v20  ;;  %v4797_v20 = vld [vmem:[%s10201_s16] sm:$0x3] }
0x2993   :  { %7611 = vrcp.f32 %v4632_v8  ;;  %v9682_v8 = vrot.slane %v4797_v20, %v2253_v40 }
0x29a0   :  { %v7612_v55 = vpop.eup %7611 }
0x29a1   :  { %v4642_v19 = vmul.f32 %v7612_v55, %v4640_v18 }
0x2a02   :  { %v4645_v39 = vpop.permute.xlu1 %4644 }
0x2a03   :  { %v4647_v57 = vmul.f32 %v7612_v55, %v4645_v39  ;;  %v4889_v55 = vpop.f32.mrf.mxu1 }
0x2a05   :  { %4649 = vrot.lane.b32.xlu0 %v4647_v57, %s8153_s7  ;;  %v9685_v57 = vadd.f32 %v4889_v55, %v9682_v8 }
0x2a77   :  { %v4650_v27 = vpop.permute.xlu0 %4649 }
0x2a78   :  { %v9570_v28 = vadd.f32 %v4650_v27, %v4642_v19 }
0x2a7a   :  { %7613 = vtanh.f32 %v9570_v28  ;;  %v4757_v3 = vrot.slane %v9570_v28, 6  ;;  %v9691_v28 = vrot.slane %v4797_v20, %v2249_v25 }
0x2a7b   :  { %7615 = vpow2.f32 %v7097_v30 }
0x2a87   :  { %v7614_v35 = vpop.eup %7613 }
0x2a88   :  { %4655 = vrot.lane.b32.xlu1 %v7614_v35, %s8153_s7  ;;  %v7616_v33 = vpop.eup %7615  ;;  %v9694_v35 = vadd.f32 %v4887_v36, %v9691_v28 }
0x2a89   :  { %v4633_v26 = vadd.f32 1.0, %v7616_v33 }
0x2a8b   :  { %7617 = vrcp.f32 %v4633_v26 }
0x2a98   :  { %v7618_v1 = vpop.eup %7617 }
0x2afa   :  { %v4656_v5 = vpop.permute.xlu1 %4655 }
0x2afb   :  { %v4658_v45 = vmul.f32 %v7618_v1, %v4656_v5 }
0x2afd   :  { %4659 = vst.msk [vmem:[#allocation2 + $0x18] sm:$0x30] %vm3274_vm10, %v4658_v45  ;;  %v4661_v32 = vrot.slane %v4658_v45, 4 }
0x2aff   :  { %7098 = vmatmul.mubr.msk.f32.vlgmr.msra.gmra.mxu0 %vm583_vm6, %v4661_v32 }
0x2b00   :  { %5003 = vmatprep.mubr.f32.mxu0 %v8152_v0 }
0x2bbf   :  { %v4730_v17 = vpop.f32.mrf.mxu0 }
0x2bc0   :  { %v4737_v21 = vrot.slane %v4730_v17, 2 }
0x2bc1   :  { %v4732_v58 = vpop.f32.mrf.mxu0 }
0x2bc2   :  { %v4738_v60 = vrot.slane %v4732_v58, 2  ;;  %v4741_v52 = vadd.f32 %v4737_v21, %v9525_v42  ;;  %v9595_v42 = vld [vmem:[#allocation17 + $0x58] sm:$0xff] }
0x2bc4   :  { %v9578_v63 = vadd.f32 %v4738_v60, %v9519_v38  ;;  %v7099_v53 = vmul.f32 -1.442695, %v4741_v52  ;;  %v9584_v38 = vld [vmem:[#allocation17 + $0x78] sm:$0xff] }
0x2bc5   :  { %4955 = vmatprep.subr.mxu0 %v9584_v38  ;;  %5064 = vmatprep.subr.mxu1 %v9584_v38 }
0x2bc6   :  { %7619 = vtanh.f32 %v9578_v63  ;;  %4956 = vmatpush1.msra.mxu0 %v9586_v10  ;;  %5065 = vmatpush1.msra.mxu1 %v9586_v10  ;;  %v7100_v11 = vmul.f32 -1.442695, %v9578_v63 }
0x2bc7   :  { %7621 = vpow2.f32 %v7099_v53  ;;  %4957 = vmatprep.subr.mxu0 %v9588_v59  ;;  %5066 = vmatprep.subr.mxu1 %v9588_v59 }
0x2bc8   :  { %4958 = vmatpush1.msra.mxu0 %v9591_v54  ;;  %5067 = vmatpush1.msra.mxu1 %v9591_v54 }
0x2bc9   :  { %4959 = vmatprep.subr.mxu0 %v9595_v42  ;;  %5068 = vmatprep.subr.mxu1 %v9595_v42 }
0x2bca   :  { %4960 = vmatpush1.msra.mxu0 %v9599_v46  ;;  %5069 = vmatpush1.msra.mxu1 %v9599_v46 }
0x2bcb   :  { %4961 = vmatprep.subr.mxu0 %v9603_v34  ;;  %5070 = vmatprep.subr.mxu1 %v9603_v34 }
0x2bcc   :  { %4962 = vmatpush1.msra.mxu0 %v9607_v47  ;;  %5071 = vmatpush1.msra.mxu1 %v9607_v47 }
0x2bcd   :  { %4963 = vmatprep.subr.mxu0 %v9611_v41  ;;  %5072 = vmatprep.subr.mxu1 %v9611_v41 }
0x2bce   :  { %4964 = vmatpush1.msra.mxu0 %v9615_v56  ;;  %5073 = vmatpush1.msra.mxu1 %v9615_v56 }
0x2bcf   :  { %4965 = vmatprep.subr.mxu0 %v9619_v9  ;;  %5074 = vmatprep.subr.mxu1 %v9619_v9 }
0x2bd0   :  { %4966 = vmatpush1.msra.mxu0 %v9623_v50  ;;  %5075 = vmatpush1.msra.mxu1 %v9623_v50 }
0x2bd1   :  { %4967 = vmatprep.subr.mxu0 %v9636_v4  ;;  %5076 = vmatprep.subr.mxu1 %v9636_v4 }
0x2bd2   :  { %4968 = vmatpush1.msra.mxu0 %v9639_v29  ;;  %5077 = vmatpush1.msra.mxu1 %v9639_v29 }
0x2bd3   :  { %v7620_v12 = vpop.eup %7619  ;;  %4969 = vmatprep.subr.mxu0 %v9643_v14  ;;  %5078 = vmatprep.subr.mxu1 %v9643_v14 }
0x2bd4   :  { %4761 = vrot.lane.b32.xlu0 %v7620_v12, %s8153_s7  ;;  %v7622_v43 = vpop.eup %7621  ;;  %4970 = vmatpush1.msra.mxu0 %v9647_v24 }
0x2bd5   :  { %v4749_v61 = vadd.f32 1.0, %v7622_v43  ;;  %5079 = vmatpush1.msra.mxu1 %v9647_v24  ;;  %5180 = vmatprep.subr.mxu0 %v9584_v38  ;;  %v9718_v43 = vpop.f32.mrf.mxu1 }
0x2bd6   :  { %5296 = vmatprep.subr.mxu1 %v9584_v38 }
0x2bd7   :  { %7623 = vrcp.f32 %v4749_v61  ;;  %v9720_v61 = vpop.f32.mrf.mxu1 }
0x2be4   :  { %v7624_v37 = vpop.eup %7623 }
0x2be5   :  { %v4759_v2 = vmul.f32 %v7624_v37, %v4757_v3 }
0x2c46   :  { %v4762_v62 = vpop.permute.xlu0 %4761 }
0x2c47   :  { %v4764_v48 = vmul.f32 %v7624_v37, %v4762_v62  ;;  %v9722_v37 = vpop.f32.mrf.mxu1 }
0x2c49   :  { %4766 = vrot.lane.b32.xlu1 %v4764_v48, %s8153_s7  ;;  %v9724_v62 = vpop.f32.mrf.mxu1 }
0x2cbb   :  { %v4767_v7 = vpop.permute.xlu1 %4766 }
0x2cbc   :  { %v9633_v23 = vadd.f32 %v4767_v7, %v4759_v2 }
0x2cbe   :  { %7625 = vtanh.f32 %v9633_v23  ;;  %v5026_v32 = vrot.slane %v9633_v23, 6 }
0x2cbf   :  { %7627 = vpow2.f32 %v7100_v11 }
0x2ccb   :  { %v7626_v16 = vpop.eup %7625 }
0x2ccc   :  { %4772 = vrot.lane.b32.xlu0 %v7626_v16, %s8153_s7  ;;  %v7628_v31 = vpop.eup %7627 }
0x2ccd   :  { %v4750_v44 = vadd.f32 1.0, %v7628_v31 }
0x2ccf   :  { %7629 = vrcp.f32 %v4750_v44 }
0x2cdc   :  { %v7630_v49 = vpop.eup %7629 }
0x2d3e   :  { %v4773_v51 = vpop.permute.xlu0 %4772 }
0x2d3f   :  { %v4775_v15 = vmul.f32 %v7630_v49, %v4773_v51 }
0x2d41   :  { %4776 = vst.msk [vmem:[#allocation2 + $0x18] sm:$0xc0] %vm3392_vm11, %v4775_v15  ;;  %v4936_v6 = vrot.slane %v4775_v15, 6 }
0x2d43   :  { %7105 = vmatmul.mubr.msk.f32.vlgmr.msra.gmra.mxu0 %vm583_vm6, %v4936_v6 }
0x2d44   :  { %5181 = vmatpush1.msra.mxu0 %v9586_v10  ;;  %5228 = vmatprep.mubr.f32.mxu0 %v8152_v0 }
0x2d45   :  { %5182 = vmatprep.subr.mxu0 %v9588_v59 }
0x2d46   :  { %5183 = vmatpush1.msra.mxu0 %v9591_v54 }
0x2d47   :  { %5184 = vmatprep.subr.mxu0 %v9595_v42 }
0x2d48   :  { %v4780_v22 = vld [vmem:[#allocation2 + $0x18] sm:$0xff]  ;;  %5185 = vmatpush1.msra.mxu0 %v9599_v46 }
0x2d49   :  { %7104 = vmatmul.mubr.msk.f32.gmra.mxu1 %vm583_vm6, %v4780_v22  ;;  %5186 = vmatprep.subr.mxu0 %v9603_v34 }
0x2d4a   :  { %5112 = vmatprep.mubr.f32.mxu1 %v8152_v0  ;;  %5187 = vmatpush1.msra.mxu0 %v9607_v47 }
0x2d4b   :  { %5188 = vmatprep.subr.mxu0 %v9611_v41 }
0x2d4c   :  { %5189 = vmatpush1.msra.mxu0 %v9615_v56 }
0x2d4d   :  { %5190 = vmatprep.subr.mxu0 %v9619_v9 }
0x2d4e   :  { %5191 = vmatpush1.msra.mxu0 %v9623_v50 }
0x2d4f   :  { %5192 = vmatprep.subr.mxu0 %v9636_v4 }
0x2d50   :  { %5193 = vmatpush1.msra.mxu0 %v9639_v29 }
0x2d51   :  { %5194 = vmatprep.subr.mxu0 %v9643_v14 }
0x2d52   :  { %5195 = vmatpush1.msra.mxu0 %v9647_v24 }
0x2d53   :  { %5412 = vmatprep.subr.mxu0 %v9584_v38 }
0x2e03   :  { %v5005_v39 = vpop.f32.mrf.mxu0 }
0x2e04   :  { %v5010_v40 = vadd.f32 %v5005_v39, %v9694_v35 }
0x2e05   :  { %v5007_v18 = vpop.f32.mrf.mxu0 }
0x2e06   :  { %v5011_v19 = vadd.f32 %v5007_v18, %v9685_v57  ;;  %v7106_v30 = vmul.f32 -1.442695, %v5010_v40 }
0x2e08   :  { %7631 = vtanh.f32 %v5011_v19  ;;  %v7107_v60 = vmul.f32 -1.442695, %v5011_v19 }
0x2e09   :  { %7633 = vpow2.f32 %v7106_v30  ;;  %v9726_v48 = vpop.f32.mrf.mxu1 }
0x2e0b   :  { %v9728_v3 = vpop.f32.mrf.mxu1 }
0x2e15   :  { %v7632_v27 = vpop.eup %7631 }
0x2e16   :  { %5030 = vrot.lane.b32.xlu1 %v7632_v27, %s8153_s7  ;;  %v7634_v33 = vpop.eup %7633 }
0x2e17   :  { %v5018_v26 = vadd.f32 1.0, %v7634_v33 }
0x2e19   :  { %7635 = vrcp.f32 %v5018_v26 }
0x2e26   :  { %v7636_v1 = vpop.eup %7635 }
0x2e27   :  { %v5028_v13 = vmul.f32 %v7636_v1, %v5026_v32 }
0x2e88   :  { %v5031_v5 = vpop.permute.xlu1 %5030 }
0x2e89   :  { %v5033_v45 = vmul.f32 %v7636_v1, %v5031_v5 }
0x2e8b   :  { %5035 = vrot.lane.b32.xlu0 %v5033_v45, %s8153_s7 }
0x2efd   :  { %v5036_v25 = vpop.permute.xlu0 %5035 }
0x2efe   :  { %v5038_v17 = vadd.f32 %v5036_v25, %v5028_v13 }
0x2f00   :  { %7637 = vtanh.f32 %v5038_v17  ;;  %v5141_v20 = vrot.slane %v5038_v17, 6 }
0x2f01   :  { %7639 = vpow2.f32 %v7107_v60 }
0x2f0d   :  { %v7638_v58 = vpop.eup %7637 }
0x2f0e   :  { %5041 = vrot.lane.b32.xlu1 %v7638_v58, %s8153_s7  ;;  %v7640_v63 = vpop.eup %7639 }
0x2f0f   :  { %v5019_v12 = vadd.f32 1.0, %v7640_v63 }
0x2f11   :  { %7641 = vrcp.f32 %v5019_v12 }
0x2f1e   :  { %v7642_v21 = vpop.eup %7641 }
0x2f80   :  { %v5042_v52 = vpop.permute.xlu1 %5041 }
0x2f81   :  { %v5044_v53 = vmul.f32 %v7642_v21, %v5042_v52 }
0x2f83   :  { %7108 = vmatmul.mubr.msk.f32.vlgmr.msra.gmra.mxu1 %vm583_vm6, %v5044_v53 }
0x2f84   :  { %5297 = vmatpush1.msra.mxu1 %v9586_v10  ;;  %5344 = vmatprep.mubr.f32.mxu1 %v8152_v0 }
0x2f85   :  { %5298 = vmatprep.subr.mxu1 %v9588_v59 }
0x2f86   :  { %5299 = vmatpush1.msra.mxu1 %v9591_v54 }
0x2f87   :  { %5300 = vmatprep.subr.mxu1 %v9595_v42 }
0x2f88   :  { %5301 = vmatpush1.msra.mxu1 %v9599_v46 }
0x2f89   :  { %5302 = vmatprep.subr.mxu1 %v9603_v34 }
0x2f8a   :  { %5303 = vmatpush1.msra.mxu1 %v9607_v47 }
0x2f8b   :  { %5304 = vmatprep.subr.mxu1 %v9611_v41 }
0x2f8c   :  { %5305 = vmatpush1.msra.mxu1 %v9615_v56 }
0x2f8d   :  { %5306 = vmatprep.subr.mxu1 %v9619_v9 }
0x2f8e   :  { %5307 = vmatpush1.msra.mxu1 %v9623_v50 }
0x2f8f   :  { %5308 = vmatprep.subr.mxu1 %v9636_v4 }
0x2f90   :  { %5309 = vmatpush1.msra.mxu1 %v9639_v29 }
0x2f91   :  { %5310 = vmatprep.subr.mxu1 %v9643_v14 }
0x2f92   :  { %5311 = vmatpush1.msra.mxu1 %v9647_v24 }
0x2f93   :  { %5521 = vmatprep.subr.mxu1 %v9584_v38 }
0x3043   :  { %v5114_v2 = vpop.f32.mrf.mxu1 }
0x3044   :  { %v5121_v31 = vrot.slane %v5114_v2, 6 }
0x3045   :  { %v5116_v7 = vpop.f32.mrf.mxu1 }
0x3046   :  { %v5122_v23 = vrot.slane %v5116_v7, 6  ;;  %v5125_v44 = vadd.f32 %v5121_v31, %v9694_v35 }
0x3048   :  { %v5126_v16 = vadd.f32 %v5122_v23, %v9685_v57  ;;  %v7109_v49 = vmul.f32 -1.442695, %v5125_v44 }
0x304a   :  { %7643 = vtanh.f32 %v5126_v16  ;;  %v7110_v27 = vmul.f32 -1.442695, %v5126_v16 }
0x304b   :  { %7645 = vpow2.f32 %v7109_v49 }
0x3057   :  { %v7644_v11 = vpop.eup %7643 }
0x3058   :  { %5145 = vrot.lane.b32.xlu0 %v7644_v11, %s8153_s7  ;;  %v7646_v51 = vpop.eup %7645 }
0x3059   :  { %v5133_v15 = vadd.f32 1.0, %v7646_v51 }
0x305b   :  { %7647 = vrcp.f32 %v5133_v15 }
0x3068   :  { %v7648_v6 = vpop.eup %7647 }
0x3069   :  { %v5143_v55 = vmul.f32 %v7648_v6, %v5141_v20 }
0x30ca   :  { %v5146_v22 = vpop.permute.xlu0 %5145 }
0x30cb   :  { %v5148_v36 = vmul.f32 %v7648_v6, %v5146_v22 }
0x30cd   :  { %5150 = vrot.lane.b32.xlu1 %v5148_v36, %s8153_s7 }
0x313f   :  { %v5151_v39 = vpop.permute.xlu1 %5150 }
0x3140   :  { %v5153_v18 = vadd.f32 %v5151_v39, %v5143_v55 }
0x3142   :  { %7649 = vtanh.f32 %v5153_v18  ;;  %v5257_v7 = vrot.slane %v5153_v18, 6 }
0x3143   :  { %7651 = vpow2.f32 %v7110_v27 }
0x314f   :  { %v7650_v19 = vpop.eup %7649 }
0x3150   :  { %5156 = vrot.lane.b32.xlu0 %v7650_v19, %s8153_s7  ;;  %v7652_v40 = vpop.eup %7651 }
0x3151   :  { %v5134_v30 = vadd.f32 1.0, %v7652_v40 }
0x3153   :  { %7653 = vrcp.f32 %v5134_v30 }
0x3160   :  { %v7654_v33 = vpop.eup %7653 }
0x31c2   :  { %v5157_v26 = vpop.permute.xlu0 %5156 }
0x31c3   :  { %v5159_v1 = vmul.f32 %v7654_v33, %v5157_v26 }
0x31c5   :  { %v5161_v5 = vrot.slane %v5159_v1, 2 }
0x31c7   :  { %7111 = vmatmul.mubr.msk.f32.vlgmr.msra.gmra.mxu0 %vm583_vm6, %v5161_v5 }
0x31c8   :  { %5413 = vmatpush1.msra.mxu0 %v9586_v10  ;;  %5460 = vmatprep.mubr.f32.mxu0 %v8152_v0 }
0x31c9   :  { %5414 = vmatprep.subr.mxu0 %v9588_v59 }
0x31ca   :  { %5415 = vmatpush1.msra.mxu0 %v9591_v54 }
0x31cb   :  { %5416 = vmatprep.subr.mxu0 %v9595_v42 }
0x31cc   :  { %5417 = vmatpush1.msra.mxu0 %v9599_v46 }
0x31cd   :  { %5418 = vmatprep.subr.mxu0 %v9603_v34 }
0x31ce   :  { %5419 = vmatpush1.msra.mxu0 %v9607_v47 }
0x31cf   :  { %5420 = vmatprep.subr.mxu0 %v9611_v41 }
0x31d0   :  { %5421 = vmatpush1.msra.mxu0 %v9615_v56 }
0x31d1   :  { %5422 = vmatprep.subr.mxu0 %v9619_v9 }
0x31d2   :  { %5423 = vmatpush1.msra.mxu0 %v9623_v50 }
0x31d3   :  { %5424 = vmatprep.subr.mxu0 %v9636_v4 }
0x31d4   :  { %5425 = vmatpush1.msra.mxu0 %v9639_v29 }
0x31d5   :  { %5426 = vmatprep.subr.mxu0 %v9643_v14 }
0x31d6   :  { %5427 = vmatpush1.msra.mxu0 %v9647_v24 }
0x31d7   :  { %5637 = vmatprep.subr.mxu0 %v9584_v38 }
0x3287   :  { %v5230_v45 = vpop.f32.mrf.mxu0 }
0x3288   :  { %v5237_v58 = vrot.slane %v5230_v45, 4 }
0x3289   :  { %v5232_v32 = vpop.f32.mrf.mxu0 }
0x328a   :  { %v5238_v13 = vrot.slane %v5232_v32, 4  ;;  %v5241_v60 = vadd.f32 %v5237_v58, %v9694_v35 }
0x328c   :  { %v5242_v25 = vadd.f32 %v5238_v13, %v9685_v57  ;;  %v7112_v63 = vmul.f32 -1.442695, %v5241_v60 }
0x328e   :  { %7655 = vtanh.f32 %v5242_v25  ;;  %v7113_v44 = vmul.f32 -1.442695, %v5242_v25 }
0x328f   :  { %7657 = vpow2.f32 %v7112_v63 }
0x329b   :  { %v7656_v17 = vpop.eup %7655 }
0x329c   :  { %5261 = vrot.lane.b32.xlu1 %v7656_v17, %s8153_s7  ;;  %v7658_v12 = vpop.eup %7657 }
0x329d   :  { %v5249_v21 = vadd.f32 1.0, %v7658_v12 }
0x329f   :  { %7659 = vrcp.f32 %v5249_v21 }
0x32ac   :  { %v7660_v52 = vpop.eup %7659 }
0x32ad   :  { %v5259_v23 = vmul.f32 %v7660_v52, %v5257_v7 }
0x330e   :  { %v5262_v53 = vpop.permute.xlu1 %5261 }
0x330f   :  { %v5264_v2 = vmul.f32 %v7660_v52, %v5262_v53 }
0x3311   :  { %5266 = vrot.lane.b32.xlu0 %v5264_v2, %s8153_s7  ;;  %v9801_v2 = vadd.f32 %v9720_v61, %v9682_v8 }
0x3383   :  { %v5267_v16 = vpop.permute.xlu0 %5266 }
0x3384   :  { %v5269_v11 = vadd.f32 %v5267_v16, %v5259_v23 }
0x3386   :  { %7661 = vtanh.f32 %v5269_v11  ;;  %v5373_v32 = vrot.slane %v5269_v11, 6  ;;  %v9807_v11 = vadd.f32 %v9718_v43, %v9691_v28 }
0x3387   :  { %7663 = vpow2.f32 %v7113_v44 }
0x3393   :  { %v7662_v31 = vpop.eup %7661 }
0x3394   :  { %5272 = vrot.lane.b32.xlu1 %v7662_v31, %s8153_s7  ;;  %v7664_v49 = vpop.eup %7663 }
0x3395   :  { %v5250_v51 = vadd.f32 1.0, %v7664_v49 }
0x3397   :  { %7665 = vrcp.f32 %v5250_v51 }
0x33a4   :  { %v7666_v15 = vpop.eup %7665 }
0x3406   :  { %v5273_v6 = vpop.permute.xlu1 %5272 }
0x3407   :  { %v5275_v22 = vmul.f32 %v7666_v15, %v5273_v6 }
0x3409   :  { %v5277_v36 = vrot.slane %v5275_v22, 4 }
0x340b   :  { %7114 = vmatmul.mubr.msk.f32.vlgmr.msra.gmra.mxu1 %vm583_vm6, %v5277_v36 }
0x340c   :  { %5522 = vmatpush1.msra.mxu1 %v9586_v10  ;;  %5569 = vmatprep.mubr.f32.mxu1 %v8152_v0 }
0x340d   :  { %5523 = vmatprep.subr.mxu1 %v9588_v59 }
0x340e   :  { %5524 = vmatpush1.msra.mxu1 %v9591_v54 }
0x340f   :  { %5525 = vmatprep.subr.mxu1 %v9595_v42 }
0x3410   :  { %5526 = vmatpush1.msra.mxu1 %v9599_v46 }
0x3411   :  { %5527 = vmatprep.subr.mxu1 %v9603_v34 }
0x3412   :  { %5528 = vmatpush1.msra.mxu1 %v9607_v47 }
0x3413   :  { %5529 = vmatprep.subr.mxu1 %v9611_v41 }
0x3414   :  { %5530 = vmatpush1.msra.mxu1 %v9615_v56 }
0x3415   :  { %5531 = vmatprep.subr.mxu1 %v9619_v9 }
0x3416   :  { %5532 = vmatpush1.msra.mxu1 %v9623_v50 }
0x3417   :  { %5533 = vmatprep.subr.mxu1 %v9636_v4 }
0x3418   :  { %5534 = vmatpush1.msra.mxu1 %v9639_v29 }
0x3419   :  { %5535 = vmatprep.subr.mxu1 %v9643_v14 }
0x341a   :  { %5536 = vmatpush1.msra.mxu1 %v9647_v24 }
0x341b   :  { %5753 = vmatprep.subr.mxu1 %v9584_v38 }
0x34cb   :  { %v5346_v20 = vpop.f32.mrf.mxu1 }
0x34cc   :  { %v5353_v27 = vrot.slane %v5346_v20, 2 }
0x34cd   :  { %v5348_v55 = vpop.f32.mrf.mxu1 }
0x34ce   :  { %v5354_v39 = vrot.slane %v5348_v55, 2  ;;  %v5357_v40 = vadd.f32 %v5353_v27, %v9694_v35 }
0x34d0   :  { %v5358_v18 = vadd.f32 %v5354_v39, %v9685_v57  ;;  %v7115_v30 = vmul.f32 -1.442695, %v5357_v40 }
0x34d2   :  { %7667 = vtanh.f32 %v5358_v18  ;;  %v7116_v58 = vmul.f32 -1.442695, %v5358_v18 }
0x34d3   :  { %7669 = vpow2.f32 %v7115_v30 }
0x34df   :  { %v7668_v19 = vpop.eup %7667 }
0x34e0   :  { %5377 = vrot.lane.b32.xlu0 %v7668_v19, %s8153_s7  ;;  %v7670_v33 = vpop.eup %7669 }
0x34e1   :  { %v5365_v26 = vadd.f32 1.0, %v7670_v33 }
0x34e3   :  { %7671 = vrcp.f32 %v5365_v26 }
0x34f0   :  { %v7672_v1 = vpop.eup %7671 }
0x34f1   :  { %v5375_v13 = vmul.f32 %v7672_v1, %v5373_v32 }
0x3552   :  { %v5378_v5 = vpop.permute.xlu0 %5377 }
0x3553   :  { %v5380_v45 = vmul.f32 %v7672_v1, %v5378_v5 }
0x3555   :  { %5382 = vrot.lane.b32.xlu1 %v5380_v45, %s8153_s7 }
0x35c7   :  { %v5383_v57 = vpop.permute.xlu1 %5382 }
0x35c8   :  { %v5385_v25 = vadd.f32 %v5383_v57, %v5375_v13 }
0x35ca   :  { %7673 = vtanh.f32 %v5385_v25  ;;  %v5483_v22 = vrot.slane %v5385_v25, 6 }
0x35cb   :  { %7675 = vpow2.f32 %v7116_v58 }
0x35d7   :  { %v7674_v17 = vpop.eup %7673 }
0x35d8   :  { %5388 = vrot.lane.b32.xlu0 %v7674_v17, %s8153_s7  ;;  %v7676_v35 = vpop.eup %7675 }
0x35d9   :  { %v5366_v60 = vadd.f32 1.0, %v7676_v35 }
0x35db   :  { %7677 = vrcp.f32 %v5366_v60 }
0x35e8   :  { %v7678_v63 = vpop.eup %7677 }
0x364a   :  { %v5389_v12 = vpop.permute.xlu0 %5388 }
0x364b   :  { %v5391_v21 = vmul.f32 %v7678_v63, %v5389_v12 }
0x364d   :  { %v5393_v52 = vrot.slane %v5391_v21, 6 }
0x364f   :  { %7117 = vmatmul.mubr.msk.f32.vlgmr.msra.gmra.mxu0 %vm583_vm6, %v5393_v52 }
0x3650   :  { %5638 = vmatpush1.msra.mxu0 %v9586_v10  ;;  %5685 = vmatprep.mubr.f32.mxu0 %v8152_v0 }
0x3651   :  { %5639 = vmatprep.subr.mxu0 %v9588_v59 }
0x3652   :  { %5640 = vmatpush1.msra.mxu0 %v9591_v54 }
0x3653   :  { %5641 = vmatprep.subr.mxu0 %v9595_v42 }
0x3654   :  { %5642 = vmatpush1.msra.mxu0 %v9599_v46 }
0x3655   :  { %5643 = vmatprep.subr.mxu0 %v9603_v34 }
0x3656   :  { %5644 = vmatpush1.msra.mxu0 %v9607_v47 }
0x3657   :  { %5645 = vmatprep.subr.mxu0 %v9611_v41 }
0x3658   :  { %5646 = vmatpush1.msra.mxu0 %v9615_v56 }
0x3659   :  { %5647 = vmatprep.subr.mxu0 %v9619_v9 }
0x365a   :  { %5648 = vmatpush1.msra.mxu0 %v9623_v50 }
0x365b   :  { %5649 = vmatprep.subr.mxu0 %v9636_v4 }
0x365c   :  { %5650 = vmatpush1.msra.mxu0 %v9639_v29 }
0x365d   :  { %5651 = vmatprep.subr.mxu0 %v9643_v14 }
0x365e   :  { %5652 = vmatpush1.msra.mxu0 %v9647_v24 }
0x365f   :  { %7379 = vmatprep.subr.mxu0 %v8152_v0 }
0x370f   :  { %v5462_v53 = vpop.f32.mrf.mxu0 }
0x3710   :  { %v5467_v31 = vadd.f32 %v5462_v53, %v9807_v11 }
0x3711   :  { %v5464_v7 = vpop.f32.mrf.mxu0 }
0x3712   :  { %v5468_v23 = vadd.f32 %v5464_v7, %v9801_v2  ;;  %v7118_v44 = vmul.f32 -1.442695, %v5467_v31 }
0x3714   :  { %7679 = vtanh.f32 %v5468_v23  ;;  %v7119_v43 = vmul.f32 -1.442695, %v5468_v23 }
0x3715   :  { %7681 = vpow2.f32 %v7118_v44 }
0x3721   :  { %v7680_v16 = vpop.eup %7679 }
0x3722   :  { %5487 = vrot.lane.b32.xlu1 %v7680_v16, %s8153_s7  ;;  %v7682_v49 = vpop.eup %7681 }
0x3723   :  { %v5475_v51 = vadd.f32 1.0, %v7682_v49 }
0x3725   :  { %7683 = vrcp.f32 %v5475_v51 }
0x3732   :  { %v7684_v61 = vpop.eup %7683 }
0x3733   :  { %v5485_v36 = vmul.f32 %v7684_v61, %v5483_v22 }
0x3794   :  { %v5488_v15 = vpop.permute.xlu1 %5487 }
0x3795   :  { %v5490_v6 = vmul.f32 %v7684_v61, %v5488_v15 }
0x3797   :  { %5492 = vrot.lane.b32.xlu0 %v5490_v6, %s8153_s7 }
0x3809   :  { %v5493_v20 = vpop.permute.xlu0 %5492 }
0x380a   :  { %v5495_v55 = vadd.f32 %v5493_v20, %v5485_v36 }
0x380c   :  { %7685 = vtanh.f32 %v5495_v55  ;;  %v5598_v63 = vrot.slane %v5495_v55, 6 }
0x380d   :  { %7687 = vpow2.f32 %v7119_v43 }
0x3819   :  { %v7686_v39 = vpop.eup %7685 }
0x381a   :  { %5498 = vrot.lane.b32.xlu1 %v7686_v39, %s8153_s7  ;;  %v7688_v18 = vpop.eup %7687 }
0x381b   :  { %v5476_v19 = vadd.f32 1.0, %v7688_v18 }
0x381d   :  { %7689 = vrcp.f32 %v5476_v19 }
0x382a   :  { %v7690_v27 = vpop.eup %7689 }
0x388c   :  { %v5499_v40 = vpop.permute.xlu1 %5498 }
0x388d   :  { %v5501_v30 = vmul.f32 %v7690_v27, %v5499_v40 }
0x388f   :  { %7120 = vmatmul.mubr.msk.f32.vlgmr.msra.gmra.mxu1 %vm583_vm6, %v5501_v30 }
0x3890   :  { %5754 = vmatpush1.msra.mxu1 %v9586_v10  ;;  %5801 = vmatprep.mubr.f32.mxu1 %v8152_v0 }
0x3891   :  { %5755 = vmatprep.subr.mxu1 %v9588_v59 }
0x3892   :  { %5756 = vmatpush1.msra.mxu1 %v9591_v54 }
0x3893   :  { %5757 = vmatprep.subr.mxu1 %v9595_v42 }
0x3894   :  { %5758 = vmatpush1.msra.mxu1 %v9599_v46 }
0x3895   :  { %5759 = vmatprep.subr.mxu1 %v9603_v34 }
0x3896   :  { %5760 = vmatpush1.msra.mxu1 %v9607_v47 }
0x3897   :  { %5761 = vmatprep.subr.mxu1 %v9611_v41 }
0x3898   :  { %5762 = vmatpush1.msra.mxu1 %v9615_v56 }
0x3899   :  { %5763 = vmatprep.subr.mxu1 %v9619_v9 }
0x389a   :  { %5764 = vmatpush1.msra.mxu1 %v9623_v50 }
0x389b   :  { %5765 = vmatprep.subr.mxu1 %v9636_v4 }
0x389c   :  { %5766 = vmatpush1.msra.mxu1 %v9639_v29 }
0x389d   :  { %5767 = vmatprep.subr.mxu1 %v9643_v14 }
0x389e   :  { %5768 = vmatpush1.msra.mxu1 %v9647_v24 }
0x389f   :  { %5944 = vmatprep.subr.mxu1 %v9584_v38 }
0x394f   :  { %v5571_v33 = vpop.f32.mrf.mxu1 }
0x3950   :  { %v5578_v32 = vrot.slane %v5571_v33, 6 }
0x3951   :  { %v5573_v26 = vpop.f32.mrf.mxu1 }
0x3952   :  { %v5579_v1 = vrot.slane %v5573_v26, 6  ;;  %v5582_v13 = vadd.f32 %v5578_v32, %v9807_v11 }
0x3954   :  { %v5583_v5 = vadd.f32 %v5579_v1, %v9801_v2  ;;  %v7121_v57 = vmul.f32 -1.442695, %v5582_v13 }
0x3956   :  { %7691 = vtanh.f32 %v5583_v5  ;;  %v7122_v7 = vmul.f32 -1.442695, %v5583_v5 }
0x3957   :  { %7693 = vpow2.f32 %v7121_v57 }
0x3963   :  { %v7692_v45 = vpop.eup %7691 }
0x3964   :  { %5602 = vrot.lane.b32.xlu0 %v7692_v45, %s8153_s7  ;;  %v7694_v25 = vpop.eup %7693 }
0x3965   :  { %v5590_v17 = vadd.f32 1.0, %v7694_v25 }
0x3967   :  { %7695 = vrcp.f32 %v5590_v17 }
0x3974   :  { %v7696_v58 = vpop.eup %7695 }
0x3975   :  { %v5600_v12 = vmul.f32 %v7696_v58, %v5598_v63 }
0x39d6   :  { %v5603_v35 = vpop.permute.xlu0 %5602 }
0x39d7   :  { %v5605_v60 = vmul.f32 %v7696_v58, %v5603_v35 }
0x39d9   :  { %5607 = vrot.lane.b32.xlu1 %v5605_v60, %s8153_s7 }
0x3a4b   :  { %v5608_v21 = vpop.permute.xlu1 %5607 }
0x3a4c   :  { %v5610_v52 = vadd.f32 %v5608_v21, %v5600_v12 }
0x3a4e   :  { %7697 = vtanh.f32 %v5610_v52  ;;  %v5714_v30 = vrot.slane %v5610_v52, 6 }
0x3a4f   :  { %7699 = vpow2.f32 %v7122_v7 }
0x3a5b   :  { %v7698_v53 = vpop.eup %7697 }
0x3a5c   :  { %5613 = vrot.lane.b32.xlu0 %v7698_v53, %s8153_s7  ;;  %v7700_v23 = vpop.eup %7699 }
0x3a5d   :  { %v5591_v16 = vadd.f32 1.0, %v7700_v23 }
0x3a5f   :  { %7701 = vrcp.f32 %v5591_v16 }
0x3a6c   :  { %v7702_v31 = vpop.eup %7701 }
0x3ace   :  { %v5614_v44 = vpop.permute.xlu0 %5613 }
0x3acf   :  { %v5616_v49 = vmul.f32 %v7702_v31, %v5614_v44 }
0x3ad1   :  { %v5618_v51 = vrot.slane %v5616_v49, 2 }
0x3ad3   :  { %7123 = vmatmul.mubr.msk.f32.vlgmr.msra.gmra.mxu0 %vm583_vm6, %v5618_v51  ;;  %v9874_v51 = vld [vmem:[%s10202_s17 + $0x30] sm:$0xff] }
0x3ad4   :  { %7395 = vmatprep.mubr.msk.f32.mxu0 %vm8154_vm12, %v8152_v0 }
0x3b93   :  { %v5687_v61 = vpop.f32.mrf.mxu0 }
0x3b94   :  { %v5694_v20 = vrot.slane %v5687_v61, 4  ;;  %v9888_v61 = vld [vmem:[%s10202_s17 + $0x20] sm:$0xff] }
0x3b95   :  { %v5689_v15 = vpop.f32.mrf.mxu0 }
0x3b96   :  { %v5695_v6 = vrot.slane %v5689_v15, 4  ;;  %v5698_v55 = vadd.f32 %v5694_v20, %v9807_v11  ;;  %v9895_v15 = vld [vmem:[%s10202_s17 + $0x18] sm:$0xff] }
0x3b98   :  { %v5699_v22 = vadd.f32 %v5695_v6, %v9801_v2  ;;  %v7124_v39 = vmul.f32 -1.442695, %v5698_v55  ;;  %v9902_v6 = vld [vmem:[%s10202_s17 + $0x10] sm:$0xff] }
0x3b9a   :  { %7703 = vtanh.f32 %v5699_v22  ;;  %v7125_v45 = vmul.f32 -1.442695, %v5699_v22 }
0x3b9b   :  { %7705 = vpow2.f32 %v7124_v39  ;;  %v9915_v39 = vld [vmem:[%s10202_s17 + $0x8] sm:$0xff] }
0x3ba7   :  { %v7704_v36 = vpop.eup %7703 }
0x3ba8   :  { %5718 = vrot.lane.b32.xlu1 %v7704_v36, %s8153_s7  ;;  %v7706_v43 = vpop.eup %7705 }
0x3ba9   :  { %v5706_v18 = vadd.f32 1.0, %v7706_v43  ;;  %v9922_v43 = vld [vmem:[%s10202_s17] sm:$0xff] }
0x3bab   :  { %7707 = vrcp.f32 %v5706_v18 }
0x3bb8   :  { %v7708_v19 = vpop.eup %7707 }
0x3bb9   :  { %v5716_v33 = vmul.f32 %v7708_v19, %v5714_v30 }
0x3c1a   :  { %v5719_v27 = vpop.permute.xlu1 %5718 }
0x3c1b   :  { %v5721_v40 = vmul.f32 %v7708_v19, %v5719_v27 }
0x3c1d   :  { %5723 = vrot.lane.b32.xlu0 %v5721_v40, %s8153_s7 }
0x3c8f   :  { %v5724_v26 = vpop.permute.xlu0 %5723 }
0x3c90   :  { %v9840_v1 = vadd.f32 %v5724_v26, %v5716_v33 }
0x3c92   :  { %7709 = vtanh.f32 %v9840_v1  ;;  %v5830_v22 = vrot.slane %v9840_v1, 6 }
0x3c93   :  { %7711 = vpow2.f32 %v7125_v45 }
0x3c9f   :  { %v7710_v5 = vpop.eup %7709 }
0x3ca0   :  { %5729 = vrot.lane.b32.xlu1 %v7710_v5, %s8153_s7  ;;  %v7712_v32 = vpop.eup %7711 }
0x3ca1   :  { %v5707_v13 = vadd.f32 1.0, %v7712_v32 }
0x3ca3   :  { %7713 = vrcp.f32 %v5707_v13 }
0x3cb0   :  { %v7714_v57 = vpop.eup %7713 }
0x3d12   :  { %v5730_v25 = vpop.permute.xlu1 %5729 }
0x3d13   :  { %v5732_v17 = vmul.f32 %v7714_v57, %v5730_v25 }
0x3d15   :  { %v5734_v58 = vrot.slane %v5732_v17, 4 }
0x3d17   :  { %7126 = vmatmul.mubr.msk.f32.vlgmr.msra.gmra.mxu1 %vm583_vm6, %v5734_v58 }
0x3d18   :  { %5945 = vmatpush1.msra.mxu1 %v9586_v10  ;;  %5992 = vmatprep.mubr.f32.mxu1 %v8152_v0 }
0x3d19   :  { %5946 = vmatprep.subr.mxu1 %v9588_v59 }
0x3d1a   :  { %5947 = vmatpush1.msra.mxu1 %v9591_v54 }
0x3d1b   :  { %5948 = vmatprep.subr.mxu1 %v9595_v42 }
0x3d1c   :  { %5949 = vmatpush1.msra.mxu1 %v9599_v46 }
0x3d1d   :  { %5950 = vmatprep.subr.mxu1 %v9603_v34 }
0x3d1e   :  { %5951 = vmatpush1.msra.mxu1 %v9607_v47 }
0x3d1f   :  { %5952 = vmatprep.subr.mxu1 %v9611_v41 }
0x3d20   :  { %5953 = vmatpush1.msra.mxu1 %v9615_v56 }
0x3d21   :  { %5954 = vmatprep.subr.mxu1 %v9619_v9 }
0x3d22   :  { %5955 = vmatpush1.msra.mxu1 %v9623_v50 }
0x3d23   :  { %5956 = vmatprep.subr.mxu1 %v9636_v4 }
0x3d24   :  { %5957 = vmatpush1.msra.mxu1 %v9639_v29 }
0x3d25   :  { %5958 = vmatprep.subr.mxu1 %v9643_v14 }
0x3d26   :  { %5959 = vmatpush1.msra.mxu1 %v9647_v24 }
0x3d27   :  { %6169 = vmatprep.subr.mxu1 %v9584_v38 }
0x3dd7   :  { %v5803_v35 = vpop.f32.mrf.mxu1 }
0x3dd8   :  { %v5810_v52 = vrot.slane %v5803_v35, 2 }
0x3dd9   :  { %v5805_v60 = vpop.f32.mrf.mxu1 }
0x3dda   :  { %v5811_v63 = vrot.slane %v5805_v60, 2  ;;  %v5814_v53 = vadd.f32 %v5810_v52, %v9807_v11  ;;  %v9881_v11 = vld [vmem:[%s10202_s17 + $0x28] sm:$0xff]  ;;  %v9993_v52 = vld [vmem:[#allocation17 + $0x68] sm:$0xff] }
0x3ddc   :  { %v5815_v12 = vadd.f32 %v5811_v63, %v9801_v2  ;;  %v7127_v7 = vmul.f32 -1.442695, %v5814_v53  ;;  %v9869_v2 = vld [vmem:[%s10202_s17 + $0x38] sm:$0xff]  ;;  %v9996_v53 = vld [vmem:[#allocation17 + $0x60] sm:$0xff]  ;;  %s8155_s17 = smov [#allocation21]  }
0x3ddd   :  { %7380 = vmatpush3.msra.mxu0 %v9869_v2  ;;  %s6935_s4 = sshll.u32 %s8155_s17, 4  ;;  %s6936_s4 = int_to_ptr.vmem [resolvable:$true] %s6935_s4 }
0x3dde   :  { %7715 = vtanh.f32 %v5815_v12  ;;  %7381 = vmatprep.subr.mxu0 %v8152_v0  ;;  %v7128_v19 = vmul.f32 -1.442695, %v5815_v12  ;;  %p8065_p9 = scmp.lt.s32.totalorder %s6936_s4, %s6936_s4 }
0x3ddf   :  { %7717 = vpow2.f32 %v7127_v7  ;;  %7382 = vmatpush3.msra.mxu0 %v9874_v51  ;;  %v9999_v7 = vld [vmem:[#allocation17 + $0x58] sm:$0xff] }
0x3de0   :  { %7383 = vmatprep.subr.mxu0 %v8152_v0 }
0x3de1   :  { %7384 = vmatpush3.msra.mxu0 %v9881_v11 }
0x3de2   :  { %7385 = vmatprep.subr.mxu0 %v8152_v0 }
0x3de3   :  { %7386 = vmatpush3.msra.mxu0 %v9888_v61 }
0x3de4   :  { %7387 = vmatprep.subr.mxu0 %v8152_v0 }
0x3de5   :  { %7388 = vmatpush3.msra.mxu0 %v9895_v15 }
0x3de6   :  { %7389 = vmatprep.subr.mxu0 %v8152_v0 }
0x3de7   :  { %7390 = vmatpush3.msra.mxu0 %v9902_v6 }
0x3de8   :  { %7391 = vmatprep.subr.mxu0 %v8152_v0 }
0x3de9   :  { %7392 = vmatpush3.msra.mxu0 %v9915_v39 }
0x3dea   :  { %7393 = vmatprep.subr.mxu0 %v8152_v0 }
0x3deb   :  { %v7716_v21 = vpop.eup %7715  ;;  %7394 = vmatpush3.msra.mxu0 %v9922_v43 }
0x3dec   :  { %5834 = vrot.lane.b32.xlu0 %v7716_v21, %s8153_s7  ;;  %v7718_v23 = vpop.eup %7717  ;;  %6053 = vmatprep.subr.mxu0 %v9584_v38  ;;  %v9963_v38 = vld [vmem:[#allocation17 + $0x78] sm:$0xff]  ;;  %v9989_v21 = vld [vmem:[#allocation17 + $0x70] sm:$0xff] }
0x3ded   :  { %v5822_v16 = vadd.f32 1.0, %v7718_v23  ;;  %v10002_v23 = vld [vmem:[#allocation17 + $0x50] sm:$0xff] }
0x3def   :  { %7719 = vrcp.f32 %v5822_v16  ;;  %v10005_v16 = vld [vmem:[#allocation17 + $0x48] sm:$0xff] }
0x3dfc   :  { %v7720_v31 = vpop.eup %7719 }
0x3dfd   :  { %v5832_v36 = vmul.f32 %v7720_v31, %v5830_v22  ;;  %v10017_v22 = vld [vmem:[#allocation17 + $0x28] sm:$0xff] }
0x3e5e   :  { %v5835_v44 = vpop.permute.xlu0 %5834 }
0x3e5f   :  { %v5837_v49 = vmul.f32 %v7720_v31, %v5835_v44  ;;  %v10008_v31 = vld [vmem:[#allocation17 + $0x40] sm:$0xff]  ;;  %v10011_v44 = vld [vmem:[#allocation17 + $0x38] sm:$0xff] }
0x3e61   :  { %5839 = vrot.lane.b32.xlu1 %v5837_v49, %s8153_s7  ;;  %v10014_v49 = vld [vmem:[#allocation17 + $0x30] sm:$0xff] }
0x3ed3   :  { %v5840_v20 = vpop.permute.xlu1 %5839 }
0x3ed4   :  { %v9909_v55 = vadd.f32 %v5840_v20, %v5832_v36  ;;  %v10020_v36 = vld [vmem:[#allocation17 + $0x20] sm:$0xff]  ;;  %v10023_v20 = vld [vmem:[#allocation17 + $0x18] sm:$0xff] }
0x3ed6   :  { %7721 = vtanh.f32 %v9909_v55  ;;  %v6015_v32 = vrot.slane %v9909_v55, 6  ;;  %v10026_v55 = vld [vmem:[#allocation17 + $0x10] sm:$0xff] }
0x3ed7   :  { %7723 = vpow2.f32 %v7128_v19  ;;  %v10032_v19 = vld [vmem:[#allocation17] sm:$0xff] }
0x3ee3   :  { %v7722_v18 = vpop.eup %7721 }
0x3ee4   :  { %5845 = vrot.lane.b32.xlu0 %v7722_v18, %s8153_s7  ;;  %v7724_v27 = vpop.eup %7723  ;;  %v10029_v18 = vld [vmem:[#allocation17 + $0x8] sm:$0xff] }
0x3ee5   :  { %v5823_v40 = vadd.f32 1.0, %v7724_v27 }
0x3ee7   :  { %7725 = vrcp.f32 %v5823_v40 }
0x3ef4   :  { %v7726_v30 = vpop.eup %7725 }
0x3f56   :  { %v5846_v33 = vpop.permute.xlu0 %5845 }
0x3f57   :  { %v5848_v26 = vmul.f32 %v7726_v30, %v5846_v33 }
0x3f59   :  { %v5850_v1 = vrot.slane %v5848_v26, 7  ;;  %v5925_v5 = vrot.slane %v5848_v26, 6 }
0x3f5b   :  { %7396 = vmatmul.mubr.msk.f32.vlgmr.msra.gmra.mxu0 %vm583_vm6, %v5850_v1  ;;  %7130 = vmatmul.mubr.msk.f32.vlgmr.msra.gmra.mxu1 %vm583_vm6, %v5925_v5 }
0x3f5c   :  { %6054 = vmatpush1.msra.mxu0 %v9586_v10  ;;  %6101 = vmatprep.mubr.f32.mxu0 %v8152_v0 }
0x3f5d   :  { %6055 = vmatprep.subr.mxu0 %v9588_v59  ;;  %6170 = vmatpush1.msra.mxu1 %v9586_v10  ;;  %v9967_v10 = vld [vmem:[#allocation18] sm:$0x1] }
0x3f5e   :  { %6056 = vmatpush1.msra.mxu0 %v9591_v54  ;;  %6171 = vmatprep.subr.mxu1 %v9588_v59 }
0x3f5f   :  { %6057 = vmatprep.subr.mxu0 %v9595_v42  ;;  %6172 = vmatpush1.msra.mxu1 %v9591_v54 }
0x3f60   :  { %6058 = vmatpush1.msra.mxu0 %v9599_v46  ;;  %6173 = vmatprep.subr.mxu1 %v9595_v42  ;;  %v9971_v42 = vadd.f32 %v9724_v62, %v9682_v8 }
0x3f61   :  { %6059 = vmatprep.subr.mxu0 %v9603_v34  ;;  %6174 = vmatpush1.msra.mxu1 %v9599_v46 }
0x3f62   :  { %6060 = vmatpush1.msra.mxu0 %v9607_v47  ;;  %6175 = vmatprep.subr.mxu1 %v9603_v34 }
0x3f63   :  { %6061 = vmatprep.subr.mxu0 %v9611_v41  ;;  %6176 = vmatpush1.msra.mxu1 %v9607_v47 }
0x3f64   :  { %6062 = vmatpush1.msra.mxu0 %v9615_v56  ;;  %6177 = vmatprep.subr.mxu1 %v9611_v41 }
0x3f65   :  { %6063 = vmatprep.subr.mxu0 %v9619_v9  ;;  %6178 = vmatpush1.msra.mxu1 %v9615_v56 }
0x3f66   :  { %6064 = vmatpush1.msra.mxu0 %v9623_v50  ;;  %6179 = vmatprep.subr.mxu1 %v9619_v9  ;;  %v9979_v9 = vadd.f32 %v9722_v37, %v9691_v28 }
0x3f67   :  { %6065 = vmatprep.subr.mxu0 %v9636_v4  ;;  %6180 = vmatpush1.msra.mxu1 %v9623_v50 }
0x3f68   :  { %6066 = vmatpush1.msra.mxu0 %v9639_v29  ;;  %6181 = vmatprep.subr.mxu1 %v9636_v4 }
0x3f69   :  { %6067 = vmatprep.subr.mxu0 %v9643_v14  ;;  %6182 = vmatpush1.msra.mxu1 %v9639_v29 }
0x3f6a   :  { %6068 = vmatpush1.msra.mxu0 %v9647_v24  ;;  %6183 = vmatprep.subr.mxu1 %v9643_v14 }
0x3f6b   :  { %6184 = vmatpush1.msra.mxu1 %v9647_v24  ;;  %6217 = vmatprep.mubr.f32.mxu1 %v8152_v0 }
0x3f6c   :  { %6285 = vmatprep.subr.mxu0 %v9963_v38  ;;  %6401 = vmatprep.subr.mxu1 %v9963_v38 }
0x401b   :  { %v5919_v59 = vpop.f32.mrf.mxu0  ;;  %v5994_v54 = vpop.f32.mrf.mxu1 }
0x401c   :  { %v5920_v46 = vadd.f32 %v5919_v59, %v9967_v10  ;;  %v5999_v50 = vadd.f32 %v5994_v54, %v9979_v9 }
0x401d   :  { %v7397_v34 = vpop.f32.mrf.mxu0  ;;  %v5996_v47 = vpop.f32.mrf.mxu1 }
0x401e   :  { %v6000_v41 = vadd.f32 %v5996_v47, %v9971_v42  ;;  %5924 = vst.msk [vmem:[#allocation20] sm:$0x1] %vm5923_vm13, %v5920_v46  ;;  %v7131_v4 = vmul.f32 -1.442695, %v5999_v50 }
0x4020   :  { %7727 = vtanh.f32 %v6000_v41  ;;  %v7132_v17 = vmul.f32 -1.442695, %v6000_v41 }
0x4021   :  { %7729 = vpow2.f32 %v7131_v4 }
0x402d   :  { %v7728_v56 = vpop.eup %7727 }
0x402e   :  { %6019 = vrot.lane.b32.xlu1 %v7728_v56, %s8153_s7  ;;  %v7730_v29 = vpop.eup %7729 }
0x402f   :  { %v6007_v14 = vadd.f32 1.0, %v7730_v29 }
0x4031   :  { %7731 = vrcp.f32 %v6007_v14 }
0x403e   :  { %v7732_v24 = vpop.eup %7731 }
0x403f   :  { %v6017_v13 = vmul.f32 %v7732_v24, %v6015_v32 }
0x40a0   :  { %v6020_v62 = vpop.permute.xlu1 %6019 }
0x40a1   :  { %v6022_v45 = vmul.f32 %v7732_v24, %v6020_v62 }
0x40a3   :  { %6024 = vrot.lane.b32.xlu0 %v6022_v45, %s8153_s7 }
0x4115   :  { %v6025_v57 = vpop.permute.xlu0 %6024 }
0x4116   :  { %v9984_v25 = vadd.f32 %v6025_v57, %v6017_v13 }
0x4118   :  { %7733 = vtanh.f32 %v9984_v25  ;;  %v6130_v56 = vrot.slane %v9984_v25, 6 }
0x4119   :  { %7735 = vpow2.f32 %v7132_v17 }
0x4125   :  { %v7734_v37 = vpop.eup %7733 }
0x4126   :  { %6030 = vrot.lane.b32.xlu1 %v7734_v37, %s8153_s7  ;;  %v7736_v58 = vpop.eup %7735 }
0x4127   :  { %v6008_v35 = vadd.f32 1.0, %v7736_v58 }
0x4129   :  { %7737 = vrcp.f32 %v6008_v35 }
0x4136   :  { %v7738_v60 = vpop.eup %7737 }
0x4198   :  { %v6031_v63 = vpop.permute.xlu1 %6030 }
0x4199   :  { %v6033_v12 = vmul.f32 %v7738_v60, %v6031_v63 }
0x419b   :  { %7133 = vmatmul.mubr.msk.f32.vlgmr.msra.gmra.mxu0 %vm583_vm6, %v6033_v12 }
0x419c   :  { %6286 = vmatpush1.msra.mxu0 %v9989_v21  ;;  %6333 = vmatprep.mubr.f32.mxu0 %v8152_v0 }
0x419d   :  { %6287 = vmatprep.subr.mxu0 %v9993_v52 }
0x419e   :  { %6288 = vmatpush1.msra.mxu0 %v9996_v53 }
0x419f   :  { %6289 = vmatprep.subr.mxu0 %v9999_v7 }
0x41a0   :  { %6290 = vmatpush1.msra.mxu0 %v10002_v23 }
0x41a1   :  { %6291 = vmatprep.subr.mxu0 %v10005_v16 }
0x41a2   :  { %6292 = vmatpush1.msra.mxu0 %v10008_v31 }
0x41a3   :  { %6293 = vmatprep.subr.mxu0 %v10011_v44 }
0x41a4   :  { %6294 = vmatpush1.msra.mxu0 %v10014_v49 }
0x41a5   :  { %6295 = vmatprep.subr.mxu0 %v10017_v22 }
0x41a6   :  { %6296 = vmatpush1.msra.mxu0 %v10020_v36 }
0x41a7   :  { %6297 = vmatprep.subr.mxu0 %v10023_v20 }
0x41a8   :  { %6298 = vmatpush1.msra.mxu0 %v10026_v55 }
0x41a9   :  { %6299 = vmatprep.subr.mxu0 %v10029_v18 }
0x41aa   :  { %6300 = vmatpush1.msra.mxu0 %v10032_v19 }
0x41ab   :  { %6510 = vmatprep.subr.mxu0 %v9963_v38 }
0x425b   :  { %v6103_v27 = vpop.f32.mrf.mxu0 }
0x425c   :  { %v6110_v1 = vrot.slane %v6103_v27, 6 }
0x425d   :  { %v6105_v40 = vpop.f32.mrf.mxu0 }
0x425e   :  { %v6111_v30 = vrot.slane %v6105_v40, 6  ;;  %v6114_v5 = vadd.f32 %v6110_v1, %v9979_v9 }
0x4260   :  { %v6115_v33 = vadd.f32 %v6111_v30, %v9971_v42  ;;  %v7134_v59 = vmul.f32 -1.442695, %v6114_v5 }
0x4262   :  { %7739 = vtanh.f32 %v6115_v33  ;;  %v7135_v24 = vmul.f32 -1.442695, %v6115_v33 }
0x4263   :  { %7741 = vpow2.f32 %v7134_v59 }
0x426f   :  { %v7740_v26 = vpop.eup %7739 }
0x4270   :  { %6134 = vrot.lane.b32.xlu0 %v7740_v26, %s8153_s7  ;;  %v7742_v54 = vpop.eup %7741 }
0x4271   :  { %v6122_v46 = vadd.f32 1.0, %v7742_v54 }
0x4273   :  { %7743 = vrcp.f32 %v6122_v46 }
0x4280   :  { %v7744_v34 = vpop.eup %7743 }
0x4281   :  { %v6132_v50 = vmul.f32 %v7744_v34, %v6130_v56 }
0x42e2   :  { %v6135_v47 = vpop.permute.xlu0 %6134 }
0x42e3   :  { %v6137_v41 = vmul.f32 %v7744_v34, %v6135_v47 }
0x42e5   :  { %6139 = vrot.lane.b32.xlu1 %v6137_v41, %s8153_s7 }
0x4357   :  { %v6140_v4 = vpop.permute.xlu1 %6139 }
0x4358   :  { %v6142_v29 = vadd.f32 %v6140_v4, %v6132_v50 }
0x435a   :  { %7745 = vtanh.f32 %v6142_v29  ;;  %v6246_v5 = vrot.slane %v6142_v29, 6 }
0x435b   :  { %7747 = vpow2.f32 %v7135_v24 }
0x4367   :  { %v7746_v14 = vpop.eup %7745 }
0x4368   :  { %6145 = vrot.lane.b32.xlu0 %v7746_v14, %s8153_s7  ;;  %v7748_v62 = vpop.eup %7747 }
0x4369   :  { %v6123_v45 = vadd.f32 1.0, %v7748_v62 }
0x436b   :  { %7749 = vrcp.f32 %v6123_v45 }
0x4378   :  { %v7750_v32 = vpop.eup %7749 }
0x43da   :  { %v6146_v13 = vpop.permute.xlu0 %6145 }
0x43db   :  { %v6148_v57 = vmul.f32 %v7750_v32, %v6146_v13 }
0x43dd   :  { %v6150_v37 = vrot.slane %v6148_v57, 2 }
0x43df   :  { %7136 = vmatmul.mubr.msk.f32.vlgmr.msra.gmra.mxu1 %vm583_vm6, %v6150_v37 }
0x43e0   :  { %6402 = vmatpush1.msra.mxu1 %v9989_v21  ;;  %6449 = vmatprep.mubr.f32.mxu1 %v8152_v0 }
0x43e1   :  { %6403 = vmatprep.subr.mxu1 %v9993_v52 }
0x43e2   :  { %6404 = vmatpush1.msra.mxu1 %v9996_v53 }
0x43e3   :  { %6405 = vmatprep.subr.mxu1 %v9999_v7 }
0x43e4   :  { %6406 = vmatpush1.msra.mxu1 %v10002_v23 }
0x43e5   :  { %6407 = vmatprep.subr.mxu1 %v10005_v16 }
0x43e6   :  { %6408 = vmatpush1.msra.mxu1 %v10008_v31 }
0x43e7   :  { %6409 = vmatprep.subr.mxu1 %v10011_v44 }
0x43e8   :  { %6410 = vmatpush1.msra.mxu1 %v10014_v49 }
0x43e9   :  { %6411 = vmatprep.subr.mxu1 %v10017_v22 }
0x43ea   :  { %6412 = vmatpush1.msra.mxu1 %v10020_v36 }
0x43eb   :  { %6413 = vmatprep.subr.mxu1 %v10023_v20 }
0x43ec   :  { %6414 = vmatpush1.msra.mxu1 %v10026_v55 }
0x43ed   :  { %6415 = vmatprep.subr.mxu1 %v10029_v18 }
0x43ee   :  { %6416 = vmatpush1.msra.mxu1 %v10032_v19 }
0x43ef   :  { %6626 = vmatprep.subr.mxu1 %v9963_v38 }
0x449f   :  { %v6219_v25 = vpop.f32.mrf.mxu1 }
0x44a0   :  { %v6226_v63 = vrot.slane %v6219_v25, 4 }
0x44a1   :  { %v6221_v17 = vpop.f32.mrf.mxu1 }
0x44a2   :  { %v6227_v58 = vrot.slane %v6221_v17, 4  ;;  %v6230_v12 = vadd.f32 %v6226_v63, %v9979_v9 }
0x44a4   :  { %v6231_v35 = vadd.f32 %v6227_v58, %v9971_v42  ;;  %v7137_v27 = vmul.f32 -1.442695, %v6230_v12 }
0x44a6   :  { %7751 = vtanh.f32 %v6231_v35  ;;  %v7138_v47 = vmul.f32 -1.442695, %v6231_v35 }
0x44a7   :  { %7753 = vpow2.f32 %v7137_v27 }
0x44b3   :  { %v7752_v60 = vpop.eup %7751 }
0x44b4   :  { %6250 = vrot.lane.b32.xlu1 %v7752_v60, %s8153_s7  ;;  %v7754_v40 = vpop.eup %7753 }
0x44b5   :  { %v6238_v30 = vadd.f32 1.0, %v7754_v40 }
0x44b7   :  { %7755 = vrcp.f32 %v6238_v30 }
0x44c4   :  { %v7756_v33 = vpop.eup %7755 }
0x44c5   :  { %v6248_v59 = vmul.f32 %v7756_v33, %v6246_v5 }
0x4526   :  { %v6251_v26 = vpop.permute.xlu1 %6250 }
0x4527   :  { %v6253_v1 = vmul.f32 %v7756_v33, %v6251_v26 }
0x4529   :  { %6255 = vrot.lane.b32.xlu0 %v6253_v1, %s8153_s7 }
0x459b   :  { %v6256_v54 = vpop.permute.xlu0 %6255 }
0x459c   :  { %v6258_v46 = vadd.f32 %v6256_v54, %v6248_v59 }
0x459e   :  { %7757 = vtanh.f32 %v6258_v46  ;;  %v6362_v63 = vrot.slane %v6258_v46, 6  ;;  %v10108_v46 = vadd.f32 %v9728_v3, %v9682_v8 }
0x459f   :  { %7759 = vpow2.f32 %v7138_v47 }
0x45ab   :  { %v7758_v34 = vpop.eup %7757 }
0x45ac   :  { %6261 = vrot.lane.b32.xlu1 %v7758_v34, %s8153_s7  ;;  %v7760_v41 = vpop.eup %7759 }
0x45ad   :  { %v6239_v56 = vadd.f32 1.0, %v7760_v41 }
0x45af   :  { %7761 = vrcp.f32 %v6239_v56  ;;  %v10114_v56 = vadd.f32 %v9726_v48, %v9691_v28 }
0x45bc   :  { %v7762_v50 = vpop.eup %7761 }
0x461e   :  { %v6262_v4 = vpop.permute.xlu1 %6261 }
0x461f   :  { %v6264_v14 = vmul.f32 %v7762_v50, %v6262_v4 }
0x4621   :  { %v6266_v24 = vrot.slane %v6264_v14, 4 }
0x4623   :  { %7139 = vmatmul.mubr.msk.f32.vlgmr.msra.gmra.mxu0 %vm583_vm6, %v6266_v24 }
0x4624   :  { %6511 = vmatpush1.msra.mxu0 %v9989_v21  ;;  %6558 = vmatprep.mubr.f32.mxu0 %v8152_v0 }
0x4625   :  { %6512 = vmatprep.subr.mxu0 %v9993_v52 }
0x4626   :  { %6513 = vmatpush1.msra.mxu0 %v9996_v53 }
0x4627   :  { %6514 = vmatprep.subr.mxu0 %v9999_v7 }
0x4628   :  { %6515 = vmatpush1.msra.mxu0 %v10002_v23 }
0x4629   :  { %6516 = vmatprep.subr.mxu0 %v10005_v16 }
0x462a   :  { %6517 = vmatpush1.msra.mxu0 %v10008_v31 }
0x462b   :  { %6518 = vmatprep.subr.mxu0 %v10011_v44 }
0x462c   :  { %6519 = vmatpush1.msra.mxu0 %v10014_v49 }
0x462d   :  { %6520 = vmatprep.subr.mxu0 %v10017_v22 }
0x462e   :  { %6521 = vmatpush1.msra.mxu0 %v10020_v36 }
0x462f   :  { %6522 = vmatprep.subr.mxu0 %v10023_v20 }
0x4630   :  { %6523 = vmatpush1.msra.mxu0 %v10026_v55 }
0x4631   :  { %6524 = vmatprep.subr.mxu0 %v10029_v18 }
0x4632   :  { %6525 = vmatpush1.msra.mxu0 %v10032_v19 }
0x4633   :  { %6742 = vmatprep.subr.mxu0 %v9963_v38 }
0x46e3   :  { %v6335_v29 = vpop.f32.mrf.mxu0 }
0x46e4   :  { %v6342_v57 = vrot.slane %v6335_v29, 2 }
0x46e5   :  { %v6337_v62 = vpop.f32.mrf.mxu0 }
0x46e6   :  { %v6343_v45 = vrot.slane %v6337_v62, 2  ;;  %v6346_v37 = vadd.f32 %v6342_v57, %v9979_v9 }
0x46e8   :  { %v6347_v32 = vadd.f32 %v6343_v45, %v9971_v42  ;;  %v7140_v25 = vmul.f32 -1.442695, %v6346_v37 }
0x46ea   :  { %7763 = vtanh.f32 %v6347_v32  ;;  %v7141_v30 = vmul.f32 -1.442695, %v6347_v32 }
0x46eb   :  { %7765 = vpow2.f32 %v7140_v25 }
0x46f7   :  { %v7764_v13 = vpop.eup %7763 }
0x46f8   :  { %6366 = vrot.lane.b32.xlu0 %v7764_v13, %s8153_s7  ;;  %v7766_v17 = vpop.eup %7765 }
0x46f9   :  { %v6354_v58 = vadd.f32 1.0, %v7766_v17 }
0x46fb   :  { %7767 = vrcp.f32 %v6354_v58 }
0x4708   :  { %v7768_v35 = vpop.eup %7767 }
0x4709   :  { %v6364_v12 = vmul.f32 %v7768_v35, %v6362_v63 }
0x476a   :  { %v6367_v60 = vpop.permute.xlu0 %6366 }
0x476b   :  { %v6369_v38 = vmul.f32 %v7768_v35, %v6367_v60 }
0x476d   :  { %6371 = vrot.lane.b32.xlu1 %v6369_v38, %s8153_s7 }
0x47df   :  { %v6372_v42 = vpop.permute.xlu1 %6371 }
0x47e0   :  { %v6374_v27 = vadd.f32 %v6372_v42, %v6364_v12 }
0x47e2   :  { %7769 = vtanh.f32 %v6374_v27  ;;  %v6472_v62 = vrot.slane %v6374_v27, 6 }
0x47e3   :  { %7771 = vpow2.f32 %v7141_v30 }
0x47ef   :  { %v7770_v40 = vpop.eup %7769 }
0x47f0   :  { %6377 = vrot.lane.b32.xlu0 %v7770_v40, %s8153_s7  ;;  %v7772_v9 = vpop.eup %7771 }
0x47f1   :  { %v6355_v33 = vadd.f32 1.0, %v7772_v9 }
0x47f3   :  { %7773 = vrcp.f32 %v6355_v33 }
0x4800   :  { %v7774_v26 = vpop.eup %7773 }
0x4862   :  { %v6378_v1 = vpop.permute.xlu0 %6377 }
0x4863   :  { %v6380_v5 = vmul.f32 %v7774_v26, %v6378_v1 }
0x4865   :  { %v6382_v59 = vrot.slane %v6380_v5, 6 }
0x4867   :  { %7142 = vmatmul.mubr.msk.f32.vlgmr.msra.gmra.mxu1 %vm583_vm6, %v6382_v59 }
0x4868   :  { %6627 = vmatpush1.msra.mxu1 %v9989_v21  ;;  %6674 = vmatprep.mubr.f32.mxu1 %v8152_v0 }
0x4869   :  { %6628 = vmatprep.subr.mxu1 %v9993_v52 }
0x486a   :  { %6629 = vmatpush1.msra.mxu1 %v9996_v53 }
0x486b   :  { %6630 = vmatprep.subr.mxu1 %v9999_v7 }
0x486c   :  { %6631 = vmatpush1.msra.mxu1 %v10002_v23 }
0x486d   :  { %6632 = vmatprep.subr.mxu1 %v10005_v16 }
0x486e   :  { %6633 = vmatpush1.msra.mxu1 %v10008_v31 }
0x486f   :  { %6634 = vmatprep.subr.mxu1 %v10011_v44 }
0x4870   :  { %6635 = vmatpush1.msra.mxu1 %v10014_v49 }
0x4871   :  { %6636 = vmatprep.subr.mxu1 %v10017_v22 }
0x4872   :  { %6637 = vmatpush1.msra.mxu1 %v10020_v36 }
0x4873   :  { %6638 = vmatprep.subr.mxu1 %v10023_v20 }
0x4874   :  { %6639 = vmatpush1.msra.mxu1 %v10026_v55 }
0x4875   :  { %6640 = vmatprep.subr.mxu1 %v10029_v18 }
0x4876   :  { %6641 = vmatpush1.msra.mxu1 %v10032_v19 }
0x4877   :  { %7398 = vmatprep.subr.mxu1 %v8152_v0 }
0x4927   :  { %v6451_v54 = vpop.f32.mrf.mxu1 }
0x4928   :  { %v6456_v50 = vadd.f32 %v6451_v54, %v10114_v56 }
0x4929   :  { %v6453_v34 = vpop.f32.mrf.mxu1 }
0x492a   :  { %v6457_v47 = vadd.f32 %v6453_v34, %v10108_v46  ;;  %v7143_v4 = vmul.f32 -1.442695, %v6456_v50 }
0x492c   :  { %7775 = vtanh.f32 %v6457_v47  ;;  %v7144_v28 = vmul.f32 -1.442695, %v6457_v47 }
0x492d   :  { %7777 = vpow2.f32 %v7143_v4 }
0x4939   :  { %v7776_v41 = vpop.eup %7775 }
0x493a   :  { %6476 = vrot.lane.b32.xlu1 %v7776_v41, %s8153_s7  ;;  %v7778_v14 = vpop.eup %7777 }
0x493b   :  { %v6464_v24 = vadd.f32 1.0, %v7778_v14 }
0x493d   :  { %7779 = vrcp.f32 %v6464_v24 }
0x494a   :  { %v7780_v8 = vpop.eup %7779 }
0x494b   :  { %v6474_v45 = vmul.f32 %v7780_v8, %v6472_v62 }
0x49ac   :  { %v6477_v3 = vpop.permute.xlu1 %6476 }
0x49ad   :  { %v6479_v29 = vmul.f32 %v7780_v8, %v6477_v3 }
0x49af   :  { %6481 = vrot.lane.b32.xlu0 %v6479_v29, %s8153_s7 }
0x4a21   :  { %v6482_v32 = vpop.permute.xlu0 %6481 }
0x4a22   :  { %v6484_v13 = vadd.f32 %v6482_v32, %v6474_v45 }
0x4a24   :  { %7781 = vtanh.f32 %v6484_v13 }
0x4a25   :  { %7783 = vpow2.f32 %v7144_v28 }
0x4a31   :  { %v7782_v57 = vpop.eup %7781 }
0x4a32   :  { %6487 = vrot.lane.b32.xlu1 %v7782_v57, %s8153_s7  ;;  %v7784_v48 = vpop.eup %7783 }
0x4a33   :  { %v6465_v37 = vadd.f32 1.0, %v7784_v48 }
0x4a35   :  { %7785 = vrcp.f32 %v6465_v37 }
0x4a42   :  { %v7786_v25 = vpop.eup %7785 }
0x4aa4   :  { %v6488_v17 = vpop.permute.xlu1 %6487 }
0x4aa5   :  { %v6490_v58 = vmul.f32 %v7786_v25, %v6488_v17 }
0x4aa7   :  { %7145 = vmatmul.mubr.msk.f32.vlgmr.msra.gmra.mxu0 %vm583_vm6, %v6490_v58 }
0x4aa8   :  { %6743 = vmatpush1.msra.mxu0 %v9989_v21  ;;  %6790 = vmatprep.mubr.f32.mxu0 %v8152_v0 }
0x4aa9   :  { %6744 = vmatprep.subr.mxu0 %v9993_v52 }
0x4aaa   :  { %6745 = vmatpush1.msra.mxu0 %v9996_v53 }
0x4aab   :  { %6746 = vmatprep.subr.mxu0 %v9999_v7 }
0x4aac   :  { %6747 = vmatpush1.msra.mxu0 %v10002_v23 }
0x4aad   :  { %6748 = vmatprep.subr.mxu0 %v10005_v16 }
0x4aae   :  { %6749 = vmatpush1.msra.mxu0 %v10008_v31 }
0x4aaf   :  { %6750 = vmatprep.subr.mxu0 %v10011_v44 }
0x4ab0   :  { %6751 = vmatpush1.msra.mxu0 %v10014_v49 }
0x4ab1   :  { %6752 = vmatprep.subr.mxu0 %v10017_v22 }
0x4ab2   :  { %6753 = vmatpush1.msra.mxu0 %v10020_v36 }
0x4ab3   :  { %6754 = vmatprep.subr.mxu0 %v10023_v20 }
0x4ab4   :  { %6755 = vmatpush1.msra.mxu0 %v10026_v55 }
0x4ab5   :  { %6756 = vmatprep.subr.mxu0 %v10029_v18  ;;  %v6587_v18 = vrot.slane %v6484_v13, 6 }
0x4ab6   :  { %6757 = vmatpush1.msra.mxu0 %v10032_v19 }
0x4b67   :  { %v6560_v21 = vpop.f32.mrf.mxu0 }
0x4b68   :  { %v6567_v16 = vrot.slane %v6560_v21, 6 }
0x4b69   :  { %v6562_v52 = vpop.f32.mrf.mxu0 }
0x4b6a   :  { %v6568_v53 = vrot.slane %v6562_v52, 6  ;;  %v6571_v31 = vadd.f32 %v6567_v16, %v10114_v56 }
0x4b6c   :  { %v6572_v7 = vadd.f32 %v6568_v53, %v10108_v46  ;;  %v7146_v44 = vmul.f32 -1.442695, %v6571_v31 }
0x4b6e   :  { %7787 = vtanh.f32 %v6572_v7  ;;  %v7147_v63 = vmul.f32 -1.442695, %v6572_v7 }
0x4b6f   :  { %7789 = vpow2.f32 %v7146_v44 }
0x4b7b   :  { %v7788_v23 = vpop.eup %7787 }
0x4b7c   :  { %6591 = vrot.lane.b32.xlu0 %v7788_v23, %s8153_s7  ;;  %v7790_v49 = vpop.eup %7789 }
0x4b7d   :  { %v6579_v22 = vadd.f32 1.0, %v7790_v49 }
0x4b7f   :  { %7791 = vrcp.f32 %v6579_v22 }
0x4b8c   :  { %v7792_v36 = vpop.eup %7791 }
0x4b8d   :  { %v6589_v19 = vmul.f32 %v7792_v36, %v6587_v18 }
0x4bee   :  { %v6592_v20 = vpop.permute.xlu0 %6591 }
0x4bef   :  { %v6594_v55 = vmul.f32 %v7792_v36, %v6592_v20 }
0x4bf1   :  { %6596 = vrot.lane.b32.xlu1 %v6594_v55, %s8153_s7 }
0x4c63   :  { %v6597_v35 = vpop.permute.xlu1 %6596 }
0x4c64   :  { %v6599_v60 = vadd.f32 %v6597_v35, %v6589_v19 }
0x4c66   :  { %7793 = vtanh.f32 %v6599_v60  ;;  %v6703_v59 = vrot.slane %v6599_v60, 6 }
0x4c67   :  { %7795 = vpow2.f32 %v7147_v63 }
0x4c73   :  { %v7794_v38 = vpop.eup %7793 }
0x4c74   :  { %6602 = vrot.lane.b32.xlu0 %v7794_v38, %s8153_s7  ;;  %v7796_v12 = vpop.eup %7795 }
0x4c75   :  { %v6580_v42 = vadd.f32 1.0, %v7796_v12 }
0x4c77   :  { %7797 = vrcp.f32 %v6580_v42 }
0x4c84   :  { %v7798_v27 = vpop.eup %7797 }
0x4ce6   :  { %v6603_v40 = vpop.permute.xlu0 %6602 }
0x4ce7   :  { %v6605_v30 = vmul.f32 %v7798_v27, %v6603_v40 }
0x4ce9   :  { %v6607_v9 = vrot.slane %v6605_v30, 2 }
0x4ceb   :  { %7148 = vmatmul.mubr.msk.f32.vlgmr.msra.gmra.mxu1 %vm583_vm6, %v6607_v9 }
0x4cec   :  { %7399 = vmatpush3.msra.mxu1 %v9869_v2  ;;  %7414 = vmatprep.mubr.msk.f32.mxu1 %vm8154_vm12, %v8152_v0 }
0x4ced   :  { %7400 = vmatprep.subr.mxu1 %v8152_v0 }
0x4cee   :  { %7401 = vmatpush3.msra.mxu1 %v9874_v51 }
0x4cef   :  { %7402 = vmatprep.subr.mxu1 %v8152_v0 }
0x4cf0   :  { %7403 = vmatpush3.msra.mxu1 %v9881_v11 }
0x4cf1   :  { %7404 = vmatprep.subr.mxu1 %v8152_v0 }
0x4cf2   :  { %7405 = vmatpush3.msra.mxu1 %v9888_v61 }
0x4cf3   :  { %7406 = vmatprep.subr.mxu1 %v8152_v0 }
0x4cf4   :  { %7407 = vmatpush3.msra.mxu1 %v9895_v15 }
0x4cf5   :  { %7408 = vmatprep.subr.mxu1 %v8152_v0 }
0x4cf6   :  { %7409 = vmatpush3.msra.mxu1 %v9902_v6 }
0x4cf7   :  { %7410 = vmatprep.subr.mxu1 %v8152_v0 }
0x4cf8   :  { %7411 = vmatpush3.msra.mxu1 %v9915_v39 }
0x4cf9   :  { %7412 = vmatprep.subr.mxu1 %v8152_v0 }
0x4cfa   :  { %7413 = vmatpush3.msra.mxu1 %v9922_v43 }
0x4dab   :  { %v6676_v2 = vpop.f32.mrf.mxu1 }
0x4dac   :  { %v6683_v15 = vrot.slane %v6676_v2, 4 }
0x4dad   :  { %v6678_v51 = vpop.f32.mrf.mxu1 }
0x4dae   :  { %v6684_v11 = vrot.slane %v6678_v51, 4  ;;  %v6687_v6 = vadd.f32 %v6683_v15, %v10114_v56 }
0x4db0   :  { %v6688_v61 = vadd.f32 %v6684_v11, %v10108_v46  ;;  %v7149_v26 = vmul.f32 -1.442695, %v6687_v6 }
0x4db2   :  { %7799 = vtanh.f32 %v6688_v61  ;;  %v7150_v50 = vmul.f32 -1.442695, %v6688_v61 }
0x4db3   :  { %7801 = vpow2.f32 %v7149_v26 }
0x4dbf   :  { %v7800_v33 = vpop.eup %7799 }
0x4dc0   :  { %6707 = vrot.lane.b32.xlu1 %v7800_v33, %s8153_s7  ;;  %v7802_v1 = vpop.eup %7801 }
0x4dc1   :  { %v6695_v39 = vadd.f32 1.0, %v7802_v1 }
0x4dc3   :  { %7803 = vrcp.f32 %v6695_v39 }
0x4dd0   :  { %v7804_v0 = vpop.eup %7803 }
0x4dd1   :  { %v6705_v54 = vmul.f32 %v7804_v0, %v6703_v59 }
0x4e32   :  { %v6708_v5 = vpop.permute.xlu1 %6707 }
0x4e33   :  { %v6710_v43 = vmul.f32 %v7804_v0, %v6708_v5 }
0x4e35   :  { %6712 = vrot.lane.b32.xlu0 %v6710_v43, %s8153_s7 }
0x4ea7   :  { %v6713_v34 = vpop.permute.xlu0 %6712 }
0x4ea8   :  { %v6715_v47 = vadd.f32 %v6713_v34, %v6705_v54 }
0x4eaa   :  { %7805 = vtanh.f32 %v6715_v47  ;;  %v6819_v53 = vrot.slane %v6715_v47, 6 }
0x4eab   :  { %7807 = vpow2.f32 %v7150_v50 }
0x4eb7   :  { %v7806_v41 = vpop.eup %7805 }
0x4eb8   :  { %6718 = vrot.lane.b32.xlu1 %v7806_v41, %s8153_s7  ;;  %v7808_v4 = vpop.eup %7807 }
0x4eb9   :  { %v6696_v14 = vadd.f32 1.0, %v7808_v4 }
0x4ebb   :  { %7809 = vrcp.f32 %v6696_v14 }
0x4ec8   :  { %v7810_v24 = vpop.eup %7809 }
0x4f2a   :  { %v6719_v8 = vpop.permute.xlu1 %6718 }
0x4f2b   :  { %v6721_v3 = vmul.f32 %v7810_v24, %v6719_v8 }
0x4f2d   :  { %v6723_v29 = vrot.slane %v6721_v3, 4 }
0x4f2f   :  { %7151 = vmatmul.mubr.msk.f32.vlgmr.msra.gmra.mxu0 %vm583_vm6, %v6723_v29 }
0x4fef   :  { %v6792_v62 = vpop.f32.mrf.mxu0 }
0x4ff0   :  { %v6799_v28 = vrot.slane %v6792_v62, 2 }
0x4ff1   :  { %v6794_v45 = vpop.f32.mrf.mxu0 }
0x4ff2   :  { %v6800_v32 = vrot.slane %v6794_v45, 2  ;;  %v6803_v48 = vadd.f32 %v6799_v28, %v10114_v56 }
0x4ff4   :  { %v6804_v13 = vadd.f32 %v6800_v32, %v10108_v46  ;;  %v7152_v37 = vmul.f32 -1.442695, %v6803_v48 }
0x4ff6   :  { %7811 = vtanh.f32 %v6804_v13  ;;  %v7153_v56 = vmul.f32 -1.442695, %v6804_v13 }
0x4ff7   :  { %7813 = vpow2.f32 %v7152_v37 }
0x5003   :  { %v7812_v57 = vpop.eup %7811 }
0x5004   :  { %6823 = vrot.lane.b32.xlu0 %v7812_v57, %s8153_s7  ;;  %v7814_v25 = vpop.eup %7813 }
0x5005   :  { %v6811_v17 = vadd.f32 1.0, %v7814_v25 }
0x5007   :  { %7815 = vrcp.f32 %v6811_v17 }
0x5014   :  { %v7816_v58 = vpop.eup %7815 }
0x5015   :  { %v6821_v7 = vmul.f32 %v7816_v58, %v6819_v53 }
0x5076   :  { %v6824_v21 = vpop.permute.xlu0 %6823 }
0x5077   :  { %v6826_v52 = vmul.f32 %v7816_v58, %v6824_v21 }
0x5079   :  { %6828 = vrot.lane.b32.xlu1 %v6826_v52, %s8153_s7 }
0x50eb   :  { %v6829_v46 = vpop.permute.xlu1 %6828 }
0x50ec   :  { %v6831_v23 = vadd.f32 %v6829_v46, %v6821_v7 }
0x50ee   :  { %7817 = vtanh.f32 %v6831_v23  ;;  %6915 = vrot.lane.b32.xlu1 %v6831_v23, %s8153_s7 }
0x50ef   :  { %7819 = vpow2.f32 %v7153_v56 }
0x50fb   :  { %v7818_v16 = vpop.eup %7817 }
0x50fc   :  { %6834 = vrot.lane.b32.xlu0 %v7818_v16, %s8153_s7  ;;  %v7820_v31 = vpop.eup %7819  ;;  %s8060_s7 = scalar_lea.vmem %s6936_s4, 32 }
0x50fd   :  { %v6812_v44 = vadd.f32 1.0, %v7820_v31  ;;  %p8061_p8 = scmp.ne.s32.totalorder %s6936_s4, %s8060_s7  ;;  %p8066_p10 = scmp.lt.s32.totalorder %s8060_s7, %s8060_s7 }
0x50ff   :  { %7821 = vrcp.f32 %v6812_v44  ;;  %p8067_p11 = por %p8066_p10, %p8065_p9 }
0x5101   :  { %p8068_p12 = pnand %p8067_p11, %p8061_p8 }
0x510c   :  { %v7822_v22 = vpop.eup %7821 }
0x5160   :  { %v6916_v49 = vpop.permute.xlu1 %6915 }
0x5161   :  { %6918 = vst.msk [vmem:[#allocation23 - $0x6] sm:$0xc0] %vm3392_vm11, %v6916_v49 }
0x516e   :  { %v6835_v36 = vpop.permute.xlu0 %6834 }
0x516f   :  { %v6837_v20 = vmul.f32 %v7822_v22, %v6835_v36 }
0x5171   :  { %v6839_v55 = vrot.slane %v6837_v20, 7  ;;  %6913 = vst.msk [vmem:[#allocation21 - $0x6] sm:$0xc0] %vm3392_vm11, %v6837_v20 }
0x5173   :  { %7415 = vmatmul.mubr.msk.f32.vlgmr.msra.gmra.mxu1 %vm583_vm6, %v6839_v55 }
0x5174   :  { %8071 = shalt.err (!%p8068_p12)
}
0x5175   :  { %6938 = dma.vmem_to_hbm [thread:$0]  %s6936_s4, 32, %s10207_s22, [#allocation22]  }
0x5176   :  { %s8156_s26 = smov [#allocation23]  }
0x5177   :  { %s6945_s20 = sshll.u32 %s8156_s26, 4  ;;  %s6946_s20 = int_to_ptr.vmem [resolvable:$true] %s6945_s20 }
0x5178   :  { %s8080_s3 = scalar_lea.vmem %s6946_s20, 32  ;;  %p8085_p0 = scmp.lt.s32.totalorder %s6946_s20, %s6946_s20 }
0x5179   :  { %p8081_p13 = scmp.ne.s32.totalorder %s6946_s20, %s8080_s3  ;;  %p8086_p1 = scmp.lt.s32.totalorder %s8080_s3, %s8080_s3 }
0x517b   :  { %p8087_p2 = por %p8086_p1, %p8085_p0 }
0x517d   :  { %p8088_p3 = pnand %p8087_p2, %p8081_p13 }
0x517f   :  { %8091 = shalt.err (!%p8088_p3)
}
0x5180   :  { %6948 = dma.vmem_to_hbm [thread:$0]  %s6946_s20, 32, %s10208_s23, [#allocation22]  }
0x5181   :  { %s8157_s13 = smov [#allocation20]  }
0x5182   :  { %s6925_s14 = sshll.u32 %s8157_s13, 4  ;;  %s6926_s14 = int_to_ptr.vmem [resolvable:$true] %s6925_s14 }
0x5183   :  { %s8100_s22 = scalar_lea.vmem %s6926_s14, 32  ;;  %p8105_p5 = scmp.lt.s32.totalorder %s6926_s14, %s6926_s14 }
0x5184   :  { %p8101_p4 = scmp.ne.s32.totalorder %s6926_s14, %s8100_s22  ;;  %p8106_p6 = scmp.lt.s32.totalorder %s8100_s22, %s8100_s22 }
0x5186   :  { %p8107_p7 = por %p8106_p6, %p8105_p5 }
0x5188   :  { %p8108_p8 = pnand %p8107_p7, %p8101_p4 }
0x5233   :  { %v6908_v18 = vpop.f32.mrf.mxu1 }
0x5234   :  { %v6909_v19 = vadd.f32 %v6908_v18, %v9967_v10 }
0x5235   :  { %v7416_v35 = vpop.f32.mrf.mxu1 }
0x5236   :  { %6912 = vst.msk [vmem:[#allocation20 + $0x1] sm:$0x1] %vm5923_vm13, %v6909_v19 }
0x5237   :  { %8111 = shalt.err (!%p8108_p8)
}
0x5238   :  { %6928 = dma.vmem_to_hbm [thread:$0]  %s6926_s14, 32, %s10206_s21, [#allocation5]  }
0x5239   :  { %8132 = dma.done.wait [#allocation5], 32  }
0x523a   :  { %8133 = vsyncadd [#allocation5], 4294967264 }
0x523b   :  { %8134 = dma.done.wait [#allocation22], 64  }
0x523c   :  { %8135 = vsyncadd [#allocation22], 4294967232 }
0x523d   :  { %6958 = vsyncpa [#allocation4], 1 }
0x523e   :  { %6959 = vsyncpa [#allocation7], 1 }
0x523f   :  { %6960 = vsyncpa [#allocation10], 1 }
0x5240   :  { %6961 = vsyncpa [#allocation13], 1 }
0x5241   :  { %6962 = vsyncpa [#allocation16], 1 }
0x5242   :  { %6963 = vsyncpa [#allocation19], 1 }
0x5243   :  { %6964 = vsyncpa [#allocation5], 1 }
0x5244   :  { %6965 = vsyncpa [#allocation22], 1 }

</bundles_post_ra>
